<compile_context>
chip_gen: v7x
topology: tpu7x:2x2x1
jax: 0.10.0
libtpu: 0.0.40
codegen_flags: <defaults>
</compile_context>

<pallas_src>
import numpy as np
import jax
import jax.numpy as jnp
from jax.experimental import pallas as pl
from jax.experimental.pallas import tpu as pltpu

BN_EPS = 1e-5
LRELU_SLOPE = 0.2


def _full_spec(shape):
    ndim = len(shape)
    return pl.BlockSpec(shape, lambda i, _n=ndim: (0,) * _n)


# ------------------------------ Pallas kernel -------------------------------

def _encoder_kernel(p1_ref, w1_ref, g1_ref, be1_ref,
                    sel2_ref, w2_ref, g2_ref, be2_ref,
                    sel3_ref, w3_ref, b3_ref,
                    ssel_ref, wfc_ref, bfc_ref,
                    out_ref):
    f32 = jnp.float32

    def bn_lrelu(acc, gamma, beta):
        # BatchNorm2d (training-mode batch statistics, biased variance)
        # followed by LeakyReLU(0.2).
        mean = jnp.mean(acc, axis=0, keepdims=True)
        var = jnp.mean((acc - mean) ** 2, axis=0, keepdims=True)
        y = (acc - mean) * jax.lax.rsqrt(var + BN_EPS) * gamma + beta
        return jnp.where(y >= 0.0, y, LRELU_SLOPE * y)

    def conv_taps(sel_ref, w_ref, x):
        # sum_t (Sel_t @ x) @ W_t : the 0/1 Sel_t gathers each tap's
        # (zero-padded) stride-2 patch rows; everything stays on the MXU.
        acc = jnp.dot(jnp.dot(sel_ref[0], x, preferred_element_type=f32),
                      w_ref[0], preferred_element_type=f32)
        for t in range(1, sel_ref.shape[0]):
            acc = acc + jnp.dot(
                jnp.dot(sel_ref[t], x, preferred_element_type=f32),
                w_ref[t], preferred_element_type=f32)
        return acc

    # conv1 + BN1 + LeakyReLU  (im2col patch matrix supplied by the wrapper)
    a1 = jnp.dot(p1_ref[...], w1_ref[...], preferred_element_type=f32)
    o1 = bn_lrelu(a1, g1_ref[...], be1_ref[...])              # (N*8*16, 32)

    # conv2 + BN2 + LeakyReLU  (in-kernel im2col via tap-selection matmuls)
    o2 = bn_lrelu(conv_taps(sel2_ref, w2_ref, o1),
                  g2_ref[...], be2_ref[...])                  # (N*4*8, 64)

    # conv3 (+ bias, no BN / activation)
    o3 = conv_taps(sel3_ref, w3_ref, o2) + b3_ref[...]        # (N*2*4, 128)

    # NCHW flatten folded into FC weights; merged fc_mu | fc_logvar heads.
    out_ref[...] = conv_taps(ssel_ref, wfc_ref, o3) + bfc_ref[...]   # (N, 2L)


# ------------------------------- glue (JAX) ---------------------------------

def im2col(x, k, stride, pad):
    # x: (N, H, W, C) -> patches (N*OH*OW, k*k*C), rows (n, oh, ow),
    # cols (kh, kw, c).  Used only once, on the raw network input.
    xp = jnp.pad(x, ((0, 0), (pad, pad), (pad, pad), (0, 0)))
    n, hp, wp, c = xp.shape
    oh = (hp - k) // stride + 1
    ow = (wp - k) // stride + 1
    cols = []
    for i in range(k):
        for j in range(k):
            cols.append(xp[:, i:i + (oh - 1) * stride + 1:stride,
                              j:j + (ow - 1) * stride + 1:stride, :])
    p = jnp.stack(cols, axis=3)                    # (N, OH, OW, k*k, C)
    return p.reshape(n * oh * ow, k * k * c), oh, ow


def _build_sel(n, ih, iw, oh, ow, k, stride, pad):
    # 0/1 selection matrices: sel[t] @ act_flat gathers, for tap t=(kh,kw),
    # the (zero-padded) input row of every output position.
    sel = np.zeros((k * k, n * oh * ow, n * ih * iw), np.float32)
    for kh in range(k):
        for kw in range(k):
            t = kh * k + kw
            for b in range(n):
                for i in range(oh):
                    for j in range(ow):
                        h = i * stride + kh - pad
                        w = j * stride + kw - pad
                        if 0 <= h < ih and 0 <= w < iw:
                            sel[t, b * oh * ow + i * ow + j,
                                b * ih * iw + h * iw + w] = 1.0
    return sel


def _build_fc_row_sel(n, n_pos):
    # sel[s] @ conv3_out picks, for spatial position s, the rows of all batch
    # elements (so the NCHW flatten becomes a weight-side permutation).
    sel = np.zeros((n_pos, n, n * n_pos), np.float32)
    for s in range(n_pos):
        for b in range(n):
            sel[s, b, b * n_pos + s] = 1.0
    return sel


def init_params(key, latent_dim):
    ks = jax.random.split(key, 10)
    flat = 128 * 2 * 4
    return {
        "w1": jax.random.normal(ks[0], (32, 3, 4, 4), jnp.float32) * 0.05,
        "b1": jax.random.normal(ks[1], (32,), jnp.float32) * 0.01,
        "g1": jnp.ones((32,), jnp.float32), "be1": jnp.zeros((32,), jnp.float32),
        "w2": jax.random.normal(ks[2], (64, 32, 4, 4), jnp.float32) * 0.05,
        "b2": jax.random.normal(ks[3], (64,), jnp.float32) * 0.01,
        "g2": jnp.ones((64,), jnp.float32), "be2": jnp.zeros((64,), jnp.float32),
        "w3": jax.random.normal(ks[4], (128, 64, 4, 4), jnp.float32) * 0.05,
        "b3": jax.random.normal(ks[5], (128,), jnp.float32) * 0.01,
        "wmu": jax.random.normal(ks[6], (latent_dim, flat), jnp.float32) * 0.02,
        "bmu": jax.random.normal(ks[7], (latent_dim,), jnp.float32) * 0.01,
        "wlv": jax.random.normal(ks[8], (latent_dim, flat), jnp.float32) * 0.02,
        "blv": jax.random.normal(ks[9], (latent_dim,), jnp.float32) * 0.01,
    }


def encoder_forward(params, x_nchw):
    x = jnp.transpose(x_nchw, (0, 2, 3, 1)).astype(jnp.float32)   # NCHW -> NHWC
    n = x.shape[0]

    # ---- one-time input preprocessing: stage-1 im2col of the raw input ----
    p1, oh1, ow1 = im2col(x, 4, 2, 1)            # (N*8*16, 48)
    oh2, ow2 = oh1 // 2, ow1 // 2                # 4, 8
    oh3, ow3 = oh2 // 2, ow2 // 2                # 2, 4
    n_pos = oh3 * ow3                            # 8 spatial positions of conv3

    # ---- trace-time weight preprocessing (tiny ops on parameters) ---------
    c1, c2, c3 = 32, 64, 128
    w1 = jnp.transpose(params["w1"], (2, 3, 1, 0)).reshape(-1, c1)      # (48,32)
    w2 = jnp.transpose(params["w2"], (2, 3, 1, 0)).reshape(16, c1, c2)  # (16,32,64)
    w3 = jnp.transpose(params["w3"], (2, 3, 1, 0)).reshape(16, c2, c3)  # (16,64,128)
    latent = params["wmu"].shape[0]
    # torch flatten index = c*n_pos + s with s = oh*ow3 + ow  -> (s, c, L)
    wmu = jnp.transpose(params["wmu"].reshape(latent, c3, n_pos), (2, 1, 0))
    wlv = jnp.transpose(params["wlv"].reshape(latent, c3, n_pos), (2, 1, 0))
    wfc = jnp.concatenate([wmu, wlv], axis=-1)                          # (8,128,2L)
    bfc = jnp.concatenate([params["bmu"], params["blv"]])[None, :]      # (1, 2L)
    g1, be1 = params["g1"][None, :], params["be1"][None, :]
    g2, be2 = params["g2"][None, :], params["be2"][None, :]
    b3 = params["b3"][None, :]
    # NOTE: conv1/conv2 biases (params "b1"/"b2") are exactly cancelled by the
    # training-mode BatchNorm mean subtraction, so they are not used here.

    # ---- constant 0/1 tap-selection matrices (trace-time) -----------------
    sel2 = jnp.asarray(_build_sel(n, oh1, ow1, oh2, ow2, 4, 2, 1))  # (16,64,256)
    sel3 = jnp.asarray(_build_sel(n, oh2, ow2, oh3, ow3, 4, 2, 1))  # (16,16,64)
    ssel = jnp.asarray(_build_fc_row_sel(n, n_pos))                 # (8, 2, 16)

    args = (p1, w1, g1, be1, sel2, w2, g2, be2, sel3, w3, b3, ssel, wfc, bfc)
    out = pl.pallas_call(
        _encoder_kernel,
        grid=(1,),
        in_specs=[_full_spec(a.shape) for a in args],
        out_specs=_full_spec((n, 2 * latent)),
        out_shape=jax.ShapeDtypeStruct((n, 2 * latent), jnp.float32),
        compiler_params=pltpu.CompilerParams(
            dimension_semantics=("arbitrary",)),
    )(*args)

    return out[:, :latent], out[:, latent:]


if __name__ == "__main__":
    key = jax.random.PRNGKey(0)
    kx, kp = jax.random.split(key)
    latent_dim = 16
    # Input spatial 16x32 so three stride-2 convs give 2x4 (flattened 128*2*4).
    x = jax.random.normal(kx, (2, 3, 16, 32), jnp.float32)  # NCHW, like PyTorch
    params = init_params(kp, latent_dim)

    mu, logvar = jax.jit(encoder_forward)(params, x)
    jax.block_until_ready((mu, logvar))
    assert mu.shape == (2, latent_dim) and logvar.shape == (2, latent_dim)
    print("KERNEL_OK")
</pallas_src>

<mosaic_0001>
module attributes {stable_mosaic.version = 11 : i64} {
  func.func @_encoder_kernel(%arg0: i32, %arg1: memref<256x48xf32, #tpu.memory_space<vmem>>, %arg2: memref<48x32xf32, #tpu.memory_space<vmem>>, %arg3: memref<1x32xf32, #tpu.memory_space<vmem>>, %arg4: memref<1x32xf32, #tpu.memory_space<vmem>>, %arg5: memref<16x64x256xf32, #tpu.memory_space<vmem>>, %arg6: memref<16x32x64xf32, #tpu.memory_space<vmem>>, %arg7: memref<1x64xf32, #tpu.memory_space<vmem>>, %arg8: memref<1x64xf32, #tpu.memory_space<vmem>>, %arg9: memref<16x16x64xf32, #tpu.memory_space<vmem>>, %arg10: memref<16x64x128xf32, #tpu.memory_space<vmem>>, %arg11: memref<1x128xf32, #tpu.memory_space<vmem>>, %arg12: memref<8x2x16xf32, #tpu.memory_space<vmem>>, %arg13: memref<8x128x32xf32, #tpu.memory_space<vmem>>, %arg14: memref<1x32xf32, #tpu.memory_space<vmem>>, %arg15: memref<2x32xf32, #tpu.memory_space<vmem>>) attributes {dimension_semantics = [#tpu.dimension_semantics<arbitrary>], iteration_bounds = array<i64: 1>, scalar_prefetch = 0 : i64, scratch_operands = 0 : i64, tpu.core_type = #tpu.core_type<tc>, window_params = [{pipeline_mode = #tpu.pipeline_mode<synchronous>, transform_indices = @transform_0, window_bounds = array<i64: 256, 48>}, {pipeline_mode = #tpu.pipeline_mode<synchronous>, transform_indices = @transform_1, window_bounds = array<i64: 48, 32>}, {pipeline_mode = #tpu.pipeline_mode<synchronous>, transform_indices = @transform_2, window_bounds = array<i64: 1, 32>}, {pipeline_mode = #tpu.pipeline_mode<synchronous>, transform_indices = @transform_3, window_bounds = array<i64: 1, 32>}, {pipeline_mode = #tpu.pipeline_mode<synchronous>, transform_indices = @transform_4, window_bounds = array<i64: 16, 64, 256>}, {pipeline_mode = #tpu.pipeline_mode<synchronous>, transform_indices = @transform_5, window_bounds = array<i64: 16, 32, 64>}, {pipeline_mode = #tpu.pipeline_mode<synchronous>, transform_indices = @transform_6, window_bounds = array<i64: 1, 64>}, {pipeline_mode = #tpu.pipeline_mode<synchronous>, transform_indices = @transform_7, window_bounds = array<i64: 1, 64>}, {pipeline_mode = #tpu.pipeline_mode<synchronous>, transform_indices = @transform_8, window_bounds = array<i64: 16, 16, 64>}, {pipeline_mode = #tpu.pipeline_mode<synchronous>, transform_indices = @transform_9, window_bounds = array<i64: 16, 64, 128>}, {pipeline_mode = #tpu.pipeline_mode<synchronous>, transform_indices = @transform_10, window_bounds = array<i64: 1, 128>}, {pipeline_mode = #tpu.pipeline_mode<synchronous>, transform_indices = @transform_11, window_bounds = array<i64: 8, 2, 16>}, {pipeline_mode = #tpu.pipeline_mode<synchronous>, transform_indices = @transform_12, window_bounds = array<i64: 8, 128, 32>}, {pipeline_mode = #tpu.pipeline_mode<synchronous>, transform_indices = @transform_13, window_bounds = array<i64: 1, 32>}, {pipeline_mode = #tpu.pipeline_mode<synchronous>, transform_indices = @transform_14, window_bounds = array<i64: 2, 32>}]} {
    %c0 = arith.constant 0 : index
    %c0_0 = arith.constant 0 : index
    %0 = vector.load %arg1[%c0, %c0_0] : memref<256x48xf32, #tpu.memory_space<vmem>>, vector<256x48xf32>
    %c0_1 = arith.constant 0 : index
    %c0_2 = arith.constant 0 : index
    %1 = vector.load %arg2[%c0_1, %c0_2] : memref<48x32xf32, #tpu.memory_space<vmem>>, vector<48x32xf32>
    %cst = arith.constant dense<0.000000e+00> : vector<256x32xf32>
    %2 = tpu.matmul %0, %1, %cst {dimension_numbers = #tpu.dot_dimension_numbers<[1], [0], [0], [1], [0, 0, 1, 1], [], []>} : vector<256x48xf32>, vector<48x32xf32>, vector<256x32xf32> -> vector<256x32xf32>
    %c0_3 = arith.constant 0 : index
    %c0_4 = arith.constant 0 : index
    %3 = vector.load %arg3[%c0_3, %c0_4] : memref<1x32xf32, #tpu.memory_space<vmem>>, vector<1x32xf32>
    %c0_5 = arith.constant 0 : index
    %c0_6 = arith.constant 0 : index
    %4 = vector.load %arg4[%c0_5, %c0_6] : memref<1x32xf32, #tpu.memory_space<vmem>>, vector<1x32xf32>
    %cst_7 = arith.constant dense<0.000000e+00> : vector<32xf32>
    %5 = vector.multi_reduction <add>, %2, %cst_7 [0] : vector<256x32xf32> to vector<32xf32>
    %6 = vector.shape_cast %5 : vector<32xf32> to vector<1x32xf32>
    %cst_8 = arith.constant 2.560000e+02 : f32
    %7 = vector.broadcast %cst_8 : f32 to vector<1x32xf32>
    %8 = arith.divf %6, %7 : vector<1x32xf32>
    %9 = vector.broadcast %8 : vector<1x32xf32> to vector<256x32xf32>
    %10 = arith.subf %2, %9 : vector<256x32xf32>
    %11 = arith.mulf %10, %10 : vector<256x32xf32>
    %cst_9 = arith.constant dense<0.000000e+00> : vector<32xf32>
    %12 = vector.multi_reduction <add>, %11, %cst_9 [0] : vector<256x32xf32> to vector<32xf32>
    %13 = vector.shape_cast %12 : vector<32xf32> to vector<1x32xf32>
    %cst_10 = arith.constant 2.560000e+02 : f32
    %14 = vector.broadcast %cst_10 : f32 to vector<1x32xf32>
    %15 = arith.divf %13, %14 : vector<1x32xf32>
    %16 = vector.broadcast %8 : vector<1x32xf32> to vector<256x32xf32>
    %17 = arith.subf %2, %16 : vector<256x32xf32>
    %cst_11 = arith.constant 9.99999974E-6 : f32
    %18 = vector.broadcast %cst_11 : f32 to vector<1x32xf32>
    %19 = arith.addf %15, %18 : vector<1x32xf32>
    %20 = math.rsqrt %19 : vector<1x32xf32>
    %21 = vector.broadcast %20 : vector<1x32xf32> to vector<256x32xf32>
    %22 = arith.mulf %17, %21 : vector<256x32xf32>
    %23 = vector.broadcast %3 : vector<1x32xf32> to vector<256x32xf32>
    %24 = arith.mulf %22, %23 : vector<256x32xf32>
    %25 = vector.broadcast %4 : vector<1x32xf32> to vector<256x32xf32>
    %26 = arith.addf %24, %25 : vector<256x32xf32>
    %cst_12 = arith.constant 0.000000e+00 : f32
    %27 = vector.broadcast %cst_12 : f32 to vector<256x32xf32>
    %28 = arith.cmpf oge, %26, %27 : vector<256x32xf32>
    %cst_13 = arith.constant 2.000000e-01 : f32
    %29 = vector.broadcast %cst_13 : f32 to vector<256x32xf32>
    %30 = arith.mulf %29, %26 : vector<256x32xf32>
    %31 = arith.select %28, %26, %30 : vector<256x32xi1>, vector<256x32xf32>
    %c0_14 = arith.constant 0 : index
    %c0_15 = arith.constant 0 : index
    %c0_16 = arith.constant 0 : index
    %32 = vector.load %arg5[%c0_14, %c0_15, %c0_16] : memref<16x64x256xf32, #tpu.memory_space<vmem>>, vector<1x64x256xf32>
    %33 = vector.shape_cast %32 : vector<1x64x256xf32> to vector<64x256xf32>
    %cst_17 = arith.constant dense<0.000000e+00> : vector<64x32xf32>
    %34 = tpu.matmul %33, %31, %cst_17 {dimension_numbers = #tpu.dot_dimension_numbers<[1], [0], [0], [1], [0, 0, 1, 1], [], []>} : vector<64x256xf32>, vector<256x32xf32>, vector<64x32xf32> -> vector<64x32xf32>
    %c0_18 = arith.constant 0 : index
    %c0_19 = arith.constant 0 : index
    %c0_20 = arith.constant 0 : index
    %35 = vector.load %arg6[%c0_18, %c0_19, %c0_20] : memref<16x32x64xf32, #tpu.memory_space<vmem>>, vector<1x32x64xf32>
    %36 = vector.shape_cast %35 : vector<1x32x64xf32> to vector<32x64xf32>
    %cst_21 = arith.constant dense<0.000000e+00> : vector<64x64xf32>
    %37 = tpu.matmul %34, %36, %cst_21 {dimension_numbers = #tpu.dot_dimension_numbers<[1], [0], [0], [1], [0, 0, 1, 1], [], []>} : vector<64x32xf32>, vector<32x64xf32>, vector<64x64xf32> -> vector<64x64xf32>
    %c1 = arith.constant 1 : index
    %c0_22 = arith.constant 0 : index
    %c0_23 = arith.constant 0 : index
    %38 = vector.load %arg5[%c1, %c0_22, %c0_23] : memref<16x64x256xf32, #tpu.memory_space<vmem>>, vector<1x64x256xf32>
    %39 = vector.shape_cast %38 : vector<1x64x256xf32> to vector<64x256xf32>
    %cst_24 = arith.constant dense<0.000000e+00> : vector<64x32xf32>
    %40 = tpu.matmul %39, %31, %cst_24 {dimension_numbers = #tpu.dot_dimension_numbers<[1], [0], [0], [1], [0, 0, 1, 1], [], []>} : vector<64x256xf32>, vector<256x32xf32>, vector<64x32xf32> -> vector<64x32xf32>
    %c1_25 = arith.constant 1 : index
    %c0_26 = arith.constant 0 : index
    %c0_27 = arith.constant 0 : index
    %41 = vector.load %arg6[%c1_25, %c0_26, %c0_27] : memref<16x32x64xf32, #tpu.memory_space<vmem>>, vector<1x32x64xf32>
    %42 = vector.shape_cast %41 : vector<1x32x64xf32> to vector<32x64xf32>
    %cst_28 = arith.constant dense<0.000000e+00> : vector<64x64xf32>
    %43 = tpu.matmul %40, %42, %cst_28 {dimension_numbers = #tpu.dot_dimension_numbers<[1], [0], [0], [1], [0, 0, 1, 1], [], []>} : vector<64x32xf32>, vector<32x64xf32>, vector<64x64xf32> -> vector<64x64xf32>
    %44 = arith.addf %37, %43 : vector<64x64xf32>
    %c2 = arith.constant 2 : index
    %c0_29 = arith.constant 0 : index
    %c0_30 = arith.constant 0 : index
    %45 = vector.load %arg5[%c2, %c0_29, %c0_30] : memref<16x64x256xf32, #tpu.memory_space<vmem>>, vector<1x64x256xf32>
    %46 = vector.shape_cast %45 : vector<1x64x256xf32> to vector<64x256xf32>
    %cst_31 = arith.constant dense<0.000000e+00> : vector<64x32xf32>
    %47 = tpu.matmul %46, %31, %cst_31 {dimension_numbers = #tpu.dot_dimension_numbers<[1], [0], [0], [1], [0, 0, 1, 1], [], []>} : vector<64x256xf32>, vector<256x32xf32>, vector<64x32xf32> -> vector<64x32xf32>
    %c2_32 = arith.constant 2 : index
    %c0_33 = arith.constant 0 : index
    %c0_34 = arith.constant 0 : index
    %48 = vector.load %arg6[%c2_32, %c0_33, %c0_34] : memref<16x32x64xf32, #tpu.memory_space<vmem>>, vector<1x32x64xf32>
    %49 = vector.shape_cast %48 : vector<1x32x64xf32> to vector<32x64xf32>
    %cst_35 = arith.constant dense<0.000000e+00> : vector<64x64xf32>
    %50 = tpu.matmul %47, %49, %cst_35 {dimension_numbers = #tpu.dot_dimension_numbers<[1], [0], [0], [1], [0, 0, 1, 1], [], []>} : vector<64x32xf32>, vector<32x64xf32>, vector<64x64xf32> -> vector<64x64xf32>
    %51 = arith.addf %44, %50 : vector<64x64xf32>
    %c3 = arith.constant 3 : index
    %c0_36 = arith.constant 0 : index
    %c0_37 = arith.constant 0 : index
    %52 = vector.load %arg5[%c3, %c0_36, %c0_37] : memref<16x64x256xf32, #tpu.memory_space<vmem>>, vector<1x64x256xf32>
    %53 = vector.shape_cast %52 : vector<1x64x256xf32> to vector<64x256xf32>
    %cst_38 = arith.constant dense<0.000000e+00> : vector<64x32xf32>
    %54 = tpu.matmul %53, %31, %cst_38 {dimension_numbers = #tpu.dot_dimension_numbers<[1], [0], [0], [1], [0, 0, 1, 1], [], []>} : vector<64x256xf32>, vector<256x32xf32>, vector<64x32xf32> -> vector<64x32xf32>
    %c3_39 = arith.constant 3 : index
    %c0_40 = arith.constant 0 : index
    %c0_41 = arith.constant 0 : index
    %55 = vector.load %arg6[%c3_39, %c0_40, %c0_41] : memref<16x32x64xf32, #tpu.memory_space<vmem>>, vector<1x32x64xf32>
    %56 = vector.shape_cast %55 : vector<1x32x64xf32> to vector<32x64xf32>
    %cst_42 = arith.constant dense<0.000000e+00> : vector<64x64xf32>
    %57 = tpu.matmul %54, %56, %cst_42 {dimension_numbers = #tpu.dot_dimension_numbers<[1], [0], [0], [1], [0, 0, 1, 1], [], []>} : vector<64x32xf32>, vector<32x64xf32>, vector<64x64xf32> -> vector<64x64xf32>
    %58 = arith.addf %51, %57 : vector<64x64xf32>
    %c4 = arith.constant 4 : index
    %c0_43 = arith.constant 0 : index
    %c0_44 = arith.constant 0 : index
    %59 = vector.load %arg5[%c4, %c0_43, %c0_44] : memref<16x64x256xf32, #tpu.memory_space<vmem>>, vector<1x64x256xf32>
    %60 = vector.shape_cast %59 : vector<1x64x256xf32> to vector<64x256xf32>
    %cst_45 = arith.constant dense<0.000000e+00> : vector<64x32xf32>
    %61 = tpu.matmul %60, %31, %cst_45 {dimension_numbers = #tpu.dot_dimension_numbers<[1], [0], [0], [1], [0, 0, 1, 1], [], []>} : vector<64x256xf32>, vector<256x32xf32>, vector<64x32xf32> -> vector<64x32xf32>
    %c4_46 = arith.constant 4 : index
    %c0_47 = arith.constant 0 : index
    %c0_48 = arith.constant 0 : index
    %62 = vector.load %arg6[%c4_46, %c0_47, %c0_48] : memref<16x32x64xf32, #tpu.memory_space<vmem>>, vector<1x32x64xf32>
    %63 = vector.shape_cast %62 : vector<1x32x64xf32> to vector<32x64xf32>
    %cst_49 = arith.constant dense<0.000000e+00> : vector<64x64xf32>
    %64 = tpu.matmul %61, %63, %cst_49 {dimension_numbers = #tpu.dot_dimension_numbers<[1], [0], [0], [1], [0, 0, 1, 1], [], []>} : vector<64x32xf32>, vector<32x64xf32>, vector<64x64xf32> -> vector<64x64xf32>
    %65 = arith.addf %58, %64 : vector<64x64xf32>
    %c5 = arith.constant 5 : index
    %c0_50 = arith.constant 0 : index
    %c0_51 = arith.constant 0 : index
    %66 = vector.load %arg5[%c5, %c0_50, %c0_51] : memref<16x64x256xf32, #tpu.memory_space<vmem>>, vector<1x64x256xf32>
    %67 = vector.shape_cast %66 : vector<1x64x256xf32> to vector<64x256xf32>
    %cst_52 = arith.constant dense<0.000000e+00> : vector<64x32xf32>
    %68 = tpu.matmul %67, %31, %cst_52 {dimension_numbers = #tpu.dot_dimension_numbers<[1], [0], [0], [1], [0, 0, 1, 1], [], []>} : vector<64x256xf32>, vector<256x32xf32>, vector<64x32xf32> -> vector<64x32xf32>
    %c5_53 = arith.constant 5 : index
    %c0_54 = arith.constant 0 : index
    %c0_55 = arith.constant 0 : index
    %69 = vector.load %arg6[%c5_53, %c0_54, %c0_55] : memref<16x32x64xf32, #tpu.memory_space<vmem>>, vector<1x32x64xf32>
    %70 = vector.shape_cast %69 : vector<1x32x64xf32> to vector<32x64xf32>
    %cst_56 = arith.constant dense<0.000000e+00> : vector<64x64xf32>
    %71 = tpu.matmul %68, %70, %cst_56 {dimension_numbers = #tpu.dot_dimension_numbers<[1], [0], [0], [1], [0, 0, 1, 1], [], []>} : vector<64x32xf32>, vector<32x64xf32>, vector<64x64xf32> -> vector<64x64xf32>
    %72 = arith.addf %65, %71 : vector<64x64xf32>
    %c6 = arith.constant 6 : index
    %c0_57 = arith.constant 0 : index
    %c0_58 = arith.constant 0 : index
    %73 = vector.load %arg5[%c6, %c0_57, %c0_58] : memref<16x64x256xf32, #tpu.memory_space<vmem>>, vector<1x64x256xf32>
    %74 = vector.shape_cast %73 : vector<1x64x256xf32> to vector<64x256xf32>
    %cst_59 = arith.constant dense<0.000000e+00> : vector<64x32xf32>
    %75 = tpu.matmul %74, %31, %cst_59 {dimension_numbers = #tpu.dot_dimension_numbers<[1], [0], [0], [1], [0, 0, 1, 1], [], []>} : vector<64x256xf32>, vector<256x32xf32>, vector<64x32xf32> -> vector<64x32xf32>
    %c6_60 = arith.constant 6 : index
    %c0_61 = arith.constant 0 : index
    %c0_62 = arith.constant 0 : index
    %76 = vector.load %arg6[%c6_60, %c0_61, %c0_62] : memref<16x32x64xf32, #tpu.memory_space<vmem>>, vector<1x32x64xf32>
    %77 = vector.shape_cast %76 : vector<1x32x64xf32> to vector<32x64xf32>
    %cst_63 = arith.constant dense<0.000000e+00> : vector<64x64xf32>
    %78 = tpu.matmul %75, %77, %cst_63 {dimension_numbers = #tpu.dot_dimension_numbers<[1], [0], [0], [1], [0, 0, 1, 1], [], []>} : vector<64x32xf32>, vector<32x64xf32>, vector<64x64xf32> -> vector<64x64xf32>
    %79 = arith.addf %72, %78 : vector<64x64xf32>
    %c7 = arith.constant 7 : index
    %c0_64 = arith.constant 0 : index
    %c0_65 = arith.constant 0 : index
    %80 = vector.load %arg5[%c7, %c0_64, %c0_65] : memref<16x64x256xf32, #tpu.memory_space<vmem>>, vector<1x64x256xf32>
    %81 = vector.shape_cast %80 : vector<1x64x256xf32> to vector<64x256xf32>
    %cst_66 = arith.constant dense<0.000000e+00> : vector<64x32xf32>
    %82 = tpu.matmul %81, %31, %cst_66 {dimension_numbers = #tpu.dot_dimension_numbers<[1], [0], [0], [1], [0, 0, 1, 1], [], []>} : vector<64x256xf32>, vector<256x32xf32>, vector<64x32xf32> -> vector<64x32xf32>
    %c7_67 = arith.constant 7 : index
    %c0_68 = arith.constant 0 : index
    %c0_69 = arith.constant 0 : index
    %83 = vector.load %arg6[%c7_67, %c0_68, %c0_69] : memref<16x32x64xf32, #tpu.memory_space<vmem>>, vector<1x32x64xf32>
    %84 = vector.shape_cast %83 : vector<1x32x64xf32> to vector<32x64xf32>
    %cst_70 = arith.constant dense<0.000000e+00> : vector<64x64xf32>
    %85 = tpu.matmul %82, %84, %cst_70 {dimension_numbers = #tpu.dot_dimension_numbers<[1], [0], [0], [1], [0, 0, 1, 1], [], []>} : vector<64x32xf32>, vector<32x64xf32>, vector<64x64xf32> -> vector<64x64xf32>
    %86 = arith.addf %79, %85 : vector<64x64xf32>
    %c8 = arith.constant 8 : index
    %c0_71 = arith.constant 0 : index
    %c0_72 = arith.constant 0 : index
    %87 = vector.load %arg5[%c8, %c0_71, %c0_72] : memref<16x64x256xf32, #tpu.memory_space<vmem>>, vector<1x64x256xf32>
    %88 = vector.shape_cast %87 : vector<1x64x256xf32> to vector<64x256xf32>
    %cst_73 = arith.constant dense<0.000000e+00> : vector<64x32xf32>
    %89 = tpu.matmul %88, %31, %cst_73 {dimension_numbers = #tpu.dot_dimension_numbers<[1], [0], [0], [1], [0, 0, 1, 1], [], []>} : vector<64x256xf32>, vector<256x32xf32>, vector<64x32xf32> -> vector<64x32xf32>
    %c8_74 = arith.constant 8 : index
    %c0_75 = arith.constant 0 : index
    %c0_76 = arith.constant 0 : index
    %90 = vector.load %arg6[%c8_74, %c0_75, %c0_76] : memref<16x32x64xf32, #tpu.memory_space<vmem>>, vector<1x32x64xf32>
    %91 = vector.shape_cast %90 : vector<1x32x64xf32> to vector<32x64xf32>
    %cst_77 = arith.constant dense<0.000000e+00> : vector<64x64xf32>
    %92 = tpu.matmul %89, %91, %cst_77 {dimension_numbers = #tpu.dot_dimension_numbers<[1], [0], [0], [1], [0, 0, 1, 1], [], []>} : vector<64x32xf32>, vector<32x64xf32>, vector<64x64xf32> -> vector<64x64xf32>
    %93 = arith.addf %86, %92 : vector<64x64xf32>
    %c9 = arith.constant 9 : index
    %c0_78 = arith.constant 0 : index
    %c0_79 = arith.constant 0 : index
    %94 = vector.load %arg5[%c9, %c0_78, %c0_79] : memref<16x64x256xf32, #tpu.memory_space<vmem>>, vector<1x64x256xf32>
    %95 = vector.shape_cast %94 : vector<1x64x256xf32> to vector<64x256xf32>
    %cst_80 = arith.constant dense<0.000000e+00> : vector<64x32xf32>
    %96 = tpu.matmul %95, %31, %cst_80 {dimension_numbers = #tpu.dot_dimension_numbers<[1], [0], [0], [1], [0, 0, 1, 1], [], []>} : vector<64x256xf32>, vector<256x32xf32>, vector<64x32xf32> -> vector<64x32xf32>
    %c9_81 = arith.constant 9 : index
    %c0_82 = arith.constant 0 : index
    %c0_83 = arith.constant 0 : index
    %97 = vector.load %arg6[%c9_81, %c0_82, %c0_83] : memref<16x32x64xf32, #tpu.memory_space<vmem>>, vector<1x32x64xf32>
    %98 = vector.shape_cast %97 : vector<1x32x64xf32> to vector<32x64xf32>
    %cst_84 = arith.constant dense<0.000000e+00> : vector<64x64xf32>
    %99 = tpu.matmul %96, %98, %cst_84 {dimension_numbers = #tpu.dot_dimension_numbers<[1], [0], [0], [1], [0, 0, 1, 1], [], []>} : vector<64x32xf32>, vector<32x64xf32>, vector<64x64xf32> -> vector<64x64xf32>
    %100 = arith.addf %93, %99 : vector<64x64xf32>
    %c10 = arith.constant 10 : index
    %c0_85 = arith.constant 0 : index
    %c0_86 = arith.constant 0 : index
    %101 = vector.load %arg5[%c10, %c0_85, %c0_86] : memref<16x64x256xf32, #tpu.memory_space<vmem>>, vector<1x64x256xf32>
    %102 = vector.shape_cast %101 : vector<1x64x256xf32> to vector<64x256xf32>
    %cst_87 = arith.constant dense<0.000000e+00> : vector<64x32xf32>
    %103 = tpu.matmul %102, %31, %cst_87 {dimension_numbers = #tpu.dot_dimension_numbers<[1], [0], [0], [1], [0, 0, 1, 1], [], []>} : vector<64x256xf32>, vector<256x32xf32>, vector<64x32xf32> -> vector<64x32xf32>
    %c10_88 = arith.constant 10 : index
    %c0_89 = arith.constant 0 : index
    %c0_90 = arith.constant 0 : index
    %104 = vector.load %arg6[%c10_88, %c0_89, %c0_90] : memref<16x32x64xf32, #tpu.memory_space<vmem>>, vector<1x32x64xf32>
    %105 = vector.shape_cast %104 : vector<1x32x64xf32> to vector<32x64xf32>
    %cst_91 = arith.constant dense<0.000000e+00> : vector<64x64xf32>
    %106 = tpu.matmul %103, %105, %cst_91 {dimension_numbers = #tpu.dot_dimension_numbers<[1], [0], [0], [1], [0, 0, 1, 1], [], []>} : vector<64x32xf32>, vector<32x64xf32>, vector<64x64xf32> -> vector<64x64xf32>
    %107 = arith.addf %100, %106 : vector<64x64xf32>
    %c11 = arith.constant 11 : index
    %c0_92 = arith.constant 0 : index
    %c0_93 = arith.constant 0 : index
    %108 = vector.load %arg5[%c11, %c0_92, %c0_93] : memref<16x64x256xf32, #tpu.memory_space<vmem>>, vector<1x64x256xf32>
    %109 = vector.shape_cast %108 : vector<1x64x256xf32> to vector<64x256xf32>
    %cst_94 = arith.constant dense<0.000000e+00> : vector<64x32xf32>
    %110 = tpu.matmul %109, %31, %cst_94 {dimension_numbers = #tpu.dot_dimension_numbers<[1], [0], [0], [1], [0, 0, 1, 1], [], []>} : vector<64x256xf32>, vector<256x32xf32>, vector<64x32xf32> -> vector<64x32xf32>
    %c11_95 = arith.constant 11 : index
    %c0_96 = arith.constant 0 : index
    %c0_97 = arith.constant 0 : index
    %111 = vector.load %arg6[%c11_95, %c0_96, %c0_97] : memref<16x32x64xf32, #tpu.memory_space<vmem>>, vector<1x32x64xf32>
    %112 = vector.shape_cast %111 : vector<1x32x64xf32> to vector<32x64xf32>
    %cst_98 = arith.constant dense<0.000000e+00> : vector<64x64xf32>
    %113 = tpu.matmul %110, %112, %cst_98 {dimension_numbers = #tpu.dot_dimension_numbers<[1], [0], [0], [1], [0, 0, 1, 1], [], []>} : vector<64x32xf32>, vector<32x64xf32>, vector<64x64xf32> -> vector<64x64xf32>
    %114 = arith.addf %107, %113 : vector<64x64xf32>
    %c12 = arith.constant 12 : index
    %c0_99 = arith.constant 0 : index
    %c0_100 = arith.constant 0 : index
    %115 = vector.load %arg5[%c12, %c0_99, %c0_100] : memref<16x64x256xf32, #tpu.memory_space<vmem>>, vector<1x64x256xf32>
    %116 = vector.shape_cast %115 : vector<1x64x256xf32> to vector<64x256xf32>
    %cst_101 = arith.constant dense<0.000000e+00> : vector<64x32xf32>
    %117 = tpu.matmul %116, %31, %cst_101 {dimension_numbers = #tpu.dot_dimension_numbers<[1], [0], [0], [1], [0, 0, 1, 1], [], []>} : vector<64x256xf32>, vector<256x32xf32>, vector<64x32xf32> -> vector<64x32xf32>
    %c12_102 = arith.constant 12 : index
    %c0_103 = arith.constant 0 : index
    %c0_104 = arith.constant 0 : index
    %118 = vector.load %arg6[%c12_102, %c0_103, %c0_104] : memref<16x32x64xf32, #tpu.memory_space<vmem>>, vector<1x32x64xf32>
    %119 = vector.shape_cast %118 : vector<1x32x64xf32> to vector<32x64xf32>
    %cst_105 = arith.constant dense<0.000000e+00> : vector<64x64xf32>
    %120 = tpu.matmul %117, %119, %cst_105 {dimension_numbers = #tpu.dot_dimension_numbers<[1], [0], [0], [1], [0, 0, 1, 1], [], []>} : vector<64x32xf32>, vector<32x64xf32>, vector<64x64xf32> -> vector<64x64xf32>
    %121 = arith.addf %114, %120 : vector<64x64xf32>
    %c13 = arith.constant 13 : index
    %c0_106 = arith.constant 0 : index
    %c0_107 = arith.constant 0 : index
    %122 = vector.load %arg5[%c13, %c0_106, %c0_107] : memref<16x64x256xf32, #tpu.memory_space<vmem>>, vector<1x64x256xf32>
    %123 = vector.shape_cast %122 : vector<1x64x256xf32> to vector<64x256xf32>
    %cst_108 = arith.constant dense<0.000000e+00> : vector<64x32xf32>
    %124 = tpu.matmul %123, %31, %cst_108 {dimension_numbers = #tpu.dot_dimension_numbers<[1], [0], [0], [1], [0, 0, 1, 1], [], []>} : vector<64x256xf32>, vector<256x32xf32>, vector<64x32xf32> -> vector<64x32xf32>
    %c13_109 = arith.constant 13 : index
    %c0_110 = arith.constant 0 : index
    %c0_111 = arith.constant 0 : index
    %125 = vector.load %arg6[%c13_109, %c0_110, %c0_111] : memref<16x32x64xf32, #tpu.memory_space<vmem>>, vector<1x32x64xf32>
    %126 = vector.shape_cast %125 : vector<1x32x64xf32> to vector<32x64xf32>
    %cst_112 = arith.constant dense<0.000000e+00> : vector<64x64xf32>
    %127 = tpu.matmul %124, %126, %cst_112 {dimension_numbers = #tpu.dot_dimension_numbers<[1], [0], [0], [1], [0, 0, 1, 1], [], []>} : vector<64x32xf32>, vector<32x64xf32>, vector<64x64xf32> -> vector<64x64xf32>
    %128 = arith.addf %121, %127 : vector<64x64xf32>
    %c14 = arith.constant 14 : index
    %c0_113 = arith.constant 0 : index
    %c0_114 = arith.constant 0 : index
    %129 = vector.load %arg5[%c14, %c0_113, %c0_114] : memref<16x64x256xf32, #tpu.memory_space<vmem>>, vector<1x64x256xf32>
    %130 = vector.shape_cast %129 : vector<1x64x256xf32> to vector<64x256xf32>
    %cst_115 = arith.constant dense<0.000000e+00> : vector<64x32xf32>
    %131 = tpu.matmul %130, %31, %cst_115 {dimension_numbers = #tpu.dot_dimension_numbers<[1], [0], [0], [1], [0, 0, 1, 1], [], []>} : vector<64x256xf32>, vector<256x32xf32>, vector<64x32xf32> -> vector<64x32xf32>
    %c14_116 = arith.constant 14 : index
    %c0_117 = arith.constant 0 : index
    %c0_118 = arith.constant 0 : index
    %132 = vector.load %arg6[%c14_116, %c0_117, %c0_118] : memref<16x32x64xf32, #tpu.memory_space<vmem>>, vector<1x32x64xf32>
    %133 = vector.shape_cast %132 : vector<1x32x64xf32> to vector<32x64xf32>
    %cst_119 = arith.constant dense<0.000000e+00> : vector<64x64xf32>
    %134 = tpu.matmul %131, %133, %cst_119 {dimension_numbers = #tpu.dot_dimension_numbers<[1], [0], [0], [1], [0, 0, 1, 1], [], []>} : vector<64x32xf32>, vector<32x64xf32>, vector<64x64xf32> -> vector<64x64xf32>
    %135 = arith.addf %128, %134 : vector<64x64xf32>
    %c15 = arith.constant 15 : index
    %c0_120 = arith.constant 0 : index
    %c0_121 = arith.constant 0 : index
    %136 = vector.load %arg5[%c15, %c0_120, %c0_121] : memref<16x64x256xf32, #tpu.memory_space<vmem>>, vector<1x64x256xf32>
    %137 = vector.shape_cast %136 : vector<1x64x256xf32> to vector<64x256xf32>
    %cst_122 = arith.constant dense<0.000000e+00> : vector<64x32xf32>
    %138 = tpu.matmul %137, %31, %cst_122 {dimension_numbers = #tpu.dot_dimension_numbers<[1], [0], [0], [1], [0, 0, 1, 1], [], []>} : vector<64x256xf32>, vector<256x32xf32>, vector<64x32xf32> -> vector<64x32xf32>
    %c15_123 = arith.constant 15 : index
    %c0_124 = arith.constant 0 : index
    %c0_125 = arith.constant 0 : index
    %139 = vector.load %arg6[%c15_123, %c0_124, %c0_125] : memref<16x32x64xf32, #tpu.memory_space<vmem>>, vector<1x32x64xf32>
    %140 = vector.shape_cast %139 : vector<1x32x64xf32> to vector<32x64xf32>
    %cst_126 = arith.constant dense<0.000000e+00> : vector<64x64xf32>
    %141 = tpu.matmul %138, %140, %cst_126 {dimension_numbers = #tpu.dot_dimension_numbers<[1], [0], [0], [1], [0, 0, 1, 1], [], []>} : vector<64x32xf32>, vector<32x64xf32>, vector<64x64xf32> -> vector<64x64xf32>
    %142 = arith.addf %135, %141 : vector<64x64xf32>
    %c0_127 = arith.constant 0 : index
    %c0_128 = arith.constant 0 : index
    %143 = vector.load %arg7[%c0_127, %c0_128] : memref<1x64xf32, #tpu.memory_space<vmem>>, vector<1x64xf32>
    %c0_129 = arith.constant 0 : index
    %c0_130 = arith.constant 0 : index
    %144 = vector.load %arg8[%c0_129, %c0_130] : memref<1x64xf32, #tpu.memory_space<vmem>>, vector<1x64xf32>
    %cst_131 = arith.constant dense<0.000000e+00> : vector<64xf32>
    %145 = vector.multi_reduction <add>, %142, %cst_131 [0] : vector<64x64xf32> to vector<64xf32>
    %146 = vector.shape_cast %145 : vector<64xf32> to vector<1x64xf32>
    %cst_132 = arith.constant 6.400000e+01 : f32
    %147 = vector.broadcast %cst_132 : f32 to vector<1x64xf32>
    %148 = arith.divf %146, %147 : vector<1x64xf32>
    %149 = vector.broadcast %148 : vector<1x64xf32> to vector<64x64xf32>
    %150 = arith.subf %142, %149 : vector<64x64xf32>
    %151 = arith.mulf %150, %150 : vector<64x64xf32>
    %cst_133 = arith.constant dense<0.000000e+00> : vector<64xf32>
    %152 = vector.multi_reduction <add>, %151, %cst_133 [0] : vector<64x64xf32> to vector<64xf32>
    %153 = vector.shape_cast %152 : vector<64xf32> to vector<1x64xf32>
    %cst_134 = arith.constant 6.400000e+01 : f32
    %154 = vector.broadcast %cst_134 : f32 to vector<1x64xf32>
    %155 = arith.divf %153, %154 : vector<1x64xf32>
    %156 = vector.broadcast %148 : vector<1x64xf32> to vector<64x64xf32>
    %157 = arith.subf %142, %156 : vector<64x64xf32>
    %cst_135 = arith.constant 9.99999974E-6 : f32
    %158 = vector.broadcast %cst_135 : f32 to vector<1x64xf32>
    %159 = arith.addf %155, %158 : vector<1x64xf32>
    %160 = math.rsqrt %159 : vector<1x64xf32>
    %161 = vector.broadcast %160 : vector<1x64xf32> to vector<64x64xf32>
    %162 = arith.mulf %157, %161 : vector<64x64xf32>
    %163 = vector.broadcast %143 : vector<1x64xf32> to vector<64x64xf32>
    %164 = arith.mulf %162, %163 : vector<64x64xf32>
    %165 = vector.broadcast %144 : vector<1x64xf32> to vector<64x64xf32>
    %166 = arith.addf %164, %165 : vector<64x64xf32>
    %cst_136 = arith.constant 0.000000e+00 : f32
    %167 = vector.broadcast %cst_136 : f32 to vector<64x64xf32>
    %168 = arith.cmpf oge, %166, %167 : vector<64x64xf32>
    %cst_137 = arith.constant 2.000000e-01 : f32
    %169 = vector.broadcast %cst_137 : f32 to vector<64x64xf32>
    %170 = arith.mulf %169, %166 : vector<64x64xf32>
    %171 = arith.select %168, %166, %170 : vector<64x64xi1>, vector<64x64xf32>
    %c0_138 = arith.constant 0 : index
    %c0_139 = arith.constant 0 : index
    %c0_140 = arith.constant 0 : index
    %172 = vector.load %arg9[%c0_138, %c0_139, %c0_140] : memref<16x16x64xf32, #tpu.memory_space<vmem>>, vector<1x16x64xf32>
    %173 = vector.shape_cast %172 : vector<1x16x64xf32> to vector<16x64xf32>
    %cst_141 = arith.constant dense<0.000000e+00> : vector<16x64xf32>
    %174 = tpu.matmul %173, %171, %cst_141 {dimension_numbers = #tpu.dot_dimension_numbers<[1], [0], [0], [1], [0, 0, 1, 1], [], []>} : vector<16x64xf32>, vector<64x64xf32>, vector<16x64xf32> -> vector<16x64xf32>
    %c0_142 = arith.constant 0 : index
    %c0_143 = arith.constant 0 : index
    %c0_144 = arith.constant 0 : index
    %175 = vector.load %arg10[%c0_142, %c0_143, %c0_144] : memref<16x64x128xf32, #tpu.memory_space<vmem>>, vector<1x64x128xf32>
    %176 = vector.shape_cast %175 : vector<1x64x128xf32> to vector<64x128xf32>
    %cst_145 = arith.constant dense<0.000000e+00> : vector<16x128xf32>
    %177 = tpu.matmul %174, %176, %cst_145 {dimension_numbers = #tpu.dot_dimension_numbers<[1], [0], [0], [1], [0, 0, 1, 1], [], []>} : vector<16x64xf32>, vector<64x128xf32>, vector<16x128xf32> -> vector<16x128xf32>
    %c1_146 = arith.constant 1 : index
    %c0_147 = arith.constant 0 : index
    %c0_148 = arith.constant 0 : index
    %178 = vector.load %arg9[%c1_146, %c0_147, %c0_148] : memref<16x16x64xf32, #tpu.memory_space<vmem>>, vector<1x16x64xf32>
    %179 = vector.shape_cast %178 : vector<1x16x64xf32> to vector<16x64xf32>
    %cst_149 = arith.constant dense<0.000000e+00> : vector<16x64xf32>
    %180 = tpu.matmul %179, %171, %cst_149 {dimension_numbers = #tpu.dot_dimension_numbers<[1], [0], [0], [1], [0, 0, 1, 1], [], []>} : vector<16x64xf32>, vector<64x64xf32>, vector<16x64xf32> -> vector<16x64xf32>
    %c1_150 = arith.constant 1 : index
    %c0_151 = arith.constant 0 : index
    %c0_152 = arith.constant 0 : index
    %181 = vector.load %arg10[%c1_150, %c0_151, %c0_152] : memref<16x64x128xf32, #tpu.memory_space<vmem>>, vector<1x64x128xf32>
    %182 = vector.shape_cast %181 : vector<1x64x128xf32> to vector<64x128xf32>
    %cst_153 = arith.constant dense<0.000000e+00> : vector<16x128xf32>
    %183 = tpu.matmul %180, %182, %cst_153 {dimension_numbers = #tpu.dot_dimension_numbers<[1], [0], [0], [1], [0, 0, 1, 1], [], []>} : vector<16x64xf32>, vector<64x128xf32>, vector<16x128xf32> -> vector<16x128xf32>
    %184 = arith.addf %177, %183 : vector<16x128xf32>
    %c2_154 = arith.constant 2 : index
    %c0_155 = arith.constant 0 : index
    %c0_156 = arith.constant 0 : index
    %185 = vector.load %arg9[%c2_154, %c0_155, %c0_156] : memref<16x16x64xf32, #tpu.memory_space<vmem>>, vector<1x16x64xf32>
    %186 = vector.shape_cast %185 : vector<1x16x64xf32> to vector<16x64xf32>
    %cst_157 = arith.constant dense<0.000000e+00> : vector<16x64xf32>
    %187 = tpu.matmul %186, %171, %cst_157 {dimension_numbers = #tpu.dot_dimension_numbers<[1], [0], [0], [1], [0, 0, 1, 1], [], []>} : vector<16x64xf32>, vector<64x64xf32>, vector<16x64xf32> -> vector<16x64xf32>
    %c2_158 = arith.constant 2 : index
    %c0_159 = arith.constant 0 : index
    %c0_160 = arith.constant 0 : index
    %188 = vector.load %arg10[%c2_158, %c0_159, %c0_160] : memref<16x64x128xf32, #tpu.memory_space<vmem>>, vector<1x64x128xf32>
    %189 = vector.shape_cast %188 : vector<1x64x128xf32> to vector<64x128xf32>
    %cst_161 = arith.constant dense<0.000000e+00> : vector<16x128xf32>
    %190 = tpu.matmul %187, %189, %cst_161 {dimension_numbers = #tpu.dot_dimension_numbers<[1], [0], [0], [1], [0, 0, 1, 1], [], []>} : vector<16x64xf32>, vector<64x128xf32>, vector<16x128xf32> -> vector<16x128xf32>
    %191 = arith.addf %184, %190 : vector<16x128xf32>
    %c3_162 = arith.constant 3 : index
    %c0_163 = arith.constant 0 : index
    %c0_164 = arith.constant 0 : index
    %192 = vector.load %arg9[%c3_162, %c0_163, %c0_164] : memref<16x16x64xf32, #tpu.memory_space<vmem>>, vector<1x16x64xf32>
    %193 = vector.shape_cast %192 : vector<1x16x64xf32> to vector<16x64xf32>
    %cst_165 = arith.constant dense<0.000000e+00> : vector<16x64xf32>
    %194 = tpu.matmul %193, %171, %cst_165 {dimension_numbers = #tpu.dot_dimension_numbers<[1], [0], [0], [1], [0, 0, 1, 1], [], []>} : vector<16x64xf32>, vector<64x64xf32>, vector<16x64xf32> -> vector<16x64xf32>
    %c3_166 = arith.constant 3 : index
    %c0_167 = arith.constant 0 : index
    %c0_168 = arith.constant 0 : index
    %195 = vector.load %arg10[%c3_166, %c0_167, %c0_168] : memref<16x64x128xf32, #tpu.memory_space<vmem>>, vector<1x64x128xf32>
    %196 = vector.shape_cast %195 : vector<1x64x128xf32> to vector<64x128xf32>
    %cst_169 = arith.constant dense<0.000000e+00> : vector<16x128xf32>
    %197 = tpu.matmul %194, %196, %cst_169 {dimension_numbers = #tpu.dot_dimension_numbers<[1], [0], [0], [1], [0, 0, 1, 1], [], []>} : vector<16x64xf32>, vector<64x128xf32>, vector<16x128xf32> -> vector<16x128xf32>
    %198 = arith.addf %191, %197 : vector<16x128xf32>
    %c4_170 = arith.constant 4 : index
    %c0_171 = arith.constant 0 : index
    %c0_172 = arith.constant 0 : index
    %199 = vector.load %arg9[%c4_170, %c0_171, %c0_172] : memref<16x16x64xf32, #tpu.memory_space<vmem>>, vector<1x16x64xf32>
    %200 = vector.shape_cast %199 : vector<1x16x64xf32> to vector<16x64xf32>
    %cst_173 = arith.constant dense<0.000000e+00> : vector<16x64xf32>
    %201 = tpu.matmul %200, %171, %cst_173 {dimension_numbers = #tpu.dot_dimension_numbers<[1], [0], [0], [1], [0, 0, 1, 1], [], []>} : vector<16x64xf32>, vector<64x64xf32>, vector<16x64xf32> -> vector<16x64xf32>
    %c4_174 = arith.constant 4 : index
    %c0_175 = arith.constant 0 : index
    %c0_176 = arith.constant 0 : index
    %202 = vector.load %arg10[%c4_174, %c0_175, %c0_176] : memref<16x64x128xf32, #tpu.memory_space<vmem>>, vector<1x64x128xf32>
    %203 = vector.shape_cast %202 : vector<1x64x128xf32> to vector<64x128xf32>
    %cst_177 = arith.constant dense<0.000000e+00> : vector<16x128xf32>
    %204 = tpu.matmul %201, %203, %cst_177 {dimension_numbers = #tpu.dot_dimension_numbers<[1], [0], [0], [1], [0, 0, 1, 1], [], []>} : vector<16x64xf32>, vector<64x128xf32>, vector<16x128xf32> -> vector<16x128xf32>
    %205 = arith.addf %198, %204 : vector<16x128xf32>
    %c5_178 = arith.constant 5 : index
    %c0_179 = arith.constant 0 : index
    %c0_180 = arith.constant 0 : index
    %206 = vector.load %arg9[%c5_178, %c0_179, %c0_180] : memref<16x16x64xf32, #tpu.memory_space<vmem>>, vector<1x16x64xf32>
    %207 = vector.shape_cast %206 : vector<1x16x64xf32> to vector<16x64xf32>
    %cst_181 = arith.constant dense<0.000000e+00> : vector<16x64xf32>
    %208 = tpu.matmul %207, %171, %cst_181 {dimension_numbers = #tpu.dot_dimension_numbers<[1], [0], [0], [1], [0, 0, 1, 1], [], []>} : vector<16x64xf32>, vector<64x64xf32>, vector<16x64xf32> -> vector<16x64xf32>
    %c5_182 = arith.constant 5 : index
    %c0_183 = arith.constant 0 : index
    %c0_184 = arith.constant 0 : index
    %209 = vector.load %arg10[%c5_182, %c0_183, %c0_184] : memref<16x64x128xf32, #tpu.memory_space<vmem>>, vector<1x64x128xf32>
    %210 = vector.shape_cast %209 : vector<1x64x128xf32> to vector<64x128xf32>
    %cst_185 = arith.constant dense<0.000000e+00> : vector<16x128xf32>
    %211 = tpu.matmul %208, %210, %cst_185 {dimension_numbers = #tpu.dot_dimension_numbers<[1], [0], [0], [1], [0, 0, 1, 1], [], []>} : vector<16x64xf32>, vector<64x128xf32>, vector<16x128xf32> -> vector<16x128xf32>
    %212 = arith.addf %205, %211 : vector<16x128xf32>
    %c6_186 = arith.constant 6 : index
    %c0_187 = arith.constant 0 : index
    %c0_188 = arith.constant 0 : index
    %213 = vector.load %arg9[%c6_186, %c0_187, %c0_188] : memref<16x16x64xf32, #tpu.memory_space<vmem>>, vector<1x16x64xf32>
    %214 = vector.shape_cast %213 : vector<1x16x64xf32> to vector<16x64xf32>
    %cst_189 = arith.constant dense<0.000000e+00> : vector<16x64xf32>
    %215 = tpu.matmul %214, %171, %cst_189 {dimension_numbers = #tpu.dot_dimension_numbers<[1], [0], [0], [1], [0, 0, 1, 1], [], []>} : vector<16x64xf32>, vector<64x64xf32>, vector<16x64xf32> -> vector<16x64xf32>
    %c6_190 = arith.constant 6 : index
    %c0_191 = arith.constant 0 : index
    %c0_192 = arith.constant 0 : index
    %216 = vector.load %arg10[%c6_190, %c0_191, %c0_192] : memref<16x64x128xf32, #tpu.memory_space<vmem>>, vector<1x64x128xf32>
    %217 = vector.shape_cast %216 : vector<1x64x128xf32> to vector<64x128xf32>
    %cst_193 = arith.constant dense<0.000000e+00> : vector<16x128xf32>
    %218 = tpu.matmul %215, %217, %cst_193 {dimension_numbers = #tpu.dot_dimension_numbers<[1], [0], [0], [1], [0, 0, 1, 1], [], []>} : vector<16x64xf32>, vector<64x128xf32>, vector<16x128xf32> -> vector<16x128xf32>
    %219 = arith.addf %212, %218 : vector<16x128xf32>
    %c7_194 = arith.constant 7 : index
    %c0_195 = arith.constant 0 : index
    %c0_196 = arith.constant 0 : index
    %220 = vector.load %arg9[%c7_194, %c0_195, %c0_196] : memref<16x16x64xf32, #tpu.memory_space<vmem>>, vector<1x16x64xf32>
    %221 = vector.shape_cast %220 : vector<1x16x64xf32> to vector<16x64xf32>
    %cst_197 = arith.constant dense<0.000000e+00> : vector<16x64xf32>
    %222 = tpu.matmul %221, %171, %cst_197 {dimension_numbers = #tpu.dot_dimension_numbers<[1], [0], [0], [1], [0, 0, 1, 1], [], []>} : vector<16x64xf32>, vector<64x64xf32>, vector<16x64xf32> -> vector<16x64xf32>
    %c7_198 = arith.constant 7 : index
    %c0_199 = arith.constant 0 : index
    %c0_200 = arith.constant 0 : index
    %223 = vector.load %arg10[%c7_198, %c0_199, %c0_200] : memref<16x64x128xf32, #tpu.memory_space<vmem>>, vector<1x64x128xf32>
    %224 = vector.shape_cast %223 : vector<1x64x128xf32> to vector<64x128xf32>
    %cst_201 = arith.constant dense<0.000000e+00> : vector<16x128xf32>
    %225 = tpu.matmul %222, %224, %cst_201 {dimension_numbers = #tpu.dot_dimension_numbers<[1], [0], [0], [1], [0, 0, 1, 1], [], []>} : vector<16x64xf32>, vector<64x128xf32>, vector<16x128xf32> -> vector<16x128xf32>
    %226 = arith.addf %219, %225 : vector<16x128xf32>
    %c8_202 = arith.constant 8 : index
    %c0_203 = arith.constant 0 : index
    %c0_204 = arith.constant 0 : index
    %227 = vector.load %arg9[%c8_202, %c0_203, %c0_204] : memref<16x16x64xf32, #tpu.memory_space<vmem>>, vector<1x16x64xf32>
    %228 = vector.shape_cast %227 : vector<1x16x64xf32> to vector<16x64xf32>
    %cst_205 = arith.constant dense<0.000000e+00> : vector<16x64xf32>
    %229 = tpu.matmul %228, %171, %cst_205 {dimension_numbers = #tpu.dot_dimension_numbers<[1], [0], [0], [1], [0, 0, 1, 1], [], []>} : vector<16x64xf32>, vector<64x64xf32>, vector<16x64xf32> -> vector<16x64xf32>
    %c8_206 = arith.constant 8 : index
    %c0_207 = arith.constant 0 : index
    %c0_208 = arith.constant 0 : index
    %230 = vector.load %arg10[%c8_206, %c0_207, %c0_208] : memref<16x64x128xf32, #tpu.memory_space<vmem>>, vector<1x64x128xf32>
    %231 = vector.shape_cast %230 : vector<1x64x128xf32> to vector<64x128xf32>
    %cst_209 = arith.constant dense<0.000000e+00> : vector<16x128xf32>
    %232 = tpu.matmul %229, %231, %cst_209 {dimension_numbers = #tpu.dot_dimension_numbers<[1], [0], [0], [1], [0, 0, 1, 1], [], []>} : vector<16x64xf32>, vector<64x128xf32>, vector<16x128xf32> -> vector<16x128xf32>
    %233 = arith.addf %226, %232 : vector<16x128xf32>
    %c9_210 = arith.constant 9 : index
    %c0_211 = arith.constant 0 : index
    %c0_212 = arith.constant 0 : index
    %234 = vector.load %arg9[%c9_210, %c0_211, %c0_212] : memref<16x16x64xf32, #tpu.memory_space<vmem>>, vector<1x16x64xf32>
    %235 = vector.shape_cast %234 : vector<1x16x64xf32> to vector<16x64xf32>
    %cst_213 = arith.constant dense<0.000000e+00> : vector<16x64xf32>
    %236 = tpu.matmul %235, %171, %cst_213 {dimension_numbers = #tpu.dot_dimension_numbers<[1], [0], [0], [1], [0, 0, 1, 1], [], []>} : vector<16x64xf32>, vector<64x64xf32>, vector<16x64xf32> -> vector<16x64xf32>
    %c9_214 = arith.constant 9 : index
    %c0_215 = arith.constant 0 : index
    %c0_216 = arith.constant 0 : index
    %237 = vector.load %arg10[%c9_214, %c0_215, %c0_216] : memref<16x64x128xf32, #tpu.memory_space<vmem>>, vector<1x64x128xf32>
    %238 = vector.shape_cast %237 : vector<1x64x128xf32> to vector<64x128xf32>
    %cst_217 = arith.constant dense<0.000000e+00> : vector<16x128xf32>
    %239 = tpu.matmul %236, %238, %cst_217 {dimension_numbers = #tpu.dot_dimension_numbers<[1], [0], [0], [1], [0, 0, 1, 1], [], []>} : vector<16x64xf32>, vector<64x128xf32>, vector<16x128xf32> -> vector<16x128xf32>
    %240 = arith.addf %233, %239 : vector<16x128xf32>
    %c10_218 = arith.constant 10 : index
    %c0_219 = arith.constant 0 : index
    %c0_220 = arith.constant 0 : index
    %241 = vector.load %arg9[%c10_218, %c0_219, %c0_220] : memref<16x16x64xf32, #tpu.memory_space<vmem>>, vector<1x16x64xf32>
    %242 = vector.shape_cast %241 : vector<1x16x64xf32> to vector<16x64xf32>
    %cst_221 = arith.constant dense<0.000000e+00> : vector<16x64xf32>
    %243 = tpu.matmul %242, %171, %cst_221 {dimension_numbers = #tpu.dot_dimension_numbers<[1], [0], [0], [1], [0, 0, 1, 1], [], []>} : vector<16x64xf32>, vector<64x64xf32>, vector<16x64xf32> -> vector<16x64xf32>
    %c10_222 = arith.constant 10 : index
    %c0_223 = arith.constant 0 : index
    %c0_224 = arith.constant 0 : index
    %244 = vector.load %arg10[%c10_222, %c0_223, %c0_224] : memref<16x64x128xf32, #tpu.memory_space<vmem>>, vector<1x64x128xf32>
    %245 = vector.shape_cast %244 : vector<1x64x128xf32> to vector<64x128xf32>
    %cst_225 = arith.constant dense<0.000000e+00> : vector<16x128xf32>
    %246 = tpu.matmul %243, %245, %cst_225 {dimension_numbers = #tpu.dot_dimension_numbers<[1], [0], [0], [1], [0, 0, 1, 1], [], []>} : vector<16x64xf32>, vector<64x128xf32>, vector<16x128xf32> -> vector<16x128xf32>
    %247 = arith.addf %240, %246 : vector<16x128xf32>
    %c11_226 = arith.constant 11 : index
    %c0_227 = arith.constant 0 : index
    %c0_228 = arith.constant 0 : index
    %248 = vector.load %arg9[%c11_226, %c0_227, %c0_228] : memref<16x16x64xf32, #tpu.memory_space<vmem>>, vector<1x16x64xf32>
    %249 = vector.shape_cast %248 : vector<1x16x64xf32> to vector<16x64xf32>
    %cst_229 = arith.constant dense<0.000000e+00> : vector<16x64xf32>
    %250 = tpu.matmul %249, %171, %cst_229 {dimension_numbers = #tpu.dot_dimension_numbers<[1], [0], [0], [1], [0, 0, 1, 1], [], []>} : vector<16x64xf32>, vector<64x64xf32>, vector<16x64xf32> -> vector<16x64xf32>
    %c11_230 = arith.constant 11 : index
    %c0_231 = arith.constant 0 : index
    %c0_232 = arith.constant 0 : index
    %251 = vector.load %arg10[%c11_230, %c0_231, %c0_232] : memref<16x64x128xf32, #tpu.memory_space<vmem>>, vector<1x64x128xf32>
    %252 = vector.shape_cast %251 : vector<1x64x128xf32> to vector<64x128xf32>
    %cst_233 = arith.constant dense<0.000000e+00> : vector<16x128xf32>
    %253 = tpu.matmul %250, %252, %cst_233 {dimension_numbers = #tpu.dot_dimension_numbers<[1], [0], [0], [1], [0, 0, 1, 1], [], []>} : vector<16x64xf32>, vector<64x128xf32>, vector<16x128xf32> -> vector<16x128xf32>
    %254 = arith.addf %247, %253 : vector<16x128xf32>
    %c12_234 = arith.constant 12 : index
    %c0_235 = arith.constant 0 : index
    %c0_236 = arith.constant 0 : index
    %255 = vector.load %arg9[%c12_234, %c0_235, %c0_236] : memref<16x16x64xf32, #tpu.memory_space<vmem>>, vector<1x16x64xf32>
    %256 = vector.shape_cast %255 : vector<1x16x64xf32> to vector<16x64xf32>
    %cst_237 = arith.constant dense<0.000000e+00> : vector<16x64xf32>
    %257 = tpu.matmul %256, %171, %cst_237 {dimension_numbers = #tpu.dot_dimension_numbers<[1], [0], [0], [1], [0, 0, 1, 1], [], []>} : vector<16x64xf32>, vector<64x64xf32>, vector<16x64xf32> -> vector<16x64xf32>
    %c12_238 = arith.constant 12 : index
    %c0_239 = arith.constant 0 : index
    %c0_240 = arith.constant 0 : index
    %258 = vector.load %arg10[%c12_238, %c0_239, %c0_240] : memref<16x64x128xf32, #tpu.memory_space<vmem>>, vector<1x64x128xf32>
    %259 = vector.shape_cast %258 : vector<1x64x128xf32> to vector<64x128xf32>
    %cst_241 = arith.constant dense<0.000000e+00> : vector<16x128xf32>
    %260 = tpu.matmul %257, %259, %cst_241 {dimension_numbers = #tpu.dot_dimension_numbers<[1], [0], [0], [1], [0, 0, 1, 1], [], []>} : vector<16x64xf32>, vector<64x128xf32>, vector<16x128xf32> -> vector<16x128xf32>
    %261 = arith.addf %254, %260 : vector<16x128xf32>
    %c13_242 = arith.constant 13 : index
    %c0_243 = arith.constant 0 : index
    %c0_244 = arith.constant 0 : index
    %262 = vector.load %arg9[%c13_242, %c0_243, %c0_244] : memref<16x16x64xf32, #tpu.memory_space<vmem>>, vector<1x16x64xf32>
    %263 = vector.shape_cast %262 : vector<1x16x64xf32> to vector<16x64xf32>
    %cst_245 = arith.constant dense<0.000000e+00> : vector<16x64xf32>
    %264 = tpu.matmul %263, %171, %cst_245 {dimension_numbers = #tpu.dot_dimension_numbers<[1], [0], [0], [1], [0, 0, 1, 1], [], []>} : vector<16x64xf32>, vector<64x64xf32>, vector<16x64xf32> -> vector<16x64xf32>
    %c13_246 = arith.constant 13 : index
    %c0_247 = arith.constant 0 : index
    %c0_248 = arith.constant 0 : index
    %265 = vector.load %arg10[%c13_246, %c0_247, %c0_248] : memref<16x64x128xf32, #tpu.memory_space<vmem>>, vector<1x64x128xf32>
    %266 = vector.shape_cast %265 : vector<1x64x128xf32> to vector<64x128xf32>
    %cst_249 = arith.constant dense<0.000000e+00> : vector<16x128xf32>
    %267 = tpu.matmul %264, %266, %cst_249 {dimension_numbers = #tpu.dot_dimension_numbers<[1], [0], [0], [1], [0, 0, 1, 1], [], []>} : vector<16x64xf32>, vector<64x128xf32>, vector<16x128xf32> -> vector<16x128xf32>
    %268 = arith.addf %261, %267 : vector<16x128xf32>
    %c14_250 = arith.constant 14 : index
    %c0_251 = arith.constant 0 : index
    %c0_252 = arith.constant 0 : index
    %269 = vector.load %arg9[%c14_250, %c0_251, %c0_252] : memref<16x16x64xf32, #tpu.memory_space<vmem>>, vector<1x16x64xf32>
    %270 = vector.shape_cast %269 : vector<1x16x64xf32> to vector<16x64xf32>
    %cst_253 = arith.constant dense<0.000000e+00> : vector<16x64xf32>
    %271 = tpu.matmul %270, %171, %cst_253 {dimension_numbers = #tpu.dot_dimension_numbers<[1], [0], [0], [1], [0, 0, 1, 1], [], []>} : vector<16x64xf32>, vector<64x64xf32>, vector<16x64xf32> -> vector<16x64xf32>
    %c14_254 = arith.constant 14 : index
    %c0_255 = arith.constant 0 : index
    %c0_256 = arith.constant 0 : index
    %272 = vector.load %arg10[%c14_254, %c0_255, %c0_256] : memref<16x64x128xf32, #tpu.memory_space<vmem>>, vector<1x64x128xf32>
    %273 = vector.shape_cast %272 : vector<1x64x128xf32> to vector<64x128xf32>
    %cst_257 = arith.constant dense<0.000000e+00> : vector<16x128xf32>
    %274 = tpu.matmul %271, %273, %cst_257 {dimension_numbers = #tpu.dot_dimension_numbers<[1], [0], [0], [1], [0, 0, 1, 1], [], []>} : vector<16x64xf32>, vector<64x128xf32>, vector<16x128xf32> -> vector<16x128xf32>
    %275 = arith.addf %268, %274 : vector<16x128xf32>
    %c15_258 = arith.constant 15 : index
    %c0_259 = arith.constant 0 : index
    %c0_260 = arith.constant 0 : index
    %276 = vector.load %arg9[%c15_258, %c0_259, %c0_260] : memref<16x16x64xf32, #tpu.memory_space<vmem>>, vector<1x16x64xf32>
    %277 = vector.shape_cast %276 : vector<1x16x64xf32> to vector<16x64xf32>
    %cst_261 = arith.constant dense<0.000000e+00> : vector<16x64xf32>
    %278 = tpu.matmul %277, %171, %cst_261 {dimension_numbers = #tpu.dot_dimension_numbers<[1], [0], [0], [1], [0, 0, 1, 1], [], []>} : vector<16x64xf32>, vector<64x64xf32>, vector<16x64xf32> -> vector<16x64xf32>
    %c15_262 = arith.constant 15 : index
    %c0_263 = arith.constant 0 : index
    %c0_264 = arith.constant 0 : index
    %279 = vector.load %arg10[%c15_262, %c0_263, %c0_264] : memref<16x64x128xf32, #tpu.memory_space<vmem>>, vector<1x64x128xf32>
    %280 = vector.shape_cast %279 : vector<1x64x128xf32> to vector<64x128xf32>
    %cst_265 = arith.constant dense<0.000000e+00> : vector<16x128xf32>
    %281 = tpu.matmul %278, %280, %cst_265 {dimension_numbers = #tpu.dot_dimension_numbers<[1], [0], [0], [1], [0, 0, 1, 1], [], []>} : vector<16x64xf32>, vector<64x128xf32>, vector<16x128xf32> -> vector<16x128xf32>
    %282 = arith.addf %275, %281 : vector<16x128xf32>
    %c0_266 = arith.constant 0 : index
    %c0_267 = arith.constant 0 : index
    %283 = vector.load %arg11[%c0_266, %c0_267] : memref<1x128xf32, #tpu.memory_space<vmem>>, vector<1x128xf32>
    %284 = vector.broadcast %283 : vector<1x128xf32> to vector<16x128xf32>
    %285 = arith.addf %282, %284 : vector<16x128xf32>
    %c0_268 = arith.constant 0 : index
    %c0_269 = arith.constant 0 : index
    %c0_270 = arith.constant 0 : index
    %286 = vector.load %arg12[%c0_268, %c0_269, %c0_270] : memref<8x2x16xf32, #tpu.memory_space<vmem>>, vector<1x2x16xf32>
    %287 = vector.shape_cast %286 : vector<1x2x16xf32> to vector<2x16xf32>
    %cst_271 = arith.constant dense<0.000000e+00> : vector<2x128xf32>
    %288 = tpu.matmul %287, %285, %cst_271 {dimension_numbers = #tpu.dot_dimension_numbers<[1], [0], [0], [1], [0, 0, 1, 1], [], []>} : vector<2x16xf32>, vector<16x128xf32>, vector<2x128xf32> -> vector<2x128xf32>
    %c0_272 = arith.constant 0 : index
    %c0_273 = arith.constant 0 : index
    %c0_274 = arith.constant 0 : index
    %289 = vector.load %arg13[%c0_272, %c0_273, %c0_274] : memref<8x128x32xf32, #tpu.memory_space<vmem>>, vector<1x128x32xf32>
    %290 = vector.shape_cast %289 : vector<1x128x32xf32> to vector<128x32xf32>
    %cst_275 = arith.constant dense<0.000000e+00> : vector<2x32xf32>
    %291 = tpu.matmul %288, %290, %cst_275 {dimension_numbers = #tpu.dot_dimension_numbers<[1], [0], [0], [1], [0, 0, 1, 1], [], []>} : vector<2x128xf32>, vector<128x32xf32>, vector<2x32xf32> -> vector<2x32xf32>
    %c1_276 = arith.constant 1 : index
    %c0_277 = arith.constant 0 : index
    %c0_278 = arith.constant 0 : index
    %292 = vector.load %arg12[%c1_276, %c0_277, %c0_278] : memref<8x2x16xf32, #tpu.memory_space<vmem>>, vector<1x2x16xf32>
    %293 = vector.shape_cast %292 : vector<1x2x16xf32> to vector<2x16xf32>
    %cst_279 = arith.constant dense<0.000000e+00> : vector<2x128xf32>
    %294 = tpu.matmul %293, %285, %cst_279 {dimension_numbers = #tpu.dot_dimension_numbers<[1], [0], [0], [1], [0, 0, 1, 1], [], []>} : vector<2x16xf32>, vector<16x128xf32>, vector<2x128xf32> -> vector<2x128xf32>
    %c1_280 = arith.constant 1 : index
    %c0_281 = arith.constant 0 : index
    %c0_282 = arith.constant 0 : index
    %295 = vector.load %arg13[%c1_280, %c0_281, %c0_282] : memref<8x128x32xf32, #tpu.memory_space<vmem>>, vector<1x128x32xf32>
    %296 = vector.shape_cast %295 : vector<1x128x32xf32> to vector<128x32xf32>
    %cst_283 = arith.constant dense<0.000000e+00> : vector<2x32xf32>
    %297 = tpu.matmul %294, %296, %cst_283 {dimension_numbers = #tpu.dot_dimension_numbers<[1], [0], [0], [1], [0, 0, 1, 1], [], []>} : vector<2x128xf32>, vector<128x32xf32>, vector<2x32xf32> -> vector<2x32xf32>
    %298 = arith.addf %291, %297 : vector<2x32xf32>
    %c2_284 = arith.constant 2 : index
    %c0_285 = arith.constant 0 : index
    %c0_286 = arith.constant 0 : index
    %299 = vector.load %arg12[%c2_284, %c0_285, %c0_286] : memref<8x2x16xf32, #tpu.memory_space<vmem>>, vector<1x2x16xf32>
    %300 = vector.shape_cast %299 : vector<1x2x16xf32> to vector<2x16xf32>
    %cst_287 = arith.constant dense<0.000000e+00> : vector<2x128xf32>
    %301 = tpu.matmul %300, %285, %cst_287 {dimension_numbers = #tpu.dot_dimension_numbers<[1], [0], [0], [1], [0, 0, 1, 1], [], []>} : vector<2x16xf32>, vector<16x128xf32>, vector<2x128xf32> -> vector<2x128xf32>
    %c2_288 = arith.constant 2 : index
    %c0_289 = arith.constant 0 : index
    %c0_290 = arith.constant 0 : index
    %302 = vector.load %arg13[%c2_288, %c0_289, %c0_290] : memref<8x128x32xf32, #tpu.memory_space<vmem>>, vector<1x128x32xf32>
    %303 = vector.shape_cast %302 : vector<1x128x32xf32> to vector<128x32xf32>
    %cst_291 = arith.constant dense<0.000000e+00> : vector<2x32xf32>
    %304 = tpu.matmul %301, %303, %cst_291 {dimension_numbers = #tpu.dot_dimension_numbers<[1], [0], [0], [1], [0, 0, 1, 1], [], []>} : vector<2x128xf32>, vector<128x32xf32>, vector<2x32xf32> -> vector<2x32xf32>
    %305 = arith.addf %298, %304 : vector<2x32xf32>
    %c3_292 = arith.constant 3 : index
    %c0_293 = arith.constant 0 : index
    %c0_294 = arith.constant 0 : index
    %306 = vector.load %arg12[%c3_292, %c0_293, %c0_294] : memref<8x2x16xf32, #tpu.memory_space<vmem>>, vector<1x2x16xf32>
    %307 = vector.shape_cast %306 : vector<1x2x16xf32> to vector<2x16xf32>
    %cst_295 = arith.constant dense<0.000000e+00> : vector<2x128xf32>
    %308 = tpu.matmul %307, %285, %cst_295 {dimension_numbers = #tpu.dot_dimension_numbers<[1], [0], [0], [1], [0, 0, 1, 1], [], []>} : vector<2x16xf32>, vector<16x128xf32>, vector<2x128xf32> -> vector<2x128xf32>
    %c3_296 = arith.constant 3 : index
    %c0_297 = arith.constant 0 : index
    %c0_298 = arith.constant 0 : index
    %309 = vector.load %arg13[%c3_296, %c0_297, %c0_298] : memref<8x128x32xf32, #tpu.memory_space<vmem>>, vector<1x128x32xf32>
    %310 = vector.shape_cast %309 : vector<1x128x32xf32> to vector<128x32xf32>
    %cst_299 = arith.constant dense<0.000000e+00> : vector<2x32xf32>
    %311 = tpu.matmul %308, %310, %cst_299 {dimension_numbers = #tpu.dot_dimension_numbers<[1], [0], [0], [1], [0, 0, 1, 1], [], []>} : vector<2x128xf32>, vector<128x32xf32>, vector<2x32xf32> -> vector<2x32xf32>
    %312 = arith.addf %305, %311 : vector<2x32xf32>
    %c4_300 = arith.constant 4 : index
    %c0_301 = arith.constant 0 : index
    %c0_302 = arith.constant 0 : index
    %313 = vector.load %arg12[%c4_300, %c0_301, %c0_302] : memref<8x2x16xf32, #tpu.memory_space<vmem>>, vector<1x2x16xf32>
    %314 = vector.shape_cast %313 : vector<1x2x16xf32> to vector<2x16xf32>
    %cst_303 = arith.constant dense<0.000000e+00> : vector<2x128xf32>
    %315 = tpu.matmul %314, %285, %cst_303 {dimension_numbers = #tpu.dot_dimension_numbers<[1], [0], [0], [1], [0, 0, 1, 1], [], []>} : vector<2x16xf32>, vector<16x128xf32>, vector<2x128xf32> -> vector<2x128xf32>
    %c4_304 = arith.constant 4 : index
    %c0_305 = arith.constant 0 : index
    %c0_306 = arith.constant 0 : index
    %316 = vector.load %arg13[%c4_304, %c0_305, %c0_306] : memref<8x128x32xf32, #tpu.memory_space<vmem>>, vector<1x128x32xf32>
    %317 = vector.shape_cast %316 : vector<1x128x32xf32> to vector<128x32xf32>
    %cst_307 = arith.constant dense<0.000000e+00> : vector<2x32xf32>
    %318 = tpu.matmul %315, %317, %cst_307 {dimension_numbers = #tpu.dot_dimension_numbers<[1], [0], [0], [1], [0, 0, 1, 1], [], []>} : vector<2x128xf32>, vector<128x32xf32>, vector<2x32xf32> -> vector<2x32xf32>
    %319 = arith.addf %312, %318 : vector<2x32xf32>
    %c5_308 = arith.constant 5 : index
    %c0_309 = arith.constant 0 : index
    %c0_310 = arith.constant 0 : index
    %320 = vector.load %arg12[%c5_308, %c0_309, %c0_310] : memref<8x2x16xf32, #tpu.memory_space<vmem>>, vector<1x2x16xf32>
    %321 = vector.shape_cast %320 : vector<1x2x16xf32> to vector<2x16xf32>
    %cst_311 = arith.constant dense<0.000000e+00> : vector<2x128xf32>
    %322 = tpu.matmul %321, %285, %cst_311 {dimension_numbers = #tpu.dot_dimension_numbers<[1], [0], [0], [1], [0, 0, 1, 1], [], []>} : vector<2x16xf32>, vector<16x128xf32>, vector<2x128xf32> -> vector<2x128xf32>
    %c5_312 = arith.constant 5 : index
    %c0_313 = arith.constant 0 : index
    %c0_314 = arith.constant 0 : index
    %323 = vector.load %arg13[%c5_312, %c0_313, %c0_314] : memref<8x128x32xf32, #tpu.memory_space<vmem>>, vector<1x128x32xf32>
    %324 = vector.shape_cast %323 : vector<1x128x32xf32> to vector<128x32xf32>
    %cst_315 = arith.constant dense<0.000000e+00> : vector<2x32xf32>
    %325 = tpu.matmul %322, %324, %cst_315 {dimension_numbers = #tpu.dot_dimension_numbers<[1], [0], [0], [1], [0, 0, 1, 1], [], []>} : vector<2x128xf32>, vector<128x32xf32>, vector<2x32xf32> -> vector<2x32xf32>
    %326 = arith.addf %319, %325 : vector<2x32xf32>
    %c6_316 = arith.constant 6 : index
    %c0_317 = arith.constant 0 : index
    %c0_318 = arith.constant 0 : index
    %327 = vector.load %arg12[%c6_316, %c0_317, %c0_318] : memref<8x2x16xf32, #tpu.memory_space<vmem>>, vector<1x2x16xf32>
    %328 = vector.shape_cast %327 : vector<1x2x16xf32> to vector<2x16xf32>
    %cst_319 = arith.constant dense<0.000000e+00> : vector<2x128xf32>
    %329 = tpu.matmul %328, %285, %cst_319 {dimension_numbers = #tpu.dot_dimension_numbers<[1], [0], [0], [1], [0, 0, 1, 1], [], []>} : vector<2x16xf32>, vector<16x128xf32>, vector<2x128xf32> -> vector<2x128xf32>
    %c6_320 = arith.constant 6 : index
    %c0_321 = arith.constant 0 : index
    %c0_322 = arith.constant 0 : index
    %330 = vector.load %arg13[%c6_320, %c0_321, %c0_322] : memref<8x128x32xf32, #tpu.memory_space<vmem>>, vector<1x128x32xf32>
    %331 = vector.shape_cast %330 : vector<1x128x32xf32> to vector<128x32xf32>
    %cst_323 = arith.constant dense<0.000000e+00> : vector<2x32xf32>
    %332 = tpu.matmul %329, %331, %cst_323 {dimension_numbers = #tpu.dot_dimension_numbers<[1], [0], [0], [1], [0, 0, 1, 1], [], []>} : vector<2x128xf32>, vector<128x32xf32>, vector<2x32xf32> -> vector<2x32xf32>
    %333 = arith.addf %326, %332 : vector<2x32xf32>
    %c7_324 = arith.constant 7 : index
    %c0_325 = arith.constant 0 : index
    %c0_326 = arith.constant 0 : index
    %334 = vector.load %arg12[%c7_324, %c0_325, %c0_326] : memref<8x2x16xf32, #tpu.memory_space<vmem>>, vector<1x2x16xf32>
    %335 = vector.shape_cast %334 : vector<1x2x16xf32> to vector<2x16xf32>
    %cst_327 = arith.constant dense<0.000000e+00> : vector<2x128xf32>
    %336 = tpu.matmul %335, %285, %cst_327 {dimension_numbers = #tpu.dot_dimension_numbers<[1], [0], [0], [1], [0, 0, 1, 1], [], []>} : vector<2x16xf32>, vector<16x128xf32>, vector<2x128xf32> -> vector<2x128xf32>
    %c7_328 = arith.constant 7 : index
    %c0_329 = arith.constant 0 : index
    %c0_330 = arith.constant 0 : index
    %337 = vector.load %arg13[%c7_328, %c0_329, %c0_330] : memref<8x128x32xf32, #tpu.memory_space<vmem>>, vector<1x128x32xf32>
    %338 = vector.shape_cast %337 : vector<1x128x32xf32> to vector<128x32xf32>
    %cst_331 = arith.constant dense<0.000000e+00> : vector<2x32xf32>
    %339 = tpu.matmul %336, %338, %cst_331 {dimension_numbers = #tpu.dot_dimension_numbers<[1], [0], [0], [1], [0, 0, 1, 1], [], []>} : vector<2x128xf32>, vector<128x32xf32>, vector<2x32xf32> -> vector<2x32xf32>
    %340 = arith.addf %333, %339 : vector<2x32xf32>
    %c0_332 = arith.constant 0 : index
    %c0_333 = arith.constant 0 : index
    %341 = vector.load %arg14[%c0_332, %c0_333] : memref<1x32xf32, #tpu.memory_space<vmem>>, vector<1x32xf32>
    %342 = vector.broadcast %341 : vector<1x32xf32> to vector<2x32xf32>
    %343 = arith.addf %340, %342 : vector<2x32xf32>
    %c0_334 = arith.constant 0 : index
    %c0_335 = arith.constant 0 : index
    %344 = vector.load %arg15[%c0_334, %c0_335] : memref<2x32xf32, #tpu.memory_space<vmem>>, vector<2x32xf32>
    tpu.vector_store %arg15[%c0_334, %c0_335], %343 {strides = array<i32>} : memref<2x32xf32, #tpu.memory_space<vmem>>, vector<2x32xf32>,
    return
  }
  func.func @transform_0(%arg0: i32) -> (i32, i32) {
    %c0_i32 = arith.constant 0 : i32
    %c0_i32_0 = arith.constant 0 : i32
    %c0_i32_1 = arith.constant 0 : i32
    return %c0_i32, %c0_i32_0 : i32, i32
  }
  func.func @transform_1(%arg0: i32) -> (i32, i32) {
    %c0_i32 = arith.constant 0 : i32
    %c0_i32_0 = arith.constant 0 : i32
    %c0_i32_1 = arith.constant 0 : i32
    return %c0_i32, %c0_i32_0 : i32, i32
  }
  func.func @transform_2(%arg0: i32) -> (i32, i32) {
    %c0_i32 = arith.constant 0 : i32
    %c0_i32_0 = arith.constant 0 : i32
    %c0_i32_1 = arith.constant 0 : i32
    return %c0_i32, %c0_i32_0 : i32, i32
  }
  func.func @transform_3(%arg0: i32) -> (i32, i32) {
    %c0_i32 = arith.constant 0 : i32
    %c0_i32_0 = arith.constant 0 : i32
    %c0_i32_1 = arith.constant 0 : i32
    return %c0_i32, %c0_i32_0 : i32, i32
  }
  func.func @transform_4(%arg0: i32) -> (i32, i32, i32) {
    %c0_i32 = arith.constant 0 : i32
    %c0_i32_0 = arith.constant 0 : i32
    %c0_i32_1 = arith.constant 0 : i32
    %c0_i32_2 = arith.constant 0 : i32
    return %c0_i32, %c0_i32_0, %c0_i32_1 : i32, i32, i32
  }
  func.func @transform_5(%arg0: i32) -> (i32, i32, i32) {
    %c0_i32 = arith.constant 0 : i32
    %c0_i32_0 = arith.constant 0 : i32
    %c0_i32_1 = arith.constant 0 : i32
    %c0_i32_2 = arith.constant 0 : i32
    return %c0_i32, %c0_i32_0, %c0_i32_1 : i32, i32, i32
  }
  func.func @transform_6(%arg0: i32) -> (i32, i32) {
    %c0_i32 = arith.constant 0 : i32
    %c0_i32_0 = arith.constant 0 : i32
    %c0_i32_1 = arith.constant 0 : i32
    return %c0_i32, %c0_i32_0 : i32, i32
  }
  func.func @transform_7(%arg0: i32) -> (i32, i32) {
    %c0_i32 = arith.constant 0 : i32
    %c0_i32_0 = arith.constant 0 : i32
    %c0_i32_1 = arith.constant 0 : i32
    return %c0_i32, %c0_i32_0 : i32, i32
  }
  func.func @transform_8(%arg0: i32) -> (i32, i32, i32) {
    %c0_i32 = arith.constant 0 : i32
    %c0_i32_0 = arith.constant 0 : i32
    %c0_i32_1 = arith.constant 0 : i32
    %c0_i32_2 = arith.constant 0 : i32
    return %c0_i32, %c0_i32_0, %c0_i32_1 : i32, i32, i32
  }
  func.func @transform_9(%arg0: i32) -> (i32, i32, i32) {
    %c0_i32 = arith.constant 0 : i32
    %c0_i32_0 = arith.constant 0 : i32
    %c0_i32_1 = arith.constant 0 : i32
    %c0_i32_2 = arith.constant 0 : i32
    return %c0_i32, %c0_i32_0, %c0_i32_1 : i32, i32, i32
  }
  func.func @transform_10(%arg0: i32) -> (i32, i32) {
    %c0_i32 = arith.constant 0 : i32
    %c0_i32_0 = arith.constant 0 : i32
    %c0_i32_1 = arith.constant 0 : i32
    return %c0_i32, %c0_i32_0 : i32, i32
  }
  func.func @transform_11(%arg0: i32) -> (i32, i32, i32) {
    %c0_i32 = arith.constant 0 : i32
    %c0_i32_0 = arith.constant 0 : i32
    %c0_i32_1 = arith.constant 0 : i32
    %c0_i32_2 = arith.constant 0 : i32
    return %c0_i32, %c0_i32_0, %c0_i32_1 : i32, i32, i32
  }
  func.func @transform_12(%arg0: i32) -> (i32, i32, i32) {
    %c0_i32 = arith.constant 0 : i32
    %c0_i32_0 = arith.constant 0 : i32
    %c0_i32_1 = arith.constant 0 : i32
    %c0_i32_2 = arith.constant 0 : i32
    return %c0_i32, %c0_i32_0, %c0_i32_1 : i32, i32, i32
  }
  func.func @transform_13(%arg0: i32) -> (i32, i32) {
    %c0_i32 = arith.constant 0 : i32
    %c0_i32_0 = arith.constant 0 : i32
    %c0_i32_1 = arith.constant 0 : i32
    return %c0_i32, %c0_i32_0 : i32, i32
  }
  func.func @transform_14(%arg0: i32) -> (i32, i32) {
    %c0_i32 = arith.constant 0 : i32
    %c0_i32_0 = arith.constant 0 : i32
    %c0_i32_1 = arith.constant 0 : i32
    return %c0_i32, %c0_i32_0 : i32, i32
  }
}

</mosaic_0001>

<bundles_post_ra>
// kernel: encoder_forward.1
= control target key start
LH: loop header
LB: loop body
LE: loop exit
PB: predicated region body
PF: predicated region fallthrough
CT: control target
= control target key end

     0   :  { %vm85_vm0 = vcmask 392192   ;;  %vm18157_vm1 = vcmask 261120   ;;  %s18142_s1 = inlined_call_operand.vmem [shape: f32[48,32], index: 1, kind: input, shape index: {}]   ;;  %s18143_s0 = inlined_call_operand.vmem [shape: f32[256,48], index: 0, kind: input, shape index: {}]   ;;  %s18144_s4 = inlined_call_operand.vmem [shape: f32[16,64,256], index: 4, kind: input, shape index: {}]   ;;  %s18145_s2 = inlined_call_operand.vmem [shape: f32[1,32], index: 2, kind: input, shape index: {}]   ;;  %s18146_s3 = inlined_call_operand.vmem [shape: f32[1,32], index: 3, kind: input, shape index: {}]   ;;  %s18147_s5 = inlined_call_operand.vmem [shape: f32[16,32,64], index: 5, kind: input, shape index: {}]   ;;  %s18148_s8 = inlined_call_operand.vmem [shape: f32[16,16,64], index: 8, kind: input, shape index: {}]   ;;  %s18149_s6 = inlined_call_operand.vmem [shape: f32[1,64], index: 6, kind: input, shape index: {}]   ;;  %s18150_s7 = inlined_call_operand.vmem [shape: f32[1,64], index: 7, kind: input, shape index: {}]   ;;  %s18151_s9 = inlined_call_operand.vmem [shape: f32[16,64,128], index: 9, kind: input, shape index: {}]   ;;  %s18152_s10 = inlined_call_operand.vmem [shape: f32[1,128], index: 10, kind: input, shape index: {}]   ;;  %s18153_s12 = inlined_call_operand.vmem [shape: f32[8,128,32], index: 12, kind: input, shape index: {}]   ;;  %s18154_s11 = inlined_call_operand.vmem [shape: f32[8,2,16], index: 11, kind: input, shape index: {}]   ;;  %s18155_s13 = inlined_call_operand.vmem [shape: f32[1,32], index: 13, kind: input, shape index: {}]   ;;  %s18156_s14 = inlined_call_operand.vmem [shape: f32[2,32], index: 14, kind: output, shape index: {}]  }
   0x1   :  { %v79_v0 = vld [vmem:[%s18142_s1] sm:$0xff]  ;;  %v80_v1 = vld [vmem:[%s18142_s1 + $0x8] sm:$0xff]  ;;  %v81_v2 = vld [vmem:[%s18142_s1 + $0x10] sm:$0xff] }
   0x2   :  { %v13024_v3 = vpack.c.bf16 %v80_v1, %v79_v0  ;;  %v82_v4 = vld [vmem:[%s18142_s1 + $0x18] sm:$0xff]  ;;  %v83_v6 = vld [vmem:[%s18142_s1 + $0x20] sm:$0xff]  ;;  %v84_v7 = vld [vmem:[%s18142_s1 + $0x28] sm:$0xff] }
   0x3   :  { %v13028_v5 = vpack.c.bf16 %v82_v4, %v81_v2  ;;  %v47_v8 = vld [vmem:[%s18143_s0] sm:$0xff]  ;;  %v13032_v9 = vpack.c.bf16 %v84_v7, %v83_v6  ;;  %v48_v10 = vld [vmem:[%s18143_s0 + $0x8] sm:$0xff]  ;;  %v49_v11 = vld [vmem:[%s18143_s0 + $0x10] sm:$0xff] }
   0x4   :  { %13025 = vmatprep.subr.bf16.mxu0 %v13024_v3  ;;  %11712 = vmatprep.mubr.msk.f32.mxu0 %vm85_vm0, %v47_v8  ;;  %v50_v12 = vld [vmem:[%s18143_s0 + $0x18] sm:$0xff]  ;;  %v51_v13 = vld [vmem:[%s18143_s0 + $0x20] sm:$0xff]  ;;  %v52_v14 = vld [vmem:[%s18143_s0 + $0x28] sm:$0xff] }
   0x5   :  { %13027 = vmatpush3.bf16.msra.mxu0 %v13024_v3  ;;  %v53_v15 = vld [vmem:[%s18143_s0 + $0x30] sm:$0xff]  ;;  %v54_v16 = vld [vmem:[%s18143_s0 + $0x38] sm:$0xff]  ;;  %v55_v17 = vld [vmem:[%s18143_s0 + $0x40] sm:$0xff] }
   0x6   :  { %13029 = vmatprep.subr.bf16.mxu0 %v13028_v5  ;;  %v56_v18 = vld [vmem:[%s18143_s0 + $0x48] sm:$0xff]  ;;  %v57_v19 = vld [vmem:[%s18143_s0 + $0x50] sm:$0xff]  ;;  %v58_v20 = vld [vmem:[%s18143_s0 + $0x58] sm:$0xff] }
   0x7   :  { %v59_v21 = vld [vmem:[%s18143_s0 + $0x60] sm:$0xff]  ;;  %v60_v22 = vld [vmem:[%s18143_s0 + $0x68] sm:$0xff]  ;;  %v61_v23 = vld [vmem:[%s18143_s0 + $0x70] sm:$0xff] }
   0x8   :  { %v62_v24 = vld [vmem:[%s18143_s0 + $0x78] sm:$0xff]  ;;  %v63_v25 = vld [vmem:[%s18143_s0 + $0x80] sm:$0xff]  ;;  %v64_v26 = vld [vmem:[%s18143_s0 + $0x88] sm:$0xff] }
   0x9   :  { %13031 = vmatpush3.bf16.msra.mxu0 %v13028_v5  ;;  %v65_v27 = vld [vmem:[%s18143_s0 + $0x90] sm:$0xff]  ;;  %v66_v28 = vld [vmem:[%s18143_s0 + $0x98] sm:$0xff]  ;;  %v67_v29 = vld [vmem:[%s18143_s0 + $0xa0] sm:$0xff] }
   0xa   :  { %13033 = vmatprep.subr.bf16.mxu0 %v13032_v9  ;;  %v68_v30 = vld [vmem:[%s18143_s0 + $0xa8] sm:$0xff]  ;;  %v69_v31 = vld [vmem:[%s18143_s0 + $0xb0] sm:$0xff]  ;;  %v70_v32 = vld [vmem:[%s18143_s0 + $0xb8] sm:$0xff] }
   0xb   :  { %v71_v33 = vld [vmem:[%s18143_s0 + $0xc0] sm:$0xff]  ;;  %v72_v34 = vld [vmem:[%s18143_s0 + $0xc8] sm:$0xff]  ;;  %v73_v35 = vld [vmem:[%s18143_s0 + $0xd0] sm:$0xff] }
   0xc   :  { %v74_v36 = vld [vmem:[%s18143_s0 + $0xd8] sm:$0xff]  ;;  %v75_v37 = vld [vmem:[%s18143_s0 + $0xe0] sm:$0xff]  ;;  %v76_v38 = vld [vmem:[%s18143_s0 + $0xe8] sm:$0xff] }
   0xd   :  { %13035 = vmatpush3.bf16.msra.mxu0 %v13032_v9  ;;  %v77_v39 = vld [vmem:[%s18143_s0 + $0xf0] sm:$0xff]  ;;  %v78_v40 = vld [vmem:[%s18143_s0 + $0xf8] sm:$0xff] }
  0x10   :  { %11713 = vmatmul.mubr.msk.f32.vlgmr.msra.gmra.mrb[0].mxu0 %vm85_vm0, %v48_v10 }
  0x11   :  { %11715 = vmatprep.mubr.msk.f32.mxu0 %vm85_vm0, %v49_v11 }
  0x14   :  { %11716 = vmatmul.mubr.msk.f32.gmra.mrb[2].mxu0 %vm85_vm0, %v50_v12 }
  0x15   :  { %11718 = vmatprep.mubr.msk.f32.mxu0 %vm85_vm0, %v51_v13 }
  0x18   :  { %11719 = vmatmul.mubr.msk.f32.gmra.mrb[4].mxu0 %vm85_vm0, %v52_v14 }
  0x19   :  { %11721 = vmatprep.mubr.msk.f32.mxu0 %vm85_vm0, %v53_v15 }
  0x1c   :  { %11722 = vmatmul.mubr.msk.f32.gmra.mrb[6].mxu0 %vm85_vm0, %v54_v16 }
  0x1d   :  { %11724 = vmatprep.mubr.msk.f32.mxu0 %vm85_vm0, %v55_v17 }
  0x20   :  { %11725 = vmatmul.mubr.msk.f32.gmra.mrb[8].mxu0 %vm85_vm0, %v56_v18 }
  0x21   :  { %11727 = vmatprep.mubr.msk.f32.mxu0 %vm85_vm0, %v57_v19 }
  0x24   :  { %11728 = vmatmul.mubr.msk.f32.gmra.mrb[10].mxu0 %vm85_vm0, %v58_v20 }
  0x25   :  { %11730 = vmatprep.mubr.msk.f32.mxu0 %vm85_vm0, %v59_v21 }
  0x28   :  { %11731 = vmatmul.mubr.msk.f32.gmra.mrb[12].mxu0 %vm85_vm0, %v60_v22 }
  0x29   :  { %11733 = vmatprep.mubr.msk.f32.mxu0 %vm85_vm0, %v61_v23 }
  0x2c   :  { %11734 = vmatmul.mubr.msk.f32.gmra.mrb[14].mxu0 %vm85_vm0, %v62_v24 }
  0x2d   :  { %11736 = vmatprep.mubr.msk.f32.mxu0 %vm85_vm0, %v63_v25 }
  0x30   :  { %11737 = vmatmul.mubr.msk.f32.gmra.mrb[16].mxu0 %vm85_vm0, %v64_v26 }
  0x31   :  { %11739 = vmatprep.mubr.msk.f32.mxu0 %vm85_vm0, %v65_v27 }
  0x34   :  { %11740 = vmatmul.mubr.msk.f32.gmra.mrb[18].mxu0 %vm85_vm0, %v66_v28 }
  0x35   :  { %11742 = vmatprep.mubr.msk.f32.mxu0 %vm85_vm0, %v67_v29 }
  0x38   :  { %11743 = vmatmul.mubr.msk.f32.gmra.mrb[20].mxu0 %vm85_vm0, %v68_v30 }
  0x39   :  { %11745 = vmatprep.mubr.msk.f32.mxu0 %vm85_vm0, %v69_v31 }
  0x3c   :  { %11746 = vmatmul.mubr.msk.f32.gmra.mrb[22].mxu0 %vm85_vm0, %v70_v32 }
  0x3d   :  { %11748 = vmatprep.mubr.msk.f32.mxu0 %vm85_vm0, %v71_v33 }
  0x40   :  { %11749 = vmatmul.mubr.msk.f32.gmra.mrb[24].mxu0 %vm85_vm0, %v72_v34 }
  0x41   :  { %11751 = vmatprep.mubr.msk.f32.mxu0 %vm85_vm0, %v73_v35 }
  0x44   :  { %11752 = vmatmul.mubr.msk.f32.gmra.mrb[26].mxu0 %vm85_vm0, %v74_v36 }
  0x45   :  { %11754 = vmatprep.mubr.msk.f32.mxu0 %vm85_vm0, %v75_v37 }
  0x48   :  { %11755 = vmatmul.mubr.msk.f32.gmra.mrb[28].mxu0 %vm85_vm0, %v76_v38 }
  0x49   :  { %11757 = vmatprep.mubr.msk.f32.mxu0 %vm85_vm0, %v77_v39 }
  0x4c   :  { %11758 = vmatmul.mubr.msk.f32.gmra.mrb[30].mxu0 %vm85_vm0, %v78_v40 }
  0xe3   :  { %v14785_v41 = vpop.f32.mrb[0].mxu0 }
  0xe4   :  { %v411_v42 = vsel %vm18157_vm1, %v14785_v41, 0.0  ;;  %v14789_v43 = vpop.f32.mrb[1].mxu0 }
  0xe5   :  { %v410_v44 = vsel %vm18157_vm1, %v14789_v43, 0.0 }
  0xe6   :  { %v412_v45 = vadd.f32 %v411_v42, %v410_v44 }
  0xe7   :  { %v14793_v46 = vpop.f32.mrb[2].mxu0 }
  0xe8   :  { %v14795_v47 = vpop.f32.mrb[3].mxu0  ;;  %v415_v50 = vsel %vm18157_vm1, %v14793_v46, 0.0 }
  0xe9   :  { %v413_v48 = vsel %vm18157_vm1, %v14795_v47, 0.0 }
  0xea   :  { %v414_v49 = vadd.f32 %v413_v48, %v412_v45 }
  0xeb   :  { %v14801_v51 = vpop.f32.mrb[4].mxu0 }
  0xec   :  { %v14803_v52 = vpop.f32.mrb[5].mxu0  ;;  %v416_v53 = vadd.f32 %v415_v50, %v414_v49  ;;  %v419_v56 = vsel %vm18157_vm1, %v14801_v51, 0.0 }
  0xed   :  { %v417_v54 = vsel %vm18157_vm1, %v14803_v52, 0.0 }
  0xee   :  { %v418_v55 = vadd.f32 %v417_v54, %v416_v53 }
  0xef   :  { %v14809_v57 = vpop.f32.mrb[6].mxu0 }
  0xf0   :  { %v14811_v58 = vpop.f32.mrb[7].mxu0  ;;  %v420_v59 = vadd.f32 %v419_v56, %v418_v55  ;;  %v423_v62 = vsel %vm18157_vm1, %v14809_v57, 0.0 }
  0xf1   :  { %v421_v60 = vsel %vm18157_vm1, %v14811_v58, 0.0 }
  0xf2   :  { %v422_v61 = vadd.f32 %v421_v60, %v420_v59 }
  0xf3   :  { %v14817_v63 = vpop.f32.mrb[8].mxu0 }
  0xf4   :  { %v14819_v0 = vpop.f32.mrb[9].mxu0  ;;  %v424_v1 = vadd.f32 %v423_v62, %v422_v61  ;;  %v427_v4 = vsel %vm18157_vm1, %v14817_v63, 0.0 }
  0xf5   :  { %v425_v2 = vsel %vm18157_vm1, %v14819_v0, 0.0 }
  0xf6   :  { %v426_v3 = vadd.f32 %v425_v2, %v424_v1 }
  0xf7   :  { %v14825_v5 = vpop.f32.mrb[10].mxu0 }
  0xf8   :  { %v14827_v6 = vpop.f32.mrb[11].mxu0  ;;  %v428_v7 = vadd.f32 %v427_v4, %v426_v3  ;;  %v431_v10 = vsel %vm18157_vm1, %v14825_v5, 0.0 }
  0xf9   :  { %v429_v8 = vsel %vm18157_vm1, %v14827_v6, 0.0 }
  0xfa   :  { %v430_v9 = vadd.f32 %v429_v8, %v428_v7 }
  0xfb   :  { %v14833_v11 = vpop.f32.mrb[12].mxu0 }
  0xfc   :  { %v14835_v12 = vpop.f32.mrb[13].mxu0  ;;  %v432_v13 = vadd.f32 %v431_v10, %v430_v9  ;;  %v435_v16 = vsel %vm18157_vm1, %v14833_v11, 0.0 }
  0xfd   :  { %v433_v14 = vsel %vm18157_vm1, %v14835_v12, 0.0 }
  0xfe   :  { %v434_v15 = vadd.f32 %v433_v14, %v432_v13 }
  0xff   :  { %v14841_v17 = vpop.f32.mrb[14].mxu0 }
 0x100   :  { %v14843_v18 = vpop.f32.mrb[15].mxu0  ;;  %v436_v19 = vadd.f32 %v435_v16, %v434_v15  ;;  %v439_v22 = vsel %vm18157_vm1, %v14841_v17, 0.0 }
 0x101   :  { %v437_v20 = vsel %vm18157_vm1, %v14843_v18, 0.0 }
 0x102   :  { %v438_v21 = vadd.f32 %v437_v20, %v436_v19 }
 0x103   :  { %v14849_v23 = vpop.f32.mrb[16].mxu0 }
 0x104   :  { %v14851_v24 = vpop.f32.mrb[17].mxu0  ;;  %v440_v25 = vadd.f32 %v439_v22, %v438_v21  ;;  %v443_v28 = vsel %vm18157_vm1, %v14849_v23, 0.0 }
 0x105   :  { %v441_v26 = vsel %vm18157_vm1, %v14851_v24, 0.0 }
 0x106   :  { %v442_v27 = vadd.f32 %v441_v26, %v440_v25 }
 0x107   :  { %v14857_v29 = vpop.f32.mrb[18].mxu0 }
 0x108   :  { %v14859_v30 = vpop.f32.mrb[19].mxu0  ;;  %v444_v31 = vadd.f32 %v443_v28, %v442_v27  ;;  %v447_v34 = vsel %vm18157_vm1, %v14857_v29, 0.0 }
 0x109   :  { %v445_v32 = vsel %vm18157_vm1, %v14859_v30, 0.0 }
 0x10a   :  { %v446_v33 = vadd.f32 %v445_v32, %v444_v31 }
 0x10b   :  { %v14865_v35 = vpop.f32.mrb[20].mxu0 }
 0x10c   :  { %v14867_v36 = vpop.f32.mrb[21].mxu0  ;;  %v448_v37 = vadd.f32 %v447_v34, %v446_v33  ;;  %v451_v40 = vsel %vm18157_vm1, %v14865_v35, 0.0 }
 0x10d   :  { %v449_v38 = vsel %vm18157_vm1, %v14867_v36, 0.0 }
 0x10e   :  { %v450_v39 = vadd.f32 %v449_v38, %v448_v37 }
 0x10f   :  { %v11747_v42 = vpop.f32.mrb[22].mxu0 }
 0x110   :  { %v358_v44 = vpop.f32.mrb[23].mxu0  ;;  %v452_v45 = vadd.f32 %v451_v40, %v450_v39  ;;  %v455_v50 = vsel %vm18157_vm1, %v11747_v42, 0.0 }
 0x111   :  { %v453_v48 = vsel %vm18157_vm1, %v358_v44, 0.0 }
 0x112   :  { %v454_v49 = vadd.f32 %v453_v48, %v452_v45 }
 0x113   :  { %v11750_v53 = vpop.f32.mrb[24].mxu0 }
 0x114   :  { %v368_v54 = vpop.f32.mrb[25].mxu0  ;;  %v456_v55 = vadd.f32 %v455_v50, %v454_v49  ;;  %v459_v60 = vsel %vm18157_vm1, %v11750_v53, 0.0 }
 0x115   :  { %v457_v56 = vsel %vm18157_vm1, %v368_v54, 0.0 }
 0x116   :  { %v458_v59 = vadd.f32 %v457_v56, %v456_v55 }
 0x117   :  { %v11753_v61 = vpop.f32.mrb[26].mxu0 }
 0x118   :  { %v378_v62 = vpop.f32.mrb[27].mxu0  ;;  %v460_v1 = vadd.f32 %v459_v60, %v458_v59  ;;  %v463_v4 = vsel %vm18157_vm1, %v11753_v61, 0.0 }
 0x119   :  { %v461_v2 = vsel %vm18157_vm1, %v378_v62, 0.0 }
 0x11a   :  { %v462_v3 = vadd.f32 %v461_v2, %v460_v1 }
 0x11b   :  { %v11756_v7 = vpop.f32.mrb[28].mxu0 }
 0x11c   :  { %v388_v8 = vpop.f32.mrb[29].mxu0  ;;  %v464_v9 = vadd.f32 %v463_v4, %v462_v3  ;;  %v467_v14 = vsel %vm18157_vm1, %v11756_v7, 0.0 }
 0x11d   :  { %v465_v10 = vsel %vm18157_vm1, %v388_v8, 0.0 }
 0x11e   :  { %v466_v13 = vadd.f32 %v465_v10, %v464_v9 }
 0x11f   :  { %v11759_v15 = vpop.f32.mrb[30].mxu0 }
 0x120   :  { %v398_v16 = vpop.f32.mrb[31].mxu0  ;;  %v468_v19 = vadd.f32 %v467_v14, %v466_v13  ;;  %v471_v22 = vsel %vm18157_vm1, %v11759_v15, 0.0 }
 0x121   :  { %v469_v20 = vsel %vm18157_vm1, %v398_v16, 0.0 }
 0x122   :  { %v470_v21 = vadd.f32 %v469_v20, %v468_v19 }
 0x124   :  { %v472_v25 = vadd.f32 %v471_v22, %v470_v21 }
 0x126   :  { %v473_v26 = vrot.slane %v472_v25, 4 }
 0x128   :  { %v474_v27 = vadd.f32 %v473_v26, %v472_v25 }
 0x12a   :  { %v475_v28 = vrot.slane %v474_v27, 2 }
 0x12c   :  { %v476_v31 = vadd.f32 %v475_v28, %v474_v27 }
 0x12e   :  { %v477_v32 = vrot.slane %v476_v31, 1 }
 0x130   :  { %v478_v33 = vadd.f32 %v477_v32, %v476_v31 }
 0x132   :  { %v480_v34 = vmul.f32 0.00390625, %v478_v33 }
 0x134   :  { %v14884_v37 = vsub.f32 %v14789_v43, %v480_v34  ;;  %v14887_v38 = vsub.f32 %v14785_v41, %v480_v34  ;;  %v14890_v39 = vsub.f32 %v14795_v47, %v480_v34  ;;  %v14893_v40 = vsub.f32 %v14793_v46, %v480_v34 }
 0x135   :  { %v14896_v45 = vsub.f32 %v14803_v52, %v480_v34  ;;  %v14899_v48 = vsub.f32 %v14801_v51, %v480_v34  ;;  %v14902_v49 = vsub.f32 %v14811_v58, %v480_v34  ;;  %v14905_v43 = vsub.f32 %v14809_v57, %v480_v34 }
 0x136   :  { %v14908_v41 = vsub.f32 %v14819_v0, %v480_v34  ;;  %v14911_v47 = vsub.f32 %v14817_v63, %v480_v34  ;;  %v14914_v46 = vsub.f32 %v14827_v6, %v480_v34  ;;  %v14917_v52 = vsub.f32 %v14825_v5, %v480_v34 }
 0x137   :  { %v14920_v51 = vsub.f32 %v14835_v12, %v480_v34  ;;  %v14923_v58 = vsub.f32 %v14833_v11, %v480_v34  ;;  %v14926_v57 = vsub.f32 %v14843_v18, %v480_v34  ;;  %v14929_v0 = vsub.f32 %v14841_v17, %v480_v34 }
 0x138   :  { %v14932_v63 = vsub.f32 %v14851_v24, %v480_v34  ;;  %v14935_v6 = vsub.f32 %v14849_v23, %v480_v34  ;;  %v14938_v5 = vsub.f32 %v14859_v30, %v480_v34  ;;  %v14941_v12 = vsub.f32 %v14857_v29, %v480_v34 }
 0x139   :  { %v14944_v11 = vsub.f32 %v14867_v36, %v480_v34  ;;  %v14947_v18 = vsub.f32 %v14865_v35, %v480_v34  ;;  %v14949_v17 = vsub.f32 %v358_v44, %v480_v34  ;;  %v14951_v50 = vsub.f32 %v11747_v42, %v480_v34 }
 0x13a   :  { %v14953_v24 = vsub.f32 %v368_v54, %v480_v34  ;;  %v14955_v23 = vsub.f32 %v11750_v53, %v480_v34  ;;  %v14957_v55 = vsub.f32 %v378_v62, %v480_v34  ;;  %v14959_v30 = vsub.f32 %v11753_v61, %v480_v34 }
 0x13b   :  { %v14961_v29 = vsub.f32 %v388_v8, %v480_v34  ;;  %v14963_v56 = vsub.f32 %v11756_v7, %v480_v34  ;;  %v14965_v36 = vsub.f32 %v398_v16, %v480_v34  ;;  %v14967_v35 = vsub.f32 %v11759_v15, %v480_v34 }
 0x13c   :  { %v513_v42 = vmul.f32 %v14884_v37, %v14884_v37  ;;  %v514_v44 = vmul.f32 %v14887_v38, %v14887_v38  ;;  %v515_v53 = vmul.f32 %v14890_v39, %v14890_v39  ;;  %v516_v54 = vmul.f32 %v14893_v40, %v14893_v40 }
 0x13d   :  { %v517_v62 = vmul.f32 %v14896_v45, %v14896_v45  ;;  %v518_v3 = vmul.f32 %v14899_v48, %v14899_v48  ;;  %v519_v8 = vmul.f32 %v14902_v49, %v14902_v49  ;;  %v520_v13 = vmul.f32 %v14905_v43, %v14905_v43 }
 0x13e   :  { %v545_v59 = vsel %vm18157_vm1, %v513_v42, 0.0  ;;  %v546_v60 = vsel %vm18157_vm1, %v514_v44, 0.0  ;;  %v548_v1 = vsel %vm18157_vm1, %v515_v53, 0.0  ;;  %v550_v4 = vsel %vm18157_vm1, %v516_v54, 0.0 }
 0x13f   :  { %v547_v61 = vadd.f32 %v546_v60, %v545_v59  ;;  %v552_v9 = vsel %vm18157_vm1, %v517_v62, 0.0  ;;  %v554_v14 = vsel %vm18157_vm1, %v518_v3, 0.0  ;;  %v521_v16 = vmul.f32 %v14908_v41, %v14908_v41 }
 0x140   :  { %v556_v19 = vsel %vm18157_vm1, %v519_v8, 0.0  ;;  %v522_v21 = vmul.f32 %v14911_v47, %v14911_v47  ;;  %v558_v22 = vsel %vm18157_vm1, %v520_v13, 0.0  ;;  %v523_v26 = vmul.f32 %v14914_v46, %v14914_v46 }
 0x141   :  { %v549_v2 = vadd.f32 %v548_v1, %v547_v61  ;;  %v560_v27 = vsel %vm18157_vm1, %v521_v16, 0.0  ;;  %v524_v31 = vmul.f32 %v14917_v52, %v14917_v52  ;;  %v525_v34 = vmul.f32 %v14920_v51, %v14920_v51 }
 0x142   :  { %v562_v32 = vsel %vm18157_vm1, %v522_v21, 0.0  ;;  %v564_v42 = vsel %vm18157_vm1, %v523_v26, 0.0  ;;  %v526_v53 = vmul.f32 %v14923_v58, %v14923_v58  ;;  %v527_v60 = vmul.f32 %v14926_v57, %v14926_v57 }
 0x143   :  { %v551_v7 = vadd.f32 %v550_v4, %v549_v2  ;;  %v566_v54 = vsel %vm18157_vm1, %v524_v31, 0.0  ;;  %v568_v61 = vsel %vm18157_vm1, %v525_v34, 0.0  ;;  %v528_v1 = vmul.f32 %v14929_v0, %v14929_v0 }
 0x144   :  { %v570_v2 = vsel %vm18157_vm1, %v526_v53, 0.0  ;;  %v529_v4 = vmul.f32 %v14932_v63, %v14932_v63 }
 0x145   :  { %v553_v10 = vadd.f32 %v552_v9, %v551_v7  ;;  %v572_v7 = vsel %vm18157_vm1, %v527_v60, 0.0  ;;  %v530_v9 = vmul.f32 %v14935_v6, %v14935_v6 }
 0x147   :  { %v555_v15 = vadd.f32 %v554_v14, %v553_v10  ;;  %v574_v10 = vsel %vm18157_vm1, %v528_v1, 0.0  ;;  %v531_v14 = vmul.f32 %v14938_v5, %v14938_v5 }
 0x149   :  { %v557_v20 = vadd.f32 %v556_v19, %v555_v15  ;;  %v576_v15 = vsel %vm18157_vm1, %v529_v4, 0.0  ;;  %v532_v19 = vmul.f32 %v14941_v12, %v14941_v12 }
 0x14b   :  { %v559_v25 = vadd.f32 %v558_v22, %v557_v20  ;;  %v578_v20 = vsel %vm18157_vm1, %v530_v9, 0.0  ;;  %v533_v22 = vmul.f32 %v14944_v11, %v14944_v11 }
 0x14d   :  { %v561_v28 = vadd.f32 %v560_v27, %v559_v25  ;;  %v580_v25 = vsel %vm18157_vm1, %v531_v14, 0.0  ;;  %v534_v27 = vmul.f32 %v14947_v18, %v14947_v18 }
 0x14f   :  { %v563_v33 = vadd.f32 %v562_v32, %v561_v28  ;;  %v582_v28 = vsel %vm18157_vm1, %v532_v19, 0.0  ;;  %v535_v32 = vmul.f32 %v14949_v17, %v14949_v17 }
 0x151   :  { %v565_v44 = vadd.f32 %v564_v42, %v563_v33  ;;  %v584_v33 = vsel %vm18157_vm1, %v533_v22, 0.0  ;;  %v536_v42 = vmul.f32 %v14951_v50, %v14951_v50 }
 0x153   :  { %v567_v59 = vadd.f32 %v566_v54, %v565_v44  ;;  %v586_v44 = vsel %vm18157_vm1, %v534_v27, 0.0  ;;  %v537_v54 = vmul.f32 %v14953_v24, %v14953_v24  ;;  %v590_v1 = vsel %vm18157_vm1, %v536_v42, 0.0 }
 0x155   :  { %v569_v62 = vadd.f32 %v568_v61, %v567_v59  ;;  %v588_v59 = vsel %vm18157_vm1, %v535_v32, 0.0  ;;  %v822_v61 = vld [vmem:[%s18144_s4 + $0x8] sm:$0xff]  ;;  %v592_v4 = vsel %vm18157_vm1, %v537_v54, 0.0 }
 0x156   :  { %901 = vmatprep.mubr.f32.mxu1 %v822_v61 }
 0x157   :  { %v571_v3 = vadd.f32 %v570_v2, %v569_v62  ;;  %v538_v62 = vmul.f32 %v14955_v23, %v14955_v23 }
 0x159   :  { %v573_v8 = vadd.f32 %v572_v7, %v571_v3  ;;  %v539_v3 = vmul.f32 %v14957_v55, %v14957_v55  ;;  %v594_v9 = vsel %vm18157_vm1, %v538_v62, 0.0 }
 0x15b   :  { %v575_v13 = vadd.f32 %v574_v10, %v573_v8  ;;  %v540_v8 = vmul.f32 %v14959_v30, %v14959_v30  ;;  %v596_v14 = vsel %vm18157_vm1, %v539_v3, 0.0 }
 0x15d   :  { %v577_v16 = vadd.f32 %v576_v15, %v575_v13  ;;  %v541_v13 = vmul.f32 %v14961_v29, %v14961_v29  ;;  %v598_v19 = vsel %vm18157_vm1, %v540_v8, 0.0 }
 0x15f   :  { %v579_v21 = vadd.f32 %v578_v20, %v577_v16  ;;  %v542_v16 = vmul.f32 %v14963_v56, %v14963_v56  ;;  %v600_v22 = vsel %vm18157_vm1, %v541_v13, 0.0 }
 0x161   :  { %v581_v26 = vadd.f32 %v580_v25, %v579_v21  ;;  %v543_v21 = vmul.f32 %v14965_v36, %v14965_v36  ;;  %v602_v27 = vsel %vm18157_vm1, %v542_v16, 0.0 }
 0x163   :  { %v583_v31 = vadd.f32 %v582_v28, %v581_v26  ;;  %v544_v26 = vmul.f32 %v14967_v35, %v14967_v35 }
 0x165   :  { %v585_v34 = vadd.f32 %v584_v33, %v583_v31  ;;  %v604_v31 = vsel %vm18157_vm1, %v543_v21, 0.0  ;;  %v606_v33 = vsel %vm18157_vm1, %v544_v26, 0.0 }
 0x167   :  { %v587_v53 = vadd.f32 %v586_v44, %v585_v34 }
 0x169   :  { %v589_v60 = vadd.f32 %v588_v59, %v587_v53 }
 0x16b   :  { %v591_v2 = vadd.f32 %v590_v1, %v589_v60 }
 0x16d   :  { %v593_v7 = vadd.f32 %v592_v4, %v591_v2  ;;  %v15073_v2 = vld [vmem:[%s18145_s2] ss:$0 sm:$0xff] }
 0x16f   :  { %v595_v10 = vadd.f32 %v594_v9, %v593_v7  ;;  %v15082_v7 = vld [vmem:[%s18146_s3] ss:$0 sm:$0xff] }
 0x171   :  { %v597_v15 = vadd.f32 %v596_v14, %v595_v10 }
 0x173   :  { %v599_v20 = vadd.f32 %v598_v19, %v597_v15 }
 0x175   :  { %v601_v25 = vadd.f32 %v600_v22, %v599_v20 }
 0x177   :  { %v603_v28 = vadd.f32 %v602_v27, %v601_v25 }
 0x179   :  { %v605_v32 = vadd.f32 %v604_v31, %v603_v28 }
 0x17b   :  { %v607_v34 = vadd.f32 %v606_v33, %v605_v32 }
 0x17d   :  { %v608_v42 = vrot.slane %v607_v34, 4 }
 0x17f   :  { %v609_v44 = vadd.f32 %v608_v42, %v607_v34 }
 0x181   :  { %v610_v53 = vrot.slane %v609_v44, 2 }
 0x183   :  { %v611_v54 = vadd.f32 %v610_v53, %v609_v44 }
 0x185   :  { %v612_v59 = vrot.slane %v611_v54, 1 }
 0x187   :  { %v613_v60 = vadd.f32 %v612_v59, %v611_v54 }
 0x189   :  { %v614_v61 = vmul.f32 0.00390625, %v613_v60 }
 0x18b   :  { %v615_v62 = vadd.f32 1e-05, %v614_v61 }
 0x18d   :  { %14557 = vrsqrt.f32 %v615_v62 }
 0x197   :  { %v15068_v1 = vpop.eup %14557 }
 0x198   :  { %v647_v3 = vmul.f32 %v15068_v1, %v14965_v36  ;;  %v648_v4 = vmul.f32 %v15068_v1, %v14967_v35  ;;  %v633_v14 = vmul.f32 %v15068_v1, %v14932_v63  ;;  %v634_v36 = vmul.f32 %v15068_v1, %v14935_v6 }
 0x199   :  { %v635_v16 = vmul.f32 %v15068_v1, %v14938_v5  ;;  %v636_v19 = vmul.f32 %v15068_v1, %v14941_v12  ;;  %v637_v20 = vmul.f32 %v15068_v1, %v14944_v11  ;;  %v638_v21 = vmul.f32 %v15068_v1, %v14947_v18 }
 0x19a   :  { %v685_v8 = vmul.f32 %v15073_v2, %v647_v3  ;;  %v686_v9 = vmul.f32 %v15073_v2, %v648_v4  ;;  %v639_v6 = vmul.f32 %v15068_v1, %v14949_v17  ;;  %v640_v25 = vmul.f32 %v15068_v1, %v14951_v50 }
 0x19b   :  { %v641_v5 = vmul.f32 %v15068_v1, %v14953_v24  ;;  %v642_v12 = vmul.f32 %v15068_v1, %v14955_v23  ;;  %v643_v11 = vmul.f32 %v15068_v1, %v14957_v55  ;;  %v644_v18 = vmul.f32 %v15068_v1, %v14959_v30 }
 0x19c   :  { %v723_v10 = vadd.f32 %v15082_v7, %v685_v8  ;;  %v724_v13 = vadd.f32 %v15082_v7, %v686_v9  ;;  %v645_v17 = vmul.f32 %v15068_v1, %v14961_v29  ;;  %v646_v50 = vmul.f32 %v15068_v1, %v14963_v56 }
 0x19d   :  { %v617_v27 = vmul.f32 %v15068_v1, %v14884_v37  ;;  %v618_v24 = vmul.f32 %v15068_v1, %v14887_v38  ;;  %v619_v23 = vmul.f32 %v15068_v1, %v14890_v39  ;;  %v620_v55 = vmul.f32 %v15068_v1, %v14893_v40 }
 0x19e   :  { %vm755_vm2 = vcmp.ge.f32.partialorder %v723_v10, 0.0  ;;  %vm756_vm3 = vcmp.ge.f32.partialorder %v724_v13, 0.0  ;;  %v787_v35 = vmul.f32 0.2, %v723_v10  ;;  %v788_v15 = vmul.f32 0.2, %v724_v13 }
 0x19f   :  { %v621_v30 = vmul.f32 %v15068_v1, %v14896_v45  ;;  %v622_v29 = vmul.f32 %v15068_v1, %v14899_v48  ;;  %v623_v56 = vmul.f32 %v15068_v1, %v14902_v49  ;;  %v624_v37 = vmul.f32 %v15068_v1, %v14905_v43 }
 0x1a0   :  { %v819_v63 = vsel %vm755_vm2, %v723_v10, %v787_v35  ;;  %v820_v22 = vsel %vm756_vm3, %v724_v13, %v788_v15  ;;  %v625_v38 = vmul.f32 %v15068_v1, %v14908_v41  ;;  %v15138_v39 = vmul.f32 %v15068_v1, %v14911_v47 }
 0x1a1   :  { %v15104_v26 = vpack.c.bf16 %v820_v22, %v819_v63  ;;  %v15142_v40 = vmul.f32 %v15068_v1, %v14914_v46  ;;  %v15146_v45 = vmul.f32 %v15068_v1, %v14917_v52  ;;  %v655_v48 = vmul.f32 %v15073_v2, %v617_v27 }
 0x1a2   :  { %v656_v49 = vmul.f32 %v15073_v2, %v618_v24  ;;  %v657_v43 = vmul.f32 %v15073_v2, %v619_v23  ;;  %v658_v41 = vmul.f32 %v15073_v2, %v620_v55  ;;  %v659_v28 = vmul.f32 %v15073_v2, %v621_v30 }
 0x1a3   :  { %v15154_v47 = vmul.f32 %v15073_v2, %v622_v29  ;;  %v15157_v46 = vmul.f32 %v15073_v2, %v623_v56  ;;  %v15160_v31 = vmul.f32 %v15073_v2, %v624_v37  ;;  %v671_v52 = vmul.f32 %v15073_v2, %v633_v14 }
 0x1a4   :  { %v672_v32 = vmul.f32 %v15073_v2, %v634_v36  ;;  %v673_v33 = vmul.f32 %v15073_v2, %v635_v16  ;;  %v674_v34 = vmul.f32 %v15073_v2, %v636_v19  ;;  %v675_v42 = vmul.f32 %v15073_v2, %v637_v20 }
 0x1a5   :  { %v676_v44 = vmul.f32 %v15073_v2, %v638_v21  ;;  %v677_v53 = vmul.f32 %v15073_v2, %v639_v6  ;;  %v678_v54 = vmul.f32 %v15073_v2, %v640_v25  ;;  %v679_v59 = vmul.f32 %v15073_v2, %v641_v5 }
 0x1a6   :  { %v680_v60 = vmul.f32 %v15073_v2, %v642_v12  ;;  %v681_v61 = vmul.f32 %v15073_v2, %v643_v11  ;;  %v682_v62 = vmul.f32 %v15073_v2, %v644_v18  ;;  %v683_v3 = vmul.f32 %v15073_v2, %v645_v17 }
 0x1a7   :  { %v684_v4 = vmul.f32 %v15073_v2, %v646_v50  ;;  %v693_v8 = vadd.f32 %v15082_v7, %v655_v48  ;;  %v694_v9 = vadd.f32 %v15082_v7, %v656_v49  ;;  %v15179_v10 = vadd.f32 %v15082_v7, %v657_v43 }
 0x1a8   :  { %v15182_v13 = vadd.f32 %v15082_v7, %v658_v41  ;;  %v15185_v14 = vadd.f32 %v15082_v7, %v659_v28  ;;  %v709_v36 = vadd.f32 %v15082_v7, %v671_v52  ;;  %v710_v35 = vadd.f32 %v15082_v7, %v672_v32 }
 0x1a9   :  { %v711_v15 = vadd.f32 %v15082_v7, %v673_v33  ;;  %v712_v16 = vadd.f32 %v15082_v7, %v674_v34  ;;  %v713_v19 = vadd.f32 %v15082_v7, %v675_v42  ;;  %v714_v20 = vadd.f32 %v15082_v7, %v676_v44 }
 0x1aa   :  { %v715_v21 = vadd.f32 %v15082_v7, %v677_v53  ;;  %v716_v63 = vadd.f32 %v15082_v7, %v678_v54  ;;  %v717_v22 = vadd.f32 %v15082_v7, %v679_v59  ;;  %v718_v6 = vadd.f32 %v15082_v7, %v680_v60 }
 0x1ab   :  { %v719_v25 = vadd.f32 %v15082_v7, %v681_v61  ;;  %v720_v5 = vadd.f32 %v15082_v7, %v682_v62  ;;  %v721_v12 = vadd.f32 %v15082_v7, %v683_v3  ;;  %v722_v11 = vadd.f32 %v15082_v7, %v684_v4 }
 0x1ac   :  { %vm726_vm5 = vcmp.ge.f32.partialorder %v694_v9, 0.0  ;;  %vm742_vm7 = vcmp.ge.f32.partialorder %v710_v35, 0.0  ;;  %vm743_vm8 = vcmp.ge.f32.partialorder %v711_v15, 0.0  ;;  %vm744_vm9 = vcmp.ge.f32.partialorder %v712_v16, 0.0 }
 0x1ad   :  { %vm745_vm10 = vcmp.ge.f32.partialorder %v713_v19, 0.0  ;;  %vm746_vm11 = vcmp.ge.f32.partialorder %v714_v20, 0.0  ;;  %vm747_vm12 = vcmp.ge.f32.partialorder %v715_v21, 0.0  ;;  %vm748_vm13 = vcmp.ge.f32.partialorder %v716_v63, 0.0 }
 0x1ae   :  { %vm749_vm14 = vcmp.ge.f32.partialorder %v717_v22, 0.0  ;;  %vm750_vm15 = vcmp.ge.f32.partialorder %v718_v6, 0.0  ;;  %vm751_vm0 = vcmp.ge.f32.partialorder %v719_v25, 0.0  ;;  %vm752_vm2 = vcmp.ge.f32.partialorder %v720_v5, 0.0 }
 0x1af   :  { %vm753_vm3 = vcmp.ge.f32.partialorder %v721_v12, 0.0  ;;  %vm754_vm1 = vcmp.ge.f32.partialorder %v722_v11, 0.0  ;;  %v757_v18 = vmul.f32 0.2, %v693_v8  ;;  %v663_v17 = vmul.f32 %v15073_v2, %v625_v38 }
 0x1b0   :  { %v758_v50 = vmul.f32 0.2, %v694_v9  ;;  %v759_v27 = vmul.f32 0.2, %v15179_v10  ;;  %v760_v24 = vmul.f32 0.2, %v15182_v13  ;;  %v664_v23 = vmul.f32 %v15073_v2, %v15138_v39 }
 0x1b1   :  { %v761_v55 = vmul.f32 0.2, %v15185_v14  ;;  %v773_v30 = vmul.f32 0.2, %v709_v36  ;;  %v774_v29 = vmul.f32 0.2, %v710_v35  ;;  %v698_v56 = vadd.f32 %v15082_v7, %v15154_v47 }
 0x1b2   :  { %v775_v37 = vmul.f32 0.2, %v711_v15  ;;  %v776_v38 = vmul.f32 0.2, %v712_v16  ;;  %v777_v48 = vmul.f32 0.2, %v713_v19  ;;  %v15213_v49 = vadd.f32 %v15082_v7, %v15157_v46 }
 0x1b3   :  { %v778_v43 = vmul.f32 0.2, %v714_v20  ;;  %v779_v41 = vmul.f32 0.2, %v715_v21  ;;  %v780_v28 = vmul.f32 0.2, %v716_v63  ;;  %v15217_v39 = vadd.f32 %v15082_v7, %v15160_v31 }
 0x1b4   :  { %v781_v52 = vmul.f32 0.2, %v717_v22  ;;  %v782_v32 = vmul.f32 0.2, %v718_v6  ;;  %v783_v33 = vmul.f32 0.2, %v719_v25  ;;  %v790_v53 = vsel %vm726_vm5, %v694_v9, %v758_v50 }
 0x1b5   :  { %v784_v34 = vmul.f32 0.2, %v720_v5  ;;  %v785_v42 = vmul.f32 0.2, %v721_v12  ;;  %v786_v47 = vmul.f32 0.2, %v722_v11  ;;  %v806_v54 = vsel %vm742_vm7, %v710_v35, %v774_v29 }
 0x1b6   :  { %vm18158_vm6 = vcmp.ge.f32.partialorder %v693_v8, 0.0  ;;  %vm18159_vm4 = vcmp.ge.f32.partialorder %v709_v36, 0.0  ;;  %v807_v59 = vsel %vm743_vm8, %v711_v15, %v775_v37  ;;  %v808_v60 = vsel %vm744_vm9, %v712_v16, %v776_v38 }
 0x1b7   :  { %v789_v44 = vsel %vm18158_vm6, %v693_v8, %v757_v18  ;;  %v805_v46 = vsel %vm18159_vm4, %v709_v36, %v773_v30  ;;  %v809_v31 = vsel %vm745_vm10, %v713_v19, %v777_v48  ;;  %v810_v61 = vsel %vm746_vm11, %v714_v20, %v778_v43 }
 0x1b8   :  { %v811_v62 = vsel %vm747_vm12, %v715_v21, %v779_v41  ;;  %v812_v3 = vsel %vm748_vm13, %v716_v63, %v780_v28  ;;  %v813_v4 = vsel %vm749_vm14, %v717_v22, %v781_v52  ;;  %v814_v8 = vsel %vm750_vm15, %v718_v6, %v782_v32 }
 0x1b9   :  { %v815_v9 = vsel %vm751_vm0, %v719_v25, %v783_v33  ;;  %v816_v36 = vsel %vm752_vm2, %v720_v5, %v784_v34  ;;  %v817_v35 = vsel %vm753_vm3, %v721_v12, %v785_v42  ;;  %v818_v15 = vsel %vm754_vm1, %v722_v11, %v786_v47 }
 0x1ba   :  { %v15235_v16 = vpack.c.bf16 %v806_v54, %v805_v46  ;;  %v762_v19 = vmul.f32 0.2, %v698_v56  ;;  %v15237_v20 = vpack.c.bf16 %v790_v53, %v789_v44  ;;  %v15239_v21 = vpack.c.bf16 %v808_v60, %v807_v59 }
 0x1bb   :  { %v15241_v63 = vpack.c.bf16 %v810_v61, %v809_v31  ;;  %vm18160_vm4 = vcmp.ge.f32.partialorder %v15179_v10, 0.0  ;;  %vm18161_vm5 = vcmp.ge.f32.partialorder %v15182_v13, 0.0  ;;  %v15250_v25 = vpack.c.bf16 %v812_v3, %v811_v62 }
 0x1bc   :  { %v791_v22 = vsel %vm18160_vm4, %v15179_v10, %v759_v27  ;;  %v792_v6 = vsel %vm18161_vm5, %v15182_v13, %v760_v24  ;;  %13037 = vmatprep.subr.bf16.mxu1 %v15235_v16  ;;  %v15252_v5 = vpack.c.bf16 %v814_v8, %v813_v4  ;;  %vm729_vm1 = vcmp.ge.f32.partialorder %v15185_v14, 0.0  ;;  %v821_v8 = vld [vmem:[%s18144_s4] sm:$0xff] }
 0x1bd   :  { %vm730_vm6 = vcmp.ge.f32.partialorder %v698_v56, 0.0  ;;  %v15255_v12 = vpack.c.bf16 %v816_v36, %v815_v9  ;;  %v15257_v11 = vpack.c.bf16 %v818_v15, %v817_v35  ;;  %13039 = vmatpush3.bf16.msra.mxu1 %v15237_v20  ;;  %v629_v10 = vmul.f32 %v15068_v1, %v14920_v51  ;;  %v824_v9 = vld [vmem:[%s18144_s4 + $0x18] sm:$0xff]  ;;  %v823_v36 = vld [vmem:[%s18144_s4 + $0x10] sm:$0xff]  ;;  %v826_v35 = vld [vmem:[%s18144_s4 + $0x28] sm:$0xff] }
 0x1be   :  { %v630_v13 = vmul.f32 %v15068_v1, %v14923_v58  ;;  %v665_v18 = vmul.f32 %v15073_v2, %v15142_v40  ;;  %13041 = vmatprep.subr.bf16.mxu1 %v15239_v21  ;;  %v666_v50 = vmul.f32 %v15073_v2, %v15146_v45  ;;  %v701_v27 = vadd.f32 %v15082_v7, %v663_v17  ;;  %v825_v15 = vld [vmem:[%s18144_s4 + $0x20] sm:$0xff] }
 0x1bf   :  { %v702_v24 = vadd.f32 %v15082_v7, %v664_v23  ;;  %v15271_v30 = vpack.c.bf16 %v792_v6, %v791_v22  ;;  %v763_v29 = vmul.f32 0.2, %v15213_v49  ;;  %v764_v51 = vmul.f32 0.2, %v15217_v39  ;;  %v827_v22 = vld [vmem:[%s18144_s4 + $0x30] sm:$0xff]  ;;  %v830_v6 = vld [vmem:[%s18144_s4 + $0x48] sm:$0xff] }
 0x1c0   :  { %v793_v58 = vsel %vm729_vm1, %v15185_v14, %v761_v55  ;;  %v794_v37 = vsel %vm730_vm6, %v698_v56, %v762_v19  ;;  %vm731_vm7 = vcmp.ge.f32.partialorder %v15213_v49, 0.0  ;;  %vm732_vm8 = vcmp.ge.f32.partialorder %v15217_v39, 0.0  ;;  %v828_v19 = vld [vmem:[%s18144_s4 + $0x38] sm:$0xff] }
 0x1c1   :  { %13043 = vmatpush3.bf16.msra.mxu1 %v15271_v30  ;;  %v631_v40 = vmul.f32 %v15068_v1, %v14926_v57  ;;  %v632_v45 = vmul.f32 %v15068_v1, %v14929_v0  ;;  %v667_v17 = vmul.f32 %v15073_v2, %v629_v10  ;;  %v668_v23 = vmul.f32 %v15073_v2, %v630_v13  ;;  %v829_v10 = vld [vmem:[%s18144_s4 + $0x40] sm:$0xff]  ;;  %v832_v13 = vld [vmem:[%s18144_s4 + $0x58] sm:$0xff] }
 0x1c2   :  { %13045 = vmatprep.subr.bf16.mxu1 %v15241_v63  ;;  %v703_v14 = vadd.f32 %v15082_v7, %v665_v18  ;;  %v704_v55 = vadd.f32 %v15082_v7, %v666_v50  ;;  %v15288_v56 = vpack.c.bf16 %v794_v37, %v793_v58  ;;  %v765_v38 = vmul.f32 0.2, %v701_v27  ;;  %v831_v18 = vld [vmem:[%s18144_s4 + $0x50] sm:$0xff]  ;;  %v834_v50 = vld [vmem:[%s18144_s4 + $0x68] sm:$0xff]  ;;  %v9321_v58 = vld [vmem:[%s18144_s4 + $0x80] sm:$0xff] }
 0x1c3   :  { %v766_v48 = vmul.f32 0.2, %v702_v24  ;;  %v795_v43 = vsel %vm731_vm7, %v15213_v49, %v763_v29  ;;  %v796_v57 = vsel %vm732_vm8, %v15217_v39, %v764_v51  ;;  %vm733_vm9 = vcmp.ge.f32.partialorder %v701_v27, 0.0  ;;  %v835_v29 = vld [vmem:[%s18144_s4 + $0x70] sm:$0xff]  ;;  %v9322_v51 = vld [vmem:[%s18144_s4 + $0x88] sm:$0xff]  ;;  %v9324_v37 = vld [vmem:[%s18144_s4 + $0x98] sm:$0xff] }
 0x1c4   :  { %vm734_vm10 = vcmp.ge.f32.partialorder %v702_v24, 0.0  ;;  %v669_v0 = vmul.f32 %v15073_v2, %v631_v40  ;;  %v670_v1 = vmul.f32 %v15073_v2, %v632_v45  ;;  %v705_v41 = vadd.f32 %v15082_v7, %v667_v17  ;;  %v9323_v40 = vld [vmem:[%s18144_s4 + $0x90] sm:$0xff]  ;;  %v9326_v45 = vld [vmem:[%s18144_s4 + $0xa8] sm:$0xff]  ;;  %v9325_v17 = vld [vmem:[%s18144_s4 + $0xa0] sm:$0xff] }
 0x1c5   :  { %13047 = vmatpush3.bf16.msra.mxu1 %v15288_v56  ;;  %v706_v28 = vadd.f32 %v15082_v7, %v668_v23  ;;  %v15298_v52 = vpack.c.bf16 %v796_v57, %v795_v43  ;;  %v767_v32 = vmul.f32 0.2, %v703_v14  ;;  %v768_v49 = vmul.f32 0.2, %v704_v55  ;;  %v9328_v23 = vld [vmem:[%s18144_s4 + $0xb8] sm:$0xff]  ;;  %v9331_v43 = vld [vmem:[%s18144_s4 + $0xd0] sm:$0xff] }
 0x1c6   :  { %13049 = vmatprep.subr.bf16.mxu1 %v15250_v25  ;;  %v797_v33 = vsel %vm733_vm9, %v701_v27, %v765_v38  ;;  %v798_v39 = vsel %vm734_vm10, %v702_v24, %v766_v48  ;;  %vm735_vm11 = vcmp.ge.f32.partialorder %v703_v14, 0.0  ;;  %vm736_vm12 = vcmp.ge.f32.partialorder %v704_v55, 0.0  ;;  %v833_v27 = vld [vmem:[%s18144_s4 + $0x60] sm:$0xff]  ;;  %v836_v24 = vld [vmem:[%s18144_s4 + $0x78] sm:$0xff]  ;;  %v9334_v57 = vld [vmem:[%s18144_s4 + $0xe8] sm:$0xff] }
 0x1c7   :  { %v707_v34 = vadd.f32 %v15082_v7, %v669_v0  ;;  %v708_v2 = vadd.f32 %v15082_v7, %v670_v1  ;;  %v15304_v42 = vpack.c.bf16 %v798_v39, %v797_v33  ;;  %v769_v47 = vmul.f32 0.2, %v705_v41  ;;  %v9329_v38 = vld [vmem:[%s18144_s4 + $0xc0] sm:$0xff]  ;;  %v9332_v48 = vld [vmem:[%s18144_s4 + $0xd8] sm:$0xff]  ;;  %v9359_v33 = vld [vmem:[%s18144_s4 + $0x110] sm:$0xff] }
 0x1c8   :  { %v770_v44 = vmul.f32 0.2, %v706_v28  ;;  %v799_v53 = vsel %vm735_vm11, %v703_v14, %v767_v32  ;;  %v800_v46 = vsel %vm736_vm12, %v704_v55, %v768_v49  ;;  %vm737_vm13 = vcmp.ge.f32.partialorder %v705_v41, 0.0  ;;  %v9327_v14 = vld [vmem:[%s18144_s4 + $0xb0] sm:$0xff]  ;;  %v9330_v55 = vld [vmem:[%s18144_s4 + $0xc8] sm:$0xff]  ;;  %v9333_v0 = vld [vmem:[%s18144_s4 + $0xe0] sm:$0xff] }
 0x1c9   :  { %13051 = vmatpush3.bf16.msra.mxu1 %v15298_v52  ;;  %vm738_vm14 = vcmp.ge.f32.partialorder %v706_v28, 0.0  ;;  %v15308_v54 = vpack.c.bf16 %v800_v46, %v799_v53  ;;  %v771_v59 = vmul.f32 0.2, %v707_v34  ;;  %v772_v60 = vmul.f32 0.2, %v708_v2  ;;  %v9336_v1 = vld [vmem:[%s18144_s4 + $0xf8] sm:$0xff] }
 0x1ca   :  { %13053 = vmatprep.subr.bf16.mxu1 %v15252_v5  ;;  %v801_v31 = vsel %vm737_vm13, %v705_v41, %v769_v47  ;;  %v802_v61 = vsel %vm738_vm14, %v706_v28, %v770_v44  ;;  %vm739_vm15 = vcmp.ge.f32.partialorder %v707_v34, 0.0  ;;  %vm740_vm0 = vcmp.ge.f32.partialorder %v708_v2, 0.0  ;;  %v9335_v41 = vld [vmem:[%s18144_s4 + $0xf0] sm:$0xff]  ;;  %v9358_v28 = vld [vmem:[%s18144_s4 + $0x108] sm:$0xff]  ;;  %v9357_v32 = vld [vmem:[%s18144_s4 + $0x100] sm:$0xff] }
 0x1cb   :  { %v15312_v7 = vpack.c.bf16 %v802_v61, %v801_v31  ;;  %v803_v62 = vsel %vm739_vm15, %v707_v34, %v771_v59  ;;  %v804_v3 = vsel %vm740_vm0, %v708_v2, %v772_v60  ;;  %v9360_v49 = vld [vmem:[%s18144_s4 + $0x118] sm:$0xff]  ;;  %v9362_v39 = vld [vmem:[%s18144_s4 + $0x128] sm:$0xff]  ;;  %v9361_v34 = vld [vmem:[%s18144_s4 + $0x120] sm:$0xff]  ;;  %vm18162_vm2 = vcmask 261120  }
 0x1cc   :  { %v15316_v4 = vpack.c.bf16 %v804_v3, %v803_v62  ;;  %v9364_v2 = vld [vmem:[%s18144_s4 + $0x138] sm:$0xff]  ;;  %v9363_v47 = vld [vmem:[%s18144_s4 + $0x130] sm:$0xff]  ;;  %v9366_v44 = vld [vmem:[%s18144_s4 + $0x148] sm:$0xff] }
 0x1cd   :  { %13055 = vmatpush3.bf16.msra.mxu1 %v15304_v42  ;;  %v9337_v53 = vld [vmem:[%s18147_s5 + $0x20] sm:$0xff]  ;;  %v9338_v46 = vld [vmem:[%s18147_s5 + $0x28] sm:$0xff]  ;;  %v9368_v31 = vld [vmem:[%s18144_s4 + $0x158] sm:$0xff] }
 0x1ce   :  { %13057 = vmatprep.subr.bf16.mxu1 %v15255_v12  ;;  %v13100_v59 = vpack.c.bf16 %v9338_v46, %v9337_v53  ;;  %v9365_v60 = vld [vmem:[%s18144_s4 + $0x140] sm:$0xff]  ;;  %v9367_v61 = vld [vmem:[%s18144_s4 + $0x150] sm:$0xff]  ;;  %v9370_v62 = vld [vmem:[%s18144_s4 + $0x168] sm:$0xff] }
 0x1cf   :  { %v9369_v3 = vld [vmem:[%s18144_s4 + $0x160] sm:$0xff]  ;;  %v9470_v53 = vld [vmem:[%s18144_s4 + $0x308] sm:$0xff]  ;;  %vm18163_vm3 = vmmov %vm18162_vm2 }
 0x1d0   :  { %13101 = vmatprep.subr.bf16.mxu0 %v13100_v59  ;;  %v9469_v46 = vld [vmem:[%s18144_s4 + $0x300] sm:$0xff]  ;;  %vm18164_vm4 = vmmov %vm18162_vm2 }
 0x1d1   :  { %13059 = vmatpush3.bf16.msra.mxu1 %v15308_v54  ;;  %13103 = vmatpush3.bf16.msra.mxu0 %v13100_v59  ;;  %v9472_v59 = vld [vmem:[%s18144_s4 + $0x318] sm:$0xff]  ;;  %vm18165_vm5 = vmmov %vm18162_vm2 }
 0x1d2   :  { %13061 = vmatprep.subr.bf16.mxu1 %v15257_v11  ;;  %vm18166_vm1 = vmmov %vm18162_vm2 }
 0x1d3   :  { %vm18167_vm6 = vmmov %vm18166_vm1 }
 0x1d4   :  { %vm18168_vm7 = vmmov %vm18166_vm1 }
 0x1d5   :  { %13063 = vmatpush3.bf16.msra.mxu1 %v15312_v7  ;;  %vm18169_vm8 = vmmov %vm18166_vm1 }
 0x1d6   :  { %13065 = vmatprep.subr.bf16.mxu1 %v15104_v26  ;;  %vm18170_vm9 = vmmov %vm18166_vm1 }
 0x1d7   :  { %vm18171_vm10 = vmmov %vm18166_vm1 }
 0x1d8   :  { %vm18172_vm11 = vmmov %vm18166_vm1 }
 0x1d9   :  { %13067 = vmatpush3.bf16.msra.mxu1 %v15316_v4  ;;  %vm18173_vm12 = vmmov %vm18166_vm1 }
 0x1da   :  { %13069 = vmatprep.subr.bf16.mxu1 %v15235_v16  ;;  %vm18174_vm13 = vmmov %vm18166_vm1 }
 0x1db   :  { %vm18175_vm14 = vmmov %vm18166_vm1 }
 0x1dc   :  { %902 = vmatmul.mubr.f32.vlgmr.msra.gmra.mrb[0].mxu1 %v821_v8  ;;  %v9372_v8 = vld [vmem:[%s18144_s4 + $0x178] sm:$0xff]  ;;  %vm18176_vm15 = vmmov %vm18166_vm1 }
 0x1dd   :  { %13071 = vmatpush3.bf16.msra.mxu1 %v15237_v20  ;;  %906 = vmatprep.mubr.f32.mxu1 %v824_v9  ;;  %v9371_v9 = vld [vmem:[%s18144_s4 + $0x170] sm:$0xff]  ;;  %vm18177_vm0 = vmmov %vm18166_vm1 }
 0x1de   :  { %13073 = vmatprep.subr.bf16.mxu1 %v15239_v21 }
 0x1e0   :  { %907 = vmatmul.mubr.f32.gmra.mrb[2].mxu1 %v823_v36  ;;  %v9386_v36 = vld [vmem:[%s18144_s4 + $0x188] sm:$0xff] }
 0x1e1   :  { %13075 = vmatpush3.bf16.msra.mxu1 %v15271_v30  ;;  %911 = vmatprep.mubr.f32.mxu1 %v826_v35  ;;  %v9385_v35 = vld [vmem:[%s18144_s4 + $0x180] sm:$0xff] }
 0x1e2   :  { %13077 = vmatprep.subr.bf16.mxu1 %v15241_v63 }
 0x1e4   :  { %912 = vmatmul.mubr.f32.gmra.mrb[4].mxu1 %v825_v15  ;;  %v9388_v15 = vld [vmem:[%s18144_s4 + $0x198] sm:$0xff] }
 0x1e5   :  { %13079 = vmatpush3.bf16.msra.mxu1 %v15288_v56  ;;  %916 = vmatprep.mubr.f32.mxu1 %v828_v19  ;;  %v9387_v19 = vld [vmem:[%s18144_s4 + $0x190] sm:$0xff] }
 0x1e6   :  { %13081 = vmatprep.subr.bf16.mxu1 %v15250_v25 }
 0x1e8   :  { %917 = vmatmul.mubr.f32.gmra.mrb[6].mxu1 %v827_v22  ;;  %v9390_v22 = vld [vmem:[%s18144_s4 + $0x1a8] sm:$0xff] }
 0x1e9   :  { %13083 = vmatpush3.bf16.msra.mxu1 %v15298_v52  ;;  %921 = vmatprep.mubr.f32.mxu1 %v830_v6  ;;  %v9389_v6 = vld [vmem:[%s18144_s4 + $0x1a0] sm:$0xff] }
 0x1ea   :  { %13085 = vmatprep.subr.bf16.mxu1 %v15252_v5 }
 0x1ec   :  { %922 = vmatmul.mubr.f32.gmra.mrb[8].mxu1 %v829_v10  ;;  %v9392_v10 = vld [vmem:[%s18144_s4 + $0x1b8] sm:$0xff] }
 0x1ed   :  { %13087 = vmatpush3.bf16.msra.mxu1 %v15304_v42  ;;  %926 = vmatprep.mubr.f32.mxu1 %v832_v13  ;;  %v9391_v13 = vld [vmem:[%s18144_s4 + $0x1b0] sm:$0xff] }
 0x1ee   :  { %13089 = vmatprep.subr.bf16.mxu1 %v15255_v12 }
 0x1f0   :  { %927 = vmatmul.mubr.f32.gmra.mrb[10].mxu1 %v831_v18  ;;  %v9394_v18 = vld [vmem:[%s18144_s4 + $0x1c8] sm:$0xff] }
 0x1f1   :  { %13091 = vmatpush3.bf16.msra.mxu1 %v15308_v54  ;;  %931 = vmatprep.mubr.f32.mxu1 %v834_v50  ;;  %v9339_v50 = vld [vmem:[%s18147_s5 + $0x30] sm:$0xff] }
 0x1f2   :  { %13093 = vmatprep.subr.bf16.mxu1 %v15257_v11 }
 0x1f4   :  { %932 = vmatmul.mubr.f32.gmra.mrb[12].mxu1 %v833_v27  ;;  %v9340_v27 = vld [vmem:[%s18147_s5 + $0x38] sm:$0xff] }
 0x1f5   :  { %13095 = vmatpush3.bf16.msra.mxu1 %v15312_v7  ;;  %936 = vmatprep.mubr.f32.mxu1 %v836_v24  ;;  %v13104_v24 = vpack.c.bf16 %v9340_v27, %v9339_v50  ;;  %v9499_v50 = vld [vmem:[%s18144_s4 + $0x390] sm:$0xff]  ;;  %v9502_v27 = vld [vmem:[%s18144_s4 + $0x3a8] sm:$0xff] }
 0x1f6   :  { %13097 = vmatprep.subr.bf16.mxu1 %v15104_v26 }
 0x1f7   :  { %13105 = vmatprep.subr.bf16.mxu0 %v13104_v24 }
 0x1f8   :  { %937 = vmatmul.mubr.f32.gmra.mrb[14].mxu1 %v835_v29  ;;  %v9393_v29 = vld [vmem:[%s18144_s4 + $0x1c0] sm:$0xff]  ;;  %13107 = vmatpush3.bf16.msra.mxu0 %v13104_v24 }
 0x1f9   :  { %13099 = vmatpush3.bf16.msra.mxu1 %v15316_v4  ;;  %1027 = vmatprep.mubr.f32.mxu1 %v9322_v51  ;;  %v9396_v51 = vld [vmem:[%s18144_s4 + $0x1d8] sm:$0xff]  ;;  %v9501_v24 = vld [vmem:[%s18144_s4 + $0x3a0] sm:$0xff] }
 0x1fa   :  { %13117 = vmatprep.subr.bf16.mxu1 %v15235_v16 }
 0x1fc   :  { %1028 = vmatmul.mubr.f32.vlgmr.msra.gmra.mrb[16].mxu1 %v9321_v58  ;;  %v9395_v58 = vld [vmem:[%s18144_s4 + $0x1d0] sm:$0xff] }
 0x1fd   :  { %13119 = vmatpush3.bf16.msra.mxu1 %v15237_v20  ;;  %1032 = vmatprep.mubr.f32.mxu1 %v9324_v37  ;;  %v9398_v37 = vld [vmem:[%s18144_s4 + $0x1e8] sm:$0xff] }
 0x1fe   :  { %13121 = vmatprep.subr.bf16.mxu1 %v15239_v21 }
 0x200   :  { %1033 = vmatmul.mubr.f32.gmra.mrb[18].mxu1 %v9323_v40  ;;  %v9397_v40 = vld [vmem:[%s18144_s4 + $0x1e0] sm:$0xff] }
 0x201   :  { %13123 = vmatpush3.bf16.msra.mxu1 %v15271_v30  ;;  %1037 = vmatprep.mubr.f32.mxu1 %v9326_v45  ;;  %v9400_v45 = vld [vmem:[%s18144_s4 + $0x1f8] sm:$0xff] }
 0x202   :  { %13125 = vmatprep.subr.bf16.mxu1 %v15241_v63 }
 0x204   :  { %1038 = vmatmul.mubr.f32.gmra.mrb[20].mxu1 %v9325_v17  ;;  %v9399_v17 = vld [vmem:[%s18144_s4 + $0x1f0] sm:$0xff] }
 0x205   :  { %13127 = vmatpush3.bf16.msra.mxu1 %v15288_v56  ;;  %1042 = vmatprep.mubr.f32.mxu1 %v9328_v23  ;;  %v9442_v23 = vld [vmem:[%s18144_s4 + $0x288] sm:$0xff] }
 0x206   :  { %13129 = vmatprep.subr.bf16.mxu1 %v15250_v25 }
 0x208   :  { %1043 = vmatmul.mubr.f32.gmra.mrb[22].mxu1 %v9327_v14  ;;  %v9441_v14 = vld [vmem:[%s18144_s4 + $0x280] sm:$0xff] }
 0x209   :  { %13131 = vmatpush3.bf16.msra.mxu1 %v15298_v52  ;;  %1047 = vmatprep.mubr.f32.mxu1 %v9330_v55  ;;  %v9444_v55 = vld [vmem:[%s18144_s4 + $0x298] sm:$0xff] }
 0x20a   :  { %13133 = vmatprep.subr.bf16.mxu1 %v15252_v5 }
 0x20c   :  { %1048 = vmatmul.mubr.f32.gmra.mrb[24].mxu1 %v9329_v38  ;;  %v9443_v38 = vld [vmem:[%s18144_s4 + $0x290] sm:$0xff] }
 0x20d   :  { %13135 = vmatpush3.bf16.msra.mxu1 %v15304_v42  ;;  %1052 = vmatprep.mubr.f32.mxu1 %v9332_v48  ;;  %v9446_v48 = vld [vmem:[%s18144_s4 + $0x2a8] sm:$0xff] }
 0x20e   :  { %13137 = vmatprep.subr.bf16.mxu1 %v15255_v12 }
 0x210   :  { %1053 = vmatmul.mubr.f32.gmra.mrb[26].mxu1 %v9331_v43  ;;  %v9445_v43 = vld [vmem:[%s18144_s4 + $0x2a0] sm:$0xff] }
 0x211   :  { %13139 = vmatpush3.bf16.msra.mxu1 %v15308_v54  ;;  %1057 = vmatprep.mubr.f32.mxu1 %v9334_v57  ;;  %v9448_v57 = vld [vmem:[%s18144_s4 + $0x2b8] sm:$0xff] }
 0x212   :  { %13141 = vmatprep.subr.bf16.mxu1 %v15257_v11 }
 0x214   :  { %1058 = vmatmul.mubr.f32.gmra.mrb[28].mxu1 %v9333_v0  ;;  %v9447_v0 = vld [vmem:[%s18144_s4 + $0x2b0] sm:$0xff] }
 0x215   :  { %13143 = vmatpush3.bf16.msra.mxu1 %v15312_v7  ;;  %1062 = vmatprep.mubr.f32.mxu1 %v9336_v1  ;;  %v9450_v1 = vld [vmem:[%s18144_s4 + $0x2c8] sm:$0xff] }
 0x216   :  { %13145 = vmatprep.subr.bf16.mxu1 %v15104_v26 }
 0x218   :  { %1063 = vmatmul.mubr.f32.gmra.mrb[30].mxu1 %v9335_v41  ;;  %v942_v41 = vld [vmem:[%s18147_s5] sm:$0xff] }
 0x219   :  { %13147 = vmatpush3.bf16.msra.mxu1 %v15316_v4  ;;  %1412 = vmatprep.mubr.f32.mxu1 %v9358_v28  ;;  %v943_v28 = vld [vmem:[%s18147_s5 + $0x8] sm:$0xff] }
 0x21a   :  { %13157 = vmatprep.subr.bf16.mxu1 %v15235_v16 }
 0x21c   :  { %1413 = vmatmul.mubr.f32.vlgmr.msra.gmra.mrb[32].mxu1 %v9357_v32  ;;  %v15624_v32 = vpack.c.bf16 %v943_v28, %v942_v41  ;;  %v9526_v41 = vld [vmem:[%s18144_s4 + $0x408] sm:$0xff] }
 0x21d   :  { %13159 = vmatpush3.bf16.msra.mxu1 %v15237_v20  ;;  %1417 = vmatprep.mubr.f32.mxu1 %v9360_v49  ;;  %v9449_v49 = vld [vmem:[%s18144_s4 + $0x2c0] sm:$0xff] }
 0x21e   :  { %13161 = vmatprep.subr.bf16.mxu1 %v15239_v21  ;;  %13109 = vmatprep.subr.bf16.mxu0 %v15624_v32 }
 0x220   :  { %1418 = vmatmul.mubr.f32.gmra.mrb[34].mxu1 %v9359_v33  ;;  %v9452_v33 = vld [vmem:[%s18144_s4 + $0x2d8] sm:$0xff] }
 0x221   :  { %13163 = vmatpush3.bf16.msra.mxu1 %v15271_v30  ;;  %1422 = vmatprep.mubr.f32.mxu1 %v9362_v39  ;;  %v9451_v39 = vld [vmem:[%s18144_s4 + $0x2d0] sm:$0xff] }
 0x222   :  { %13165 = vmatprep.subr.bf16.mxu1 %v15241_v63 }
 0x224   :  { %1423 = vmatmul.mubr.f32.gmra.mrb[36].mxu1 %v9361_v34  ;;  %v9454_v34 = vld [vmem:[%s18144_s4 + $0x2e8] sm:$0xff] }
 0x225   :  { %13167 = vmatpush3.bf16.msra.mxu1 %v15288_v56  ;;  %1427 = vmatprep.mubr.f32.mxu1 %v9364_v2  ;;  %v9453_v2 = vld [vmem:[%s18144_s4 + $0x2e0] sm:$0xff] }
 0x226   :  { %13169 = vmatprep.subr.bf16.mxu1 %v15250_v25 }
 0x228   :  { %1428 = vmatmul.mubr.f32.gmra.mrb[38].mxu1 %v9363_v47  ;;  %v9456_v47 = vld [vmem:[%s18144_s4 + $0x2f8] sm:$0xff] }
 0x229   :  { %13171 = vmatpush3.bf16.msra.mxu1 %v15298_v52  ;;  %1432 = vmatprep.mubr.f32.mxu1 %v9366_v44  ;;  %v9455_v44 = vld [vmem:[%s18144_s4 + $0x2f0] sm:$0xff] }
 0x22a   :  { %13173 = vmatprep.subr.bf16.mxu1 %v15252_v5 }
 0x22c   :  { %1433 = vmatmul.mubr.f32.gmra.mrb[40].mxu1 %v9365_v60  ;;  %v9471_v60 = vld [vmem:[%s18144_s4 + $0x310] sm:$0xff] }
 0x22d   :  { %13175 = vmatpush3.bf16.msra.mxu1 %v15304_v42  ;;  %1437 = vmatprep.mubr.f32.mxu1 %v9368_v31  ;;  %v9474_v31 = vld [vmem:[%s18144_s4 + $0x328] sm:$0xff] }
 0x22e   :  { %13177 = vmatprep.subr.bf16.mxu1 %v15255_v12 }
 0x230   :  { %1438 = vmatmul.mubr.f32.gmra.mrb[42].mxu1 %v9367_v61  ;;  %v9473_v61 = vld [vmem:[%s18144_s4 + $0x320] sm:$0xff] }
 0x231   :  { %13179 = vmatpush3.bf16.msra.mxu1 %v15308_v54  ;;  %1442 = vmatprep.mubr.f32.mxu1 %v9370_v62  ;;  %v9476_v62 = vld [vmem:[%s18144_s4 + $0x338] sm:$0xff] }
 0x232   :  { %13181 = vmatprep.subr.bf16.mxu1 %v15257_v11 }
 0x234   :  { %1443 = vmatmul.mubr.f32.gmra.mrb[44].mxu1 %v9369_v3  ;;  %v9475_v3 = vld [vmem:[%s18144_s4 + $0x330] sm:$0xff] }
 0x235   :  { %13183 = vmatpush3.bf16.msra.mxu1 %v15312_v7  ;;  %1447 = vmatprep.mubr.f32.mxu1 %v9372_v8  ;;  %v9478_v8 = vld [vmem:[%s18144_s4 + $0x348] sm:$0xff] }
 0x236   :  { %13185 = vmatprep.subr.bf16.mxu1 %v15104_v26 }
 0x238   :  { %1448 = vmatmul.mubr.f32.gmra.mrb[46].mxu1 %v9371_v9  ;;  %v9477_v9 = vld [vmem:[%s18144_s4 + $0x340] sm:$0xff] }
 0x239   :  { %13187 = vmatpush3.bf16.msra.mxu1 %v15316_v4  ;;  %1676 = vmatprep.mubr.f32.mxu1 %v9386_v36  ;;  %v9480_v36 = vld [vmem:[%s18144_s4 + $0x358] sm:$0xff] }
 0x23a   :  { %13237 = vmatprep.subr.bf16.mxu1 %v15235_v16 }
 0x23c   :  { %1677 = vmatmul.mubr.f32.vlgmr.msra.gmra.mrb[48].mxu1 %v9385_v35  ;;  %v9479_v35 = vld [vmem:[%s18144_s4 + $0x350] sm:$0xff] }
 0x23d   :  { %13239 = vmatpush3.bf16.msra.mxu1 %v15237_v20  ;;  %1681 = vmatprep.mubr.f32.mxu1 %v9388_v15  ;;  %v9482_v15 = vld [vmem:[%s18144_s4 + $0x368] sm:$0xff] }
 0x23e   :  { %13241 = vmatprep.subr.bf16.mxu1 %v15239_v21 }
 0x240   :  { %1682 = vmatmul.mubr.f32.gmra.mrb[50].mxu1 %v9387_v19  ;;  %v9481_v19 = vld [vmem:[%s18144_s4 + $0x360] sm:$0xff] }
 0x241   :  { %13243 = vmatpush3.bf16.msra.mxu1 %v15271_v30  ;;  %1686 = vmatprep.mubr.f32.mxu1 %v9390_v22  ;;  %v9484_v22 = vld [vmem:[%s18144_s4 + $0x378] sm:$0xff] }
 0x242   :  { %13245 = vmatprep.subr.bf16.mxu1 %v15241_v63 }
 0x244   :  { %1687 = vmatmul.mubr.f32.gmra.mrb[52].mxu1 %v9389_v6  ;;  %v9483_v6 = vld [vmem:[%s18144_s4 + $0x370] sm:$0xff] }
 0x245   :  { %13247 = vmatpush3.bf16.msra.mxu1 %v15288_v56  ;;  %1691 = vmatprep.mubr.f32.mxu1 %v9392_v10  ;;  %v9498_v10 = vld [vmem:[%s18144_s4 + $0x388] sm:$0xff] }
 0x246   :  { %13249 = vmatprep.subr.bf16.mxu1 %v15250_v25 }
 0x248   :  { %1692 = vmatmul.mubr.f32.gmra.mrb[54].mxu1 %v9391_v13  ;;  %v9497_v13 = vld [vmem:[%s18144_s4 + $0x380] sm:$0xff] }
 0x249   :  { %13251 = vmatpush3.bf16.msra.mxu1 %v15298_v52  ;;  %1696 = vmatprep.mubr.f32.mxu1 %v9394_v18  ;;  %v9500_v18 = vld [vmem:[%s18144_s4 + $0x398] sm:$0xff] }
 0x24a   :  { %13253 = vmatprep.subr.bf16.mxu1 %v15252_v5 }
 0x24c   :  { %1697 = vmatmul.mubr.f32.gmra.mrb[56].mxu1 %v9393_v29  ;;  %v9504_v29 = vld [vmem:[%s18144_s4 + $0x3b8] sm:$0xff] }
 0x24d   :  { %13255 = vmatpush3.bf16.msra.mxu1 %v15304_v42  ;;  %1701 = vmatprep.mubr.f32.mxu1 %v9396_v51  ;;  %v9503_v51 = vld [vmem:[%s18144_s4 + $0x3b0] sm:$0xff] }
 0x24e   :  { %13257 = vmatprep.subr.bf16.mxu1 %v15255_v12 }
 0x250   :  { %1702 = vmatmul.mubr.f32.gmra.mrb[58].mxu1 %v9395_v58  ;;  %v9506_v58 = vld [vmem:[%s18144_s4 + $0x3c8] sm:$0xff] }
 0x251   :  { %13259 = vmatpush3.bf16.msra.mxu1 %v15308_v54  ;;  %1706 = vmatprep.mubr.f32.mxu1 %v9398_v37  ;;  %v9505_v37 = vld [vmem:[%s18144_s4 + $0x3c0] sm:$0xff] }
 0x252   :  { %13261 = vmatprep.subr.bf16.mxu1 %v15257_v11 }
 0x254   :  { %1707 = vmatmul.mubr.f32.gmra.mrb[60].mxu1 %v9397_v40  ;;  %v9508_v40 = vld [vmem:[%s18144_s4 + $0x3d8] sm:$0xff] }
 0x255   :  { %13263 = vmatpush3.bf16.msra.mxu1 %v15312_v7  ;;  %1711 = vmatprep.mubr.f32.mxu1 %v9400_v45  ;;  %v9507_v45 = vld [vmem:[%s18144_s4 + $0x3d0] sm:$0xff] }
 0x256   :  { %13265 = vmatprep.subr.bf16.mxu1 %v15104_v26 }
 0x258   :  { %1712 = vmatmul.mubr.f32.gmra.mrb[62].mxu1 %v9399_v17  ;;  %v9510_v17 = vld [vmem:[%s18144_s4 + $0x3e8] sm:$0xff] }
 0x259   :  { %13267 = vmatpush3.bf16.msra.mxu1 %v15316_v4  ;;  %2204 = vmatprep.mubr.f32.mxu1 %v9442_v23 }
 0x25a   :  { %13277 = vmatprep.subr.bf16.mxu1 %v15235_v16 }
 0x25c   :  { %2205 = vmatmul.mubr.f32.vlgmr.msra.gmra.mrb[64].mxu1 %v9441_v14 }
 0x25d   :  { %13279 = vmatpush3.bf16.msra.mxu1 %v15237_v20  ;;  %2209 = vmatprep.mubr.f32.mxu1 %v9444_v55 }
 0x25e   :  { %13281 = vmatprep.subr.bf16.mxu1 %v15239_v21 }
 0x260   :  { %2210 = vmatmul.mubr.f32.gmra.mrb[66].mxu1 %v9443_v38  ;;  %v9509_v38 = vld [vmem:[%s18144_s4 + $0x3e0] sm:$0xff] }
 0x261   :  { %13283 = vmatpush3.bf16.msra.mxu1 %v15271_v30  ;;  %2214 = vmatprep.mubr.f32.mxu1 %v9446_v48  ;;  %v9512_v48 = vld [vmem:[%s18144_s4 + $0x3f8] sm:$0xff] }
 0x262   :  { %13285 = vmatprep.subr.bf16.mxu1 %v15241_v63 }
 0x264   :  { %2215 = vmatmul.mubr.f32.gmra.mrb[68].mxu1 %v9445_v43 }
 0x265   :  { %13287 = vmatpush3.bf16.msra.mxu1 %v15288_v56  ;;  %2219 = vmatprep.mubr.f32.mxu1 %v9448_v57 }
 0x266   :  { %13289 = vmatprep.subr.bf16.mxu1 %v15250_v25 }
 0x268   :  { %2220 = vmatmul.mubr.f32.gmra.mrb[70].mxu1 %v9447_v0 }
 0x269   :  { %13291 = vmatpush3.bf16.msra.mxu1 %v15298_v52  ;;  %2224 = vmatprep.mubr.f32.mxu1 %v9450_v1  ;;  %v9511_v1 = vld [vmem:[%s18144_s4 + $0x3f0] sm:$0xff] }
 0x26a   :  { %13293 = vmatprep.subr.bf16.mxu1 %v15252_v5 }
 0x26c   :  { %2225 = vmatmul.mubr.f32.gmra.mrb[72].mxu1 %v9449_v49 }
 0x26d   :  { %13295 = vmatpush3.bf16.msra.mxu1 %v15304_v42  ;;  %2229 = vmatprep.mubr.f32.mxu1 %v9452_v33 }
 0x26e   :  { %13297 = vmatprep.subr.bf16.mxu1 %v15255_v12 }
 0x270   :  { %2230 = vmatmul.mubr.f32.gmra.mrb[74].mxu1 %v9451_v39  ;;  %v9525_v39 = vld [vmem:[%s18144_s4 + $0x400] sm:$0xff] }
 0x271   :  { %13299 = vmatpush3.bf16.msra.mxu1 %v15308_v54  ;;  %2234 = vmatprep.mubr.f32.mxu1 %v9454_v34  ;;  %v9528_v34 = vld [vmem:[%s18144_s4 + $0x418] sm:$0xff] }
 0x272   :  { %13301 = vmatprep.subr.bf16.mxu1 %v15257_v11 }
 0x274   :  { %2235 = vmatmul.mubr.f32.gmra.mrb[76].mxu1 %v9453_v2 }
 0x275   :  { %13303 = vmatpush3.bf16.msra.mxu1 %v15312_v7  ;;  %2239 = vmatprep.mubr.f32.mxu1 %v9456_v47 }
 0x276   :  { %13305 = vmatprep.subr.bf16.mxu1 %v15104_v26 }
 0x278   :  { %2240 = vmatmul.mubr.f32.gmra.mrb[78].mxu1 %v9455_v44 }
 0x279   :  { %13307 = vmatpush3.bf16.msra.mxu1 %v15316_v4  ;;  %2468 = vmatprep.mubr.f32.mxu1 %v9470_v53  ;;  %v9527_v53 = vld [vmem:[%s18144_s4 + $0x410] sm:$0xff] }
 0x27a   :  { %13317 = vmatprep.subr.bf16.mxu1 %v15235_v16 }
 0x27c   :  { %2469 = vmatmul.mubr.f32.vlgmr.msra.gmra.mrb[80].mxu1 %v9469_v46  ;;  %v9530_v46 = vld [vmem:[%s18144_s4 + $0x428] sm:$0xff] }
 0x27d   :  { %13319 = vmatpush3.bf16.msra.mxu1 %v15237_v20  ;;  %2473 = vmatprep.mubr.f32.mxu1 %v9472_v59 }
 0x27e   :  { %13321 = vmatprep.subr.bf16.mxu1 %v15239_v21 }
 0x280   :  { %2474 = vmatmul.mubr.f32.gmra.mrb[82].mxu1 %v9471_v60 }
 0x281   :  { %13323 = vmatpush3.bf16.msra.mxu1 %v15271_v30  ;;  %2478 = vmatprep.mubr.f32.mxu1 %v9474_v31 }
 0x282   :  { %13325 = vmatprep.subr.bf16.mxu1 %v15241_v63 }
 0x284   :  { %2479 = vmatmul.mubr.f32.gmra.mrb[84].mxu1 %v9473_v61  ;;  %v9529_v61 = vld [vmem:[%s18144_s4 + $0x420] sm:$0xff] }
 0x285   :  { %13327 = vmatpush3.bf16.msra.mxu1 %v15288_v56  ;;  %2483 = vmatprep.mubr.f32.mxu1 %v9476_v62  ;;  %v9532_v62 = vld [vmem:[%s18144_s4 + $0x438] sm:$0xff] }
 0x286   :  { %13329 = vmatprep.subr.bf16.mxu1 %v15250_v25 }
 0x288   :  { %2484 = vmatmul.mubr.f32.gmra.mrb[86].mxu1 %v9475_v3 }
 0x289   :  { %13331 = vmatpush3.bf16.msra.mxu1 %v15298_v52  ;;  %2488 = vmatprep.mubr.f32.mxu1 %v9478_v8 }
 0x28a   :  { %13333 = vmatprep.subr.bf16.mxu1 %v15252_v5 }
 0x28c   :  { %2489 = vmatmul.mubr.f32.gmra.mrb[88].mxu1 %v9477_v9 }
 0x28d   :  { %13335 = vmatpush3.bf16.msra.mxu1 %v15304_v42  ;;  %2493 = vmatprep.mubr.f32.mxu1 %v9480_v36  ;;  %v9531_v36 = vld [vmem:[%s18144_s4 + $0x430] sm:$0xff] }
 0x28e   :  { %13337 = vmatprep.subr.bf16.mxu1 %v15255_v12 }
 0x290   :  { %2494 = vmatmul.mubr.f32.gmra.mrb[90].mxu1 %v9479_v35  ;;  %v9534_v35 = vld [vmem:[%s18144_s4 + $0x448] sm:$0xff] }
 0x291   :  { %13339 = vmatpush3.bf16.msra.mxu1 %v15308_v54  ;;  %2498 = vmatprep.mubr.f32.mxu1 %v9482_v15 }
 0x292   :  { %13341 = vmatprep.subr.bf16.mxu1 %v15257_v11 }
 0x294   :  { %2499 = vmatmul.mubr.f32.gmra.mrb[92].mxu1 %v9481_v19 }
 0x295   :  { %13343 = vmatpush3.bf16.msra.mxu1 %v15312_v7  ;;  %2503 = vmatprep.mubr.f32.mxu1 %v9484_v22 }
 0x296   :  { %13345 = vmatprep.subr.bf16.mxu1 %v15104_v26 }
 0x298   :  { %2504 = vmatmul.mubr.f32.gmra.mrb[94].mxu1 %v9483_v6  ;;  %v9533_v6 = vld [vmem:[%s18144_s4 + $0x440] sm:$0xff] }
 0x299   :  { %13347 = vmatpush3.bf16.msra.mxu1 %v15316_v4  ;;  %2732 = vmatprep.mubr.f32.mxu1 %v9498_v10  ;;  %v9536_v10 = vld [vmem:[%s18144_s4 + $0x458] sm:$0xff] }
 0x29a   :  { %13357 = vmatprep.subr.bf16.mxu1 %v15235_v16 }
 0x29c   :  { %2733 = vmatmul.mubr.f32.vlgmr.msra.gmra.mrb[96].mxu1 %v9497_v13 }
 0x29d   :  { %13359 = vmatpush3.bf16.msra.mxu1 %v15237_v20  ;;  %2737 = vmatprep.mubr.f32.mxu1 %v9500_v18 }
 0x29e   :  { %13361 = vmatprep.subr.bf16.mxu1 %v15239_v21 }
 0x2a0   :  { %2738 = vmatmul.mubr.f32.gmra.mrb[98].mxu1 %v9499_v50 }
 0x2a1   :  { %13363 = vmatpush3.bf16.msra.mxu1 %v15271_v30  ;;  %2742 = vmatprep.mubr.f32.mxu1 %v9502_v27  ;;  %v9535_v27 = vld [vmem:[%s18144_s4 + $0x450] sm:$0xff] }
 0x2a2   :  { %13365 = vmatprep.subr.bf16.mxu1 %v15241_v63 }
 0x2a4   :  { %2743 = vmatmul.mubr.f32.gmra.mrb[100].mxu1 %v9501_v24  ;;  %v9538_v24 = vld [vmem:[%s18144_s4 + $0x468] sm:$0xff] }
 0x2a5   :  { %13367 = vmatpush3.bf16.msra.mxu1 %v15288_v56  ;;  %2747 = vmatprep.mubr.f32.mxu1 %v9504_v29 }
 0x2a6   :  { %13369 = vmatprep.subr.bf16.mxu1 %v15250_v25 }
 0x2a8   :  { %2748 = vmatmul.mubr.f32.gmra.mrb[102].mxu1 %v9503_v51 }
 0x2a9   :  { %13371 = vmatpush3.bf16.msra.mxu1 %v15298_v52  ;;  %2752 = vmatprep.mubr.f32.mxu1 %v9506_v58 }
 0x2aa   :  { %13373 = vmatprep.subr.bf16.mxu1 %v15252_v5 }
 0x2ac   :  { %2753 = vmatmul.mubr.f32.gmra.mrb[104].mxu1 %v9505_v37  ;;  %v9537_v37 = vld [vmem:[%s18144_s4 + $0x460] sm:$0xff] }
 0x2ad   :  { %13375 = vmatpush3.bf16.msra.mxu1 %v15304_v42  ;;  %2757 = vmatprep.mubr.f32.mxu1 %v9508_v40  ;;  %v9540_v40 = vld [vmem:[%s18144_s4 + $0x478] sm:$0xff] }
 0x2ae   :  { %13377 = vmatprep.subr.bf16.mxu1 %v15255_v12 }
 0x2af   :  { %v10164_v23 = vpop.f32.mrb[0].mxu1 }
 0x2b0   :  { %v10165_v14 = vpop.f32.mrb[1].mxu1  ;;  %2758 = vmatmul.mubr.f32.gmra.mrb[106].mxu1 %v9507_v45 }
 0x2b1   :  { %v15771_v55 = vadd.f32 %v10165_v14, %v10164_v23  ;;  %13379 = vmatpush3.bf16.msra.mxu1 %v15308_v54  ;;  %2762 = vmatprep.mubr.f32.mxu1 %v9510_v17  ;;  %v944_v17 = vld [vmem:[%s18147_s5 + $0x10] sm:$0xff]  ;;  %v945_v23 = vld [vmem:[%s18147_s5 + $0x18] sm:$0xff] }
 0x2b2   :  { %13381 = vmatprep.subr.bf16.mxu1 %v15257_v11 }
 0x2b3   :  { %v10167_v43 = vpop.f32.mrb[2].mxu1 }
 0x2b4   :  { %v10168_v57 = vpop.f32.mrb[3].mxu1  ;;  %2763 = vmatmul.mubr.f32.gmra.mrb[108].mxu1 %v9509_v38 }
 0x2b5   :  { %v15781_v0 = vadd.f32 %v10168_v57, %v10167_v43  ;;  %13383 = vmatpush3.bf16.msra.mxu1 %v15312_v7  ;;  %2767 = vmatprep.mubr.f32.mxu1 %v9512_v48  ;;  %v9539_v48 = vld [vmem:[%s18144_s4 + $0x470] sm:$0xff]  ;;  %v9582_v43 = vld [vmem:[%s18144_s4 + $0x508] sm:$0xff]  ;;  %v13112_v57 = vpack.c.bf16 %v945_v23, %v944_v17 }
 0x2b6   :  { %13385 = vmatprep.subr.bf16.mxu1 %v15104_v26 }
 0x2b7   :  { %v10170_v28 = vpop.f32.mrb[4].mxu1 }
 0x2b8   :  { %v10171_v49 = vpop.f32.mrb[5].mxu1  ;;  %2768 = vmatmul.mubr.f32.gmra.mrb[110].mxu1 %v9511_v1 }
 0x2b9   :  { %v15791_v33 = vadd.f32 %v10171_v49, %v10170_v28  ;;  %13387 = vmatpush3.bf16.msra.mxu1 %v15316_v4  ;;  %2996 = vmatprep.mubr.f32.mxu1 %v9526_v41  ;;  %v9373_v41 = vld [vmem:[%s18147_s5 + $0x40] sm:$0xff]  ;;  %v9374_v28 = vld [vmem:[%s18147_s5 + $0x48] sm:$0xff] }
 0x2ba   :  { %13437 = vmatprep.subr.bf16.mxu1 %v15235_v16 }
 0x2bb   :  { %v10173_v2 = vpop.f32.mrb[6].mxu1 }
 0x2bc   :  { %v10174_v47 = vpop.f32.mrb[7].mxu1  ;;  %2997 = vmatmul.mubr.f32.vlgmr.msra.gmra.mrb[112].mxu1 %v9525_v39 }
 0x2bd   :  { %v15801_v44 = vadd.f32 %v10174_v47, %v10173_v2  ;;  %13439 = vmatpush3.bf16.msra.mxu1 %v15237_v20  ;;  %3001 = vmatprep.mubr.f32.mxu1 %v9528_v34  ;;  %v9581_v34 = vld [vmem:[%s18144_s4 + $0x500] sm:$0xff]  ;;  %v9584_v2 = vld [vmem:[%s18144_s4 + $0x518] sm:$0xff]  ;;  %v15890_v47 = vpack.c.bf16 %v9374_v28, %v9373_v41 }
 0x2be   :  { %13441 = vmatprep.subr.bf16.mxu1 %v15239_v21  ;;  %v9401_v28 = vld [vmem:[%s18147_s5 + $0x60] sm:$0xff] }
 0x2bf   :  { %v10176_v59 = vpop.f32.mrb[8].mxu1 }
 0x2c0   :  { %v10177_v60 = vpop.f32.mrb[9].mxu1  ;;  %3002 = vmatmul.mubr.f32.gmra.mrb[114].mxu1 %v9527_v53 }
 0x2c1   :  { %v15811_v31 = vadd.f32 %v10177_v60, %v10176_v59  ;;  %13443 = vmatpush3.bf16.msra.mxu1 %v15271_v30  ;;  %3006 = vmatprep.mubr.f32.mxu1 %v9530_v46  ;;  %v9583_v59 = vld [vmem:[%s18144_s4 + $0x510] sm:$0xff]  ;;  %v9586_v60 = vld [vmem:[%s18144_s4 + $0x528] sm:$0xff] }
 0x2c2   :  { %13445 = vmatprep.subr.bf16.mxu1 %v15241_v63 }
 0x2c3   :  { %v10179_v3 = vpop.f32.mrb[10].mxu1 }
 0x2c4   :  { %v10180_v8 = vpop.f32.mrb[11].mxu1  ;;  %3007 = vmatmul.mubr.f32.gmra.mrb[116].mxu1 %v9529_v61 }
 0x2c5   :  { %v15821_v9 = vadd.f32 %v10180_v8, %v10179_v3  ;;  %13447 = vmatpush3.bf16.msra.mxu1 %v15288_v56  ;;  %3011 = vmatprep.mubr.f32.mxu1 %v9532_v62  ;;  %v9585_v8 = vld [vmem:[%s18144_s4 + $0x520] sm:$0xff] }
 0x2c6   :  { %13449 = vmatprep.subr.bf16.mxu1 %v15250_v25 }
 0x2c7   :  { %v10182_v15 = vpop.f32.mrb[12].mxu1 }
 0x2c8   :  { %v10183_v19 = vpop.f32.mrb[13].mxu1  ;;  %3012 = vmatmul.mubr.f32.gmra.mrb[118].mxu1 %v9531_v36  ;;  %v9588_v36 = vld [vmem:[%s18144_s4 + $0x538] sm:$0xff] }
 0x2c9   :  { %v15831_v22 = vadd.f32 %v10183_v19, %v10182_v15  ;;  %13451 = vmatpush3.bf16.msra.mxu1 %v15298_v52  ;;  %3016 = vmatprep.mubr.f32.mxu1 %v9534_v35 }
 0x2ca   :  { %13453 = vmatprep.subr.bf16.mxu1 %v15252_v5 }
 0x2cb   :  { %v10185_v13 = vpop.f32.mrb[14].mxu1 }
 0x2cc   :  { %v10186_v18 = vpop.f32.mrb[15].mxu1  ;;  %3017 = vmatmul.mubr.f32.gmra.mrb[120].mxu1 %v9533_v6  ;;  %v9587_v6 = vld [vmem:[%s18144_s4 + $0x530] sm:$0xff] }
 0x2cd   :  { %v15841_v50 = vadd.f32 %v10186_v18, %v10185_v13  ;;  %13455 = vmatpush3.bf16.msra.mxu1 %v15304_v42  ;;  %3021 = vmatprep.mubr.f32.mxu1 %v9536_v10  ;;  %v9590_v10 = vld [vmem:[%s18144_s4 + $0x548] sm:$0xff] }
 0x2ce   :  { %13457 = vmatprep.subr.bf16.mxu1 %v15255_v12 }
 0x2cf   :  { %v10220_v29 = vpop.f32.mrb[16].mxu1 }
 0x2d0   :  { %v10221_v51 = vpop.f32.mrb[17].mxu1  ;;  %3022 = vmatmul.mubr.f32.gmra.mrb[122].mxu1 %v9535_v27 }
 0x2d1   :  { %v10222_v58 = vadd.f32 %v10221_v51, %v10220_v29  ;;  %13459 = vmatpush3.bf16.msra.mxu1 %v15308_v54  ;;  %3026 = vmatprep.mubr.f32.mxu1 %v9538_v24  ;;  %v9589_v24 = vld [vmem:[%s18144_s4 + $0x540] sm:$0xff]  ;;  %v9592_v29 = vld [vmem:[%s18144_s4 + $0x558] sm:$0xff] }
 0x2d2   :  { %13461 = vmatprep.subr.bf16.mxu1 %v15257_v11 }
 0x2d3   :  { %v10223_v45 = vpop.f32.mrb[18].mxu1  ;;  %11768 = vmatprep.mubr.msk.f32.mxu0 %vm18162_vm2, %v10222_v58  ;;  %vm18178_vm2 = vmmov %vm18177_vm0 }
 0x2d4   :  { %v10224_v14 = vpop.f32.mrb[19].mxu1  ;;  %3027 = vmatmul.mubr.f32.gmra.mrb[124].mxu1 %v9537_v37 }
 0x2d5   :  { %v10225_v38 = vadd.f32 %v10224_v14, %v10223_v45  ;;  %13463 = vmatpush3.bf16.msra.mxu1 %v15312_v7  ;;  %3031 = vmatprep.mubr.f32.mxu1 %v9540_v40  ;;  %v9591_v40 = vld [vmem:[%s18144_s4 + $0x550] sm:$0xff]  ;;  %v9594_v45 = vld [vmem:[%s18144_s4 + $0x568] sm:$0xff] }
 0x2d6   :  { %13465 = vmatprep.subr.bf16.mxu1 %v15104_v26  ;;  %v9375_v14 = vld [vmem:[%s18147_s5 + $0x50] sm:$0xff] }
 0x2d7   :  { %v10226_v1 = vpop.f32.mrb[20].mxu1  ;;  %11769 = vmatmul.mubr.msk.f32.vlgmr.msra.gmra.mrb[32].mxu0 %vm18163_vm3, %v10225_v38  ;;  %v9376_v38 = vld [vmem:[%s18147_s5 + $0x58] sm:$0xff]  ;;  %vm18179_vm3 = vmmov %vm18177_vm0 }
 0x2d8   :  { %v10227_v49 = vpop.f32.mrb[21].mxu1  ;;  %3032 = vmatmul.mubr.f32.gmra.mrb[126].mxu1 %v9539_v48  ;;  %13111 = vmatpush3.bf16.msra.mxu0 %v15624_v32 }
 0x2d9   :  { %v10228_v39 = vadd.f32 %v10227_v49, %v10226_v1  ;;  %13467 = vmatpush3.bf16.msra.mxu1 %v15316_v4  ;;  %3524 = vmatprep.mubr.f32.mxu1 %v9582_v43  ;;  %v9593_v43 = vld [vmem:[%s18144_s4 + $0x560] sm:$0xff]  ;;  %v13152_v1 = vpack.c.bf16 %v9376_v38, %v9375_v14  ;;  %v9402_v49 = vld [vmem:[%s18147_s5 + $0x68] sm:$0xff] }
 0x2da   :  { %13477 = vmatprep.subr.bf16.mxu1 %v15235_v16  ;;  %13113 = vmatprep.subr.bf16.mxu0 %v13112_v57 }
 0x2db   :  { %v10229_v53 = vpop.f32.mrb[22].mxu1  ;;  %11771 = vmatprep.mubr.msk.f32.mxu0 %vm18164_vm4, %v10228_v39  ;;  %v9595_v39 = vld [vmem:[%s18144_s4 + $0x570] sm:$0xff]  ;;  %vm18180_vm4 = vmmov %vm18177_vm0 }
 0x2dc   :  { %v10230_v32 = vpop.f32.mrb[23].mxu1  ;;  %3525 = vmatmul.mubr.f32.vlgmr.msra.gmra.mrb[128].mxu1 %v9581_v34  ;;  %13115 = vmatpush3.bf16.msra.mxu0 %v13112_v57  ;;  %v9596_v57 = vld [vmem:[%s18144_s4 + $0x578] sm:$0xff] }
 0x2dd   :  { %v10231_v46 = vadd.f32 %v10230_v32, %v10229_v53  ;;  %13479 = vmatpush3.bf16.msra.mxu1 %v15237_v20  ;;  %3529 = vmatprep.mubr.f32.mxu1 %v9584_v2  ;;  %v13188_v2 = vpack.c.bf16 %v9402_v49, %v9401_v28  ;;  %v9609_v32 = vld [vmem:[%s18144_s4 + $0x580] sm:$0xff]  ;;  %v9638_v49 = vld [vmem:[%s18144_s4 + $0x608] sm:$0xff] }
 0x2de   :  { %13481 = vmatprep.subr.bf16.mxu1 %v15239_v21  ;;  %13149 = vmatprep.subr.bf16.mxu0 %v15890_v47 }
 0x2df   :  { %v10232_v61 = vpop.f32.mrb[24].mxu1  ;;  %11772 = vmatmul.mubr.msk.f32.gmra.mrb[34].mxu0 %vm18165_vm5, %v10231_v46  ;;  %vm18181_vm5 = vmmov %vm18177_vm0 }
 0x2e0   :  { %v10233_v62 = vpop.f32.mrb[25].mxu1  ;;  %3530 = vmatmul.mubr.f32.gmra.mrb[130].mxu1 %v9583_v59 }
 0x2e1   :  { %v10234_v3 = vadd.f32 %v10233_v62, %v10232_v61  ;;  %13483 = vmatpush3.bf16.msra.mxu1 %v15271_v30  ;;  %3534 = vmatprep.mubr.f32.mxu1 %v9586_v60  ;;  %v9611_v60 = vld [vmem:[%s18144_s4 + $0x590] sm:$0xff]  ;;  %v9404_v61 = vld [vmem:[%s18147_s5 + $0x78] sm:$0xff] }
 0x2e2   :  { %13485 = vmatprep.subr.bf16.mxu1 %v15241_v63 }
 0x2e3   :  { %v10235_v35 = vpop.f32.mrb[26].mxu1  ;;  %11774 = vmatprep.mubr.msk.f32.mxu0 %vm18166_vm1, %v10234_v3  ;;  %vm18182_vm1 = vmmov %vm18177_vm0 }
 0x2e4   :  { %v10236_v15 = vpop.f32.mrb[27].mxu1  ;;  %3535 = vmatmul.mubr.f32.gmra.mrb[132].mxu1 %v9585_v8 }
 0x2e5   :  { %v10237_v19 = vadd.f32 %v10236_v15, %v10235_v35  ;;  %13487 = vmatpush3.bf16.msra.mxu1 %v15288_v56  ;;  %3539 = vmatprep.mubr.f32.mxu1 %v9588_v36  ;;  %v9613_v35 = vld [vmem:[%s18144_s4 + $0x5a0] sm:$0xff] }
 0x2e6   :  { %13489 = vmatprep.subr.bf16.mxu1 %v15250_v25 }
 0x2e7   :  { %v10238_v13 = vpop.f32.mrb[28].mxu1  ;;  %11775 = vmatmul.mubr.msk.f32.gmra.mrb[36].mxu0 %vm18167_vm6, %v10237_v19  ;;  %vm18183_vm6 = vmmov %vm18177_vm0 }
 0x2e8   :  { %v10239_v18 = vpop.f32.mrb[29].mxu1  ;;  %3540 = vmatmul.mubr.f32.gmra.mrb[134].mxu1 %v9587_v6 }
 0x2e9   :  { %v10240_v27 = vadd.f32 %v10239_v18, %v10238_v13  ;;  %13491 = vmatpush3.bf16.msra.mxu1 %v15298_v52  ;;  %3544 = vmatprep.mubr.f32.mxu1 %v9590_v10  ;;  %v9615_v10 = vld [vmem:[%s18144_s4 + $0x5b0] sm:$0xff]  ;;  %v9618_v18 = vld [vmem:[%s18144_s4 + $0x5c8] sm:$0xff] }
 0x2ea   :  { %13493 = vmatprep.subr.bf16.mxu1 %v15252_v5 }
 0x2eb   :  { %v10241_v51 = vpop.f32.mrb[30].mxu1  ;;  %11777 = vmatprep.mubr.msk.f32.mxu0 %vm18168_vm7, %v10240_v27  ;;  %vm18184_vm7 = vmmov %vm18177_vm0 }
 0x2ec   :  { %v10242_v58 = vpop.f32.mrb[31].mxu1  ;;  %3545 = vmatmul.mubr.f32.gmra.mrb[136].mxu1 %v9589_v24 }
 0x2ed   :  { %v10243_v37 = vadd.f32 %v10242_v58, %v10241_v51  ;;  %13495 = vmatpush3.bf16.msra.mxu1 %v15304_v42  ;;  %3549 = vmatprep.mubr.f32.mxu1 %v9592_v29  ;;  %v9617_v29 = vld [vmem:[%s18144_s4 + $0x5c0] sm:$0xff]  ;;  %v9620_v58 = vld [vmem:[%s18144_s4 + $0x5d8] sm:$0xff] }
 0x2ee   :  { %13497 = vmatprep.subr.bf16.mxu1 %v15255_v12 }
 0x2ef   :  { %11778 = vmatmul.mubr.msk.f32.gmra.mrb[38].mxu0 %vm18169_vm8, %v10243_v37  ;;  %v10300_v17 = vpop.f32.mrb[32].mxu1  ;;  %vm18185_vm8 = vmmov %vm18177_vm0 }
 0x2f0   :  { %11788 = vmatprep.mubr.msk.f32.mxu0 %vm18170_vm9, %v15771_v55  ;;  %v10301_v23 = vpop.f32.mrb[33].mxu1  ;;  %3550 = vmatmul.mubr.f32.gmra.mrb[138].mxu1 %v9591_v40  ;;  %vm18186_vm9 = vmmov %vm18177_vm0 }
 0x2f1   :  { %v10302_v48 = vadd.f32 %v10301_v23, %v10300_v17  ;;  %13499 = vmatpush3.bf16.msra.mxu1 %v15308_v54  ;;  %3554 = vmatprep.mubr.f32.mxu1 %v9594_v45  ;;  %v9619_v45 = vld [vmem:[%s18144_s4 + $0x5d0] sm:$0xff]  ;;  %v9622_v23 = vld [vmem:[%s18144_s4 + $0x5e8] sm:$0xff] }
 0x2f2   :  { %13501 = vmatprep.subr.bf16.mxu1 %v15257_v11 }
 0x2f3   :  { %11789 = vmatmul.mubr.msk.f32.vlgmr.msra.gmra.mrb[32].mxu0 %vm18171_vm10, %v15781_v0  ;;  %v10303_v55 = vpop.f32.mrb[34].mxu1  ;;  %vm18187_vm10 = vmmov %vm18177_vm0 }
 0x2f4   :  { %11791 = vmatprep.mubr.msk.f32.mxu0 %vm18172_vm11, %v15791_v33  ;;  %v10304_v41 = vpop.f32.mrb[35].mxu1  ;;  %3555 = vmatmul.mubr.f32.gmra.mrb[140].mxu1 %v9593_v43  ;;  %v9610_v33 = vld [vmem:[%s18144_s4 + $0x588] sm:$0xff]  ;;  %vm18188_vm11 = vmmov %vm18177_vm0 }
 0x2f5   :  { %v10305_v0 = vadd.f32 %v10304_v41, %v10303_v55  ;;  %13503 = vmatpush3.bf16.msra.mxu1 %v15312_v7  ;;  %13151 = vmatpush3.bf16.msra.mxu0 %v15890_v47  ;;  %v9624_v55 = vld [vmem:[%s18144_s4 + $0x5f8] sm:$0xff]  ;;  %v9623_v41 = vld [vmem:[%s18144_s4 + $0x5f0] sm:$0xff] }
 0x2f6   :  { %13505 = vmatprep.subr.bf16.mxu1 %v15104_v26  ;;  %3559 = vmatprep.mubr.f32.mxu1 %v9596_v57 }
 0x2f7   :  { %11792 = vmatmul.mubr.msk.f32.gmra.mrb[34].mxu0 %vm18173_vm12, %v15801_v44  ;;  %v10306_v34 = vpop.f32.mrb[36].mxu1  ;;  %13153 = vmatprep.subr.bf16.mxu0 %v13152_v1  ;;  %v9612_v44 = vld [vmem:[%s18144_s4 + $0x598] sm:$0xff]  ;;  %vm18189_vm12 = vmmov %vm18177_vm0 }
 0x2f8   :  { %11794 = vmatprep.mubr.msk.f32.mxu0 %vm18174_vm13, %v15811_v31  ;;  %v10307_v47 = vpop.f32.mrb[37].mxu1  ;;  %3560 = vmatmul.mubr.f32.gmra.mrb[142].mxu1 %v9595_v39  ;;  %vm18190_vm13 = vmmov %vm18177_vm0 }
 0x2f9   :  { %v10308_v53 = vadd.f32 %v10307_v47, %v10306_v34  ;;  %13507 = vmatpush3.bf16.msra.mxu1 %v15316_v4  ;;  %3788 = vmatprep.mubr.f32.mxu1 %v9610_v33  ;;  %v9637_v33 = vld [vmem:[%s18144_s4 + $0x600] sm:$0xff] }
 0x2fa   :  { %13517 = vmatprep.subr.bf16.mxu1 %v15235_v16  ;;  %13155 = vmatpush3.bf16.msra.mxu0 %v13152_v1 }
 0x2fb   :  { %11795 = vmatmul.mubr.msk.f32.gmra.mrb[36].mxu0 %vm18175_vm14, %v15821_v9  ;;  %v10309_v31 = vpop.f32.mrb[38].mxu1  ;;  %13189 = vmatprep.subr.bf16.mxu0 %v13188_v2  ;;  %v9614_v9 = vld [vmem:[%s18144_s4 + $0x5a8] sm:$0xff]  ;;  %vm18191_vm14 = vmmov %vm18177_vm0 }
 0x2fc   :  { %11797 = vmatprep.mubr.msk.f32.mxu0 %vm18176_vm15, %v15831_v22  ;;  %v10310_v46 = vpop.f32.mrb[39].mxu1  ;;  %3789 = vmatmul.mubr.f32.vlgmr.msra.gmra.mrb[144].mxu1 %v9609_v32  ;;  %v9403_v22 = vld [vmem:[%s18147_s5 + $0x70] sm:$0xff]  ;;  %vm18192_vm15 = vmmov %vm18177_vm0 }
 0x2fd   :  { %v10311_v59 = vadd.f32 %v10310_v46, %v10309_v31  ;;  %13519 = vmatpush3.bf16.msra.mxu1 %v15237_v20  ;;  %3793 = vmatprep.mubr.f32.mxu1 %v9612_v44  ;;  %v13192_v36 = vpack.c.bf16 %v9404_v61, %v9403_v22  ;;  %v9639_v32 = vld [vmem:[%s18144_s4 + $0x610] sm:$0xff]  ;;  %v9642_v31 = vld [vmem:[%s18144_s4 + $0x628] sm:$0xff]  ;;  %v9644_v22 = vld [vmem:[%s18144_s4 + $0x638] sm:$0xff] }
 0x2fe   :  { %13521 = vmatprep.subr.bf16.mxu1 %v15239_v21 }
 0x2ff   :  { %11798 = vmatmul.mubr.msk.f32.gmra.mrb[38].mxu0 %vm18177_vm0, %v15841_v50  ;;  %v10312_v62 = vpop.f32.mrb[40].mxu1  ;;  %v9616_v50 = vld [vmem:[%s18144_s4 + $0x5b8] sm:$0xff] }
 0x300   :  { %v10313_v3 = vpop.f32.mrb[41].mxu1  ;;  %11808 = vmatprep.mubr.msk.f32.mxu0 %vm18178_vm2, %v10302_v48  ;;  %3794 = vmatmul.mubr.f32.gmra.mrb[146].mxu1 %v9611_v60  ;;  %v9621_v48 = vld [vmem:[%s18144_s4 + $0x5e0] sm:$0xff]  ;;  %vm18193_vm2 = vmmov %vm18177_vm0 }
 0x301   :  { %v10314_v8 = vadd.f32 %v10313_v3, %v10312_v62  ;;  %13523 = vmatpush3.bf16.msra.mxu1 %v15271_v30  ;;  %3798 = vmatprep.mubr.f32.mxu1 %v9614_v9  ;;  %v9641_v60 = vld [vmem:[%s18144_s4 + $0x620] sm:$0xff]  ;;  %v9643_v3 = vld [vmem:[%s18144_s4 + $0x630] sm:$0xff] }
 0x302   :  { %13525 = vmatprep.subr.bf16.mxu1 %v15241_v63 }
 0x303   :  { %v10315_v15 = vpop.f32.mrb[42].mxu1  ;;  %11809 = vmatmul.mubr.msk.f32.vlgmr.msra.gmra.mrb[32].mxu0 %vm18179_vm3, %v10305_v0  ;;  %vm18194_vm3 = vmmov %vm18177_vm0 }
 0x304   :  { %13191 = vmatpush3.bf16.msra.mxu0 %v13188_v2  ;;  %v10316_v19 = vpop.f32.mrb[43].mxu1  ;;  %11811 = vmatprep.mubr.msk.f32.mxu0 %vm18180_vm4, %v10308_v53  ;;  %v9640_v2 = vld [vmem:[%s18144_s4 + $0x618] sm:$0xff]  ;;  %vm18195_vm4 = vmmov %vm18177_vm0 }
 0x305   :  { %v10317_v6 = vadd.f32 %v10316_v19, %v10315_v15  ;;  %3799 = vmatmul.mubr.f32.gmra.mrb[148].mxu1 %v9613_v35  ;;  %13193 = vmatprep.subr.bf16.mxu0 %v13192_v36 }
 0x306   :  { %13527 = vmatpush3.bf16.msra.mxu1 %v15288_v56  ;;  %3803 = vmatprep.mubr.f32.mxu1 %v9616_v50  ;;  %v9645_v50 = vld [vmem:[%s18144_s4 + $0x640] sm:$0xff] }
 0x307   :  { %13529 = vmatprep.subr.bf16.mxu1 %v15250_v25  ;;  %v10318_v13 = vpop.f32.mrb[44].mxu1  ;;  %11812 = vmatmul.mubr.msk.f32.gmra.mrb[34].mxu0 %vm18181_vm5, %v10311_v59  ;;  %vm18196_vm5 = vmmov %vm18177_vm0 }
 0x308   :  { %13195 = vmatpush3.bf16.msra.mxu0 %v13192_v36  ;;  %v10319_v27 = vpop.f32.mrb[45].mxu1  ;;  %11814 = vmatprep.mubr.msk.f32.mxu0 %vm18182_vm1, %v10314_v8  ;;  %v9646_v36 = vld [vmem:[%s18144_s4 + $0x648] sm:$0xff]  ;;  %vm18198_vm1 = vmmov %vm18177_vm0 }
 0x309   :  { %v10320_v24 = vadd.f32 %v10319_v27, %v10318_v13  ;;  %13197 = vmatprep.subr.bf16.mxu0 %v15235_v16  ;;  %3804 = vmatmul.mubr.f32.gmra.mrb[150].mxu1 %v9615_v10  ;;  %v9647_v27 = vld [vmem:[%s18144_s4 + $0x650] sm:$0xff] }
 0x30a   :  { %13531 = vmatpush3.bf16.msra.mxu1 %v15298_v52  ;;  %3808 = vmatprep.mubr.f32.mxu1 %v9618_v18  ;;  %v9414_v18 = vld [vmem:[%s18144_s4 + $0x208] sm:$0xff] }
 0x30b   :  { %13533 = vmatprep.subr.bf16.mxu1 %v15252_v5  ;;  %v10321_v51 = vpop.f32.mrb[46].mxu1  ;;  %11815 = vmatmul.mubr.msk.f32.gmra.mrb[36].mxu0 %vm18183_vm6, %v10317_v6  ;;  %v9648_v6 = vld [vmem:[%s18144_s4 + $0x658] sm:$0xff]  ;;  %vm18200_vm6 = vmmov %vm18177_vm0 }
 0x30c   :  { %v10322_v37 = vpop.f32.mrb[47].mxu1  ;;  %11817 = vmatprep.mubr.msk.f32.mxu0 %vm18184_vm7, %v10320_v24  ;;  %v9429_v24 = vld [vmem:[%s18147_s5 + $0x80] sm:$0xff]  ;;  %vm18202_vm7 = vmmov %vm18177_vm0 }
 0x30d   :  { %v10323_v40 = vadd.f32 %v10322_v37, %v10321_v51  ;;  %3809 = vmatmul.mubr.f32.gmra.mrb[152].mxu1 %v9617_v29  ;;  %v9430_v29 = vld [vmem:[%s18147_s5 + $0x88] sm:$0xff] }
 0x30e   :  { %13535 = vmatpush3.bf16.msra.mxu1 %v15304_v42  ;;  %3813 = vmatprep.mubr.f32.mxu1 %v9620_v58  ;;  %v9650_v51 = vld [vmem:[%s18144_s4 + $0x668] sm:$0xff] }
 0x30f   :  { %13537 = vmatprep.subr.bf16.mxu1 %v15255_v12  ;;  %11818 = vmatmul.mubr.msk.f32.gmra.mrb[38].mxu0 %vm18185_vm8, %v10323_v40  ;;  %v10368_v17 = vpop.f32.mrb[48].mxu1  ;;  %vm18203_vm8 = vmmov %vm18177_vm0 }
 0x310   :  { %v10369_v14 = vpop.f32.mrb[49].mxu1 }
 0x311   :  { %v10370_v38 = vadd.f32 %v10369_v14, %v10368_v17  ;;  %3814 = vmatmul.mubr.f32.gmra.mrb[154].mxu1 %v9619_v45  ;;  %v13228_v45 = vpack.c.bf16 %v9430_v29, %v9429_v24  ;;  %v9649_v17 = vld [vmem:[%s18144_s4 + $0x660] sm:$0xff] }
 0x312   :  { %13539 = vmatpush3.bf16.msra.mxu1 %v15308_v54  ;;  %3818 = vmatprep.mubr.f32.mxu1 %v9622_v23  ;;  %v9652_v23 = vld [vmem:[%s18144_s4 + $0x678] sm:$0xff] }
 0x313   :  { %13541 = vmatprep.subr.bf16.mxu1 %v15257_v11  ;;  %v10371_v43 = vpop.f32.mrb[50].mxu1  ;;  %11828 = vmatprep.mubr.msk.f32.mxu0 %vm18186_vm9, %v10370_v38  ;;  %v9413_v38 = vld [vmem:[%s18144_s4 + $0x200] sm:$0xff]  ;;  %vm18204_vm9 = vmmov %vm18177_vm0 }
 0x314   :  { %v10372_v57 = vpop.f32.mrb[51].mxu1 }
 0x315   :  { %v10373_v1 = vadd.f32 %v10372_v57, %v10371_v43  ;;  %3819 = vmatmul.mubr.f32.gmra.mrb[156].mxu1 %v9621_v48  ;;  %v9416_v43 = vld [vmem:[%s18144_s4 + $0x218] sm:$0xff]  ;;  %v9651_v57 = vld [vmem:[%s18144_s4 + $0x670] sm:$0xff] }
 0x316   :  { %13543 = vmatpush3.bf16.msra.mxu1 %v15312_v7  ;;  %3823 = vmatprep.mubr.f32.mxu1 %v9624_v55 }
 0x317   :  { %13545 = vmatprep.subr.bf16.mxu1 %v15104_v26  ;;  %11829 = vmatmul.mubr.msk.f32.vlgmr.msra.gmra.mrb[32].mxu0 %vm18187_vm10, %v10373_v1  ;;  %v10374_v28 = vpop.f32.mrb[52].mxu1  ;;  %v9666_v1 = vld [vmem:[%s18144_s4 + $0x688] sm:$0xff]  ;;  %vm18205_vm10 = vmmov %vm18177_vm0 }
 0x318   :  { %13199 = vmatpush3.bf16.msra.mxu0 %v15237_v20  ;;  %v10375_v0 = vpop.f32.mrb[53].mxu1 }
 0x319   :  { %13201 = vmatprep.subr.bf16.mxu0 %v15239_v21  ;;  %3824 = vmatmul.mubr.f32.gmra.mrb[158].mxu1 %v9623_v41  ;;  %v10376_v39 = vadd.f32 %v10375_v0, %v10374_v28  ;;  %v9415_v28 = vld [vmem:[%s18144_s4 + $0x210] sm:$0xff]  ;;  %v9418_v0 = vld [vmem:[%s18144_s4 + $0x228] sm:$0xff] }
 0x31a   :  { %13547 = vmatpush3.bf16.msra.mxu1 %v15316_v4  ;;  %4052 = vmatprep.mubr.f32.mxu1 %v9638_v49 }
 0x31b   :  { %13557 = vmatprep.subr.bf16.mxu1 %v15235_v16  ;;  %v10377_v34 = vpop.f32.mrb[54].mxu1  ;;  %11831 = vmatprep.mubr.msk.f32.mxu0 %vm18188_vm11, %v10376_v39  ;;  %vm18206_vm11 = vmmov %vm18177_vm0 }
 0x31c   :  { %13203 = vmatpush3.bf16.msra.mxu0 %v15271_v30  ;;  %v10378_v47 = vpop.f32.mrb[55].mxu1 }
 0x31d   :  { %13205 = vmatprep.subr.bf16.mxu0 %v15241_v63  ;;  %4053 = vmatmul.mubr.f32.vlgmr.msra.gmra.mrb[160].mxu1 %v9637_v33  ;;  %v10379_v53 = vadd.f32 %v10378_v47, %v10377_v34  ;;  %v9665_v33 = vld [vmem:[%s18144_s4 + $0x680] sm:$0xff] }
 0x31e   :  { %13559 = vmatpush3.bf16.msra.mxu1 %v15237_v20  ;;  %4057 = vmatprep.mubr.f32.mxu1 %v9640_v2  ;;  %v9417_v2 = vld [vmem:[%s18144_s4 + $0x220] sm:$0xff] }
 0x31f   :  { %13561 = vmatprep.subr.bf16.mxu1 %v15239_v21  ;;  %v10380_v44 = vpop.f32.mrb[56].mxu1  ;;  %11832 = vmatmul.mubr.msk.f32.gmra.mrb[34].mxu0 %vm18189_vm12, %v10379_v53  ;;  %v9420_v53 = vld [vmem:[%s18144_s4 + $0x238] sm:$0xff]  ;;  %vm18207_vm12 = vmmov %vm18177_vm0 }
 0x320   :  { %13207 = vmatpush3.bf16.msra.mxu0 %v15288_v56  ;;  %v10381_v46 = vpop.f32.mrb[57].mxu1 }
 0x321   :  { %13209 = vmatprep.subr.bf16.mxu0 %v15250_v25  ;;  %4058 = vmatmul.mubr.f32.gmra.mrb[162].mxu1 %v9639_v32  ;;  %v10382_v59 = vadd.f32 %v10381_v46, %v10380_v44 }
 0x322   :  { %13563 = vmatpush3.bf16.msra.mxu1 %v15271_v30  ;;  %4062 = vmatprep.mubr.f32.mxu1 %v9642_v31  ;;  %v9419_v31 = vld [vmem:[%s18144_s4 + $0x230] sm:$0xff] }
 0x323   :  { %13565 = vmatprep.subr.bf16.mxu1 %v15241_v63  ;;  %v10383_v9 = vpop.f32.mrb[58].mxu1  ;;  %11834 = vmatprep.mubr.msk.f32.mxu0 %vm18190_vm13, %v10382_v59  ;;  %v9422_v59 = vld [vmem:[%s18144_s4 + $0x248] sm:$0xff]  ;;  %vm18208_vm13 = vmmov %vm18177_vm0 }
 0x324   :  { %13211 = vmatpush3.bf16.msra.mxu0 %v15298_v52  ;;  %v10384_v61 = vpop.f32.mrb[59].mxu1 }
 0x325   :  { %13213 = vmatprep.subr.bf16.mxu0 %v15252_v5  ;;  %4063 = vmatmul.mubr.f32.gmra.mrb[164].mxu1 %v9641_v60  ;;  %v10385_v62 = vadd.f32 %v10384_v61, %v10383_v9  ;;  %v9424_v61 = vld [vmem:[%s18144_s4 + $0x258] sm:$0xff] }
 0x326   :  { %13567 = vmatpush3.bf16.msra.mxu1 %v15288_v56  ;;  %4067 = vmatprep.mubr.f32.mxu1 %v9644_v22  ;;  %v9421_v22 = vld [vmem:[%s18144_s4 + $0x240] sm:$0xff] }
 0x327   :  { %13569 = vmatprep.subr.bf16.mxu1 %v15250_v25  ;;  %v10386_v8 = vpop.f32.mrb[60].mxu1  ;;  %11835 = vmatmul.mubr.msk.f32.gmra.mrb[36].mxu0 %vm18191_vm14, %v10385_v62  ;;  %v9423_v62 = vld [vmem:[%s18144_s4 + $0x250] sm:$0xff]  ;;  %vm18209_vm14 = vmmov %vm18177_vm0 }
 0x328   :  { %13215 = vmatpush3.bf16.msra.mxu0 %v15304_v42  ;;  %v10387_v35 = vpop.f32.mrb[61].mxu1 }
 0x329   :  { %13217 = vmatprep.subr.bf16.mxu0 %v15255_v12  ;;  %4068 = vmatmul.mubr.f32.gmra.mrb[166].mxu1 %v9643_v3  ;;  %v10388_v15 = vadd.f32 %v10387_v35, %v10386_v8  ;;  %v9426_v3 = vld [vmem:[%s18144_s4 + $0x268] sm:$0xff]  ;;  %v9425_v8 = vld [vmem:[%s18144_s4 + $0x260] sm:$0xff]  ;;  %v9427_v35 = vld [vmem:[%s18144_s4 + $0x270] sm:$0xff] }
 0x32a   :  { %13571 = vmatpush3.bf16.msra.mxu1 %v15298_v52  ;;  %4072 = vmatprep.mubr.f32.mxu1 %v9646_v36  ;;  %v9428_v36 = vld [vmem:[%s18144_s4 + $0x278] sm:$0xff] }
 0x32b   :  { %13573 = vmatprep.subr.bf16.mxu1 %v15252_v5  ;;  %v10389_v19 = vpop.f32.mrb[62].mxu1  ;;  %11837 = vmatprep.mubr.msk.f32.mxu0 %vm18192_vm15, %v10388_v15  ;;  %vm18210_vm15 = vmmov %vm18177_vm0 }
 0x32c   :  { %13219 = vmatpush3.bf16.msra.mxu0 %v15308_v54  ;;  %v10390_v10 = vpop.f32.mrb[63].mxu1 }
 0x32d   :  { %13221 = vmatprep.subr.bf16.mxu0 %v15257_v11  ;;  %4073 = vmatmul.mubr.f32.gmra.mrb[168].mxu1 %v9645_v50  ;;  %v10391_v13 = vadd.f32 %v10390_v10, %v10389_v19  ;;  %v9432_v10 = vld [vmem:[%s18147_s5 + $0x98] sm:$0xff] }
 0x32e   :  { %13575 = vmatpush3.bf16.msra.mxu1 %v15304_v42  ;;  %4077 = vmatprep.mubr.f32.mxu1 %v9648_v6  ;;  %v9431_v6 = vld [vmem:[%s18147_s5 + $0x90] sm:$0xff] }
 0x32f   :  { %13577 = vmatprep.subr.bf16.mxu1 %v15255_v12  ;;  %11838 = vmatmul.mubr.msk.f32.gmra.mrb[38].mxu0 %vm18177_vm0, %v10391_v13  ;;  %v10504_v58 = vpop.f32.mrb[64].mxu1 }
 0x330   :  { %13223 = vmatpush3.bf16.msra.mxu0 %v15312_v7  ;;  %1940 = vmatprep.mubr.f32.mxu0 %v9414_v18  ;;  %v10505_v37 = vpop.f32.mrb[65].mxu1  ;;  %v13232_v18 = vpack.c.bf16 %v9432_v10, %v9431_v6 }
 0x331   :  { %13225 = vmatprep.subr.bf16.mxu0 %v15104_v26  ;;  %4078 = vmatmul.mubr.f32.gmra.mrb[170].mxu1 %v9647_v27  ;;  %v16142_v40 = vadd.f32 %v10505_v37, %v10504_v58 }
 0x332   :  { %13579 = vmatpush3.bf16.msra.mxu1 %v15308_v54  ;;  %4082 = vmatprep.mubr.f32.mxu1 %v9650_v51 }
 0x333   :  { %13581 = vmatprep.subr.bf16.mxu1 %v15257_v11  ;;  %v10507_v14 = vpop.f32.mrb[66].mxu1 }
 0x334   :  { %13227 = vmatpush3.bf16.msra.mxu0 %v15316_v4  ;;  %v10508_v48 = vpop.f32.mrb[67].mxu1 }
 0x335   :  { %4083 = vmatmul.mubr.f32.gmra.mrb[172].mxu1 %v9649_v17  ;;  %v16159_v55 = vadd.f32 %v10508_v48, %v10507_v14  ;;  %13229 = vmatprep.subr.bf16.mxu0 %v13228_v45  ;;  %v9457_v48 = vld [vmem:[%s18147_s5 + $0xa0] sm:$0xff] }
 0x336   :  { %13583 = vmatpush3.bf16.msra.mxu1 %v15312_v7  ;;  %4087 = vmatprep.mubr.f32.mxu1 %v9652_v23 }
 0x337   :  { %1941 = vmatmul.mubr.f32.vlgmr.msra.gmra.mrb[40].mxu0 %v9413_v38  ;;  %13585 = vmatprep.subr.bf16.mxu1 %v15104_v26  ;;  %v10510_v41 = vpop.f32.mrb[68].mxu1 }
 0x338   :  { %1945 = vmatprep.mubr.f32.mxu0 %v9416_v43  ;;  %v10511_v49 = vpop.f32.mrb[69].mxu1  ;;  %13231 = vmatpush3.bf16.msra.mxu0 %v13228_v45  ;;  %v9458_v43 = vld [vmem:[%s18147_s5 + $0xa8] sm:$0xff] }
 0x339   :  { %4088 = vmatmul.mubr.f32.gmra.mrb[174].mxu1 %v9651_v57  ;;  %v16175_v39 = vadd.f32 %v10511_v49, %v10510_v41  ;;  %13233 = vmatprep.subr.bf16.mxu0 %v13232_v18 }
 0x33a   :  { %13587 = vmatpush3.bf16.msra.mxu1 %v15316_v4  ;;  %4316 = vmatprep.mubr.f32.mxu1 %v9666_v1  ;;  %v16256_v1 = vpack.c.bf16 %v9458_v43, %v9457_v48 }
 0x33b   :  { %1946 = vmatmul.mubr.f32.gmra.mrb[42].mxu0 %v9415_v28  ;;  %13637 = vmatprep.subr.bf16.mxu1 %v15235_v16  ;;  %v10513_v34 = vpop.f32.mrb[70].mxu1 }
 0x33c   :  { %1950 = vmatprep.mubr.f32.mxu0 %v9418_v0  ;;  %v10514_v47 = vpop.f32.mrb[71].mxu1  ;;  %13235 = vmatpush3.bf16.msra.mxu0 %v13232_v18 }
 0x33d   :  { %4317 = vmatmul.mubr.f32.vlgmr.msra.gmra.mrb[176].mxu1 %v9665_v33  ;;  %v16188_v32 = vadd.f32 %v10514_v47, %v10513_v34  ;;  %13269 = vmatprep.subr.bf16.mxu0 %v16256_v1 }
 0x33e   :  { %13639 = vmatpush3.bf16.msra.mxu1 %v15237_v20 }
 0x33f   :  { %1951 = vmatmul.mubr.f32.gmra.mrb[44].mxu0 %v9417_v2  ;;  %13641 = vmatprep.subr.bf16.mxu1 %v15239_v21  ;;  %v10516_v44 = vpop.f32.mrb[72].mxu1 }
 0x340   :  { %1955 = vmatprep.mubr.f32.mxu0 %v9420_v53  ;;  %v10517_v46 = vpop.f32.mrb[73].mxu1 }
 0x341   :  { %v16198_v60 = vadd.f32 %v10517_v46, %v10516_v44 }
 0x342   :  { %13643 = vmatpush3.bf16.msra.mxu1 %v15271_v30 }
 0x343   :  { %1956 = vmatmul.mubr.f32.gmra.mrb[46].mxu0 %v9419_v31  ;;  %13645 = vmatprep.subr.bf16.mxu1 %v15241_v63  ;;  %v10519_v9 = vpop.f32.mrb[74].mxu1 }
 0x344   :  { %1960 = vmatprep.mubr.f32.mxu0 %v9422_v59  ;;  %v10520_v15 = vpop.f32.mrb[75].mxu1 }
 0x345   :  { %v16234_v50 = vadd.f32 %v10520_v15, %v10519_v9 }
 0x346   :  { %13647 = vmatpush3.bf16.msra.mxu1 %v15288_v56 }
 0x347   :  { %1961 = vmatmul.mubr.f32.gmra.mrb[48].mxu0 %v9421_v22  ;;  %13649 = vmatprep.subr.bf16.mxu1 %v15250_v25  ;;  %v10522_v19 = vpop.f32.mrb[76].mxu1 }
 0x348   :  { %1965 = vmatprep.mubr.f32.mxu0 %v9424_v61  ;;  %v10523_v13 = vpop.f32.mrb[77].mxu1 }
 0x349   :  { %v16242_v27 = vadd.f32 %v10523_v13, %v10522_v19 }
 0x34a   :  { %13651 = vmatpush3.bf16.msra.mxu1 %v15298_v52 }
 0x34b   :  { %1966 = vmatmul.mubr.f32.gmra.mrb[50].mxu0 %v9423_v62  ;;  %13653 = vmatprep.subr.bf16.mxu1 %v15252_v5  ;;  %v10525_v24 = vpop.f32.mrb[78].mxu1 }
 0x34c   :  { %1970 = vmatprep.mubr.f32.mxu0 %v9426_v3  ;;  %v10526_v29 = vpop.f32.mrb[79].mxu1 }
 0x34d   :  { %v16244_v51 = vadd.f32 %v10526_v29, %v10525_v24 }
 0x34e   :  { %13655 = vmatpush3.bf16.msra.mxu1 %v15304_v42 }
 0x34f   :  { %1971 = vmatmul.mubr.f32.gmra.mrb[52].mxu0 %v9425_v8  ;;  %13657 = vmatprep.subr.bf16.mxu1 %v15255_v12  ;;  %v10572_v58 = vpop.f32.mrb[80].mxu1 }
 0x350   :  { %1975 = vmatprep.mubr.f32.mxu0 %v9428_v36  ;;  %v10573_v37 = vpop.f32.mrb[81].mxu1 }
 0x351   :  { %v16246_v45 = vadd.f32 %v10573_v37, %v10572_v58 }
 0x352   :  { %13659 = vmatpush3.bf16.msra.mxu1 %v15308_v54 }
 0x353   :  { %1976 = vmatmul.mubr.f32.gmra.mrb[54].mxu0 %v9427_v35  ;;  %13661 = vmatprep.subr.bf16.mxu1 %v15257_v11  ;;  %v10575_v17 = vpop.f32.mrb[82].mxu1 }
 0x354   :  { %v10576_v23 = vpop.f32.mrb[83].mxu1 }
 0x355   :  { %v16248_v14 = vadd.f32 %v10576_v23, %v10575_v17 }
 0x356   :  { %13663 = vmatpush3.bf16.msra.mxu1 %v15312_v7 }
 0x357   :  { %13665 = vmatprep.subr.bf16.mxu1 %v15104_v26  ;;  %v10578_v38 = vpop.f32.mrb[84].mxu1 }
 0x358   :  { %v10579_v57 = vpop.f32.mrb[85].mxu1 }
 0x359   :  { %v16258_v41 = vadd.f32 %v10579_v57, %v10578_v38 }
 0x35a   :  { %13667 = vmatpush3.bf16.msra.mxu1 %v15316_v4 }
 0x35b   :  { %v10581_v28 = vpop.f32.mrb[86].mxu1 }
 0x35c   :  { %v10582_v49 = vpop.f32.mrb[87].mxu1 }
 0x35d   :  { %v16261_v0 = vadd.f32 %v10582_v49, %v10581_v28 }
 0x35f   :  { %v10584_v33 = vpop.f32.mrb[88].mxu1 }
 0x360   :  { %v10585_v34 = vpop.f32.mrb[89].mxu1 }
 0x361   :  { %v16263_v2 = vadd.f32 %v10585_v34, %v10584_v33 }
 0x363   :  { %v10587_v47 = vpop.f32.mrb[90].mxu1 }
 0x364   :  { %v10588_v53 = vpop.f32.mrb[91].mxu1 }
 0x365   :  { %v16265_v44 = vadd.f32 %v10588_v53, %v10587_v47 }
 0x367   :  { %v10590_v31 = vpop.f32.mrb[92].mxu1 }
 0x368   :  { %v10591_v46 = vpop.f32.mrb[93].mxu1 }
 0x369   :  { %v16267_v59 = vadd.f32 %v10591_v46, %v10590_v31 }
 0x36b   :  { %v10593_v9 = vpop.f32.mrb[94].mxu1 }
 0x36c   :  { %v10594_v22 = vpop.f32.mrb[95].mxu1 }
 0x36d   :  { %v16269_v61 = vadd.f32 %v10594_v22, %v10593_v9 }
 0x36f   :  { %v10640_v62 = vpop.f32.mrb[96].mxu1 }
 0x370   :  { %v10641_v3 = vpop.f32.mrb[97].mxu1 }
 0x371   :  { %v16271_v8 = vadd.f32 %v10641_v3, %v10640_v62 }
 0x373   :  { %v10643_v36 = vpop.f32.mrb[98].mxu1 }
 0x374   :  { %v10644_v35 = vpop.f32.mrb[99].mxu1 }
 0x375   :  { %v16273_v15 = vadd.f32 %v10644_v35, %v10643_v36 }
 0x377   :  { %v10646_v19 = vpop.f32.mrb[100].mxu1 }
 0x378   :  { %v10647_v6 = vpop.f32.mrb[101].mxu1 }
 0x379   :  { %v16275_v10 = vadd.f32 %v10647_v6, %v10646_v19 }
 0x37b   :  { %v10649_v13 = vpop.f32.mrb[102].mxu1 }
 0x37c   :  { %v10650_v18 = vpop.f32.mrb[103].mxu1 }
 0x37d   :  { %v16277_v24 = vadd.f32 %v10650_v18, %v10649_v13 }
 0x37f   :  { %v10652_v29 = vpop.f32.mrb[104].mxu1 }
 0x380   :  { %v10653_v58 = vpop.f32.mrb[105].mxu1 }
 0x381   :  { %v16279_v37 = vadd.f32 %v10653_v58, %v10652_v29 }
 0x383   :  { %v10655_v17 = vpop.f32.mrb[106].mxu1 }
 0x384   :  { %v10656_v23 = vpop.f32.mrb[107].mxu1 }
 0x385   :  { %v16281_v38 = vadd.f32 %v10656_v23, %v10655_v17 }
 0x387   :  { %v10658_v48 = vpop.f32.mrb[108].mxu1 }
 0x388   :  { %v10659_v43 = vpop.f32.mrb[109].mxu1 }
 0x389   :  { %v16283_v57 = vadd.f32 %v10659_v43, %v10658_v48 }
 0x38b   :  { %v10661_v28 = vpop.f32.mrb[110].mxu1 }
 0x38c   :  { %v10662_v49 = vpop.f32.mrb[111].mxu1 }
 0x38d   :  { %v16285_v33 = vadd.f32 %v10662_v49, %v10661_v28 }
 0x38f   :  { %v10708_v34 = vpop.f32.mrb[112].mxu1 }
 0x390   :  { %v10709_v47 = vpop.f32.mrb[113].mxu1 }
 0x391   :  { %v16287_v53 = vadd.f32 %v10709_v47, %v10708_v34 }
 0x393   :  { %v10711_v31 = vpop.f32.mrb[114].mxu1 }
 0x394   :  { %v10712_v46 = vpop.f32.mrb[115].mxu1 }
 0x395   :  { %v16289_v9 = vadd.f32 %v10712_v46, %v10711_v31 }
 0x397   :  { %v10714_v22 = vpop.f32.mrb[116].mxu1 }
 0x398   :  { %v10715_v62 = vpop.f32.mrb[117].mxu1 }
 0x399   :  { %v16291_v3 = vadd.f32 %v10715_v62, %v10714_v22  ;;  %v9459_v22 = vld [vmem:[%s18147_s5 + $0xb0] sm:$0xff]  ;;  %v9460_v62 = vld [vmem:[%s18147_s5 + $0xb8] sm:$0xff] }
 0x39b   :  { %v10717_v36 = vpop.f32.mrb[118].mxu1 }
 0x39c   :  { %v10718_v35 = vpop.f32.mrb[119].mxu1 }
 0x39d   :  { %v16293_v19 = vadd.f32 %v10718_v35, %v10717_v36 }
 0x39f   :  { %v10720_v6 = vpop.f32.mrb[120].mxu1 }
 0x3a0   :  { %v10721_v13 = vpop.f32.mrb[121].mxu1 }
 0x3a1   :  { %v16295_v18 = vadd.f32 %v10721_v13, %v10720_v6  ;;  %v13272_v13 = vpack.c.bf16 %v9460_v62, %v9459_v22  ;;  %v9668_v62 = vld [vmem:[%s18144_s4 + $0x698] sm:$0xff] }
 0x3a2   :  { %4321 = vmatprep.mubr.f32.mxu1 %v9668_v62 }
 0x3a3   :  { %v10723_v29 = vpop.f32.mrb[122].mxu1 }
 0x3a4   :  { %v10724_v58 = vpop.f32.mrb[123].mxu1 }
 0x3a5   :  { %v16297_v17 = vadd.f32 %v10724_v58, %v10723_v29  ;;  %v9485_v29 = vld [vmem:[%s18147_s5 + $0xc0] sm:$0xff]  ;;  %v9486_v58 = vld [vmem:[%s18147_s5 + $0xc8] sm:$0xff] }
 0x3a7   :  { %v10726_v23 = vpop.f32.mrb[124].mxu1 }
 0x3a8   :  { %v10727_v48 = vpop.f32.mrb[125].mxu1 }
 0x3a9   :  { %v16299_v43 = vadd.f32 %v10727_v48, %v10726_v23 }
 0x3ab   :  { %v10729_v28 = vpop.f32.mrb[126].mxu1 }
 0x3ac   :  { %v10730_v49 = vpop.f32.mrb[127].mxu1 }
 0x3ad   :  { %v16301_v34 = vadd.f32 %v10730_v49, %v10729_v28  ;;  %v16318_v49 = vpack.c.bf16 %v9486_v58, %v9485_v29 }
 0x40a   :  { %v10436_v47 = vpop.f32.mrb[40].mxu0 }
 0x40b   :  { %v10437_v31 = vpop.f32.mrb[41].mxu0 }
 0x40c   :  { %v10438_v46 = vadd.f32 %v10437_v31, %v10436_v47 }
 0x40e   :  { %v10439_v36 = vpop.f32.mrb[42].mxu0  ;;  %11848 = vmatprep.mubr.msk.f32.mxu0 %vm18193_vm2, %v10438_v46  ;;  %vm18211_vm2 = vmmov %vm18177_vm0 }
 0x40f   :  { %v10440_v35 = vpop.f32.mrb[43].mxu0 }
 0x410   :  { %v10441_v6 = vadd.f32 %v10440_v35, %v10439_v36  ;;  %v9670_v36 = vld [vmem:[%s18144_s4 + $0x6a8] sm:$0xff]  ;;  %v10844_v35 = vpop.f32.mrb[128].mxu1 }
 0x412   :  { %v10442_v23 = vpop.f32.mrb[44].mxu0  ;;  %11849 = vmatmul.mubr.msk.f32.vlgmr.msra.gmra.mrb[32].mxu0 %vm18194_vm3, %v10441_v6  ;;  %vm18212_vm3 = vmmov %vm18177_vm0 }
 0x413   :  { %v10443_v48 = vpop.f32.mrb[45].mxu0  ;;  %13271 = vmatpush3.bf16.msra.mxu0 %v16256_v1  ;;  %v9667_v1 = vld [vmem:[%s18144_s4 + $0x690] sm:$0xff] }
 0x414   :  { %v10444_v28 = vadd.f32 %v10443_v48, %v10442_v23  ;;  %13273 = vmatprep.subr.bf16.mxu0 %v13272_v13  ;;  %4322 = vmatmul.mubr.f32.gmra.mrb[178].mxu1 %v9667_v1  ;;  %v9669_v48 = vld [vmem:[%s18144_s4 + $0x6a0] sm:$0xff] }
 0x415   :  { %4326 = vmatprep.mubr.f32.mxu1 %v9670_v36 }
 0x416   :  { %v10445_v47 = vpop.f32.mrb[46].mxu0  ;;  %11851 = vmatprep.mubr.msk.f32.mxu0 %vm18195_vm4, %v10444_v28  ;;  %vm18213_vm4 = vmmov %vm18177_vm0 }
 0x417   :  { %v10446_v31 = vpop.f32.mrb[47].mxu0  ;;  %13275 = vmatpush3.bf16.msra.mxu0 %v13272_v13  ;;  %v10845_v13 = vpop.f32.mrb[129].mxu1 }
 0x418   :  { %v10447_v46 = vadd.f32 %v10446_v31, %v10445_v47  ;;  %13309 = vmatprep.subr.bf16.mxu0 %v16318_v49  ;;  %v16332_v58 = vadd.f32 %v10845_v13, %v10844_v35  ;;  %v10847_v23 = vpop.f32.mrb[130].mxu1  ;;  %v9672_v31 = vld [vmem:[%s18144_s4 + $0x6b8] sm:$0xff]  ;;  %4327 = vmatmul.mubr.f32.gmra.mrb[180].mxu1 %v9669_v48  ;;  %v9671_v13 = vld [vmem:[%s18144_s4 + $0x6b0] sm:$0xff] }
 0x419   :  { %v10848_v28 = vpop.f32.mrb[131].mxu1  ;;  %4331 = vmatprep.mubr.f32.mxu1 %v9672_v31 }
 0x41a   :  { %v10448_v22 = vpop.f32.mrb[48].mxu0  ;;  %11852 = vmatmul.mubr.msk.f32.gmra.mrb[34].mxu0 %vm18196_vm5, %v10447_v46  ;;  %18197 = vst [vmem:[#allocation2_spill] sm:$0xff] %v16332_v58  ;;  %v16341_v46 = vadd.f32 %v10848_v28, %v10847_v23  ;;  %v9674_v23 = vld [vmem:[%s18144_s4 + $0x6c8] sm:$0xff]  ;;  %vm18214_vm5 = vmmov %vm18177_vm0 }
 0x41b   :  { %v10449_v6 = vpop.f32.mrb[49].mxu0 }
 0x41c   :  { %v10450_v29 = vadd.f32 %v10449_v6, %v10448_v22  ;;  %v10850_v22 = vpop.f32.mrb[132].mxu1  ;;  %4332 = vmatmul.mubr.f32.gmra.mrb[182].mxu1 %v9671_v13  ;;  %v9488_v13 = vld [vmem:[%s18147_s5 + $0xd8] sm:$0xff] }
 0x41d   :  { %v10851_v1 = vpop.f32.mrb[133].mxu1  ;;  %4336 = vmatprep.mubr.f32.mxu1 %v9674_v23  ;;  %v9675_v23 = vld [vmem:[%s18144_s4 + $0x6d0] sm:$0xff] }
 0x41e   :  { %v10451_v47 = vpop.f32.mrb[50].mxu0  ;;  %11854 = vmatprep.mubr.msk.f32.mxu0 %vm18198_vm1, %v10450_v29  ;;  %v16343_v36 = vadd.f32 %v10851_v1, %v10850_v22  ;;  %v10853_v6 = vpop.f32.mrb[134].mxu1  ;;  %vm18215_vm1 = vmmov %vm18177_vm0 }
 0x41f   :  { %v10452_v62 = vpop.f32.mrb[51].mxu0  ;;  %v10854_v29 = vpop.f32.mrb[135].mxu1 }
 0x420   :  { %v10453_v35 = vadd.f32 %v10452_v62, %v10451_v47  ;;  %18199 = vst [vmem:[#allocation3_spill] sm:$0xff] %v16343_v36  ;;  %v16352_v28 = vadd.f32 %v10854_v29, %v10853_v6  ;;  %v10856_v47 = vpop.f32.mrb[136].mxu1  ;;  %v9676_v6 = vld [vmem:[%s18144_s4 + $0x6d8] sm:$0xff] }
 0x421   :  { %v10857_v22 = vpop.f32.mrb[137].mxu1 }
 0x422   :  { %v10454_v58 = vpop.f32.mrb[52].mxu0  ;;  %11855 = vmatmul.mubr.msk.f32.gmra.mrb[36].mxu0 %vm18200_vm6, %v10453_v35  ;;  %18201 = vst [vmem:[#allocation4_spill] sm:$0xff] %v16352_v28  ;;  %v16354_v31 = vadd.f32 %v10857_v22, %v10856_v47  ;;  %v16356_v1 = vpop.f32.mrb[138].mxu1  ;;  %v9673_v35 = vld [vmem:[%s18144_s4 + $0x6c0] sm:$0xff]  ;;  %v9514_v22 = vld [vmem:[%s18147_s5 + $0xe8] sm:$0xff]  ;;  %vm18216_vm6 = vmmov %vm18177_vm0 }
 0x423   :  { %v10455_v48 = vpop.f32.mrb[53].mxu0  ;;  %4337 = vmatmul.mubr.f32.gmra.mrb[184].mxu1 %v9673_v35  ;;  %v9679_v35 = vld [vmem:[%s18144_s4 + $0x6f0] sm:$0xff] }
 0x424   :  { %v10456_v62 = vadd.f32 %v10455_v48, %v10454_v58  ;;  %v9487_v58 = vld [vmem:[%s18147_s5 + $0xd0] sm:$0xff]  ;;  %4341 = vmatprep.mubr.f32.mxu1 %v9676_v6  ;;  %v9513_v48 = vld [vmem:[%s18147_s5 + $0xe0] sm:$0xff]  ;;  %v9572_v6 = vld [vmem:[%s18147_s5 + $0x138] sm:$0xff] }
 0x425   :  { %v13312_v47 = vpack.c.bf16 %v9488_v13, %v9487_v58 }
 0x426   :  { %v10457_v36 = vpop.f32.mrb[54].mxu0  ;;  %11857 = vmatprep.mubr.msk.f32.mxu0 %vm18202_vm7, %v10456_v62  ;;  %v13348_v62 = vpack.c.bf16 %v9514_v22, %v9513_v48  ;;  %vm18217_vm7 = vmmov %vm18177_vm0 }
 0x427   :  { %v10458_v29 = vpop.f32.mrb[55].mxu0  ;;  %4342 = vmatmul.mubr.f32.gmra.mrb[186].mxu1 %v9675_v23 }
 0x428   :  { %v10459_v28 = vadd.f32 %v10458_v29, %v10457_v36  ;;  %v9678_v36 = vld [vmem:[%s18144_s4 + $0x6e8] sm:$0xff] }
 0x429   :  { %4346 = vmatprep.mubr.f32.mxu1 %v9678_v36 }
 0x42a   :  { %11858 = vmatmul.mubr.msk.f32.gmra.mrb[38].mxu0 %vm18203_vm8, %v10459_v28  ;;  %v9677_v28 = vld [vmem:[%s18144_s4 + $0x6e0] sm:$0xff]  ;;  %vm18218_vm8 = vmmov %vm18177_vm0 }
 0x42b   :  { %11868 = vmatprep.mubr.msk.f32.mxu0 %vm18204_vm9, %v16142_v40  ;;  %v9680_v40 = vld [vmem:[%s18144_s4 + $0x6f8] sm:$0xff]  ;;  %4347 = vmatmul.mubr.f32.gmra.mrb[188].mxu1 %v9677_v28  ;;  %vm18219_vm9 = vmmov %vm18177_vm0 }
 0x42c   :  { %4351 = vmatprep.mubr.f32.mxu1 %v9680_v40 }
 0x42e   :  { %11869 = vmatmul.mubr.msk.f32.vlgmr.msra.gmra.mrb[32].mxu0 %vm18205_vm10, %v16159_v55  ;;  %v9515_v55 = vld [vmem:[%s18147_s5 + $0xf0] sm:$0xff]  ;;  %vm18220_vm10 = vmmov %vm18177_vm0 }
 0x42f   :  { %11871 = vmatprep.mubr.msk.f32.mxu0 %vm18206_vm11, %v16175_v39  ;;  %13311 = vmatpush3.bf16.msra.mxu0 %v16318_v49  ;;  %v9516_v39 = vld [vmem:[%s18147_s5 + $0xf8] sm:$0xff]  ;;  %vm18221_vm11 = vmmov %vm18177_vm0  ;;  %v9571_v49 = vld [vmem:[%s18147_s5 + $0x130] sm:$0xff] }
 0x430   :  { %13313 = vmatprep.subr.bf16.mxu0 %v13312_v47  ;;  %4352 = vmatmul.mubr.f32.gmra.mrb[190].mxu1 %v9679_v35  ;;  %v13432_v29 = vpack.c.bf16 %v9572_v6, %v9571_v49 }
 0x432   :  { %11872 = vmatmul.mubr.msk.f32.gmra.mrb[34].mxu0 %vm18207_vm12, %v16188_v32  ;;  %v13352_v32 = vpack.c.bf16 %v9516_v39, %v9515_v55  ;;  %vm18222_vm12 = vmmov %vm18177_vm0  ;;  %v9597_v55 = vld [vmem:[%s18147_s5 + $0x140] sm:$0xff]  ;;  %v9598_v39 = vld [vmem:[%s18147_s5 + $0x148] sm:$0xff] }
 0x433   :  { %11874 = vmatprep.mubr.msk.f32.mxu0 %vm18208_vm13, %v16198_v60  ;;  %13315 = vmatpush3.bf16.msra.mxu0 %v13312_v47  ;;  %v9541_v60 = vld [vmem:[%s18147_s5 + $0x100] sm:$0xff]  ;;  %vm18223_vm13 = vmmov %vm18177_vm0 }
 0x434   :  { %13349 = vmatprep.subr.bf16.mxu0 %v13348_v62 }
 0x436   :  { %11875 = vmatmul.mubr.msk.f32.gmra.mrb[36].mxu0 %vm18209_vm14, %v16234_v50  ;;  %v9542_v50 = vld [vmem:[%s18147_s5 + $0x108] sm:$0xff]  ;;  %vm18224_vm14 = vmmov %vm18177_vm0 }
 0x437   :  { %11877 = vmatprep.mubr.msk.f32.mxu0 %vm18210_vm15, %v16242_v27  ;;  %v13388_v27 = vpack.c.bf16 %v9542_v50, %v9541_v60  ;;  %vm18225_vm15 = vmmov %vm18177_vm0  ;;  %v16569_v60 = vpack.c.bf16 %v9598_v39, %v9597_v55 }
 0x43a   :  { %11878 = vmatmul.mubr.msk.f32.gmra.mrb[38].mxu0 %vm18177_vm0, %v16244_v51  ;;  %v9543_v51 = vld [vmem:[%s18147_s5 + $0x110] sm:$0xff] }
 0x43b   :  { %11888 = vmatprep.mubr.msk.f32.mxu0 %vm18211_vm2, %v16246_v45  ;;  %v9544_v45 = vld [vmem:[%s18147_s5 + $0x118] sm:$0xff]  ;;  %vm18226_vm2 = vmmov %vm18177_vm0 }
 0x43e   :  { %11889 = vmatmul.mubr.msk.f32.vlgmr.msra.gmra.mrb[32].mxu0 %vm18212_vm3, %v16248_v14  ;;  %v13392_v14 = vpack.c.bf16 %v9544_v45, %v9543_v51  ;;  %vm18227_vm3 = vmmov %vm18177_vm0 }
 0x43f   :  { %11891 = vmatprep.mubr.msk.f32.mxu0 %vm18213_vm4, %v16258_v41  ;;  %13351 = vmatpush3.bf16.msra.mxu0 %v13348_v62  ;;  %vm18228_vm4 = vmmov %vm18177_vm0  ;;  %v9554_v41 = vld [vmem:[%s18144_s4 + $0x488] sm:$0xff] }
 0x440   :  { %13353 = vmatprep.subr.bf16.mxu0 %v13352_v32 }
 0x442   :  { %11892 = vmatmul.mubr.msk.f32.gmra.mrb[34].mxu0 %vm18214_vm5, %v16261_v0  ;;  %vm18229_vm5 = vmmov %vm18177_vm0  ;;  %v9569_v0 = vld [vmem:[%s18147_s5 + $0x120] sm:$0xff] }
 0x443   :  { %11894 = vmatprep.mubr.msk.f32.mxu0 %vm18215_vm1, %v16263_v2  ;;  %13355 = vmatpush3.bf16.msra.mxu0 %v13352_v32  ;;  %vm18230_vm1 = vmmov %vm18177_vm0  ;;  %v9570_v2 = vld [vmem:[%s18147_s5 + $0x128] sm:$0xff] }
 0x444   :  { %13389 = vmatprep.subr.bf16.mxu0 %v13388_v27 }
 0x446   :  { %11895 = vmatmul.mubr.msk.f32.gmra.mrb[36].mxu0 %vm18216_vm6, %v16265_v44  ;;  %vm18231_vm6 = vmmov %vm18177_vm0  ;;  %v13428_v44 = vpack.c.bf16 %v9570_v2, %v9569_v0 }
 0x447   :  { %11897 = vmatprep.mubr.msk.f32.mxu0 %vm18217_vm7, %v16267_v59  ;;  %vm18232_vm7 = vmmov %vm18177_vm0  ;;  %v9553_v59 = vld [vmem:[%s18144_s4 + $0x480] sm:$0xff] }
 0x44a   :  { %11898 = vmatmul.mubr.msk.f32.gmra.mrb[38].mxu0 %vm18218_vm8, %v16269_v61  ;;  %vm18233_vm8 = vmmov %vm18177_vm0  ;;  %v9556_v61 = vld [vmem:[%s18144_s4 + $0x498] sm:$0xff] }
 0x44b   :  { %11908 = vmatprep.mubr.msk.f32.mxu0 %vm18219_vm9, %v16271_v8  ;;  %v9555_v8 = vld [vmem:[%s18144_s4 + $0x490] sm:$0xff]  ;;  %vm18234_vm9 = vmmov %vm18177_vm0 }
 0x44e   :  { %11909 = vmatmul.mubr.msk.f32.vlgmr.msra.gmra.mrb[32].mxu0 %vm18220_vm10, %v16273_v15  ;;  %v9558_v15 = vld [vmem:[%s18144_s4 + $0x4a8] sm:$0xff]  ;;  %vm18235_vm10 = vmmov %vm18177_vm0 }
 0x44f   :  { %13391 = vmatpush3.bf16.msra.mxu0 %v13388_v27  ;;  %11911 = vmatprep.mubr.msk.f32.mxu0 %vm18221_vm11, %v16275_v10  ;;  %v9557_v10 = vld [vmem:[%s18144_s4 + $0x4a0] sm:$0xff]  ;;  %vm18236_vm11 = vmmov %vm18177_vm0 }
 0x450   :  { %13393 = vmatprep.subr.bf16.mxu0 %v13392_v14 }
 0x452   :  { %11912 = vmatmul.mubr.msk.f32.gmra.mrb[34].mxu0 %vm18222_vm12, %v16277_v24  ;;  %v9560_v24 = vld [vmem:[%s18144_s4 + $0x4b8] sm:$0xff]  ;;  %vm18237_vm12 = vmmov %vm18177_vm0 }
 0x453   :  { %13395 = vmatpush3.bf16.msra.mxu0 %v13392_v14  ;;  %11914 = vmatprep.mubr.msk.f32.mxu0 %vm18223_vm13, %v16279_v37  ;;  %v9559_v37 = vld [vmem:[%s18144_s4 + $0x4b0] sm:$0xff]  ;;  %vm18238_vm13 = vmmov %vm18177_vm0 }
 0x454   :  { %13397 = vmatprep.subr.bf16.mxu0 %v15235_v16 }
 0x456   :  { %11915 = vmatmul.mubr.msk.f32.gmra.mrb[36].mxu0 %vm18224_vm14, %v16281_v38  ;;  %v9562_v38 = vld [vmem:[%s18144_s4 + $0x4c8] sm:$0xff]  ;;  %vm18239_vm14 = vmmov %vm18177_vm0 }
 0x457   :  { %11917 = vmatprep.mubr.msk.f32.mxu0 %vm18225_vm15, %v16283_v57  ;;  %v9561_v57 = vld [vmem:[%s18144_s4 + $0x4c0] sm:$0xff]  ;;  %vm18240_vm15 = vmmov %vm18177_vm0 }
 0x45a   :  { %11918 = vmatmul.mubr.msk.f32.gmra.mrb[38].mxu0 %vm18177_vm0, %v16285_v33  ;;  %v9564_v33 = vld [vmem:[%s18144_s4 + $0x4d8] sm:$0xff] }
 0x45b   :  { %11928 = vmatprep.mubr.msk.f32.mxu0 %vm18226_vm2, %v16287_v53  ;;  %v9563_v53 = vld [vmem:[%s18144_s4 + $0x4d0] sm:$0xff]  ;;  %vm18242_vm2 = vmmov %vm18177_vm0 }
 0x45e   :  { %11929 = vmatmul.mubr.msk.f32.vlgmr.msra.gmra.mrb[32].mxu0 %vm18227_vm3, %v16289_v9  ;;  %v9566_v9 = vld [vmem:[%s18144_s4 + $0x4e8] sm:$0xff]  ;;  %vm18243_vm3 = vmmov %vm18177_vm0 }
 0x45f   :  { %13399 = vmatpush3.bf16.msra.mxu0 %v15237_v20  ;;  %11931 = vmatprep.mubr.msk.f32.mxu0 %vm18228_vm4, %v16291_v3  ;;  %v9565_v3 = vld [vmem:[%s18144_s4 + $0x4e0] sm:$0xff]  ;;  %vm18245_vm4 = vmmov %vm18177_vm0 }
 0x460   :  { %13401 = vmatprep.subr.bf16.mxu0 %v15239_v21 }
 0x462   :  { %11932 = vmatmul.mubr.msk.f32.gmra.mrb[34].mxu0 %vm18229_vm5, %v16293_v19  ;;  %v9568_v19 = vld [vmem:[%s18144_s4 + $0x4f8] sm:$0xff]  ;;  %vm18247_vm5 = vmmov %vm18177_vm0 }
 0x463   :  { %13403 = vmatpush3.bf16.msra.mxu0 %v15271_v30  ;;  %11934 = vmatprep.mubr.msk.f32.mxu0 %vm18230_vm1, %v16295_v18  ;;  %v9567_v18 = vld [vmem:[%s18144_s4 + $0x4f0] sm:$0xff]  ;;  %vm18248_vm1 = vmmov %vm18177_vm0 }
 0x464   :  { %13405 = vmatprep.subr.bf16.mxu0 %v15241_v63 }
 0x466   :  { %11935 = vmatmul.mubr.msk.f32.gmra.mrb[36].mxu0 %vm18231_vm6, %v16297_v17  ;;  %v10860_v17 = vpop.f32.mrb[139].mxu1  ;;  %vm18249_vm6 = vmmov %vm18177_vm0 }
 0x467   :  { %13407 = vmatpush3.bf16.msra.mxu0 %v15288_v56  ;;  %11937 = vmatprep.mubr.msk.f32.mxu0 %vm18232_vm7, %v16299_v43  ;;  %v16547_v43 = vadd.f32 %v10860_v17, %v16356_v1  ;;  %vm18250_vm7 = vmmov %vm18177_vm0 }
 0x468   :  { %13409 = vmatprep.subr.bf16.mxu0 %v15250_v25 }
 0x46a   :  { %11938 = vmatmul.mubr.msk.f32.gmra.mrb[38].mxu0 %vm18233_vm8, %v16301_v34  ;;  %v10862_v34 = vpop.f32.mrb[140].mxu1  ;;  %vm18251_vm8 = vmmov %vm18177_vm0 }
 0x46b   :  { %13411 = vmatpush3.bf16.msra.mxu0 %v15298_v52  ;;  %3260 = vmatprep.mubr.f32.mxu0 %v9554_v41  ;;  %v10863_v58 = vpop.f32.mrb[141].mxu1 }
 0x46c   :  { %13413 = vmatprep.subr.bf16.mxu0 %v15252_v5  ;;  %v16555_v13 = vadd.f32 %v10863_v58, %v10862_v34  ;;  %v10865_v23 = vpop.f32.mrb[142].mxu1 }
 0x46d   :  { %v10866_v36 = vpop.f32.mrb[143].mxu1 }
 0x46e   :  { %v16557_v47 = vadd.f32 %v10866_v36, %v10865_v23  ;;  %v10912_v1 = vpop.f32.mrb[144].mxu1 }
 0x46f   :  { %13415 = vmatpush3.bf16.msra.mxu0 %v15304_v42  ;;  %v10913_v48 = vpop.f32.mrb[145].mxu1 }
 0x470   :  { %13417 = vmatprep.subr.bf16.mxu0 %v15255_v12  ;;  %v16559_v22 = vadd.f32 %v10913_v48, %v10912_v1  ;;  %v10915_v28 = vpop.f32.mrb[146].mxu1 }
 0x471   :  { %v10916_v40 = vpop.f32.mrb[147].mxu1 }
 0x472   :  { %v16561_v62 = vadd.f32 %v10916_v40, %v10915_v28  ;;  %v10918_v35 = vpop.f32.mrb[148].mxu1 }
 0x473   :  { %13419 = vmatpush3.bf16.msra.mxu0 %v15308_v54  ;;  %v10919_v32 = vpop.f32.mrb[149].mxu1 }
 0x474   :  { %13421 = vmatprep.subr.bf16.mxu0 %v15257_v11  ;;  %v16571_v50 = vadd.f32 %v10919_v32, %v10918_v35  ;;  %v10921_v27 = vpop.f32.mrb[150].mxu1 }
 0x475   :  { %v10922_v51 = vpop.f32.mrb[151].mxu1 }
 0x476   :  { %v16574_v45 = vadd.f32 %v10922_v51, %v10921_v27  ;;  %v10924_v14 = vpop.f32.mrb[152].mxu1 }
 0x477   :  { %13423 = vmatpush3.bf16.msra.mxu0 %v15312_v7  ;;  %v10925_v41 = vpop.f32.mrb[153].mxu1 }
 0x478   :  { %13425 = vmatprep.subr.bf16.mxu0 %v15104_v26  ;;  %v16576_v0 = vadd.f32 %v10925_v41, %v10924_v14  ;;  %v10927_v2 = vpop.f32.mrb[154].mxu1 }
 0x47b   :  { %13427 = vmatpush3.bf16.msra.mxu0 %v15316_v4 }
 0x47c   :  { %13429 = vmatprep.subr.bf16.mxu0 %v13428_v44 }
 0x47e   :  { %3261 = vmatmul.mubr.f32.vlgmr.msra.gmra.mrb[56].mxu0 %v9553_v59 }
 0x47f   :  { %3265 = vmatprep.mubr.f32.mxu0 %v9556_v61  ;;  %13431 = vmatpush3.bf16.msra.mxu0 %v13428_v44  ;;  %v10928_v44 = vpop.f32.mrb[155].mxu1 }
 0x480   :  { %13433 = vmatprep.subr.bf16.mxu0 %v13432_v29  ;;  %v16578_v59 = vadd.f32 %v10928_v44, %v10927_v2  ;;  %v10930_v61 = vpop.f32.mrb[156].mxu1 }
 0x482   :  { %3266 = vmatmul.mubr.f32.gmra.mrb[58].mxu0 %v9555_v8  ;;  %v10931_v8 = vpop.f32.mrb[157].mxu1 }
 0x483   :  { %3270 = vmatprep.mubr.f32.mxu0 %v9558_v15  ;;  %13435 = vmatpush3.bf16.msra.mxu0 %v13432_v29  ;;  %v16580_v15 = vadd.f32 %v10931_v8, %v10930_v61 }
 0x484   :  { %13469 = vmatprep.subr.bf16.mxu0 %v16569_v60 }
 0x486   :  { %3271 = vmatmul.mubr.f32.gmra.mrb[60].mxu0 %v9557_v10  ;;  %v10933_v10 = vpop.f32.mrb[158].mxu1 }
 0x487   :  { %3275 = vmatprep.mubr.f32.mxu0 %v9560_v24  ;;  %v10934_v24 = vpop.f32.mrb[159].mxu1 }
 0x48a   :  { %3276 = vmatmul.mubr.f32.gmra.mrb[62].mxu0 %v9559_v37  ;;  %v16582_v37 = vadd.f32 %v10934_v24, %v10933_v10 }
 0x48b   :  { %3280 = vmatprep.mubr.f32.mxu0 %v9562_v38  ;;  %v10980_v38 = vpop.f32.mrb[160].mxu1 }
 0x48e   :  { %3281 = vmatmul.mubr.f32.gmra.mrb[64].mxu0 %v9561_v57  ;;  %v10981_v57 = vpop.f32.mrb[161].mxu1 }
 0x48f   :  { %3285 = vmatprep.mubr.f32.mxu0 %v9564_v33  ;;  %v16584_v33 = vadd.f32 %v10981_v57, %v10980_v38 }
 0x492   :  { %3286 = vmatmul.mubr.f32.gmra.mrb[66].mxu0 %v9563_v53  ;;  %v10983_v53 = vpop.f32.mrb[162].mxu1 }
 0x493   :  { %3290 = vmatprep.mubr.f32.mxu0 %v9566_v9  ;;  %v10984_v9 = vpop.f32.mrb[163].mxu1 }
 0x496   :  { %3291 = vmatmul.mubr.f32.gmra.mrb[68].mxu0 %v9565_v3  ;;  %v16586_v3 = vadd.f32 %v10984_v9, %v10983_v53 }
 0x497   :  { %3295 = vmatprep.mubr.f32.mxu0 %v9568_v19  ;;  %v10986_v19 = vpop.f32.mrb[164].mxu1 }
 0x49a   :  { %3296 = vmatmul.mubr.f32.gmra.mrb[70].mxu0 %v9567_v18  ;;  %v10987_v18 = vpop.f32.mrb[165].mxu1 }
 0x49b   :  { %v16588_v17 = vadd.f32 %v10987_v18, %v10986_v19  ;;  %v10989_v34 = vpop.f32.mrb[166].mxu1 }
 0x49c   :  { %v10990_v49 = vpop.f32.mrb[167].mxu1 }
 0x49d   :  { %v16590_v6 = vadd.f32 %v10990_v49, %v10989_v34  ;;  %v10992_v29 = vpop.f32.mrb[168].mxu1 }
 0x49e   :  { %v10993_v58 = vpop.f32.mrb[169].mxu1 }
 0x49f   :  { %v16592_v23 = vadd.f32 %v10993_v58, %v10992_v29  ;;  %v10995_v36 = vpop.f32.mrb[170].mxu1 }
 0x4a0   :  { %v10996_v1 = vpop.f32.mrb[171].mxu1 }
 0x4a1   :  { %v16594_v48 = vadd.f32 %v10996_v1, %v10995_v36  ;;  %v10998_v28 = vpop.f32.mrb[172].mxu1 }
 0x4a2   :  { %v10999_v40 = vpop.f32.mrb[173].mxu1 }
 0x4a3   :  { %v16596_v35 = vadd.f32 %v10999_v40, %v10998_v28  ;;  %v11001_v55 = vpop.f32.mrb[174].mxu1 }
 0x4a4   :  { %v11002_v39 = vpop.f32.mrb[175].mxu1 }
 0x4a5   :  { %v16598_v32 = vadd.f32 %v11002_v39, %v11001_v55  ;;  %v11048_v27 = vpop.f32.mrb[176].mxu1  ;;  %v9722_v55 = vld [vmem:[%s18144_s4 + $0x788] sm:$0xff]  ;;  %v9721_v39 = vld [vmem:[%s18144_s4 + $0x780] sm:$0xff] }
 0x4a6   :  { %v11049_v51 = vpop.f32.mrb[177].mxu1  ;;  %4844 = vmatprep.mubr.f32.mxu1 %v9722_v55 }
 0x4a7   :  { %v16600_v14 = vadd.f32 %v11049_v51, %v11048_v27  ;;  %4845 = vmatmul.mubr.f32.vlgmr.msra.gmra.mrb[192].mxu1 %v9721_v39  ;;  %v9724_v27 = vld [vmem:[%s18144_s4 + $0x798] sm:$0xff]  ;;  %v9723_v51 = vld [vmem:[%s18144_s4 + $0x790] sm:$0xff] }
 0x4a8   :  { %4849 = vmatprep.mubr.f32.mxu1 %v9724_v27 }
 0x4ab   :  { %4850 = vmatmul.mubr.f32.gmra.mrb[194].mxu1 %v9723_v51  ;;  %v9625_v51 = vld [vmem:[%s18147_s5 + $0x160] sm:$0xff] }
 0x4e7   :  { %v11051_v41 = vpop.f32.mrb[178].mxu1 }
 0x4e8   :  { %v11052_v2 = vpop.f32.mrb[179].mxu1 }
 0x4e9   :  { %v16602_v44 = vadd.f32 %v11052_v2, %v11051_v41  ;;  %v9726_v41 = vld [vmem:[%s18144_s4 + $0x7a8] sm:$0xff]  ;;  %v9725_v2 = vld [vmem:[%s18144_s4 + $0x7a0] sm:$0xff] }
 0x4ea   :  { %4854 = vmatprep.mubr.f32.mxu1 %v9726_v41  ;;  %v9626_v41 = vld [vmem:[%s18147_s5 + $0x168] sm:$0xff] }
 0x4eb   :  { %v11054_v61 = vpop.f32.mrb[180].mxu1  ;;  %4855 = vmatmul.mubr.f32.gmra.mrb[196].mxu1 %v9725_v2 }
 0x4ec   :  { %v11055_v8 = vpop.f32.mrb[181].mxu1 }
 0x4ed   :  { %v16604_v10 = vadd.f32 %v11055_v8, %v11054_v61  ;;  %v9728_v61 = vld [vmem:[%s18144_s4 + $0x7b8] sm:$0xff]  ;;  %v9727_v8 = vld [vmem:[%s18144_s4 + $0x7b0] sm:$0xff] }
 0x4ee   :  { %4859 = vmatprep.mubr.f32.mxu1 %v9728_v61  ;;  %v9734_v61 = vld [vmem:[%s18144_s4 + $0x7e8] sm:$0xff] }
 0x4ef   :  { %v11057_v24 = vpop.f32.mrb[182].mxu1  ;;  %4860 = vmatmul.mubr.f32.gmra.mrb[198].mxu1 %v9727_v8  ;;  %v9733_v8 = vld [vmem:[%s18144_s4 + $0x7e0] sm:$0xff] }
 0x4f0   :  { %v11058_v38 = vpop.f32.mrb[183].mxu1 }
 0x4f1   :  { %v16606_v57 = vadd.f32 %v11058_v38, %v11057_v24  ;;  %v9730_v38 = vld [vmem:[%s18144_s4 + $0x7c8] sm:$0xff] }
 0x4f2   :  { %4864 = vmatprep.mubr.f32.mxu1 %v9730_v38 }
 0x4f6   :  { %v11060_v53 = vpop.f32.mrb[184].mxu1 }
 0x4f7   :  { %v11061_v9 = vpop.f32.mrb[185].mxu1 }
 0x4f8   :  { %v16608_v19 = vadd.f32 %v11061_v9, %v11060_v53  ;;  %v9729_v53 = vld [vmem:[%s18144_s4 + $0x7c0] sm:$0xff] }
 0x4f9   :  { %4865 = vmatmul.mubr.f32.gmra.mrb[200].mxu1 %v9729_v53  ;;  %v13508_v53 = vpack.c.bf16 %v9626_v41, %v9625_v51 }
 0x4fa   :  { %v11063_v18 = vpop.f32.mrb[186].mxu1 }
 0x4fb   :  { %v11064_v34 = vpop.f32.mrb[187].mxu1 }
 0x4fc   :  { %v16610_v49 = vadd.f32 %v11064_v34, %v11063_v18  ;;  %v9599_v34 = vld [vmem:[%s18147_s5 + $0x150] sm:$0xff] }
 0x4fe   :  { %v11066_v29 = vpop.f32.mrb[188].mxu1 }
 0x4ff   :  { %v11067_v58 = vpop.f32.mrb[189].mxu1 }
 0x500   :  { %v16612_v36 = vadd.f32 %v11067_v58, %v11066_v29  ;;  %v9600_v29 = vld [vmem:[%s18147_s5 + $0x158] sm:$0xff] }
 0x501   :  { %v13472_v27 = vpack.c.bf16 %v9600_v29, %v9599_v34  ;;  %v9735_v34 = vld [vmem:[%s18144_s4 + $0x7f0] sm:$0xff] }
 0x503   :  { %v11069_v1 = vpop.f32.mrb[190].mxu1 }
 0x504   :  { %v11070_v28 = vpop.f32.mrb[191].mxu1 }
 0x505   :  { %v16614_v40 = vadd.f32 %v11070_v28, %v11069_v1  ;;  %v9732_v1 = vld [vmem:[%s18144_s4 + $0x7d8] sm:$0xff]  ;;  %v9731_v28 = vld [vmem:[%s18144_s4 + $0x7d0] sm:$0xff] }
 0x506   :  { %4869 = vmatprep.mubr.f32.mxu1 %v9732_v1  ;;  %v9737_v1 = vld [vmem:[%s18147_s5 + $0x1e0] sm:$0xff] }
 0x507   :  { %4870 = vmatmul.mubr.f32.gmra.mrb[202].mxu1 %v9731_v28 }
 0x508   :  { %4874 = vmatprep.mubr.f32.mxu1 %v9734_v61 }
 0x50b   :  { %4875 = vmatmul.mubr.f32.gmra.mrb[204].mxu1 %v9733_v8 }
 0x551   :  { %v10776_v24 = vpop.f32.mrb[56].mxu0 }
 0x552   :  { %v10777_v9 = vpop.f32.mrb[57].mxu0 }
 0x553   :  { %v10778_v18 = vadd.f32 %v10777_v9, %v10776_v24 }
 0x555   :  { %v10779_v58 = vpop.f32.mrb[58].mxu0  ;;  %11948 = vmatprep.mubr.msk.f32.mxu0 %vm18234_vm9, %v10778_v18  ;;  %v9736_v18 = vld [vmem:[%s18144_s4 + $0x7f8] sm:$0xff]  ;;  %vm18252_vm9 = vmmov %vm18177_vm0 }
 0x556   :  { %v10780_v55 = vpop.f32.mrb[59].mxu0  ;;  %4879 = vmatprep.mubr.f32.mxu1 %v9736_v18 }
 0x557   :  { %v10781_v39 = vadd.f32 %v10780_v55, %v10779_v58  ;;  %4880 = vmatmul.mubr.f32.gmra.mrb[206].mxu1 %v9735_v34  ;;  %v9738_v55 = vld [vmem:[%s18147_s5 + $0x1e8] sm:$0xff]  ;;  %v9627_v34 = vld [vmem:[%s18147_s5 + $0x170] sm:$0xff] }
 0x558   :  { %v13668_v51 = vpack.c.bf16 %v9738_v55, %v9737_v1  ;;  %v9653_v1 = vld [vmem:[%s18147_s5 + $0x180] sm:$0xff]  ;;  %v18244_v55 = vld [vmem:[#allocation3_spill] sm:$0xff] }
 0x559   :  { %v10782_v2 = vpop.f32.mrb[60].mxu0  ;;  %11949 = vmatmul.mubr.msk.f32.vlgmr.msra.gmra.mrb[32].mxu0 %vm18235_vm10, %v10781_v39  ;;  %vm18253_vm10 = vmmov %vm18177_vm0 }
 0x55a   :  { %v10783_v24 = vpop.f32.mrb[61].mxu0  ;;  %13471 = vmatpush3.bf16.msra.mxu0 %v16569_v60  ;;  %13669 = vmatprep.subr.bf16.mxu1 %v13668_v51 }
 0x55b   :  { %v10784_v38 = vadd.f32 %v10783_v24, %v10782_v2  ;;  %13473 = vmatprep.subr.bf16.mxu0 %v13472_v27  ;;  %13671 = vmatpush3.bf16.msra.mxu1 %v13668_v51  ;;  %v18246_v51 = vld [vmem:[#allocation4_spill] sm:$0xff] }
 0x55d   :  { %v10785_v9 = vpop.f32.mrb[62].mxu0  ;;  %11951 = vmatprep.mubr.msk.f32.mxu0 %vm18236_vm11, %v10784_v38  ;;  %vm18254_vm11 = vmmov %vm18177_vm0 }
 0x55e   :  { %v10786_v29 = vpop.f32.mrb[63].mxu0  ;;  %13475 = vmatpush3.bf16.msra.mxu0 %v13472_v27 }
 0x55f   :  { %v10787_v60 = vadd.f32 %v10786_v29, %v10785_v9  ;;  %13509 = vmatprep.subr.bf16.mxu0 %v13508_v53  ;;  %v9628_v29 = vld [vmem:[%s18147_s5 + $0x178] sm:$0xff] }
 0x561   :  { %v10788_v58 = vpop.f32.mrb[64].mxu0  ;;  %11952 = vmatmul.mubr.msk.f32.gmra.mrb[34].mxu0 %vm18237_vm12, %v10787_v60  ;;  %v18241_v60 = vld [vmem:[#allocation2_spill] sm:$0xff]  ;;  %vm18255_vm12 = vmmov %vm18177_vm0 }
 0x562   :  { %v10789_v28 = vpop.f32.mrb[65].mxu0 }
 0x563   :  { %v10790_v39 = vadd.f32 %v10789_v28, %v10788_v58  ;;  %v13512_v58 = vpack.c.bf16 %v9628_v29, %v9627_v34  ;;  %v9654_v28 = vld [vmem:[%s18147_s5 + $0x188] sm:$0xff] }
 0x565   :  { %v10791_v41 = vpop.f32.mrb[66].mxu0  ;;  %11954 = vmatprep.mubr.msk.f32.mxu0 %vm18238_vm13, %v10790_v39  ;;  %v13548_v39 = vpack.c.bf16 %v9654_v28, %v9653_v1  ;;  %vm18256_vm13 = vmmov %vm18177_vm0 }
 0x566   :  { %v10792_v27 = vpop.f32.mrb[67].mxu0 }
 0x567   :  { %v10793_v2 = vadd.f32 %v10792_v27, %v10791_v41 }
 0x569   :  { %v10794_v61 = vpop.f32.mrb[68].mxu0  ;;  %11955 = vmatmul.mubr.msk.f32.gmra.mrb[36].mxu0 %vm18239_vm14, %v10793_v2  ;;  %vm18257_vm14 = vmmov %vm18177_vm0 }
 0x56a   :  { %v10795_v8 = vpop.f32.mrb[69].mxu0 }
 0x56b   :  { %v10796_v24 = vadd.f32 %v10795_v8, %v10794_v61 }
 0x56d   :  { %v10797_v38 = vpop.f32.mrb[70].mxu0  ;;  %11957 = vmatprep.mubr.msk.f32.mxu0 %vm18240_vm15, %v10796_v24  ;;  %vm18258_vm15 = vmmov %vm18177_vm0 }
 0x56e   :  { %v10798_v9 = vpop.f32.mrb[71].mxu0 }
 0x56f   :  { %v10799_v18 = vadd.f32 %v10798_v9, %v10797_v38 }
 0x571   :  { %11958 = vmatmul.mubr.msk.f32.gmra.mrb[38].mxu0 %vm18177_vm0, %v10799_v18 }
 0x572   :  { %11968 = vmatprep.mubr.msk.f32.mxu0 %vm18242_vm2, %v18241_v60  ;;  %vm18259_vm2 = vmmov %vm18177_vm0 }
 0x575   :  { %11969 = vmatmul.mubr.msk.f32.vlgmr.msra.gmra.mrb[32].mxu0 %vm18243_vm3, %v16341_v46  ;;  %v9655_v46 = vld [vmem:[%s18147_s5 + $0x190] sm:$0xff]  ;;  %vm18260_vm3 = vmmov %vm18177_vm0 }
 0x576   :  { %11971 = vmatprep.mubr.msk.f32.mxu0 %vm18245_vm4, %v18244_v55  ;;  %13511 = vmatpush3.bf16.msra.mxu0 %v13508_v53  ;;  %v9656_v53 = vld [vmem:[%s18147_s5 + $0x198] sm:$0xff]  ;;  %vm18261_vm4 = vmmov %vm18177_vm0 }
 0x577   :  { %13513 = vmatprep.subr.bf16.mxu0 %v13512_v58 }
 0x579   :  { %11972 = vmatmul.mubr.msk.f32.gmra.mrb[34].mxu0 %vm18247_vm5, %v18246_v51  ;;  %vm18262_vm5 = vmmov %vm18177_vm0 }
 0x57a   :  { %11974 = vmatprep.mubr.msk.f32.mxu0 %vm18248_vm1, %v16354_v31  ;;  %13515 = vmatpush3.bf16.msra.mxu0 %v13512_v58  ;;  %v13552_v31 = vpack.c.bf16 %v9656_v53, %v9655_v46  ;;  %vm18263_vm1 = vmmov %vm18177_vm0 }
 0x57b   :  { %13549 = vmatprep.subr.bf16.mxu0 %v13548_v39 }
 0x57d   :  { %11975 = vmatmul.mubr.msk.f32.gmra.mrb[36].mxu0 %vm18249_vm6, %v16547_v43  ;;  %v9681_v43 = vld [vmem:[%s18147_s5 + $0x1a0] sm:$0xff]  ;;  %vm18264_vm6 = vmmov %vm18177_vm0 }
 0x57e   :  { %11977 = vmatprep.mubr.msk.f32.mxu0 %vm18250_vm7, %v16555_v13  ;;  %v9682_v13 = vld [vmem:[%s18147_s5 + $0x1a8] sm:$0xff]  ;;  %vm18265_vm7 = vmmov %vm18177_vm0 }
 0x581   :  { %11978 = vmatmul.mubr.msk.f32.gmra.mrb[38].mxu0 %vm18251_vm8, %v16557_v47  ;;  %v13588_v47 = vpack.c.bf16 %v9682_v13, %v9681_v43  ;;  %vm18266_vm8 = vmmov %vm18177_vm0 }
 0x582   :  { %11988 = vmatprep.mubr.msk.f32.mxu0 %vm18252_vm9, %v16559_v22  ;;  %v9683_v22 = vld [vmem:[%s18147_s5 + $0x1b0] sm:$0xff]  ;;  %vm18267_vm9 = vmmov %vm18177_vm0 }
 0x585   :  { %11989 = vmatmul.mubr.msk.f32.vlgmr.msra.gmra.mrb[32].mxu0 %vm18253_vm10, %v16561_v62  ;;  %v9684_v62 = vld [vmem:[%s18147_s5 + $0x1b8] sm:$0xff]  ;;  %vm18268_vm10 = vmmov %vm18177_vm0 }
 0x586   :  { %11991 = vmatprep.mubr.msk.f32.mxu0 %vm18254_vm11, %v16571_v50  ;;  %13551 = vmatpush3.bf16.msra.mxu0 %v13548_v39  ;;  %v13592_v50 = vpack.c.bf16 %v9684_v62, %v9683_v22  ;;  %vm18269_vm11 = vmmov %vm18177_vm0 }
 0x587   :  { %13553 = vmatprep.subr.bf16.mxu0 %v13552_v31 }
 0x589   :  { %11992 = vmatmul.mubr.msk.f32.gmra.mrb[34].mxu0 %vm18255_vm12, %v16574_v45  ;;  %vm18270_vm12 = vmmov %vm18177_vm0  ;;  %v9705_v45 = vld [vmem:[%s18144_s4 + $0x760] sm:$0xff] }
 0x58a   :  { %11994 = vmatprep.mubr.msk.f32.mxu0 %vm18256_vm13, %v16576_v0  ;;  %13555 = vmatpush3.bf16.msra.mxu0 %v13552_v31  ;;  %vm18271_vm13 = vmmov %vm18177_vm0  ;;  %v9708_v0 = vld [vmem:[%s18144_s4 + $0x778] sm:$0xff] }
 0x58b   :  { %13589 = vmatprep.subr.bf16.mxu0 %v13588_v47 }
 0x58d   :  { %11995 = vmatmul.mubr.msk.f32.gmra.mrb[36].mxu0 %vm18257_vm14, %v16578_v59  ;;  %vm18272_vm14 = vmmov %vm18177_vm0  ;;  %v9707_v59 = vld [vmem:[%s18144_s4 + $0x770] sm:$0xff] }
 0x58e   :  { %11997 = vmatprep.mubr.msk.f32.mxu0 %vm18258_vm15, %v16580_v15  ;;  %vm18273_vm15 = vmmov %vm18177_vm0  ;;  %v11184_v15 = vpop.f32.mrb[192].mxu1 }
 0x591   :  { %11998 = vmatmul.mubr.msk.f32.gmra.mrb[38].mxu0 %vm18177_vm0, %v16582_v37  ;;  %v11185_v37 = vpop.f32.mrb[193].mxu1 }
 0x592   :  { %12008 = vmatprep.mubr.msk.f32.mxu0 %vm18259_vm2, %v16584_v33  ;;  %v9739_v33 = vld [vmem:[%s18147_s5 + $0x1f0] sm:$0xff]  ;;  %vm18274_vm2 = vmmov %vm18177_vm0 }
 0x595   :  { %12009 = vmatmul.mubr.msk.f32.vlgmr.msra.gmra.mrb[32].mxu0 %vm18260_vm3, %v16586_v3  ;;  %v9740_v3 = vld [vmem:[%s18147_s5 + $0x1f8] sm:$0xff]  ;;  %vm18275_vm3 = vmmov %vm18177_vm0 }
 0x596   :  { %13591 = vmatpush3.bf16.msra.mxu0 %v13588_v47  ;;  %12011 = vmatprep.mubr.msk.f32.mxu0 %vm18261_vm4, %v16588_v17  ;;  %v11186_v17 = vadd.f32 %v11185_v37, %v11184_v15  ;;  %vm18276_vm4 = vmmov %vm18177_vm0 }
 0x597   :  { %13593 = vmatprep.subr.bf16.mxu0 %v13592_v50 }
 0x598   :  { %12068 = vmatprep.mubr.msk.f32.mxu1 %vm18274_vm2, %v11186_v17  ;;  %vm5029_vm2 = vcmask 523264  }
 0x599   :  { %12012 = vmatmul.mubr.msk.f32.gmra.mrb[34].mxu0 %vm18262_vm5, %v16590_v6  ;;  %v13672_v6 = vpack.c.bf16 %v9740_v3, %v9739_v33  ;;  %vm18277_vm5 = vmmov %vm18177_vm0 }
 0x59a   :  { %13595 = vmatpush3.bf16.msra.mxu0 %v13592_v50  ;;  %12014 = vmatprep.mubr.msk.f32.mxu0 %vm18263_vm1, %v16592_v23  ;;  %v9711_v23 = vld [vmem:[%s18147_s5 + $0x1d0] sm:$0xff]  ;;  %vm18278_vm1 = vmmov %vm18177_vm0 }
 0x59b   :  { %13597 = vmatprep.subr.bf16.mxu0 %v15235_v16  ;;  %v9694_v16 = vld [vmem:[%s18144_s4 + $0x708] sm:$0xff]  ;;  %13673 = vmatprep.subr.bf16.mxu1 %v13672_v6 }
 0x59c   :  { %13675 = vmatpush3.bf16.msra.mxu1 %v13672_v6 }
 0x59d   :  { %12015 = vmatmul.mubr.msk.f32.gmra.mrb[36].mxu0 %vm18264_vm6, %v16594_v48  ;;  %v9712_v48 = vld [vmem:[%s18147_s5 + $0x1d8] sm:$0xff]  ;;  %vm18279_vm6 = vmmov %vm18177_vm0 }
 0x59e   :  { %12017 = vmatprep.mubr.msk.f32.mxu0 %vm18265_vm7, %v16596_v35  ;;  %v11187_v35 = vpop.f32.mrb[194].mxu1  ;;  %vm18280_vm7 = vmmov %vm18177_vm0 }
 0x5a1   :  { %12018 = vmatmul.mubr.msk.f32.gmra.mrb[38].mxu0 %vm18266_vm8, %v16598_v32  ;;  %v13632_v32 = vpack.c.bf16 %v9712_v48, %v9711_v23  ;;  %vm18281_vm8 = vmmov %vm18177_vm0 }
 0x5a2   :  { %12028 = vmatprep.mubr.msk.f32.mxu0 %vm18267_vm9, %v16600_v14  ;;  %v11188_v14 = vpop.f32.mrb[195].mxu1  ;;  %vm18282_vm9 = vmmov %vm18177_vm0 }
 0x5a5   :  { %12029 = vmatmul.mubr.msk.f32.vlgmr.msra.gmra.mrb[32].mxu0 %vm18268_vm10, %v16602_v44  ;;  %v11189_v44 = vadd.f32 %v11188_v14, %v11187_v35  ;;  %vm18283_vm10 = vmmov %vm18177_vm0 }
 0x5a6   :  { %13599 = vmatpush3.bf16.msra.mxu0 %v15237_v20  ;;  %12031 = vmatprep.mubr.msk.f32.mxu0 %vm18269_vm11, %v16604_v10  ;;  %v9709_v20 = vld [vmem:[%s18147_s5 + $0x1c0] sm:$0xff]  ;;  %vm18284_vm11 = vmmov %vm18177_vm0 }
 0x5a7   :  { %13601 = vmatprep.subr.bf16.mxu0 %v15239_v21  ;;  %v9710_v21 = vld [vmem:[%s18147_s5 + $0x1c8] sm:$0xff]  ;;  %12069 = vmatmul.mubr.msk.f32.vlgmr.msra.gmra.mrb[208].mxu1 %vm18275_vm3, %v11189_v44 }
 0x5a9   :  { %12032 = vmatmul.mubr.msk.f32.gmra.mrb[34].mxu0 %vm18270_vm12, %v16606_v57  ;;  %vm18285_vm12 = vmmov %vm18177_vm0 }
 0x5aa   :  { %13603 = vmatpush3.bf16.msra.mxu0 %v15271_v30  ;;  %12034 = vmatprep.mubr.msk.f32.mxu0 %vm18271_vm13, %v16608_v19  ;;  %v9700_v30 = vld [vmem:[%s18144_s4 + $0x738] sm:$0xff]  ;;  %vm18286_vm13 = vmmov %vm18177_vm0 }
 0x5ab   :  { %13605 = vmatprep.subr.bf16.mxu0 %v15241_v63  ;;  %v13628_v63 = vpack.c.bf16 %v9710_v21, %v9709_v20 }
 0x5ad   :  { %12035 = vmatmul.mubr.msk.f32.gmra.mrb[36].mxu0 %vm18272_vm14, %v16610_v49  ;;  %vm18287_vm14 = vmmov %vm18177_vm0 }
 0x5ae   :  { %13607 = vmatpush3.bf16.msra.mxu0 %v15288_v56  ;;  %12037 = vmatprep.mubr.msk.f32.mxu0 %vm18273_vm15, %v16612_v36  ;;  %v9699_v56 = vld [vmem:[%s18144_s4 + $0x730] sm:$0xff]  ;;  %vm18288_vm15 = vmmov %vm18177_vm0 }
 0x5af   :  { %13609 = vmatprep.subr.bf16.mxu0 %v15250_v25  ;;  %v9693_v25 = vld [vmem:[%s18144_s4 + $0x700] sm:$0xff] }
 0x5b1   :  { %12038 = vmatmul.mubr.msk.f32.gmra.mrb[38].mxu0 %vm18177_vm0, %v16614_v40 }
 0x5b2   :  { %13611 = vmatpush3.bf16.msra.mxu0 %v15298_v52  ;;  %4580 = vmatprep.mubr.f32.mxu0 %v9694_v16  ;;  %v9702_v52 = vld [vmem:[%s18144_s4 + $0x748] sm:$0xff] }
 0x5b3   :  { %13613 = vmatprep.subr.bf16.mxu0 %v15252_v5  ;;  %v9696_v5 = vld [vmem:[%s18144_s4 + $0x718] sm:$0xff] }
 0x5b6   :  { %13615 = vmatpush3.bf16.msra.mxu0 %v15304_v42  ;;  %v9701_v42 = vld [vmem:[%s18144_s4 + $0x740] sm:$0xff] }
 0x5b7   :  { %13617 = vmatprep.subr.bf16.mxu0 %v15255_v12  ;;  %v9695_v12 = vld [vmem:[%s18144_s4 + $0x710] sm:$0xff] }
 0x5ba   :  { %13619 = vmatpush3.bf16.msra.mxu0 %v15308_v54  ;;  %v9704_v54 = vld [vmem:[%s18144_s4 + $0x758] sm:$0xff] }
 0x5bb   :  { %13621 = vmatprep.subr.bf16.mxu0 %v15257_v11  ;;  %v9697_v11 = vld [vmem:[%s18144_s4 + $0x720] sm:$0xff] }
 0x5be   :  { %13623 = vmatpush3.bf16.msra.mxu0 %v15312_v7  ;;  %v9703_v7 = vld [vmem:[%s18144_s4 + $0x750] sm:$0xff]  ;;  %v11190_v10 = vpop.f32.mrb[196].mxu1 }
 0x5bf   :  { %13625 = vmatprep.subr.bf16.mxu0 %v15104_v26  ;;  %v9698_v26 = vld [vmem:[%s18144_s4 + $0x728] sm:$0xff]  ;;  %v11191_v57 = vpop.f32.mrb[197].mxu1 }
 0x5c0   :  { %v11192_v19 = vadd.f32 %v11191_v57, %v11190_v10 }
 0x5c2   :  { %13627 = vmatpush3.bf16.msra.mxu0 %v15316_v4  ;;  %v9706_v4 = vld [vmem:[%s18144_s4 + $0x768] sm:$0xff]  ;;  %v11193_v49 = vpop.f32.mrb[198].mxu1  ;;  %12071 = vmatprep.mubr.msk.f32.mxu1 %vm18276_vm4, %v11192_v19 }
 0x5c3   :  { %13629 = vmatprep.subr.bf16.mxu0 %v13628_v63  ;;  %v11194_v36 = vpop.f32.mrb[199].mxu1 }
 0x5c4   :  { %v11195_v40 = vadd.f32 %v11194_v36, %v11193_v49 }
 0x5c5   :  { %4581 = vmatmul.mubr.f32.vlgmr.msra.gmra.mrb[72].mxu0 %v9693_v25 }
 0x5c6   :  { %4585 = vmatprep.mubr.f32.mxu0 %v9696_v5  ;;  %13631 = vmatpush3.bf16.msra.mxu0 %v13628_v63 }
 0x5c7   :  { %13633 = vmatprep.subr.bf16.mxu0 %v13632_v32  ;;  %12072 = vmatmul.mubr.msk.f32.gmra.mrb[210].mxu1 %vm18277_vm5, %v11195_v40 }
 0x5c9   :  { %4586 = vmatmul.mubr.f32.gmra.mrb[74].mxu0 %v9695_v12 }
 0x5ca   :  { %4590 = vmatprep.mubr.f32.mxu0 %v9698_v26  ;;  %13635 = vmatpush3.bf16.msra.mxu0 %v13632_v32 }
 0x5cc   :  { %v11196_v41 = vpop.f32.mrb[200].mxu1 }
 0x5cd   :  { %4591 = vmatmul.mubr.f32.gmra.mrb[76].mxu0 %v9697_v11  ;;  %v11197_v27 = vpop.f32.mrb[201].mxu1 }
 0x5ce   :  { %4595 = vmatprep.mubr.f32.mxu0 %v9700_v30  ;;  %v11198_v2 = vadd.f32 %v11197_v27, %v11196_v41 }
 0x5d0   :  { %12074 = vmatprep.mubr.msk.f32.mxu1 %vm18278_vm1, %v11198_v2 }
 0x5d1   :  { %4596 = vmatmul.mubr.f32.gmra.mrb[78].mxu0 %v9699_v56 }
 0x5d2   :  { %4600 = vmatprep.mubr.f32.mxu0 %v9702_v52 }
 0x5d5   :  { %4601 = vmatmul.mubr.f32.gmra.mrb[80].mxu0 %v9701_v42 }
 0x5d6   :  { %4605 = vmatprep.mubr.f32.mxu0 %v9704_v54 }
 0x5d9   :  { %4606 = vmatmul.mubr.f32.gmra.mrb[82].mxu0 %v9703_v7 }
 0x5da   :  { %4610 = vmatprep.mubr.f32.mxu0 %v9706_v4  ;;  %v11199_v61 = vpop.f32.mrb[202].mxu1 }
 0x5db   :  { %v11200_v8 = vpop.f32.mrb[203].mxu1 }
 0x5dc   :  { %v11201_v24 = vadd.f32 %v11200_v8, %v11199_v61 }
 0x5dd   :  { %4611 = vmatmul.mubr.f32.gmra.mrb[84].mxu0 %v9705_v45 }
 0x5de   :  { %4615 = vmatprep.mubr.f32.mxu0 %v9708_v0  ;;  %12075 = vmatmul.mubr.msk.f32.gmra.mrb[212].mxu1 %vm18279_vm6, %v11201_v24  ;;  %v11202_v38 = vpop.f32.mrb[204].mxu1  ;;  %v5153_v0 = vld [vmem:[%s18148_s8] sm:$0xff] }
 0x5df   :  { %v11203_v9 = vpop.f32.mrb[205].mxu1 }
 0x5e0   :  { %v11204_v18 = vadd.f32 %v11203_v9, %v11202_v38 }
 0x5e1   :  { %4616 = vmatmul.mubr.f32.gmra.mrb[86].mxu0 %v9707_v59 }
 0x5e2   :  { %12077 = vmatprep.mubr.msk.f32.mxu1 %vm18280_vm7, %v11204_v18 }
 0x62a   :  { %v11205_v34 = vpop.f32.mrb[206].mxu1 }
 0x62b   :  { %v11206_v29 = vpop.f32.mrb[207].mxu1 }
 0x62c   :  { %v11207_v60 = vadd.f32 %v11206_v29, %v11205_v34 }
 0x62e   :  { %12078 = vmatmul.mubr.msk.f32.gmra.mrb[214].mxu1 %vm18281_vm8, %v11207_v60 }
 0x62f   :  { %12096 = vmatprep.mubr.msk.f32.mxu1 %vm5029_vm2, %v5153_v0 }
 0x67a   :  { %v12070_v30 = vpop.f32.mrb[208].mxu1 }
 0x67b   :  { %v4980_v56 = vpop.f32.mrb[209].mxu1 }
 0x698   :  { %v11116_v58 = vpop.f32.mrb[72].mxu0 }
 0x699   :  { %v11117_v1 = vpop.f32.mrb[73].mxu0 }
 0x69a   :  { %v11118_v28 = vadd.f32 %v11117_v1, %v11116_v58  ;;  %v12073_v52 = vpop.f32.mrb[210].mxu1 }
 0x69b   :  { %v4990_v42 = vpop.f32.mrb[211].mxu1 }
 0x69c   :  { %v11119_v55 = vpop.f32.mrb[74].mxu0  ;;  %12048 = vmatprep.mubr.msk.f32.mxu0 %vm18282_vm9, %v11118_v28 }
 0x69d   :  { %v11120_v39 = vpop.f32.mrb[75].mxu0 }
 0x69e   :  { %v11121_v51 = vadd.f32 %v11120_v39, %v11119_v55 }
 0x6a0   :  { %v11122_v46 = vpop.f32.mrb[76].mxu0  ;;  %12049 = vmatmul.mubr.msk.f32.vlgmr.msra.gmra.mrb[32].mxu0 %vm18283_vm10, %v11121_v51  ;;  %vm14562_vm10 = vmmov 0  }
 0x6a1   :  { %v11123_v53 = vpop.f32.mrb[77].mxu0 }
 0x6a2   :  { %v11124_v31 = vadd.f32 %v11123_v53, %v11122_v46 }
 0x6a4   :  { %v11125_v43 = vpop.f32.mrb[78].mxu0  ;;  %12051 = vmatprep.mubr.msk.f32.mxu0 %vm18284_vm11, %v11124_v31  ;;  %vm7973_vm11 = vcmask 130048  }
 0x6a5   :  { %v11126_v13 = vpop.f32.mrb[79].mxu0 }
 0x6a6   :  { %v11127_v47 = vadd.f32 %v11126_v13, %v11125_v43 }
 0x6a8   :  { %v11128_v22 = vpop.f32.mrb[80].mxu0  ;;  %12052 = vmatmul.mubr.msk.f32.gmra.mrb[34].mxu0 %vm18285_vm12, %v11127_v47  ;;  %vm9281_vm12 = vcmask 254976  }
 0x6a9   :  { %v11129_v62 = vpop.f32.mrb[81].mxu0 }
 0x6aa   :  { %v11130_v50 = vadd.f32 %v11129_v62, %v11128_v22 }
 0x6ac   :  { %v11131_v16 = vpop.f32.mrb[82].mxu0  ;;  %12054 = vmatprep.mubr.msk.f32.mxu0 %vm18286_vm13, %v11130_v50 }
 0x6ad   :  { %v11132_v20 = vpop.f32.mrb[83].mxu0 }
 0x6ae   :  { %v11133_v21 = vadd.f32 %v11132_v20, %v11131_v16 }
 0x6b0   :  { %v11134_v63 = vpop.f32.mrb[84].mxu0  ;;  %12055 = vmatmul.mubr.msk.f32.gmra.mrb[36].mxu0 %vm18287_vm14, %v11133_v21 }
 0x6b1   :  { %v11135_v25 = vpop.f32.mrb[85].mxu0  ;;  %v12076_v54 = vpop.f32.mrb[212].mxu1 }
 0x6b2   :  { %v11136_v5 = vadd.f32 %v11135_v25, %v11134_v63  ;;  %v5000_v7 = vpop.f32.mrb[213].mxu1 }
 0x6b4   :  { %v11137_v12 = vpop.f32.mrb[86].mxu0  ;;  %12057 = vmatprep.mubr.msk.f32.mxu0 %vm18288_vm15, %v11136_v5 }
 0x6b5   :  { %v11138_v26 = vpop.f32.mrb[87].mxu0 }
 0x6b6   :  { %v11139_v11 = vadd.f32 %v11138_v26, %v11137_v12 }
 0x6b8   :  { %12058 = vmatmul.mubr.msk.f32.gmra.mrb[38].mxu0 %vm18177_vm0, %v11139_v11 }
 0x701   :  { %v12079_v4 = vpop.f32.mrb[214].mxu1 }
 0x702   :  { %v5010_v45 = vpop.f32.mrb[215].mxu1 }
 0x773   :  { %v12050_v59 = vpop.f32.mrb[32].mxu0 }
 0x774   :  { %v14404_v15 = vadd.f32 %v12070_v30, %v12050_v59  ;;  %v4716_v37 = vpop.f32.mrb[33].mxu0 }
 0x775   :  { %v14405_v33 = vadd.f32 %v4980_v56, %v4716_v37 }
 0x776   :  { %v5031_v3 = vsel %vm5029_vm2, %v14404_v15, 0.0 }
 0x777   :  { %v5030_v17 = vsel %vm5029_vm2, %v14405_v33, 0.0 }
 0x778   :  { %v5032_v6 = vadd.f32 %v5031_v3, %v5030_v17 }
 0x77b   :  { %v12053_v23 = vpop.f32.mrb[34].mxu0 }
 0x77c   :  { %v14406_v48 = vadd.f32 %v12073_v52, %v12053_v23  ;;  %v4726_v35 = vpop.f32.mrb[35].mxu0 }
 0x77d   :  { %v14407_v32 = vadd.f32 %v4990_v42, %v4726_v35 }
 0x77e   :  { %v5035_v10 = vsel %vm5029_vm2, %v14406_v48, 0.0 }
 0x77f   :  { %v5033_v14 = vsel %vm5029_vm2, %v14407_v32, 0.0 }
 0x780   :  { %v5034_v44 = vadd.f32 %v5033_v14, %v5032_v6 }
 0x782   :  { %v5036_v57 = vadd.f32 %v5035_v10, %v5034_v44 }
 0x783   :  { %v12056_v19 = vpop.f32.mrb[36].mxu0 }
 0x784   :  { %v14408_v49 = vadd.f32 %v12076_v54, %v12056_v19  ;;  %v4736_v36 = vpop.f32.mrb[37].mxu0 }
 0x785   :  { %v14409_v40 = vadd.f32 %v5000_v7, %v4736_v36 }
 0x786   :  { %v5039_v2 = vsel %vm5029_vm2, %v14408_v49, 0.0 }
 0x787   :  { %v5037_v41 = vsel %vm5029_vm2, %v14409_v40, 0.0 }
 0x788   :  { %v5038_v27 = vadd.f32 %v5037_v41, %v5036_v57  ;;  %v9749_v57 = vld [vmem:[%s18149_s6] ss:$0 sm:$0xff] }
 0x789   :  { %v9750_v41 = vld [vmem:[%s18150_s7] ss:$0 sm:$0xff] }
 0x78a   :  { %v5040_v61 = vadd.f32 %v5039_v2, %v5038_v27 }
 0x78b   :  { %v12059_v8 = vpop.f32.mrb[38].mxu0 }
 0x78c   :  { %v14410_v24 = vadd.f32 %v12079_v4, %v12059_v8  ;;  %v4746_v38 = vpop.f32.mrb[39].mxu0 }
 0x78d   :  { %v14411_v9 = vadd.f32 %v5010_v45, %v4746_v38 }
 0x78e   :  { %v5043_v29 = vsel %vm5029_vm2, %v14410_v24, 0.0 }
 0x78f   :  { %v5041_v18 = vsel %vm5029_vm2, %v14411_v9, 0.0 }
 0x790   :  { %v5042_v34 = vadd.f32 %v5041_v18, %v5040_v61 }
 0x792   :  { %v5044_v60 = vadd.f32 %v5043_v29, %v5042_v34 }
 0x794   :  { %v5045_v58 = vrot.slane %v5044_v60, 4 }
 0x796   :  { %v5046_v1 = vadd.f32 %v5045_v58, %v5044_v60 }
 0x798   :  { %v5047_v28 = vrot.slane %v5046_v1, 2 }
 0x79a   :  { %v5048_v55 = vadd.f32 %v5047_v28, %v5046_v1 }
 0x79c   :  { %v5049_v39 = vrot.slane %v5048_v55, 1 }
 0x79e   :  { %v5050_v51 = vadd.f32 %v5049_v39, %v5048_v55 }
 0x7a0   :  { %v5052_v46 = vmul.f32 0.015625, %v5050_v51 }
 0x7a2   :  { %v5053_v53 = vsub.f32 %v14405_v33, %v5052_v46  ;;  %v5054_v31 = vsub.f32 %v14404_v15, %v5052_v46  ;;  %v5055_v43 = vsub.f32 %v14407_v32, %v5052_v46  ;;  %v5056_v13 = vsub.f32 %v14406_v48, %v5052_v46 }
 0x7a3   :  { %v5057_v47 = vsub.f32 %v14409_v40, %v5052_v46  ;;  %v5058_v22 = vsub.f32 %v14408_v49, %v5052_v46  ;;  %v5059_v62 = vsub.f32 %v14411_v9, %v5052_v46  ;;  %v5060_v50 = vsub.f32 %v14410_v24, %v5052_v46 }
 0x7a4   :  { %v5061_v16 = vmul.f32 %v5053_v53, %v5053_v53  ;;  %v5062_v20 = vmul.f32 %v5054_v31, %v5054_v31  ;;  %v5063_v21 = vmul.f32 %v5055_v43, %v5055_v43  ;;  %v5064_v63 = vmul.f32 %v5056_v13, %v5056_v13 }
 0x7a5   :  { %v5065_v26 = vmul.f32 %v5057_v47, %v5057_v47  ;;  %v5066_v56 = vmul.f32 %v5058_v22, %v5058_v22  ;;  %v5067_v54 = vmul.f32 %v5059_v62, %v5059_v62  ;;  %v5068_v45 = vmul.f32 %v5060_v50, %v5060_v50 }
 0x7a6   :  { %v5069_v25 = vsel %vm5029_vm2, %v5061_v16, 0.0  ;;  %v5070_v5 = vsel %vm5029_vm2, %v5062_v20, 0.0  ;;  %v5072_v11 = vsel %vm5029_vm2, %v5063_v21, 0.0  ;;  %v5074_v52 = vsel %vm5029_vm2, %v5064_v63, 0.0 }
 0x7a7   :  { %v5071_v12 = vadd.f32 %v5070_v5, %v5069_v25  ;;  %v5076_v7 = vsel %vm5029_vm2, %v5065_v26, 0.0  ;;  %v5078_v0 = vsel %vm5029_vm2, %v5066_v56, 0.0  ;;  %v5080_v15 = vsel %vm5029_vm2, %v5067_v54, 0.0 }
 0x7a8   :  { %v5082_v33 = vsel %vm5029_vm2, %v5068_v45, 0.0  ;;  %v9754_v45 = vld [vmem:[%s18148_s8 + $0x18] sm:$0xff] }
 0x7a9   :  { %v5073_v30 = vadd.f32 %v5072_v11, %v5071_v12 }
 0x7ab   :  { %v5075_v42 = vadd.f32 %v5074_v52, %v5073_v30 }
 0x7ad   :  { %v5077_v4 = vadd.f32 %v5076_v7, %v5075_v42  ;;  %v5154_v7 = vld [vmem:[%s18148_s8 + $0x8] sm:$0xff] }
 0x7af   :  { %v5079_v59 = vadd.f32 %v5078_v0, %v5077_v4  ;;  %v9753_v4 = vld [vmem:[%s18148_s8 + $0x10] sm:$0xff]  ;;  %v9769_v0 = vld [vmem:[%s18148_s8 + $0x20] sm:$0xff] }
 0x7b1   :  { %v5081_v37 = vadd.f32 %v5080_v15, %v5079_v59  ;;  %v9770_v59 = vld [vmem:[%s18148_s8 + $0x28] sm:$0xff]  ;;  %v9783_v15 = vld [vmem:[%s18148_s8 + $0x30] sm:$0xff] }
 0x7b3   :  { %v5083_v3 = vadd.f32 %v5082_v33, %v5081_v37  ;;  %v9784_v37 = vld [vmem:[%s18148_s8 + $0x38] sm:$0xff]  ;;  %v9797_v33 = vld [vmem:[%s18148_s8 + $0x40] sm:$0xff] }
 0x7b5   :  { %v5084_v17 = vrot.slane %v5083_v3, 4 }
 0x7b7   :  { %v5085_v6 = vadd.f32 %v5084_v17, %v5083_v3  ;;  %v9798_v3 = vld [vmem:[%s18148_s8 + $0x48] sm:$0xff]  ;;  %v9811_v17 = vld [vmem:[%s18148_s8 + $0x50] sm:$0xff] }
 0x7b9   :  { %v5086_v23 = vrot.slane %v5085_v6, 2 }
 0x7bb   :  { %v5087_v48 = vadd.f32 %v5086_v23, %v5085_v6  ;;  %v9812_v6 = vld [vmem:[%s18148_s8 + $0x58] sm:$0xff]  ;;  %v9825_v23 = vld [vmem:[%s18148_s8 + $0x60] sm:$0xff] }
 0x7bd   :  { %v5088_v35 = vrot.slane %v5087_v48, 1 }
 0x7bf   :  { %v5089_v32 = vadd.f32 %v5088_v35, %v5087_v48  ;;  %v9757_v48 = vld [vmem:[%s18151_s9 + $0x40] sm:$0xff]  ;;  %v9758_v35 = vld [vmem:[%s18151_s9 + $0x48] sm:$0xff] }
 0x7c1   :  { %v5090_v14 = vmul.f32 0.015625, %v5089_v32  ;;  %v13708_v32 = vpack.c.bf16 %v9758_v35, %v9757_v48  ;;  %v9789_v48 = vld [vmem:[%s18151_s9 + $0xd0] sm:$0xff]  ;;  %v9790_v35 = vld [vmem:[%s18151_s9 + $0xd8] sm:$0xff] }
 0x7c3   :  { %v5091_v44 = vadd.f32 1e-05, %v5090_v14  ;;  %13709 = vmatprep.subr.bf16.mxu0 %v13708_v32  ;;  %v9759_v14 = vld [vmem:[%s18151_s9 + $0x50] sm:$0xff] }
 0x7c4   :  { %13711 = vmatpush3.bf16.msra.mxu0 %v13708_v32 }
 0x7c5   :  { %14559 = vrsqrt.f32 %v5091_v44  ;;  %v9760_v44 = vld [vmem:[%s18151_s9 + $0x58] sm:$0xff] }
 0x7cf   :  { %v14560_v10 = vpop.eup %14559 }
 0x7d0   :  { %v5093_v19 = vmul.f32 %v14560_v10, %v5053_v53  ;;  %v5094_v49 = vmul.f32 %v14560_v10, %v5054_v31  ;;  %v5095_v36 = vmul.f32 %v14560_v10, %v5055_v43  ;;  %v5096_v40 = vmul.f32 %v14560_v10, %v5056_v13 }
 0x7d1   :  { %v5097_v27 = vmul.f32 %v14560_v10, %v5057_v47  ;;  %v5098_v2 = vmul.f32 %v14560_v10, %v5058_v22  ;;  %v5099_v61 = vmul.f32 %v14560_v10, %v5059_v62  ;;  %v5100_v8 = vmul.f32 %v14560_v10, %v5060_v50 }
 0x7d2   :  { %v5107_v24 = vmul.f32 %v9749_v57, %v5093_v19  ;;  %v5108_v38 = vmul.f32 %v9749_v57, %v5094_v49  ;;  %v5109_v9 = vmul.f32 %v9749_v57, %v5095_v36  ;;  %v5110_v18 = vmul.f32 %v9749_v57, %v5096_v40  ;;  %v9762_v19 = vld [vmem:[%s18151_s9 + $0x68] sm:$0xff]  ;;  %v9839_v40 = vld [vmem:[%s18148_s8 + $0x70] sm:$0xff] }
 0x7d3   :  { %v5111_v34 = vmul.f32 %v9749_v57, %v5097_v27  ;;  %v5112_v29 = vmul.f32 %v9749_v57, %v5098_v2  ;;  %v5113_v60 = vmul.f32 %v9749_v57, %v5099_v61  ;;  %v5114_v58 = vmul.f32 %v9749_v57, %v5100_v8  ;;  %v9761_v57 = vld [vmem:[%s18151_s9 + $0x60] sm:$0xff]  ;;  %v9826_v36 = vld [vmem:[%s18148_s8 + $0x68] sm:$0xff]  ;;  %v9764_v27 = vld [vmem:[%s18151_s9 + $0x78] sm:$0xff] }
 0x7d4   :  { %v5121_v1 = vadd.f32 %v9750_v41, %v5107_v24  ;;  %v5122_v28 = vadd.f32 %v9750_v41, %v5108_v38  ;;  %v5123_v55 = vadd.f32 %v9750_v41, %v5109_v9  ;;  %v5124_v39 = vadd.f32 %v9750_v41, %v5110_v18  ;;  %v5236_v61 = vld [vmem:[%s18151_s9] sm:$0xff]  ;;  %v5237_v8 = vld [vmem:[%s18151_s9 + $0x8] sm:$0xff]  ;;  %v9840_v38 = vld [vmem:[%s18148_s8 + $0x78] sm:$0xff] }
 0x7d5   :  { %v5125_v51 = vadd.f32 %v9750_v41, %v5111_v34  ;;  %v5126_v46 = vadd.f32 %v9750_v41, %v5112_v29  ;;  %v5127_v53 = vadd.f32 %v9750_v41, %v5113_v60  ;;  %v5128_v31 = vadd.f32 %v9750_v41, %v5114_v58  ;;  %v9763_v41 = vld [vmem:[%s18151_s9 + $0x70] sm:$0xff]  ;;  %v9853_v9 = vld [vmem:[%s18148_s8 + $0x80] sm:$0xff]  ;;  %v9854_v18 = vld [vmem:[%s18148_s8 + $0x88] sm:$0xff] }
 0x7d6   :  { %vm5129_vm3 = vcmp.ge.f32.partialorder %v5121_v1, 0.0  ;;  %vm5130_vm4 = vcmp.ge.f32.partialorder %v5122_v28, 0.0  ;;  %vm5131_vm5 = vcmp.ge.f32.partialorder %v5123_v55, 0.0  ;;  %vm5132_vm1 = vcmp.ge.f32.partialorder %v5124_v39, 0.0  ;;  %v9867_v34 = vld [vmem:[%s18148_s8 + $0x90] sm:$0xff]  ;;  %v9868_v29 = vld [vmem:[%s18148_s8 + $0x98] sm:$0xff] }
 0x7d7   :  { %vm5133_vm6 = vcmp.ge.f32.partialorder %v5125_v51, 0.0  ;;  %vm5134_vm7 = vcmp.ge.f32.partialorder %v5126_v46, 0.0  ;;  %vm5135_vm8 = vcmp.ge.f32.partialorder %v5127_v53, 0.0  ;;  %vm5136_vm9 = vcmp.ge.f32.partialorder %v5128_v31, 0.0  ;;  %v9881_v60 = vld [vmem:[%s18148_s8 + $0xa0] sm:$0xff]  ;;  %v9882_v58 = vld [vmem:[%s18148_s8 + $0xa8] sm:$0xff] }
 0x7d8   :  { %v5137_v43 = vmul.f32 0.2, %v5121_v1  ;;  %v5138_v13 = vmul.f32 0.2, %v5122_v28  ;;  %v5139_v47 = vmul.f32 0.2, %v5123_v55  ;;  %v13712_v10 = vpack.c.bf16 %v9760_v44, %v9759_v14 }
 0x7d9   :  { %v5140_v22 = vmul.f32 0.2, %v5124_v39  ;;  %v5141_v62 = vmul.f32 0.2, %v5125_v51  ;;  %v5142_v50 = vmul.f32 0.2, %v5126_v46  ;;  %v13716_v49 = vpack.c.bf16 %v9762_v19, %v9761_v57 }
 0x7da   :  { %v5143_v16 = vmul.f32 0.2, %v5127_v53  ;;  %v5144_v20 = vmul.f32 0.2, %v5128_v31  ;;  %v5145_v21 = vsel %vm5129_vm3, %v5121_v1, %v5137_v43  ;;  %v5146_v63 = vsel %vm5130_vm4, %v5122_v28, %v5138_v13  ;;  %13713 = vmatprep.subr.bf16.mxu0 %v13712_v10  ;;  %v9895_v1 = vld [vmem:[%s18148_s8 + $0xb0] sm:$0xff]  ;;  %v9896_v28 = vld [vmem:[%s18148_s8 + $0xb8] sm:$0xff] }
 0x7db   :  { %v5147_v25 = vsel %vm5131_vm5, %v5123_v55, %v5139_v47  ;;  %v5148_v5 = vsel %vm5132_vm1, %v5124_v39, %v5140_v22  ;;  %v5149_v12 = vsel %vm5133_vm6, %v5125_v51, %v5141_v62  ;;  %v5150_v26 = vsel %vm5134_vm7, %v5126_v46, %v5142_v50  ;;  %13715 = vmatpush3.bf16.msra.mxu0 %v13712_v10  ;;  %v9909_v55 = vld [vmem:[%s18148_s8 + $0xc0] sm:$0xff]  ;;  %v9910_v39 = vld [vmem:[%s18148_s8 + $0xc8] sm:$0xff]  ;;  %v9923_v51 = vld [vmem:[%s18148_s8 + $0xd0] sm:$0xff] }
 0x7dc   :  { %v5151_v11 = vsel %vm5135_vm8, %v5127_v53, %v5143_v16  ;;  %v5152_v30 = vsel %vm5136_vm9, %v5128_v31, %v5144_v20  ;;  %v16917_v56 = vpack.c.bf16 %v5146_v63, %v5145_v21  ;;  %v16919_v52 = vpack.c.bf16 %v5148_v5, %v5147_v25  ;;  %13717 = vmatprep.subr.bf16.mxu0 %v13716_v49  ;;  %v9924_v46 = vld [vmem:[%s18148_s8 + $0xd8] sm:$0xff]  ;;  %v9937_v53 = vld [vmem:[%s18148_s8 + $0xe0] sm:$0xff]  ;;  %v9938_v13 = vld [vmem:[%s18148_s8 + $0xe8] sm:$0xff] }
 0x7dd   :  { %v16921_v42 = vpack.c.bf16 %v5150_v26, %v5149_v12  ;;  %v16923_v54 = vpack.c.bf16 %v5152_v30, %v5151_v11  ;;  %v13720_v2 = vpack.c.bf16 %v9764_v27, %v9763_v41  ;;  %v17070_v24 = vpack.c.bf16 %v5237_v8, %v5236_v61  ;;  %v9951_v47 = vld [vmem:[%s18148_s8 + $0xf0] sm:$0xff]  ;;  %v5239_v62 = vld [vmem:[%s18151_s9 + $0x18] sm:$0xff]  ;;  %v5240_v21 = vld [vmem:[%s18151_s9 + $0x20] sm:$0xff] }
 0x7de   :  { %13677 = vmatprep.subr.bf16.mxu1 %v16917_v56  ;;  %v5238_v22 = vld [vmem:[%s18151_s9 + $0x10] sm:$0xff]  ;;  %v5241_v63 = vld [vmem:[%s18151_s9 + $0x28] sm:$0xff]  ;;  %v5243_v12 = vld [vmem:[%s18151_s9 + $0x38] sm:$0xff]  ;;  %v13792_v14 = vpack.c.bf16 %v9790_v35, %v9789_v48 }
 0x7df   :  { %13679 = vmatpush3.bf16.msra.mxu1 %v16917_v56  ;;  %13719 = vmatpush3.bf16.msra.mxu0 %v13716_v49  ;;  %v13728_v20 = vpack.c.bf16 %v5239_v62, %v5238_v22  ;;  %v13732_v25 = vpack.c.bf16 %v5241_v63, %v5240_v21  ;;  %v5242_v5 = vld [vmem:[%s18151_s9 + $0x30] sm:$0xff]  ;;  %v9773_v11 = vld [vmem:[%s18151_s9 + $0x80] sm:$0xff]  ;;  %v9774_v30 = vld [vmem:[%s18151_s9 + $0x88] sm:$0xff] }
 0x7e0   :  { %13681 = vmatprep.subr.bf16.mxu1 %v16919_v52  ;;  %13721 = vmatprep.subr.bf16.mxu0 %v13720_v2  ;;  %v13736_v26 = vpack.c.bf16 %v5243_v12, %v5242_v5  ;;  %v9791_v10 = vld [vmem:[%s18151_s9 + $0xe0] sm:$0xff]  ;;  %v9792_v57 = vld [vmem:[%s18151_s9 + $0xe8] sm:$0xff]  ;;  %v9793_v49 = vld [vmem:[%s18151_s9 + $0xf0] sm:$0xff] }
 0x7e1   :  { %v13796_v19 = vpack.c.bf16 %v9792_v57, %v9791_v10  ;;  %v9801_v41 = vld [vmem:[%s18151_s9 + $0x100] sm:$0xff]  ;;  %v9802_v27 = vld [vmem:[%s18151_s9 + $0x108] sm:$0xff]  ;;  %v9803_v61 = vld [vmem:[%s18151_s9 + $0x110] sm:$0xff] }
 0x7e2   :  { %v9804_v8 = vld [vmem:[%s18151_s9 + $0x118] sm:$0xff]  ;;  %v9821_v62 = vld [vmem:[%s18151_s9 + $0x170] sm:$0xff]  ;;  %v9830_v21 = vld [vmem:[%s18151_s9 + $0x188] sm:$0xff] }
 0x7e3   :  { %13683 = vmatpush3.bf16.msra.mxu1 %v16919_v52  ;;  %13723 = vmatpush3.bf16.msra.mxu0 %v13720_v2  ;;  %v13820_v2 = vpack.c.bf16 %v9802_v27, %v9801_v41  ;;  %v9832_v5 = vld [vmem:[%s18151_s9 + $0x198] sm:$0xff]  ;;  %v9849_v48 = vld [vmem:[%s18151_s9 + $0x1f0] sm:$0xff]  ;;  %v9861_v41 = vld [vmem:[%s18151_s9 + $0x220] sm:$0xff] }
 0x7e4   :  { %13685 = vmatprep.subr.bf16.mxu1 %v16921_v42  ;;  %13725 = vmatprep.subr.bf16.mxu0 %v17070_v24  ;;  %v9850_v35 = vld [vmem:[%s18151_s9 + $0x1f8] sm:$0xff]  ;;  %v9859_v57 = vld [vmem:[%s18151_s9 + $0x210] sm:$0xff]  ;;  %v9862_v27 = vld [vmem:[%s18151_s9 + $0x228] sm:$0xff] }
 0x7e7   :  { %13687 = vmatpush3.bf16.msra.mxu1 %v16921_v42 }
 0x7e8   :  { %13689 = vmatprep.subr.bf16.mxu1 %v16923_v54 }
 0x7eb   :  { %13691 = vmatpush3.bf16.msra.mxu1 %v16923_v54 }
 0x7ec   :  { %13693 = vmatprep.subr.bf16.mxu1 %v16917_v56 }
 0x7ee   :  { %12097 = vmatmul.mubr.msk.f32.vlgmr.msra.gmra.mrb[216].mxu1 %vm5029_vm2, %v5154_v7 }
 0x7ef   :  { %13695 = vmatpush3.bf16.msra.mxu1 %v16917_v56  ;;  %12115 = vmatprep.mubr.msk.f32.mxu1 %vm5029_vm2, %v9753_v4 }
 0x7f0   :  { %13697 = vmatprep.subr.bf16.mxu1 %v16919_v52 }
 0x7f3   :  { %13699 = vmatpush3.bf16.msra.mxu1 %v16919_v52 }
 0x7f4   :  { %13701 = vmatprep.subr.bf16.mxu1 %v16921_v42 }
 0x7f7   :  { %13703 = vmatpush3.bf16.msra.mxu1 %v16921_v42 }
 0x7f8   :  { %13705 = vmatprep.subr.bf16.mxu1 %v16923_v54 }
 0x7fb   :  { %13707 = vmatpush3.bf16.msra.mxu1 %v16923_v54 }
 0x7fc   :  { %13741 = vmatprep.subr.bf16.mxu1 %v16917_v56 }
 0x7fe   :  { %12116 = vmatmul.mubr.msk.f32.vlgmr.msra.gmra.mrb[218].mxu1 %vm5029_vm2, %v9754_v45 }
 0x7ff   :  { %13743 = vmatpush3.bf16.msra.mxu1 %v16917_v56  ;;  %12172 = vmatprep.mubr.msk.f32.mxu1 %vm5029_vm2, %v9769_v0  ;;  %v9777_v0 = vld [vmem:[%s18151_s9 + $0xa0] sm:$0xff] }
 0x800   :  { %13745 = vmatprep.subr.bf16.mxu1 %v16919_v52 }
 0x803   :  { %13747 = vmatpush3.bf16.msra.mxu1 %v16919_v52 }
 0x804   :  { %13749 = vmatprep.subr.bf16.mxu1 %v16921_v42 }
 0x807   :  { %13751 = vmatpush3.bf16.msra.mxu1 %v16921_v42 }
 0x808   :  { %13753 = vmatprep.subr.bf16.mxu1 %v16923_v54 }
 0x80b   :  { %13755 = vmatpush3.bf16.msra.mxu1 %v16923_v54 }
 0x80c   :  { %13773 = vmatprep.subr.bf16.mxu1 %v16917_v56 }
 0x80e   :  { %12173 = vmatmul.mubr.msk.f32.vlgmr.msra.gmra.mrb[220].mxu1 %vm5029_vm2, %v9770_v59  ;;  %v9778_v59 = vld [vmem:[%s18151_s9 + $0xa8] sm:$0xff] }
 0x80f   :  { %13775 = vmatpush3.bf16.msra.mxu1 %v16917_v56  ;;  %12210 = vmatprep.mubr.msk.f32.mxu1 %vm5029_vm2, %v9783_v15  ;;  %v13764_v15 = vpack.c.bf16 %v9778_v59, %v9777_v0  ;;  %v9845_v59 = vld [vmem:[%s18151_s9 + $0x1d0] sm:$0xff] }
 0x810   :  { %13777 = vmatprep.subr.bf16.mxu1 %v16919_v52 }
 0x813   :  { %13779 = vmatpush3.bf16.msra.mxu1 %v16919_v52 }
 0x814   :  { %13781 = vmatprep.subr.bf16.mxu1 %v16921_v42 }
 0x817   :  { %13783 = vmatpush3.bf16.msra.mxu1 %v16921_v42 }
 0x818   :  { %13785 = vmatprep.subr.bf16.mxu1 %v16923_v54 }
 0x81b   :  { %13787 = vmatpush3.bf16.msra.mxu1 %v16923_v54 }
 0x81c   :  { %13805 = vmatprep.subr.bf16.mxu1 %v16917_v56 }
 0x81e   :  { %12211 = vmatmul.mubr.msk.f32.vlgmr.msra.gmra.mrb[222].mxu1 %vm5029_vm2, %v9784_v37  ;;  %v9779_v37 = vld [vmem:[%s18151_s9 + $0xb0] sm:$0xff] }
 0x81f   :  { %13807 = vmatpush3.bf16.msra.mxu1 %v16917_v56  ;;  %12248 = vmatprep.mubr.msk.f32.mxu1 %vm5029_vm2, %v9797_v33  ;;  %v9780_v33 = vld [vmem:[%s18151_s9 + $0xb8] sm:$0xff] }
 0x820   :  { %13809 = vmatprep.subr.bf16.mxu1 %v16919_v52 }
 0x823   :  { %13811 = vmatpush3.bf16.msra.mxu1 %v16919_v52 }
 0x824   :  { %13813 = vmatprep.subr.bf16.mxu1 %v16921_v42 }
 0x827   :  { %13815 = vmatpush3.bf16.msra.mxu1 %v16921_v42 }
 0x828   :  { %13817 = vmatprep.subr.bf16.mxu1 %v16923_v54 }
 0x82b   :  { %13819 = vmatpush3.bf16.msra.mxu1 %v16923_v54 }
 0x82c   :  { %13837 = vmatprep.subr.bf16.mxu1 %v16917_v56 }
 0x82e   :  { %12249 = vmatmul.mubr.msk.f32.vlgmr.msra.gmra.mrb[224].mxu1 %vm5029_vm2, %v9798_v3  ;;  %v13768_v3 = vpack.c.bf16 %v9780_v33, %v9779_v37 }
 0x82f   :  { %13839 = vmatpush3.bf16.msra.mxu1 %v16917_v56  ;;  %12286 = vmatprep.mubr.msk.f32.mxu1 %vm5029_vm2, %v9811_v17  ;;  %v9787_v17 = vld [vmem:[%s18151_s9 + $0xc0] sm:$0xff] }
 0x830   :  { %13841 = vmatprep.subr.bf16.mxu1 %v16919_v52 }
 0x833   :  { %13843 = vmatpush3.bf16.msra.mxu1 %v16919_v52 }
 0x834   :  { %13845 = vmatprep.subr.bf16.mxu1 %v16921_v42 }
 0x837   :  { %13847 = vmatpush3.bf16.msra.mxu1 %v16921_v42 }
 0x838   :  { %13849 = vmatprep.subr.bf16.mxu1 %v16923_v54 }
 0x83b   :  { %13851 = vmatpush3.bf16.msra.mxu1 %v16923_v54 }
 0x83c   :  { %13869 = vmatprep.subr.bf16.mxu1 %v16917_v56 }
 0x83e   :  { %12287 = vmatmul.mubr.msk.f32.vlgmr.msra.gmra.mrb[226].mxu1 %vm5029_vm2, %v9812_v6  ;;  %v9788_v6 = vld [vmem:[%s18151_s9 + $0xc8] sm:$0xff] }
 0x83f   :  { %13871 = vmatpush3.bf16.msra.mxu1 %v16917_v56  ;;  %12324 = vmatprep.mubr.msk.f32.mxu1 %vm5029_vm2, %v9825_v23  ;;  %v13788_v23 = vpack.c.bf16 %v9788_v6, %v9787_v17  ;;  %v9847_v17 = vld [vmem:[%s18151_s9 + $0x1e0] sm:$0xff]  ;;  %v9848_v6 = vld [vmem:[%s18151_s9 + $0x1e8] sm:$0xff] }
 0x840   :  { %13873 = vmatprep.subr.bf16.mxu1 %v16919_v52 }
 0x843   :  { %13875 = vmatpush3.bf16.msra.mxu1 %v16919_v52 }
 0x844   :  { %13877 = vmatprep.subr.bf16.mxu1 %v16921_v42 }
 0x847   :  { %13879 = vmatpush3.bf16.msra.mxu1 %v16921_v42 }
 0x848   :  { %13881 = vmatprep.subr.bf16.mxu1 %v16923_v54 }
 0x84b   :  { %13883 = vmatpush3.bf16.msra.mxu1 %v16923_v54 }
 0x84c   :  { %13901 = vmatprep.subr.bf16.mxu1 %v16917_v56 }
 0x84e   :  { %12325 = vmatmul.mubr.msk.f32.vlgmr.msra.gmra.mrb[228].mxu1 %vm5029_vm2, %v9826_v36  ;;  %v9794_v36 = vld [vmem:[%s18151_s9 + $0xf8] sm:$0xff] }
 0x84f   :  { %13903 = vmatpush3.bf16.msra.mxu1 %v16917_v56  ;;  %12362 = vmatprep.mubr.msk.f32.mxu1 %vm5029_vm2, %v9839_v40  ;;  %v13800_v40 = vpack.c.bf16 %v9794_v36, %v9793_v49 }
 0x850   :  { %13905 = vmatprep.subr.bf16.mxu1 %v16919_v52 }
 0x853   :  { %13907 = vmatpush3.bf16.msra.mxu1 %v16919_v52 }
 0x854   :  { %13909 = vmatprep.subr.bf16.mxu1 %v16921_v42 }
 0x857   :  { %13911 = vmatpush3.bf16.msra.mxu1 %v16921_v42 }
 0x858   :  { %13913 = vmatprep.subr.bf16.mxu1 %v16923_v54 }
 0x85b   :  { %13915 = vmatpush3.bf16.msra.mxu1 %v16923_v54 }
 0x85c   :  { %13933 = vmatprep.subr.bf16.mxu1 %v16917_v56 }
 0x85e   :  { %12363 = vmatmul.mubr.msk.f32.vlgmr.msra.gmra.mrb[230].mxu1 %vm5029_vm2, %v9840_v38  ;;  %v13824_v38 = vpack.c.bf16 %v9804_v8, %v9803_v61  ;;  %v9863_v61 = vld [vmem:[%s18151_s9 + $0x230] sm:$0xff]  ;;  %v9864_v8 = vld [vmem:[%s18151_s9 + $0x238] sm:$0xff] }
 0x85f   :  { %13935 = vmatpush3.bf16.msra.mxu1 %v16917_v56  ;;  %12400 = vmatprep.mubr.msk.f32.mxu1 %vm5029_vm2, %v9853_v9 }
 0x860   :  { %13937 = vmatprep.subr.bf16.mxu1 %v16919_v52 }
 0x863   :  { %13939 = vmatpush3.bf16.msra.mxu1 %v16919_v52 }
 0x864   :  { %13941 = vmatprep.subr.bf16.mxu1 %v16921_v42 }
 0x867   :  { %13943 = vmatpush3.bf16.msra.mxu1 %v16921_v42 }
 0x868   :  { %13945 = vmatprep.subr.bf16.mxu1 %v16923_v54 }
 0x86b   :  { %13947 = vmatpush3.bf16.msra.mxu1 %v16923_v54 }
 0x86c   :  { %13965 = vmatprep.subr.bf16.mxu1 %v16917_v56 }
 0x86e   :  { %12401 = vmatmul.mubr.msk.f32.vlgmr.msra.gmra.mrb[232].mxu1 %vm5029_vm2, %v9854_v18  ;;  %v9805_v18 = vld [vmem:[%s18151_s9 + $0x120] sm:$0xff] }
 0x86f   :  { %13967 = vmatpush3.bf16.msra.mxu1 %v16917_v56  ;;  %12438 = vmatprep.mubr.msk.f32.mxu1 %vm5029_vm2, %v9867_v34  ;;  %v9806_v34 = vld [vmem:[%s18151_s9 + $0x128] sm:$0xff] }
 0x870   :  { %13969 = vmatprep.subr.bf16.mxu1 %v16919_v52 }
 0x873   :  { %13971 = vmatpush3.bf16.msra.mxu1 %v16919_v52 }
 0x874   :  { %13973 = vmatprep.subr.bf16.mxu1 %v16921_v42 }
 0x877   :  { %13975 = vmatpush3.bf16.msra.mxu1 %v16921_v42 }
 0x878   :  { %13977 = vmatprep.subr.bf16.mxu1 %v16923_v54 }
 0x87b   :  { %13979 = vmatpush3.bf16.msra.mxu1 %v16923_v54 }
 0x87c   :  { %13997 = vmatprep.subr.bf16.mxu1 %v16917_v56 }
 0x87e   :  { %12439 = vmatmul.mubr.msk.f32.vlgmr.msra.gmra.mrb[234].mxu1 %vm5029_vm2, %v9868_v29  ;;  %v13828_v29 = vpack.c.bf16 %v9806_v34, %v9805_v18  ;;  %v9873_v34 = vld [vmem:[%s18151_s9 + $0x250] sm:$0xff] }
 0x87f   :  { %13999 = vmatpush3.bf16.msra.mxu1 %v16917_v56  ;;  %12476 = vmatprep.mubr.msk.f32.mxu1 %vm5029_vm2, %v9881_v60  ;;  %v9807_v60 = vld [vmem:[%s18151_s9 + $0x130] sm:$0xff] }
 0x880   :  { %14001 = vmatprep.subr.bf16.mxu1 %v16919_v52 }
 0x883   :  { %14003 = vmatpush3.bf16.msra.mxu1 %v16919_v52 }
 0x884   :  { %14005 = vmatprep.subr.bf16.mxu1 %v16921_v42 }
 0x887   :  { %14007 = vmatpush3.bf16.msra.mxu1 %v16921_v42 }
 0x888   :  { %14009 = vmatprep.subr.bf16.mxu1 %v16923_v54 }
 0x88b   :  { %14011 = vmatpush3.bf16.msra.mxu1 %v16923_v54 }
 0x88c   :  { %14029 = vmatprep.subr.bf16.mxu1 %v16917_v56 }
 0x88e   :  { %12477 = vmatmul.mubr.msk.f32.vlgmr.msra.gmra.mrb[236].mxu1 %vm5029_vm2, %v9882_v58  ;;  %v9808_v58 = vld [vmem:[%s18151_s9 + $0x138] sm:$0xff] }
 0x88f   :  { %14031 = vmatpush3.bf16.msra.mxu1 %v16917_v56  ;;  %12514 = vmatprep.mubr.msk.f32.mxu1 %vm5029_vm2, %v9895_v1  ;;  %v13832_v1 = vpack.c.bf16 %v9808_v58, %v9807_v60 }
 0x890   :  { %14033 = vmatprep.subr.bf16.mxu1 %v16919_v52 }
 0x893   :  { %14035 = vmatpush3.bf16.msra.mxu1 %v16919_v52 }
 0x894   :  { %14037 = vmatprep.subr.bf16.mxu1 %v16921_v42 }
 0x897   :  { %14039 = vmatpush3.bf16.msra.mxu1 %v16921_v42 }
 0x898   :  { %14041 = vmatprep.subr.bf16.mxu1 %v16923_v54 }
 0x89b   :  { %14043 = vmatpush3.bf16.msra.mxu1 %v16923_v54 }
 0x89c   :  { %14061 = vmatprep.subr.bf16.mxu1 %v16917_v56 }
 0x89e   :  { %12515 = vmatmul.mubr.msk.f32.vlgmr.msra.gmra.mrb[238].mxu1 %vm5029_vm2, %v9896_v28  ;;  %v9815_v28 = vld [vmem:[%s18151_s9 + $0x140] sm:$0xff] }
 0x89f   :  { %14063 = vmatpush3.bf16.msra.mxu1 %v16917_v56  ;;  %12552 = vmatprep.mubr.msk.f32.mxu1 %vm5029_vm2, %v9909_v55  ;;  %v9816_v55 = vld [vmem:[%s18151_s9 + $0x148] sm:$0xff] }
 0x8a0   :  { %14065 = vmatprep.subr.bf16.mxu1 %v16919_v52 }
 0x8a3   :  { %14067 = vmatpush3.bf16.msra.mxu1 %v16919_v52 }
 0x8a4   :  { %14069 = vmatprep.subr.bf16.mxu1 %v16921_v42 }
 0x8a7   :  { %14071 = vmatpush3.bf16.msra.mxu1 %v16921_v42 }
 0x8a8   :  { %14073 = vmatprep.subr.bf16.mxu1 %v16923_v54 }
 0x8ab   :  { %14075 = vmatpush3.bf16.msra.mxu1 %v16923_v54 }
 0x8ac   :  { %14093 = vmatprep.subr.bf16.mxu1 %v16917_v56 }
 0x8ae   :  { %12553 = vmatmul.mubr.msk.f32.vlgmr.msra.gmra.mrb[240].mxu1 %vm5029_vm2, %v9910_v39  ;;  %v13852_v39 = vpack.c.bf16 %v9816_v55, %v9815_v28  ;;  %v9875_v28 = vld [vmem:[%s18151_s9 + $0x260] sm:$0xff]  ;;  %v9876_v55 = vld [vmem:[%s18151_s9 + $0x268] sm:$0xff] }
 0x8af   :  { %14095 = vmatpush3.bf16.msra.mxu1 %v16917_v56  ;;  %12590 = vmatprep.mubr.msk.f32.mxu1 %vm5029_vm2, %v9923_v51  ;;  %v9817_v51 = vld [vmem:[%s18151_s9 + $0x150] sm:$0xff] }
 0x8b0   :  { %14097 = vmatprep.subr.bf16.mxu1 %v16919_v52 }
 0x8b3   :  { %14099 = vmatpush3.bf16.msra.mxu1 %v16919_v52 }
 0x8b4   :  { %14101 = vmatprep.subr.bf16.mxu1 %v16921_v42 }
 0x8b7   :  { %14103 = vmatpush3.bf16.msra.mxu1 %v16921_v42 }
 0x8b8   :  { %14105 = vmatprep.subr.bf16.mxu1 %v16923_v54 }
 0x8bb   :  { %14107 = vmatpush3.bf16.msra.mxu1 %v16923_v54 }
 0x8bc   :  { %14125 = vmatprep.subr.bf16.mxu1 %v16917_v56 }
 0x8be   :  { %12591 = vmatmul.mubr.msk.f32.vlgmr.msra.gmra.mrb[242].mxu1 %vm5029_vm2, %v9924_v46  ;;  %v9818_v46 = vld [vmem:[%s18151_s9 + $0x158] sm:$0xff] }
 0x8bf   :  { %14127 = vmatpush3.bf16.msra.mxu1 %v16917_v56  ;;  %12628 = vmatprep.mubr.msk.f32.mxu1 %vm5029_vm2, %v9937_v53 }
 0x8c0   :  { %14129 = vmatprep.subr.bf16.mxu1 %v16919_v52 }
 0x8c1   :  { %v12098_v31 = vpop.f32.mrb[216].mxu1 }
 0x8c2   :  { %v5227_v43 = vpop.f32.mrb[217].mxu1 }
 0x8c3   :  { %14131 = vmatpush3.bf16.msra.mxu1 %v16919_v52 }
 0x8c4   :  { %14133 = vmatprep.subr.bf16.mxu1 %v16921_v42 }
 0x8c7   :  { %14135 = vmatpush3.bf16.msra.mxu1 %v16921_v42 }
 0x8c8   :  { %14137 = vmatprep.subr.bf16.mxu1 %v16923_v54 }
 0x8cb   :  { %14139 = vmatpush3.bf16.msra.mxu1 %v16923_v54 }
 0x8cc   :  { %14157 = vmatprep.subr.bf16.mxu1 %v16917_v56 }
 0x8ce   :  { %12629 = vmatmul.mubr.msk.f32.vlgmr.msra.gmra.mrb[244].mxu1 %vm5029_vm2, %v9938_v13  ;;  %v9819_v13 = vld [vmem:[%s18151_s9 + $0x160] sm:$0xff] }
 0x8cf   :  { %14159 = vmatpush3.bf16.msra.mxu1 %v16917_v56  ;;  %12666 = vmatprep.mubr.msk.f32.mxu1 %vm5029_vm2, %v9951_v47  ;;  %v9952_v56 = vld [vmem:[%s18148_s8 + $0xf8] sm:$0xff]  ;;  %v9820_v47 = vld [vmem:[%s18151_s9 + $0x168] sm:$0xff] }
 0x8d0   :  { %14161 = vmatprep.subr.bf16.mxu1 %v16919_v52  ;;  %v13860_v22 = vpack.c.bf16 %v9820_v47, %v9819_v13  ;;  %v9887_v47 = vld [vmem:[%s18151_s9 + $0x290] sm:$0xff] }
 0x8d1   :  { %v12117_v50 = vpop.f32.mrb[218].mxu1 }
 0x8d2   :  { %v5319_v16 = vpop.f32.mrb[219].mxu1 }
 0x8d3   :  { %12134 = vmatprep.mubr.msk.f32.mxu0 %vm5029_vm2, %v5319_v16  ;;  %14163 = vmatpush3.bf16.msra.mxu1 %v16919_v52  ;;  %v13756_v52 = vpack.c.bf16 %v9774_v30, %v9773_v11  ;;  %v9833_v30 = vld [vmem:[%s18151_s9 + $0x1a0] sm:$0xff] }
 0x8d4   :  { %12135 = vmatmul.mubr.msk.f32.vlgmr.msra.gmra.mrb[88].mxu0 %vm5029_vm2, %v12117_v50  ;;  %14165 = vmatprep.subr.bf16.mxu1 %v16921_v42  ;;  %v9822_v50 = vld [vmem:[%s18151_s9 + $0x178] sm:$0xff] }
 0x8d5   :  { %13727 = vmatpush3.bf16.msra.mxu0 %v17070_v24  ;;  %12153 = vmatprep.mubr.msk.f32.mxu0 %vm5029_vm2, %v5227_v43  ;;  %v13864_v16 = vpack.c.bf16 %v9822_v50, %v9821_v62 }
 0x8d6   :  { %13729 = vmatprep.subr.bf16.mxu0 %v13728_v20 }
 0x8d7   :  { %14167 = vmatpush3.bf16.msra.mxu1 %v16921_v42  ;;  %v9775_v42 = vld [vmem:[%s18151_s9 + $0x90] sm:$0xff] }
 0x8d8   :  { %14169 = vmatprep.subr.bf16.mxu1 %v16923_v54 }
 0x8d9   :  { %13731 = vmatpush3.bf16.msra.mxu0 %v13728_v20  ;;  %v9829_v20 = vld [vmem:[%s18151_s9 + $0x180] sm:$0xff] }
 0x8da   :  { %13733 = vmatprep.subr.bf16.mxu0 %v13732_v25  ;;  %v13884_v63 = vpack.c.bf16 %v9830_v21, %v9829_v20  ;;  %v9889_v20 = vld [vmem:[%s18151_s9 + $0x2a0] sm:$0xff]  ;;  %v9890_v21 = vld [vmem:[%s18151_s9 + $0x2a8] sm:$0xff] }
 0x8db   :  { %14171 = vmatpush3.bf16.msra.mxu1 %v16923_v54  ;;  %v9776_v54 = vld [vmem:[%s18151_s9 + $0x98] sm:$0xff] }
 0x8dc   :  { %v13760_v4 = vpack.c.bf16 %v9776_v54, %v9775_v42  ;;  %v9835_v42 = vld [vmem:[%s18151_s9 + $0x1b0] sm:$0xff]  ;;  %v9836_v54 = vld [vmem:[%s18151_s9 + $0x1b8] sm:$0xff] }
 0x8dd   :  { %13735 = vmatpush3.bf16.msra.mxu0 %v13732_v25  ;;  %v9831_v25 = vld [vmem:[%s18151_s9 + $0x190] sm:$0xff] }
 0x8de   :  { %13737 = vmatprep.subr.bf16.mxu0 %v13736_v26  ;;  %12667 = vmatmul.mubr.msk.f32.vlgmr.msra.gmra.mrb[246].mxu1 %vm5029_vm2, %v9952_v56  ;;  %v9834_v56 = vld [vmem:[%s18151_s9 + $0x1a8] sm:$0xff] }
 0x8e1   :  { %13739 = vmatpush3.bf16.msra.mxu0 %v13736_v26  ;;  %v12174_v7 = vpop.f32.mrb[220].mxu1  ;;  %v13888_v26 = vpack.c.bf16 %v9832_v5, %v9831_v25  ;;  %v9891_v25 = vld [vmem:[%s18151_s9 + $0x2b0] sm:$0xff]  ;;  %v9892_v5 = vld [vmem:[%s18151_s9 + $0x2b8] sm:$0xff] }
 0x8e2   :  { %13757 = vmatprep.subr.bf16.mxu0 %v13756_v52  ;;  %v5574_v45 = vpop.f32.mrb[221].mxu1 }
 0x8e4   :  { %12154 = vmatmul.mubr.msk.f32.vlgmr.msra.gmra.mrb[88].mxu0 %vm5029_vm2, %v12098_v31  ;;  %v13856_v31 = vpack.c.bf16 %v9818_v46, %v9817_v51  ;;  %v9877_v51 = vld [vmem:[%s18151_s9 + $0x270] sm:$0xff]  ;;  %v9878_v46 = vld [vmem:[%s18151_s9 + $0x278] sm:$0xff] }
 0x8e5   :  { %13759 = vmatpush3.bf16.msra.mxu0 %v13756_v52  ;;  %12191 = vmatprep.mubr.msk.f32.mxu0 %vm5029_vm2, %v5574_v45  ;;  %v13892_v52 = vpack.c.bf16 %v9834_v56, %v9833_v30  ;;  %v9844_v45 = vld [vmem:[%s18151_s9 + $0x1c8] sm:$0xff]  ;;  %v9901_v56 = vld [vmem:[%s18151_s9 + $0x2d0] sm:$0xff] }
 0x8e6   :  { %13761 = vmatprep.subr.bf16.mxu0 %v13760_v4 }
 0x8e9   :  { %13763 = vmatpush3.bf16.msra.mxu0 %v13760_v4  ;;  %v9843_v4 = vld [vmem:[%s18151_s9 + $0x1c0] sm:$0xff] }
 0x8ea   :  { %13765 = vmatprep.subr.bf16.mxu0 %v13764_v15  ;;  %v13916_v0 = vpack.c.bf16 %v9844_v45, %v9843_v4  ;;  %v9903_v4 = vld [vmem:[%s18151_s9 + $0x2e0] sm:$0xff]  ;;  %v9904_v45 = vld [vmem:[%s18151_s9 + $0x2e8] sm:$0xff] }
 0x8ed   :  { %13767 = vmatpush3.bf16.msra.mxu0 %v13764_v15  ;;  %v9846_v15 = vld [vmem:[%s18151_s9 + $0x1d8] sm:$0xff] }
 0x8ee   :  { %13769 = vmatprep.subr.bf16.mxu0 %v13768_v3  ;;  %v13920_v33 = vpack.c.bf16 %v9846_v15, %v9845_v59  ;;  %v9905_v59 = vld [vmem:[%s18151_s9 + $0x2f0] sm:$0xff]  ;;  %v9906_v15 = vld [vmem:[%s18151_s9 + $0x2f8] sm:$0xff] }
 0x8f1   :  { %13771 = vmatpush3.bf16.msra.mxu0 %v13768_v3  ;;  %v12212_v32 = vpop.f32.mrb[222].mxu1 }
 0x8f2   :  { %13789 = vmatprep.subr.bf16.mxu0 %v13788_v23  ;;  %v5750_v44 = vpop.f32.mrb[223].mxu1 }
 0x8f4   :  { %12192 = vmatmul.mubr.msk.f32.vlgmr.msra.gmra.mrb[88].mxu0 %vm5029_vm2, %v12174_v7  ;;  %v13896_v7 = vpack.c.bf16 %v9836_v54, %v9835_v42 }
 0x8f5   :  { %13791 = vmatpush3.bf16.msra.mxu0 %v13788_v23  ;;  %12229 = vmatprep.mubr.msk.f32.mxu0 %vm5029_vm2, %v5750_v44  ;;  %v13924_v23 = vpack.c.bf16 %v9848_v6, %v9847_v17  ;;  %v9858_v44 = vld [vmem:[%s18151_s9 + $0x208] sm:$0xff]  ;;  %v9915_v6 = vld [vmem:[%s18151_s9 + $0x310] sm:$0xff] }
 0x8f6   :  { %13793 = vmatprep.subr.bf16.mxu0 %v13792_v14 }
 0x8f9   :  { %13795 = vmatpush3.bf16.msra.mxu0 %v13792_v14  ;;  %v9857_v14 = vld [vmem:[%s18151_s9 + $0x200] sm:$0xff] }
 0x8fa   :  { %13797 = vmatprep.subr.bf16.mxu0 %v13796_v19  ;;  %v13948_v10 = vpack.c.bf16 %v9858_v44, %v9857_v14  ;;  %v9917_v14 = vld [vmem:[%s18151_s9 + $0x320] sm:$0xff]  ;;  %v9918_v44 = vld [vmem:[%s18151_s9 + $0x328] sm:$0xff] }
 0x8fd   :  { %13799 = vmatpush3.bf16.msra.mxu0 %v13796_v19  ;;  %v9860_v19 = vld [vmem:[%s18151_s9 + $0x218] sm:$0xff] }
 0x8fe   :  { %13801 = vmatprep.subr.bf16.mxu0 %v13800_v40  ;;  %v13952_v36 = vpack.c.bf16 %v9860_v19, %v9859_v57  ;;  %v9919_v57 = vld [vmem:[%s18151_s9 + $0x330] sm:$0xff]  ;;  %v9920_v19 = vld [vmem:[%s18151_s9 + $0x338] sm:$0xff] }
 0x901   :  { %13803 = vmatpush3.bf16.msra.mxu0 %v13800_v40  ;;  %v12250_v24 = vpop.f32.mrb[224].mxu1 }
 0x902   :  { %13821 = vmatprep.subr.bf16.mxu0 %v13820_v2  ;;  %v5926_v9 = vpop.f32.mrb[225].mxu1 }
 0x904   :  { %12230 = vmatmul.mubr.msk.f32.vlgmr.msra.gmra.mrb[88].mxu0 %vm5029_vm2, %v12212_v32  ;;  %v13928_v32 = vpack.c.bf16 %v9850_v35, %v9849_v48 }
 0x905   :  { %13823 = vmatpush3.bf16.msra.mxu0 %v13820_v2  ;;  %12267 = vmatprep.mubr.msk.f32.mxu0 %vm5029_vm2, %v5926_v9  ;;  %v13956_v2 = vpack.c.bf16 %v9862_v27, %v9861_v41  ;;  %v9872_v9 = vld [vmem:[%s18151_s9 + $0x248] sm:$0xff]  ;;  %v9929_v27 = vld [vmem:[%s18151_s9 + $0x350] sm:$0xff] }
 0x906   :  { %13825 = vmatprep.subr.bf16.mxu0 %v13824_v38 }
 0x909   :  { %13827 = vmatpush3.bf16.msra.mxu0 %v13824_v38  ;;  %v9871_v38 = vld [vmem:[%s18151_s9 + $0x240] sm:$0xff] }
 0x90a   :  { %13829 = vmatprep.subr.bf16.mxu0 %v13828_v29  ;;  %v13980_v18 = vpack.c.bf16 %v9872_v9, %v9871_v38  ;;  %v9931_v38 = vld [vmem:[%s18151_s9 + $0x360] sm:$0xff]  ;;  %v9932_v9 = vld [vmem:[%s18151_s9 + $0x368] sm:$0xff] }
 0x90d   :  { %13831 = vmatpush3.bf16.msra.mxu0 %v13828_v29  ;;  %v9874_v29 = vld [vmem:[%s18151_s9 + $0x258] sm:$0xff] }
 0x90e   :  { %13833 = vmatprep.subr.bf16.mxu0 %v13832_v1  ;;  %v13984_v58 = vpack.c.bf16 %v9874_v29, %v9873_v34  ;;  %v9933_v34 = vld [vmem:[%s18151_s9 + $0x370] sm:$0xff]  ;;  %v9934_v29 = vld [vmem:[%s18151_s9 + $0x378] sm:$0xff] }
 0x911   :  { %13835 = vmatpush3.bf16.msra.mxu0 %v13832_v1  ;;  %v12288_v53 = vpop.f32.mrb[226].mxu1 }
 0x912   :  { %13853 = vmatprep.subr.bf16.mxu0 %v13852_v39  ;;  %v6102_v43 = vpop.f32.mrb[227].mxu1 }
 0x914   :  { %12268 = vmatmul.mubr.msk.f32.vlgmr.msra.gmra.mrb[88].mxu0 %vm5029_vm2, %v12250_v24  ;;  %v13960_v24 = vpack.c.bf16 %v9864_v8, %v9863_v61 }
 0x915   :  { %13855 = vmatpush3.bf16.msra.mxu0 %v13852_v39  ;;  %12305 = vmatprep.mubr.msk.f32.mxu0 %vm5029_vm2, %v6102_v43  ;;  %v13988_v39 = vpack.c.bf16 %v9876_v55, %v9875_v28  ;;  %v9886_v43 = vld [vmem:[%s18151_s9 + $0x288] sm:$0xff]  ;;  %v9943_v55 = vld [vmem:[%s18151_s9 + $0x390] sm:$0xff] }
 0x916   :  { %13857 = vmatprep.subr.bf16.mxu0 %v13856_v31 }
 0x919   :  { %13859 = vmatpush3.bf16.msra.mxu0 %v13856_v31  ;;  %v9885_v31 = vld [vmem:[%s18151_s9 + $0x280] sm:$0xff] }
 0x91a   :  { %13861 = vmatprep.subr.bf16.mxu0 %v13860_v22  ;;  %v14012_v13 = vpack.c.bf16 %v9886_v43, %v9885_v31  ;;  %v9945_v31 = vld [vmem:[%s18151_s9 + $0x3a0] sm:$0xff]  ;;  %v9946_v43 = vld [vmem:[%s18151_s9 + $0x3a8] sm:$0xff] }
 0x91d   :  { %13863 = vmatpush3.bf16.msra.mxu0 %v13860_v22  ;;  %v9888_v22 = vld [vmem:[%s18151_s9 + $0x298] sm:$0xff] }
 0x91e   :  { %13865 = vmatprep.subr.bf16.mxu0 %v13864_v16  ;;  %v14016_v50 = vpack.c.bf16 %v9888_v22, %v9887_v47  ;;  %v9947_v47 = vld [vmem:[%s18151_s9 + $0x3b0] sm:$0xff]  ;;  %v9948_v22 = vld [vmem:[%s18151_s9 + $0x3b8] sm:$0xff] }
 0x921   :  { %13867 = vmatpush3.bf16.msra.mxu0 %v13864_v16  ;;  %v12326_v12 = vpop.f32.mrb[228].mxu1 }
 0x922   :  { %13885 = vmatprep.subr.bf16.mxu0 %v13884_v63  ;;  %v6278_v11 = vpop.f32.mrb[229].mxu1 }
 0x924   :  { %12306 = vmatmul.mubr.msk.f32.vlgmr.msra.gmra.mrb[88].mxu0 %vm5029_vm2, %v12288_v53  ;;  %v13992_v53 = vpack.c.bf16 %v9878_v46, %v9877_v51 }
 0x925   :  { %13887 = vmatpush3.bf16.msra.mxu0 %v13884_v63  ;;  %12343 = vmatprep.mubr.msk.f32.mxu0 %vm5029_vm2, %v6278_v11  ;;  %v14020_v63 = vpack.c.bf16 %v9890_v21, %v9889_v20  ;;  %v9900_v11 = vld [vmem:[%s18151_s9 + $0x2c8] sm:$0xff]  ;;  %v9957_v21 = vld [vmem:[%s18151_s9 + $0x3d0] sm:$0xff] }
 0x926   :  { %13889 = vmatprep.subr.bf16.mxu0 %v13888_v26 }
 0x929   :  { %13891 = vmatpush3.bf16.msra.mxu0 %v13888_v26  ;;  %v9899_v26 = vld [vmem:[%s18151_s9 + $0x2c0] sm:$0xff] }
 0x92a   :  { %13893 = vmatprep.subr.bf16.mxu0 %v13892_v52  ;;  %v14044_v30 = vpack.c.bf16 %v9900_v11, %v9899_v26  ;;  %v9959_v26 = vld [vmem:[%s18151_s9 + $0x3e0] sm:$0xff]  ;;  %v9960_v11 = vld [vmem:[%s18151_s9 + $0x3e8] sm:$0xff] }
 0x92d   :  { %13895 = vmatpush3.bf16.msra.mxu0 %v13892_v52  ;;  %v9902_v52 = vld [vmem:[%s18151_s9 + $0x2d8] sm:$0xff] }
 0x92e   :  { %13897 = vmatprep.subr.bf16.mxu0 %v13896_v7  ;;  %v14048_v54 = vpack.c.bf16 %v9902_v52, %v9901_v56  ;;  %v9961_v56 = vld [vmem:[%s18151_s9 + $0x3f0] sm:$0xff]  ;;  %v9962_v52 = vld [vmem:[%s18151_s9 + $0x3f8] sm:$0xff] }
 0x931   :  { %13899 = vmatpush3.bf16.msra.mxu0 %v13896_v7  ;;  %v12364_v37 = vpop.f32.mrb[230].mxu1 }
 0x932   :  { %13917 = vmatprep.subr.bf16.mxu0 %v13916_v0  ;;  %v6454_v3 = vpop.f32.mrb[231].mxu1 }
 0x934   :  { %12344 = vmatmul.mubr.msk.f32.vlgmr.msra.gmra.mrb[88].mxu0 %vm5029_vm2, %v12326_v12  ;;  %v14024_v12 = vpack.c.bf16 %v9892_v5, %v9891_v25 }
 0x935   :  { %13919 = vmatpush3.bf16.msra.mxu0 %v13916_v0  ;;  %12381 = vmatprep.mubr.msk.f32.mxu0 %vm5029_vm2, %v6454_v3  ;;  %v14052_v0 = vpack.c.bf16 %v9904_v45, %v9903_v4  ;;  %v9914_v3 = vld [vmem:[%s18151_s9 + $0x308] sm:$0xff]  ;;  %v9965_v4 = vld [vmem:[%s18152_s10] ss:$0 sm:$0xff] }
 0x936   :  { %13921 = vmatprep.subr.bf16.mxu0 %v13920_v33 }
 0x939   :  { %13923 = vmatpush3.bf16.msra.mxu0 %v13920_v33  ;;  %v9913_v33 = vld [vmem:[%s18151_s9 + $0x300] sm:$0xff] }
 0x93a   :  { %13925 = vmatprep.subr.bf16.mxu0 %v13924_v23  ;;  %v14076_v17 = vpack.c.bf16 %v9914_v3, %v9913_v33  ;;  %v9970_v33 = vld [vmem:[%s18153_s12 + $0x88] sm:$0xff]  ;;  %v8047_v3 = vld [vmem:[%s18153_s12] sm:$0xff] }
 0x93d   :  { %13927 = vmatpush3.bf16.msra.mxu0 %v13924_v23  ;;  %v9916_v23 = vld [vmem:[%s18151_s9 + $0x318] sm:$0xff] }
 0x93e   :  { %13929 = vmatprep.subr.bf16.mxu0 %v13928_v32  ;;  %v14080_v35 = vpack.c.bf16 %v9916_v23, %v9915_v6  ;;  %v7972_v23 = vld [vmem:[%s18154_s11] sm:$0x3] }
 0x941   :  { %13931 = vmatpush3.bf16.msra.mxu0 %v13928_v32  ;;  %v12402_v49 = vpop.f32.mrb[232].mxu1 }
 0x942   :  { %13949 = vmatprep.subr.bf16.mxu0 %v13948_v10  ;;  %v6630_v40 = vpop.f32.mrb[233].mxu1 }
 0x944   :  { %12382 = vmatmul.mubr.msk.f32.vlgmr.msra.gmra.mrb[88].mxu0 %vm5029_vm2, %v12364_v37  ;;  %v14056_v37 = vpack.c.bf16 %v9906_v15, %v9905_v59 }
 0x945   :  { %13951 = vmatpush3.bf16.msra.mxu0 %v13948_v10  ;;  %12419 = vmatprep.mubr.msk.f32.mxu0 %vm5029_vm2, %v6630_v40  ;;  %v14084_v10 = vpack.c.bf16 %v9918_v44, %v9917_v14  ;;  %v9928_v40 = vld [vmem:[%s18151_s9 + $0x348] sm:$0xff]  ;;  %v9971_v14 = vld [vmem:[%s18153_s12 + $0x90] sm:$0xff]  ;;  %v9972_v44 = vld [vmem:[%s18153_s12 + $0x98] sm:$0xff] }
 0x946   :  { %13953 = vmatprep.subr.bf16.mxu0 %v13952_v36 }
 0x949   :  { %13955 = vmatpush3.bf16.msra.mxu0 %v13952_v36  ;;  %v9927_v36 = vld [vmem:[%s18151_s9 + $0x340] sm:$0xff] }
 0x94a   :  { %13957 = vmatprep.subr.bf16.mxu0 %v13956_v2  ;;  %v14108_v41 = vpack.c.bf16 %v9928_v40, %v9927_v36  ;;  %v9973_v36 = vld [vmem:[%s18153_s12 + $0xa0] sm:$0xff]  ;;  %v9974_v40 = vld [vmem:[%s18153_s12 + $0xa8] sm:$0xff] }
 0x94d   :  { %13959 = vmatpush3.bf16.msra.mxu0 %v13956_v2  ;;  %v9930_v2 = vld [vmem:[%s18151_s9 + $0x358] sm:$0xff] }
 0x94e   :  { %13961 = vmatprep.subr.bf16.mxu0 %v13960_v24  ;;  %v14112_v8 = vpack.c.bf16 %v9930_v2, %v9929_v27  ;;  %v8052_v27 = vld [vmem:[%s18153_s12 + $0x28] sm:$0xff]  ;;  %v14201_v2 = vpack.c.bf16 %v9974_v40, %v9973_v36  ;;  %v9994_v36 = vld [vmem:[%s18153_s12 + $0x138] sm:$0xff]  ;;  %v10011_v40 = vld [vmem:[%s18153_s12 + $0x1b0] sm:$0xff] }
 0x951   :  { %13963 = vmatpush3.bf16.msra.mxu0 %v13960_v24  ;;  %v12440_v60 = vpop.f32.mrb[234].mxu1 }
 0x952   :  { %13981 = vmatprep.subr.bf16.mxu0 %v13980_v18  ;;  %v6806_v1 = vpop.f32.mrb[235].mxu1 }
 0x954   :  { %12420 = vmatmul.mubr.msk.f32.vlgmr.msra.gmra.mrb[88].mxu0 %vm5029_vm2, %v12402_v49  ;;  %v14088_v49 = vpack.c.bf16 %v9920_v19, %v9919_v57  ;;  %v8050_v57 = vld [vmem:[%s18153_s12 + $0x18] sm:$0xff]  ;;  %v14198_v19 = vpack.c.bf16 %v9972_v44, %v9971_v14  ;;  %v9992_v14 = vld [vmem:[%s18153_s12 + $0x128] sm:$0xff]  ;;  %v10009_v44 = vld [vmem:[%s18153_s12 + $0x1a0] sm:$0xff] }
 0x955   :  { %13983 = vmatpush3.bf16.msra.mxu0 %v13980_v18  ;;  %12457 = vmatprep.mubr.msk.f32.mxu0 %vm5029_vm2, %v6806_v1  ;;  %v14116_v18 = vpack.c.bf16 %v9932_v9, %v9931_v38  ;;  %v9942_v1 = vld [vmem:[%s18151_s9 + $0x388] sm:$0xff]  ;;  %v8053_v38 = vld [vmem:[%s18153_s12 + $0x30] sm:$0xff]  ;;  %v8054_v9 = vld [vmem:[%s18153_s12 + $0x38] sm:$0xff] }
 0x956   :  { %13985 = vmatprep.subr.bf16.mxu0 %v13984_v58 }
 0x959   :  { %13987 = vmatpush3.bf16.msra.mxu0 %v13984_v58  ;;  %v9941_v58 = vld [vmem:[%s18151_s9 + $0x380] sm:$0xff] }
 0x95a   :  { %13989 = vmatprep.subr.bf16.mxu0 %v13988_v39  ;;  %v14140_v28 = vpack.c.bf16 %v9942_v1, %v9941_v58  ;;  %v8055_v58 = vld [vmem:[%s18153_s12 + $0x40] sm:$0xff]  ;;  %v8056_v1 = vld [vmem:[%s18153_s12 + $0x48] sm:$0xff] }
 0x95d   :  { %13991 = vmatpush3.bf16.msra.mxu0 %v13988_v39  ;;  %v9944_v39 = vld [vmem:[%s18151_s9 + $0x398] sm:$0xff] }
 0x95e   :  { %13993 = vmatprep.subr.bf16.mxu0 %v13992_v53  ;;  %v14144_v46 = vpack.c.bf16 %v9944_v39, %v9943_v55  ;;  %v14231_v55 = vpack.c.bf16 %v8056_v1, %v8055_v58  ;;  %v9979_v39 = vld [vmem:[%s18153_s12 + $0xd0] sm:$0xff]  ;;  %v10016_v58 = vld [vmem:[%s18153_s12 + $0x1d8] sm:$0xff] }
 0x961   :  { %13995 = vmatpush3.bf16.msra.mxu0 %v13992_v53  ;;  %v12478_v62 = vpop.f32.mrb[236].mxu1 }
 0x962   :  { %14013 = vmatprep.subr.bf16.mxu0 %v14012_v13  ;;  %v6982_v16 = vpop.f32.mrb[237].mxu1 }
 0x964   :  { %12458 = vmatmul.mubr.msk.f32.vlgmr.msra.gmra.mrb[88].mxu0 %vm5029_vm2, %v12440_v60  ;;  %v14120_v60 = vpack.c.bf16 %v9934_v29, %v9933_v34  ;;  %v14228_v34 = vpack.c.bf16 %v8054_v9, %v8053_v38  ;;  %v9977_v29 = vld [vmem:[%s18153_s12 + $0xc0] sm:$0xff]  ;;  %v10014_v38 = vld [vmem:[%s18153_s12 + $0x1c8] sm:$0xff] }
 0x965   :  { %14015 = vmatpush3.bf16.msra.mxu0 %v14012_v13  ;;  %12495 = vmatprep.mubr.msk.f32.mxu0 %vm5029_vm2, %v6982_v16  ;;  %v14148_v13 = vpack.c.bf16 %v9946_v43, %v9945_v31  ;;  %v9956_v16 = vld [vmem:[%s18151_s9 + $0x3c8] sm:$0xff] }
 0x966   :  { %14017 = vmatprep.subr.bf16.mxu0 %v14016_v50 }
 0x969   :  { %14019 = vmatpush3.bf16.msra.mxu0 %v14016_v50  ;;  %v9955_v50 = vld [vmem:[%s18151_s9 + $0x3c0] sm:$0xff] }
 0x96a   :  { %14021 = vmatprep.subr.bf16.mxu0 %v14020_v63  ;;  %v14172_v20 = vpack.c.bf16 %v9956_v16, %v9955_v50 }
 0x96d   :  { %14023 = vmatpush3.bf16.msra.mxu0 %v14020_v63  ;;  %v9958_v63 = vld [vmem:[%s18151_s9 + $0x3d8] sm:$0xff] }
 0x96e   :  { %14025 = vmatprep.subr.bf16.mxu0 %v14024_v12  ;;  %v14176_v5 = vpack.c.bf16 %v9958_v63, %v9957_v21  ;;  %v9984_v21 = vld [vmem:[%s18153_s12 + $0xf8] sm:$0xff]  ;;  %v8061_v63 = vld [vmem:[%s18153_s12 + $0x70] sm:$0xff] }
 0x971   :  { %14027 = vmatpush3.bf16.msra.mxu0 %v14024_v12  ;;  %v12516_v42 = vpop.f32.mrb[238].mxu1 }
 0x972   :  { %14045 = vmatprep.subr.bf16.mxu0 %v14044_v30  ;;  %v7158_v7 = vpop.f32.mrb[239].mxu1 }
 0x974   :  { %12496 = vmatmul.mubr.msk.f32.vlgmr.msra.gmra.mrb[88].mxu0 %vm5029_vm2, %v12478_v62  ;;  %v14152_v62 = vpack.c.bf16 %v9948_v22, %v9947_v47  ;;  %v9982_v47 = vld [vmem:[%s18153_s12 + $0xe8] sm:$0xff]  ;;  %v8059_v22 = vld [vmem:[%s18153_s12 + $0x60] sm:$0xff] }
 0x975   :  { %14047 = vmatpush3.bf16.msra.mxu0 %v14044_v30  ;;  %12533 = vmatprep.mubr.msk.f32.mxu0 %vm5029_vm2, %v7158_v7  ;;  %v14180_v30 = vpack.c.bf16 %v9960_v11, %v9959_v26  ;;  %v14563_v7 = vmov 0.0   ;;  %v9987_v26 = vld [vmem:[%s18153_s12 + $0x100] sm:$0xff]  ;;  %v9988_v11 = vld [vmem:[%s18153_s12 + $0x108] sm:$0xff] }
 0x976   :  { %14049 = vmatprep.subr.bf16.mxu0 %v14048_v54  ;;  %12699 = vmatprep.mubr.msk.f32.mxu1 %vm14562_vm10, %v14563_v7 }
 0x979   :  { %14051 = vmatpush3.bf16.msra.mxu0 %v14048_v54  ;;  %v14561_v54 = vmov 0.0|0.0  }
 0x97a   :  { %14053 = vmatprep.subr.bf16.mxu0 %v14052_v0  ;;  %14191 = vmatprep.subr.bf16.mxu1 %v14561_v54 }
 0x97d   :  { %14055 = vmatpush3.bf16.msra.mxu0 %v14052_v0 }
 0x97e   :  { %14057 = vmatprep.subr.bf16.mxu0 %v14056_v37 }
 0x981   :  { %14059 = vmatpush3.bf16.msra.mxu0 %v14056_v37  ;;  %v12554_v48 = vpop.f32.mrb[240].mxu1  ;;  %v9969_v37 = vld [vmem:[%s18153_s12 + $0x80] sm:$0xff] }
 0x982   :  { %14077 = vmatprep.subr.bf16.mxu0 %v14076_v17  ;;  %v7334_v32 = vpop.f32.mrb[241].mxu1 }
 0x984   :  { %12534 = vmatmul.mubr.msk.f32.vlgmr.msra.gmra.mrb[88].mxu0 %vm5029_vm2, %v12516_v42  ;;  %v14184_v42 = vpack.c.bf16 %v9962_v52, %v9961_v56  ;;  %v10006_v56 = vld [vmem:[%s18153_s12 + $0x188] sm:$0xff] }
 0x985   :  { %14079 = vmatpush3.bf16.msra.mxu0 %v14076_v17  ;;  %12571 = vmatprep.mubr.msk.f32.mxu0 %vm5029_vm2, %v7334_v32  ;;  %v8048_v17 = vld [vmem:[%s18153_s12 + $0x8] sm:$0xff] }
 0x986   :  { %14081 = vmatprep.subr.bf16.mxu0 %v14080_v35  ;;  %v14219_v32 = vpack.c.bf16 %v8048_v17, %v8047_v3  ;;  %v9990_v3 = vld [vmem:[%s18153_s12 + $0x118] sm:$0xff]  ;;  %v10007_v17 = vld [vmem:[%s18153_s12 + $0x190] sm:$0xff] }
 0x989   :  { %14083 = vmatpush3.bf16.msra.mxu0 %v14080_v35  ;;  %v14195_v35 = vpack.c.bf16 %v9970_v33, %v9969_v37  ;;  %v9989_v33 = vld [vmem:[%s18153_s12 + $0x110] sm:$0xff] }
 0x98a   :  { %14085 = vmatprep.subr.bf16.mxu0 %v14084_v10 }
 0x98d   :  { %14087 = vmatpush3.bf16.msra.mxu0 %v14084_v10  ;;  %v8049_v10 = vld [vmem:[%s18153_s12 + $0x10] sm:$0xff] }
 0x98e   :  { %14089 = vmatprep.subr.bf16.mxu0 %v14088_v49 }
 0x991   :  { %14091 = vmatpush3.bf16.msra.mxu0 %v14088_v49  ;;  %v12592_v61 = vpop.f32.mrb[242].mxu1  ;;  %v14222_v49 = vpack.c.bf16 %v8050_v57, %v8049_v10  ;;  %v10010_v10 = vld [vmem:[%s18153_s12 + $0x1a8] sm:$0xff] }
 0x992   :  { %14109 = vmatprep.subr.bf16.mxu0 %v14108_v41  ;;  %v7510_v24 = vpop.f32.mrb[243].mxu1 }
 0x994   :  { %12572 = vmatmul.mubr.msk.f32.vlgmr.msra.gmra.mrb[88].mxu0 %vm5029_vm2, %v12554_v48  ;;  %v9967_v48 = vld [vmem:[%s18154_s11 + $0x2] sm:$0x3] }
 0x995   :  { %14111 = vmatpush3.bf16.msra.mxu0 %v14108_v41  ;;  %12609 = vmatprep.mubr.msk.f32.mxu0 %vm5029_vm2, %v7510_v24  ;;  %v8051_v41 = vld [vmem:[%s18153_s12 + $0x20] sm:$0xff]  ;;  %v9976_v24 = vld [vmem:[%s18153_s12 + $0xb8] sm:$0xff] }
 0x996   :  { %14113 = vmatprep.subr.bf16.mxu0 %v14112_v8 }
 0x999   :  { %14115 = vmatpush3.bf16.msra.mxu0 %v14112_v8  ;;  %v9975_v8 = vld [vmem:[%s18153_s12 + $0xb0] sm:$0xff] }
 0x99a   :  { %14117 = vmatprep.subr.bf16.mxu0 %v14116_v18 }
 0x99d   :  { %14119 = vmatpush3.bf16.msra.mxu0 %v14116_v18  ;;  %v14204_v18 = vpack.c.bf16 %v9976_v24, %v9975_v8  ;;  %v9996_v8 = vld [vmem:[%s18153_s12 + $0x148] sm:$0xff]  ;;  %v10013_v24 = vld [vmem:[%s18153_s12 + $0x1c0] sm:$0xff] }
 0x99e   :  { %14121 = vmatprep.subr.bf16.mxu0 %v14120_v60 }
 0x9a1   :  { %14123 = vmatpush3.bf16.msra.mxu0 %v14120_v60  ;;  %v12630_v51 = vpop.f32.mrb[244].mxu1  ;;  %v9978_v60 = vld [vmem:[%s18153_s12 + $0xc8] sm:$0xff] }
 0x9a2   :  { %14141 = vmatprep.subr.bf16.mxu0 %v14140_v28  ;;  %v7686_v53 = vpop.f32.mrb[245].mxu1 }
 0x9a4   :  { %12610 = vmatmul.mubr.msk.f32.vlgmr.msra.gmra.mrb[88].mxu0 %vm5029_vm2, %v12592_v61  ;;  %v14225_v61 = vpack.c.bf16 %v8052_v27, %v8051_v41  ;;  %v10012_v41 = vld [vmem:[%s18153_s12 + $0x1b8] sm:$0xff] }
 0x9a5   :  { %14143 = vmatpush3.bf16.msra.mxu0 %v14140_v28  ;;  %12647 = vmatprep.mubr.msk.f32.mxu0 %vm5029_vm2, %v7686_v53  ;;  %v14207_v28 = vpack.c.bf16 %v9978_v60, %v9977_v29  ;;  %v8058_v53 = vld [vmem:[%s18153_s12 + $0x58] sm:$0xff]  ;;  %v10015_v60 = vld [vmem:[%s18153_s12 + $0x1d0] sm:$0xff] }
 0x9a6   :  { %14145 = vmatprep.subr.bf16.mxu0 %v14144_v46  ;;  %v9998_v29 = vld [vmem:[%s18153_s12 + $0x158] sm:$0xff] }
 0x9a9   :  { %14147 = vmatpush3.bf16.msra.mxu0 %v14144_v46  ;;  %v8057_v46 = vld [vmem:[%s18153_s12 + $0x50] sm:$0xff] }
 0x9aa   :  { %14149 = vmatprep.subr.bf16.mxu0 %v14148_v13  ;;  %v14234_v43 = vpack.c.bf16 %v8058_v53, %v8057_v46  ;;  %v10018_v46 = vld [vmem:[%s18153_s12 + $0x1e8] sm:$0xff] }
 0x9ad   :  { %14151 = vmatpush3.bf16.msra.mxu0 %v14148_v13  ;;  %v9981_v13 = vld [vmem:[%s18153_s12 + $0xe0] sm:$0xff] }
 0x9ae   :  { %14153 = vmatprep.subr.bf16.mxu0 %v14152_v62  ;;  %v14213_v50 = vpack.c.bf16 %v9982_v47, %v9981_v13  ;;  %v10002_v13 = vld [vmem:[%s18153_s12 + $0x178] sm:$0xff]  ;;  %v10019_v47 = vld [vmem:[%s18153_s12 + $0x1f0] sm:$0xff] }
 0x9b1   :  { %14155 = vmatpush3.bf16.msra.mxu0 %v14152_v62  ;;  %v12668_v25 = vpop.f32.mrb[246].mxu1  ;;  %v8060_v62 = vld [vmem:[%s18153_s12 + $0x68] sm:$0xff] }
 0x9b2   :  { %14173 = vmatprep.subr.bf16.mxu0 %v14172_v20  ;;  %v7862_v12 = vpop.f32.mrb[247].mxu1  ;;  %v14237_v16 = vpack.c.bf16 %v8060_v62, %v8059_v22  ;;  %v10020_v62 = vld [vmem:[%s18153_s12 + $0x1f8] sm:$0xff] }
 0x9b4   :  { %12648 = vmatmul.mubr.msk.f32.vlgmr.msra.gmra.mrb[88].mxu0 %vm5029_vm2, %v12630_v51  ;;  %v9980_v51 = vld [vmem:[%s18153_s12 + $0xd8] sm:$0xff] }
 0x9b5   :  { %14175 = vmatpush3.bf16.msra.mxu0 %v14172_v20  ;;  %12685 = vmatprep.mubr.msk.f32.mxu0 %vm5029_vm2, %v7862_v12  ;;  %v14210_v31 = vpack.c.bf16 %v9980_v51, %v9979_v39  ;;  %v9983_v20 = vld [vmem:[%s18153_s12 + $0xf0] sm:$0xff]  ;;  %v10000_v39 = vld [vmem:[%s18153_s12 + $0x168] sm:$0xff]  ;;  %v10017_v51 = vld [vmem:[%s18153_s12 + $0x1e0] sm:$0xff] }
 0x9b6   :  { %14177 = vmatprep.subr.bf16.mxu0 %v14176_v5 }
 0x9b9   :  { %14179 = vmatpush3.bf16.msra.mxu0 %v14176_v5  ;;  %v14216_v5 = vpack.c.bf16 %v9984_v21, %v9983_v20 }
 0x9ba   :  { %14181 = vmatprep.subr.bf16.mxu0 %v14180_v30 }
 0x9bd   :  { %14183 = vmatpush3.bf16.msra.mxu0 %v14180_v30  ;;  %v10005_v30 = vld [vmem:[%s18153_s12 + $0x180] sm:$0xff] }
 0x9be   :  { %14185 = vmatprep.subr.bf16.mxu0 %v14184_v42  ;;  %v14273_v37 = vpack.c.bf16 %v10006_v56, %v10005_v30 }
 0x9c1   :  { %14187 = vmatpush3.bf16.msra.mxu0 %v14184_v42 }
 0x9c2   :  { %14188 = vmatprep.subr.bf16.mxu0 %v14561_v54 }
 0x9c4   :  { %12686 = vmatmul.mubr.msk.f32.vlgmr.msra.gmra.mrb[88].mxu0 %vm5029_vm2, %v12668_v25  ;;  %v8062_v25 = vld [vmem:[%s18153_s12 + $0x78] sm:$0xff] }
 0x9c5   :  { %12692 = vmatprep.mubr.msk.f32.mxu0 %vm14562_vm10, %v14563_v7  ;;  %v14240_v12 = vpack.c.bf16 %v8062_v25, %v8061_v63 }
 0xa97   :  { %v12687_v45 = vpop.f32.mrb[88].mxu0 }
 0xa98   :  { %v7971_v0 = vadd.f32 %v12687_v45, %v9965_v4  ;;  %v7952_v59 = vpop.f32.mrb[89].mxu0 }
 0xa99   :  { %v7970_v15 = vadd.f32 %v9965_v4, %v7952_v59  ;;  %v10003_v59 = vld [vmem:[%s18154_s11 + $0x6] sm:$0x3] }
 0xa9b   :  { %v17618_v6 = vpack.c.bf16 %v7971_v0, %v7970_v15  ;;  %v9985_v0 = vld [vmem:[%s18154_s11 + $0x4] sm:$0x3]  ;;  %v14246_v15 = vpack.c.bf16 %v9988_v11, %v9987_v26  ;;  %v10042_v11 = vld [vmem:[%s18153_s12 + $0x288] sm:$0xff] }
 0xa9c   :  { %v10041_v26 = vld [vmem:[%s18153_s12 + $0x280] sm:$0xff] }
 0xa9d   :  { %14190 = vmatpush3.bf16.msra.mxu0 %v17618_v6  ;;  %14193 = vmatpush3.bf16.msra.mxu1 %v17618_v6 }
 0xa9e   :  { %14194 = vmatprep.subr.bf16.mxu1 %v14561_v54  ;;  %14218 = vmatprep.subr.bf16.mxu0 %v14561_v54 }
 0xaa0   :  { %12693 = vmatmul.mubr.msk.f32.vlgmr.msra.gmra.mrb[90].mxu0 %vm7973_vm11, %v7972_v23  ;;  %12700 = vmatmul.mubr.msk.f32.vlgmr.msra.gmra.mrb[248].mxu1 %vm7973_vm11, %v9967_v48  ;;  %v10008_v23 = vld [vmem:[%s18153_s12 + $0x198] sm:$0xff]  ;;  %v14249_v48 = vpack.c.bf16 %v9990_v3, %v9989_v33  ;;  %v10043_v33 = vld [vmem:[%s18153_s12 + $0x290] sm:$0xff] }
 0xaa1   :  { %14196 = vmatpush3.bf16.msra.mxu1 %v14195_v35  ;;  %14220 = vmatpush3.bf16.msra.mxu0 %v14219_v32  ;;  %v14276_v35 = vpack.c.bf16 %v10008_v23, %v10007_v17  ;;  %v9991_v32 = vld [vmem:[%s18153_s12 + $0x120] sm:$0xff]  ;;  %v10044_v3 = vld [vmem:[%s18153_s12 + $0x298] sm:$0xff] }
 0xaa2   :  { %14197 = vmatprep.subr.bf16.mxu1 %v14561_v54  ;;  %14221 = vmatprep.subr.bf16.mxu0 %v14561_v54  ;;  %v14252_v57 = vpack.c.bf16 %v9992_v14, %v9991_v32  ;;  %v14330_v23 = vpack.c.bf16 %v10044_v3, %v10043_v33  ;;  %v10045_v32 = vld [vmem:[%s18153_s12 + $0x2a0] sm:$0xff]  ;;  %v10046_v14 = vld [vmem:[%s18153_s12 + $0x2a8] sm:$0xff] }
 0xaa3   :  { %12734 = vmatprep.mubr.msk.f32.mxu1 %vm14562_vm10, %v14563_v7  ;;  %12769 = vmatprep.mubr.msk.f32.mxu0 %vm14562_vm10, %v14563_v7 }
 0xaa5   :  { %14199 = vmatpush3.bf16.msra.mxu1 %v14198_v19  ;;  %14223 = vmatpush3.bf16.msra.mxu0 %v14222_v49  ;;  %v14279_v19 = vpack.c.bf16 %v10010_v10, %v10009_v44  ;;  %v9993_v49 = vld [vmem:[%s18153_s12 + $0x130] sm:$0xff]  ;;  %v14333_v10 = vpack.c.bf16 %v10046_v14, %v10045_v32 }
 0xaa6   :  { %14200 = vmatprep.subr.bf16.mxu1 %v14561_v54  ;;  %14224 = vmatprep.subr.bf16.mxu0 %v14561_v54  ;;  %v14255_v27 = vpack.c.bf16 %v9994_v36, %v9993_v49  ;;  %v10047_v49 = vld [vmem:[%s18153_s12 + $0x2b0] sm:$0xff]  ;;  %v10048_v36 = vld [vmem:[%s18153_s12 + $0x2b8] sm:$0xff] }
 0xaa9   :  { %14202 = vmatpush3.bf16.msra.mxu1 %v14201_v2  ;;  %14226 = vmatpush3.bf16.msra.mxu0 %v14225_v61  ;;  %v14282_v2 = vpack.c.bf16 %v10012_v41, %v10011_v40  ;;  %v9995_v61 = vld [vmem:[%s18153_s12 + $0x140] sm:$0xff]  ;;  %v14336_v41 = vpack.c.bf16 %v10048_v36, %v10047_v49 }
 0xaaa   :  { %14203 = vmatprep.subr.bf16.mxu1 %v14561_v54  ;;  %14227 = vmatprep.subr.bf16.mxu0 %v14561_v54  ;;  %v14258_v9 = vpack.c.bf16 %v9996_v8, %v9995_v61  ;;  %v10049_v61 = vld [vmem:[%s18153_s12 + $0x2c0] sm:$0xff]  ;;  %v10050_v8 = vld [vmem:[%s18153_s12 + $0x2c8] sm:$0xff] }
 0xaab   :  { %v10067_v36 = vld [vmem:[%s18153_s12 + $0x340] sm:$0xff] }
 0xaad   :  { %14205 = vmatpush3.bf16.msra.mxu1 %v14204_v18  ;;  %14229 = vmatpush3.bf16.msra.mxu0 %v14228_v34  ;;  %v14285_v18 = vpack.c.bf16 %v10014_v38, %v10013_v24  ;;  %v9997_v34 = vld [vmem:[%s18153_s12 + $0x150] sm:$0xff]  ;;  %v14339_v38 = vpack.c.bf16 %v10050_v8, %v10049_v61 }
 0xaae   :  { %14206 = vmatprep.subr.bf16.mxu1 %v14561_v54  ;;  %14230 = vmatprep.subr.bf16.mxu0 %v14561_v54  ;;  %v14261_v1 = vpack.c.bf16 %v9998_v29, %v9997_v34  ;;  %v10051_v34 = vld [vmem:[%s18153_s12 + $0x2d0] sm:$0xff]  ;;  %v10052_v29 = vld [vmem:[%s18153_s12 + $0x2d8] sm:$0xff] }
 0xaaf   :  { %v10069_v8 = vld [vmem:[%s18153_s12 + $0x350] sm:$0xff] }
 0xab1   :  { %14208 = vmatpush3.bf16.msra.mxu1 %v14207_v28  ;;  %14232 = vmatpush3.bf16.msra.mxu0 %v14231_v55  ;;  %v14288_v28 = vpack.c.bf16 %v10016_v58, %v10015_v60  ;;  %v9999_v55 = vld [vmem:[%s18153_s12 + $0x160] sm:$0xff]  ;;  %v14342_v58 = vpack.c.bf16 %v10052_v29, %v10051_v34 }
 0xab2   :  { %14209 = vmatprep.subr.bf16.mxu1 %v14561_v54  ;;  %14233 = vmatprep.subr.bf16.mxu0 %v14561_v54  ;;  %v14264_v53 = vpack.c.bf16 %v10000_v39, %v9999_v55  ;;  %v10053_v55 = vld [vmem:[%s18153_s12 + $0x2e0] sm:$0xff]  ;;  %v10054_v39 = vld [vmem:[%s18153_s12 + $0x2e8] sm:$0xff] }
 0xab3   :  { %v10071_v29 = vld [vmem:[%s18153_s12 + $0x360] sm:$0xff] }
 0xab5   :  { %14211 = vmatpush3.bf16.msra.mxu1 %v14210_v31  ;;  %14235 = vmatpush3.bf16.msra.mxu0 %v14234_v43  ;;  %v14291_v31 = vpack.c.bf16 %v10018_v46, %v10017_v51  ;;  %v10001_v43 = vld [vmem:[%s18153_s12 + $0x170] sm:$0xff]  ;;  %v14345_v46 = vpack.c.bf16 %v10054_v39, %v10053_v55 }
 0xab6   :  { %14212 = vmatprep.subr.bf16.mxu1 %v14561_v54  ;;  %14236 = vmatprep.subr.bf16.mxu0 %v14561_v54  ;;  %v14267_v22 = vpack.c.bf16 %v10002_v13, %v10001_v43  ;;  %v10055_v43 = vld [vmem:[%s18153_s12 + $0x2f0] sm:$0xff] }
 0xab7   :  { %v10073_v39 = vld [vmem:[%s18153_s12 + $0x370] sm:$0xff] }
 0xab9   :  { %14214 = vmatpush3.bf16.msra.mxu1 %v14213_v50  ;;  %14238 = vmatpush3.bf16.msra.mxu0 %v14237_v16  ;;  %v14294_v50 = vpack.c.bf16 %v10020_v62, %v10019_v47  ;;  %v10056_v47 = vld [vmem:[%s18153_s12 + $0x2f8] sm:$0xff] }
 0xaba   :  { %14215 = vmatprep.subr.bf16.mxu1 %v14561_v54  ;;  %14239 = vmatprep.subr.bf16.mxu0 %v14561_v54 }
 0xabd   :  { %14217 = vmatpush3.bf16.msra.mxu1 %v14216_v5  ;;  %14241 = vmatpush3.bf16.msra.mxu0 %v14240_v12  ;;  %v10023_v5 = vld [vmem:[%s18153_s12 + $0x200] sm:$0xff]  ;;  %v10024_v12 = vld [vmem:[%s18153_s12 + $0x208] sm:$0xff] }
 0xabe   :  { %14242 = vmatprep.subr.bf16.mxu1 %v14561_v54  ;;  %14269 = vmatprep.subr.bf16.mxu0 %v14561_v54 }
 0xb73   :  { %v8043_v52 = vpop.f32.mrb[90].mxu0  ;;  %v8134_v42 = vpop.f32.mrb[248].mxu1 }
 0xb74   :  { %v12701_v4 = vpop.f32.mrb[249].mxu1  ;;  %12735 = vmatmul.mubr.f32.vlgmr.msra.gmra.mrb[250].mxu1 %v8134_v42  ;;  %12770 = vmatmul.mubr.f32.vlgmr.msra.gmra.mrb[92].mxu0 %v8043_v52  ;;  %v12694_v45 = vpop.f32.mrb[91].mxu0 }
 0xb75   :  { %14244 = vmatpush3.bf16.msra.mxu1 %v17618_v6  ;;  %14271 = vmatpush3.bf16.msra.mxu0 %v17618_v6  ;;  %v10021_v4 = vld [vmem:[%s18154_s11 + $0x8] sm:$0x3]  ;;  %v10039_v45 = vld [vmem:[%s18154_s11 + $0xa] sm:$0x3] }
 0xb76   :  { %12776 = vmatprep.mubr.msk.f32.mxu1 %vm14562_vm10, %v14563_v7  ;;  %12818 = vmatprep.mubr.msk.f32.mxu0 %vm14562_vm10, %v14563_v7 }
 0xb77   :  { %14245 = vmatprep.subr.bf16.mxu1 %v14561_v54  ;;  %14272 = vmatprep.subr.bf16.mxu0 %v14561_v54 }
 0xb78   :  { %12777 = vmatmul.mubr.msk.f32.vlgmr.msra.gmra.mrb[252].mxu1 %vm7973_vm11, %v9985_v0  ;;  %12819 = vmatmul.mubr.msk.f32.vlgmr.msra.gmra.mrb[94].mxu0 %vm7973_vm11, %v10003_v59  ;;  %v14300_v0 = vpack.c.bf16 %v10024_v12, %v10023_v5  ;;  %v14327_v59 = vpack.c.bf16 %v10042_v11, %v10041_v26  ;;  %v10060_v12 = vld [vmem:[%s18153_s12 + $0x308] sm:$0xff]  ;;  %v10077_v26 = vld [vmem:[%s18153_s12 + $0x380] sm:$0xff] }
 0xb79   :  { %14247 = vmatpush3.bf16.msra.mxu1 %v14246_v15  ;;  %14274 = vmatpush3.bf16.msra.mxu0 %v14273_v37  ;;  %v10025_v15 = vld [vmem:[%s18153_s12 + $0x210] sm:$0xff]  ;;  %v10026_v37 = vld [vmem:[%s18153_s12 + $0x218] sm:$0xff] }
 0xb7a   :  { %14248 = vmatprep.subr.bf16.mxu1 %v14561_v54  ;;  %14275 = vmatprep.subr.bf16.mxu0 %v14561_v54  ;;  %v14303_v17 = vpack.c.bf16 %v10026_v37, %v10025_v15  ;;  %v10079_v15 = vld [vmem:[%s18153_s12 + $0x390] sm:$0xff]  ;;  %v10080_v37 = vld [vmem:[%s18153_s12 + $0x398] sm:$0xff] }
 0xb7b   :  { %12811 = vmatprep.mubr.msk.f32.mxu1 %vm14562_vm10, %v14563_v7  ;;  %12853 = vmatprep.mubr.msk.f32.mxu0 %vm14562_vm10, %v14563_v7  ;;  %v14384_v3 = vpack.c.bf16 %v10080_v37, %v10079_v15 }
 0xb7d   :  { %14250 = vmatpush3.bf16.msra.mxu1 %v14249_v48  ;;  %14277 = vmatpush3.bf16.msra.mxu0 %v14276_v35  ;;  %v10027_v48 = vld [vmem:[%s18153_s12 + $0x220] sm:$0xff]  ;;  %v10028_v35 = vld [vmem:[%s18153_s12 + $0x228] sm:$0xff] }
 0xb7e   :  { %14251 = vmatprep.subr.bf16.mxu1 %v14561_v54  ;;  %14278 = vmatprep.subr.bf16.mxu0 %v14561_v54  ;;  %v14306_v44 = vpack.c.bf16 %v10028_v35, %v10027_v48  ;;  %v10081_v48 = vld [vmem:[%s18153_s12 + $0x3a0] sm:$0xff]  ;;  %v10082_v35 = vld [vmem:[%s18153_s12 + $0x3a8] sm:$0xff] }
 0xb7f   :  { %v14387_v14 = vpack.c.bf16 %v10082_v35, %v10081_v48 }
 0xb81   :  { %14253 = vmatpush3.bf16.msra.mxu1 %v14252_v57  ;;  %14280 = vmatpush3.bf16.msra.mxu0 %v14279_v19  ;;  %v10029_v57 = vld [vmem:[%s18153_s12 + $0x230] sm:$0xff]  ;;  %v10030_v19 = vld [vmem:[%s18153_s12 + $0x238] sm:$0xff] }
 0xb82   :  { %14254 = vmatprep.subr.bf16.mxu1 %v14561_v54  ;;  %14281 = vmatprep.subr.bf16.mxu0 %v14561_v54  ;;  %v14309_v40 = vpack.c.bf16 %v10030_v19, %v10029_v57  ;;  %v10084_v57 = vld [vmem:[%s18153_s12 + $0x3b8] sm:$0xff] }
 0xb85   :  { %14256 = vmatpush3.bf16.msra.mxu1 %v14255_v27  ;;  %14283 = vmatpush3.bf16.msra.mxu0 %v14282_v2  ;;  %v10031_v27 = vld [vmem:[%s18153_s12 + $0x240] sm:$0xff]  ;;  %v10032_v2 = vld [vmem:[%s18153_s12 + $0x248] sm:$0xff] }
 0xb86   :  { %14257 = vmatprep.subr.bf16.mxu1 %v14561_v54  ;;  %14284 = vmatprep.subr.bf16.mxu0 %v14561_v54  ;;  %v14312_v24 = vpack.c.bf16 %v10032_v2, %v10031_v27  ;;  %v10086_v27 = vld [vmem:[%s18153_s12 + $0x3c8] sm:$0xff] }
 0xb89   :  { %14259 = vmatpush3.bf16.msra.mxu1 %v14258_v9  ;;  %14286 = vmatpush3.bf16.msra.mxu0 %v14285_v18  ;;  %v10033_v9 = vld [vmem:[%s18153_s12 + $0x250] sm:$0xff]  ;;  %v10034_v18 = vld [vmem:[%s18153_s12 + $0x258] sm:$0xff] }
 0xb8a   :  { %14260 = vmatprep.subr.bf16.mxu1 %v14561_v54  ;;  %14287 = vmatprep.subr.bf16.mxu0 %v14561_v54  ;;  %v14315_v60 = vpack.c.bf16 %v10034_v18, %v10033_v9  ;;  %v10088_v9 = vld [vmem:[%s18153_s12 + $0x3d8] sm:$0xff] }
 0xb8d   :  { %14262 = vmatpush3.bf16.msra.mxu1 %v14261_v1  ;;  %14289 = vmatpush3.bf16.msra.mxu0 %v14288_v28  ;;  %v10035_v1 = vld [vmem:[%s18153_s12 + $0x260] sm:$0xff]  ;;  %v10036_v28 = vld [vmem:[%s18153_s12 + $0x268] sm:$0xff] }
 0xb8e   :  { %14263 = vmatprep.subr.bf16.mxu1 %v14561_v54  ;;  %14290 = vmatprep.subr.bf16.mxu0 %v14561_v54  ;;  %v14318_v51 = vpack.c.bf16 %v10036_v28, %v10035_v1  ;;  %v10089_v1 = vld [vmem:[%s18153_s12 + $0x3e0] sm:$0xff]  ;;  %v10090_v28 = vld [vmem:[%s18153_s12 + $0x3e8] sm:$0xff] }
 0xb8f   :  { %v14399_v55 = vpack.c.bf16 %v10090_v28, %v10089_v1 }
 0xb91   :  { %14265 = vmatpush3.bf16.msra.mxu1 %v14264_v53  ;;  %14292 = vmatpush3.bf16.msra.mxu0 %v14291_v31  ;;  %v10037_v53 = vld [vmem:[%s18153_s12 + $0x270] sm:$0xff]  ;;  %v10038_v31 = vld [vmem:[%s18153_s12 + $0x278] sm:$0xff] }
 0xb92   :  { %14266 = vmatprep.subr.bf16.mxu1 %v14561_v54  ;;  %14293 = vmatprep.subr.bf16.mxu0 %v14561_v54  ;;  %v14321_v13 = vpack.c.bf16 %v10038_v31, %v10037_v53  ;;  %v10091_v53 = vld [vmem:[%s18153_s12 + $0x3f0] sm:$0xff]  ;;  %v10092_v31 = vld [vmem:[%s18153_s12 + $0x3f8] sm:$0xff] }
 0xb95   :  { %14268 = vmatpush3.bf16.msra.mxu1 %v14267_v22  ;;  %14295 = vmatpush3.bf16.msra.mxu0 %v14294_v50  ;;  %v14348_v22 = vpack.c.bf16 %v10056_v47, %v10055_v43  ;;  %v14402_v43 = vpack.c.bf16 %v10092_v31, %v10091_v53 }
 0xb96   :  { %14296 = vmatprep.subr.bf16.mxu1 %v14561_v54  ;;  %14323 = vmatprep.subr.bf16.mxu0 %v14561_v54 }
 0xc47   :  { %v8221_v16 = vpop.f32.mrb[250].mxu1  ;;  %v8291_v20 = vpop.f32.mrb[92].mxu0 }
 0xc48   :  { %v12736_v21 = vpop.f32.mrb[251].mxu1  ;;  %v17868_v63 = vadd.f32 %v8291_v20, %v8221_v16  ;;  %v12771_v25 = vpop.f32.mrb[93].mxu0 }
 0xc49   :  { %v10059_v25 = vld [vmem:[%s18153_s12 + $0x300] sm:$0xff] }
 0xc4b   :  { %v8366_v30 = vpop.f32.mrb[252].mxu1  ;;  %v8529_v56 = vpop.f32.mrb[94].mxu0 }
 0xc4c   :  { %v12778_v52 = vpop.f32.mrb[253].mxu1  ;;  %12812 = vmatmul.mubr.f32.vlgmr.msra.gmra.mrb[254].mxu1 %v8366_v30  ;;  %12854 = vmatmul.mubr.f32.vlgmr.msra.gmra.mrb[96].mxu0 %v8529_v56  ;;  %v12820_v42 = vpop.f32.mrb[95].mxu0 }
 0xc4d   :  { %14298 = vmatpush3.bf16.msra.mxu1 %v17618_v6  ;;  %14325 = vmatpush3.bf16.msra.mxu0 %v17618_v6  ;;  %v10057_v42 = vld [vmem:[%s18154_s11 + $0xc] sm:$0x3] }
 0xc4e   :  { %12860 = vmatprep.mubr.msk.f32.mxu1 %vm14562_vm10, %v14563_v7  ;;  %12902 = vmatprep.mubr.msk.f32.mxu0 %vm14562_vm10, %v14563_v7 }
 0xc4f   :  { %14299 = vmatprep.subr.bf16.mxu1 %v14561_v54  ;;  %14326 = vmatprep.subr.bf16.mxu0 %v14561_v54 }
 0xc50   :  { %12861 = vmatmul.mubr.msk.f32.vlgmr.msra.gmra.mrb[0].mxu1 %vm7973_vm11, %v10021_v4  ;;  %12903 = vmatmul.mubr.msk.f32.vlgmr.msra.gmra.mrb[98].mxu0 %vm7973_vm11, %v10039_v45  ;;  %v10075_v4 = vld [vmem:[%s18154_s11 + $0xe] sm:$0x3]  ;;  %v14354_v45 = vpack.c.bf16 %v10060_v12, %v10059_v25 }
 0xc51   :  { %14301 = vmatpush3.bf16.msra.mxu1 %v14300_v0  ;;  %14328 = vmatpush3.bf16.msra.mxu0 %v14327_v59  ;;  %v10061_v59 = vld [vmem:[%s18153_s12 + $0x310] sm:$0xff] }
 0xc52   :  { %14302 = vmatprep.subr.bf16.mxu1 %v14561_v54  ;;  %14329 = vmatprep.subr.bf16.mxu0 %v14561_v54 }
 0xc53   :  { %12895 = vmatprep.mubr.msk.f32.mxu1 %vm14562_vm10, %v14563_v7  ;;  %12937 = vmatprep.mubr.msk.f32.mxu0 %vm14562_vm10, %v14563_v7 }
 0xc55   :  { %14304 = vmatpush3.bf16.msra.mxu1 %v14303_v17  ;;  %14331 = vmatpush3.bf16.msra.mxu0 %v14330_v23  ;;  %v10063_v17 = vld [vmem:[%s18153_s12 + $0x320] sm:$0xff]  ;;  %v10064_v23 = vld [vmem:[%s18153_s12 + $0x328] sm:$0xff] }
 0xc56   :  { %14305 = vmatprep.subr.bf16.mxu1 %v14561_v54  ;;  %14332 = vmatprep.subr.bf16.mxu0 %v14561_v54  ;;  %v14360_v32 = vpack.c.bf16 %v10064_v23, %v10063_v17 }
 0xc59   :  { %14307 = vmatpush3.bf16.msra.mxu1 %v14306_v44  ;;  %14334 = vmatpush3.bf16.msra.mxu0 %v14333_v10  ;;  %v10065_v44 = vld [vmem:[%s18153_s12 + $0x330] sm:$0xff]  ;;  %v10066_v10 = vld [vmem:[%s18153_s12 + $0x338] sm:$0xff] }
 0xc5a   :  { %14308 = vmatprep.subr.bf16.mxu1 %v14561_v54  ;;  %14335 = vmatprep.subr.bf16.mxu0 %v14561_v54  ;;  %v14363_v19 = vpack.c.bf16 %v10066_v10, %v10065_v44 }
 0xc5d   :  { %14310 = vmatpush3.bf16.msra.mxu1 %v14309_v40  ;;  %14337 = vmatpush3.bf16.msra.mxu0 %v14336_v41  ;;  %v10068_v40 = vld [vmem:[%s18153_s12 + $0x348] sm:$0xff]  ;;  %v10085_v41 = vld [vmem:[%s18153_s12 + $0x3c0] sm:$0xff] }
 0xc5e   :  { %14311 = vmatprep.subr.bf16.mxu1 %v14561_v54  ;;  %14338 = vmatprep.subr.bf16.mxu0 %v14561_v54  ;;  %v14366_v2 = vpack.c.bf16 %v10068_v40, %v10067_v36  ;;  %v14393_v61 = vpack.c.bf16 %v10086_v27, %v10085_v41 }
 0xc61   :  { %14313 = vmatpush3.bf16.msra.mxu1 %v14312_v24  ;;  %14340 = vmatpush3.bf16.msra.mxu0 %v14339_v38  ;;  %v10070_v24 = vld [vmem:[%s18153_s12 + $0x358] sm:$0xff]  ;;  %v10087_v38 = vld [vmem:[%s18153_s12 + $0x3d0] sm:$0xff] }
 0xc62   :  { %14314 = vmatprep.subr.bf16.mxu1 %v14561_v54  ;;  %14341 = vmatprep.subr.bf16.mxu0 %v14561_v54  ;;  %v14369_v18 = vpack.c.bf16 %v10070_v24, %v10069_v8  ;;  %v14396_v34 = vpack.c.bf16 %v10088_v9, %v10087_v38 }
 0xc65   :  { %14316 = vmatpush3.bf16.msra.mxu1 %v14315_v60  ;;  %14343 = vmatpush3.bf16.msra.mxu0 %v14342_v58  ;;  %v10072_v60 = vld [vmem:[%s18153_s12 + $0x368] sm:$0xff] }
 0xc66   :  { %14317 = vmatprep.subr.bf16.mxu1 %v14561_v54  ;;  %14344 = vmatprep.subr.bf16.mxu0 %v14561_v54  ;;  %v14372_v58 = vpack.c.bf16 %v10072_v60, %v10071_v29 }
 0xc69   :  { %14319 = vmatpush3.bf16.msra.mxu1 %v14318_v51  ;;  %14346 = vmatpush3.bf16.msra.mxu0 %v14345_v46  ;;  %v10074_v51 = vld [vmem:[%s18153_s12 + $0x378] sm:$0xff] }
 0xc6a   :  { %14320 = vmatprep.subr.bf16.mxu1 %v14561_v54  ;;  %14347 = vmatprep.subr.bf16.mxu0 %v14561_v54  ;;  %v14375_v46 = vpack.c.bf16 %v10074_v51, %v10073_v39 }
 0xc6d   :  { %14322 = vmatpush3.bf16.msra.mxu1 %v14321_v13  ;;  %14349 = vmatpush3.bf16.msra.mxu0 %v14348_v22 }
 0xc6e   :  { %14350 = vmatprep.subr.bf16.mxu1 %v14561_v54  ;;  %14377 = vmatprep.subr.bf16.mxu0 %v14561_v54 }
 0xd1f   :  { %v8453_v62 = vpop.f32.mrb[254].mxu1  ;;  %v8616_v50 = vpop.f32.mrb[96].mxu0 }
 0xd20   :  { %v8457_v16 = vadd.f32 %v8453_v62, %v17868_v63  ;;  %v12813_v20 = vpop.f32.mrb[255].mxu1  ;;  %v12855_v21 = vpop.f32.mrb[97].mxu0  ;;  %v10078_v63 = vld [vmem:[%s18153_s12 + $0x388] sm:$0xff] }
 0xd21   :  { %v14381_v0 = vpack.c.bf16 %v10078_v63, %v10077_v26 }
 0xd22   :  { %v18006_v5 = vadd.f32 %v8616_v50, %v8457_v16 }
 0xd23   :  { %v8692_v11 = vpop.f32.mrb[0].mxu1  ;;  %v8855_v30 = vpop.f32.mrb[98].mxu0 }
 0xd24   :  { %v12862_v56 = vpop.f32.mrb[1].mxu1  ;;  %12896 = vmatmul.mubr.f32.vlgmr.msra.gmra.mrb[2].mxu1 %v8692_v11  ;;  %12938 = vmatmul.mubr.f32.vlgmr.msra.gmra.mrb[100].mxu0 %v8855_v30  ;;  %v12904_v52 = vpop.f32.mrb[99].mxu0 }
 0xd25   :  { %14352 = vmatpush3.bf16.msra.mxu1 %v17618_v6  ;;  %14379 = vmatpush3.bf16.msra.mxu0 %v17618_v6  ;;  %v10062_v6 = vld [vmem:[%s18153_s12 + $0x318] sm:$0xff]  ;;  %v10093_v56 = vld [vmem:[%s18155_s13] ss:$0 sm:$0xff] }
 0xd26   :  { %12944 = vmatprep.mubr.msk.f32.mxu1 %vm14562_vm10, %v14563_v7  ;;  %12986 = vmatprep.mubr.msk.f32.mxu0 %vm14562_vm10, %v14563_v7  ;;  %v14357_v33 = vpack.c.bf16 %v10062_v6, %v10061_v59 }
 0xd27   :  { %14353 = vmatprep.subr.bf16.mxu1 %v14561_v54  ;;  %14380 = vmatprep.subr.bf16.mxu0 %v14561_v54 }
 0xd28   :  { %12945 = vmatmul.mubr.msk.f32.vlgmr.msra.gmra.mrb[4].mxu1 %vm7973_vm11, %v10057_v42  ;;  %12987 = vmatmul.mubr.msk.f32.vlgmr.msra.gmra.mrb[102].mxu0 %vm7973_vm11, %v10075_v4 }
 0xd29   :  { %14355 = vmatpush3.bf16.msra.mxu1 %v14354_v45  ;;  %14382 = vmatpush3.bf16.msra.mxu0 %v14381_v0 }
 0xd2a   :  { %14356 = vmatprep.subr.bf16.mxu1 %v14561_v54  ;;  %14383 = vmatprep.subr.bf16.mxu0 %v14561_v54 }
 0xd2b   :  { %12979 = vmatprep.mubr.msk.f32.mxu1 %vm14562_vm10, %v14563_v7  ;;  %13021 = vmatprep.mubr.msk.f32.mxu0 %vm14562_vm10, %v14563_v7  ;;  %v10083_v7 = vld [vmem:[%s18153_s12 + $0x3b0] sm:$0xff] }
 0xd2c   :  { %v14390_v49 = vpack.c.bf16 %v10084_v57, %v10083_v7 }
 0xd2d   :  { %14358 = vmatpush3.bf16.msra.mxu1 %v14357_v33  ;;  %14385 = vmatpush3.bf16.msra.mxu0 %v14384_v3 }
 0xd2e   :  { %14359 = vmatprep.subr.bf16.mxu1 %v14561_v54  ;;  %14386 = vmatprep.subr.bf16.mxu0 %v14561_v54 }
 0xd31   :  { %14361 = vmatpush3.bf16.msra.mxu1 %v14360_v32  ;;  %14388 = vmatpush3.bf16.msra.mxu0 %v14387_v14 }
 0xd32   :  { %14362 = vmatprep.subr.bf16.mxu1 %v14561_v54  ;;  %14389 = vmatprep.subr.bf16.mxu0 %v14561_v54 }
 0xd35   :  { %14364 = vmatpush3.bf16.msra.mxu1 %v14363_v19  ;;  %14391 = vmatpush3.bf16.msra.mxu0 %v14390_v49 }
 0xd36   :  { %14365 = vmatprep.subr.bf16.mxu1 %v14561_v54  ;;  %14392 = vmatprep.subr.bf16.mxu0 %v14561_v54 }
 0xd39   :  { %14367 = vmatpush3.bf16.msra.mxu1 %v14366_v2  ;;  %14394 = vmatpush3.bf16.msra.mxu0 %v14393_v61 }
 0xd3a   :  { %14368 = vmatprep.subr.bf16.mxu1 %v14561_v54  ;;  %14395 = vmatprep.subr.bf16.mxu0 %v14561_v54 }
 0xd3d   :  { %14370 = vmatpush3.bf16.msra.mxu1 %v14369_v18  ;;  %14397 = vmatpush3.bf16.msra.mxu0 %v14396_v34 }
 0xd3e   :  { %14371 = vmatprep.subr.bf16.mxu1 %v14561_v54  ;;  %14398 = vmatprep.subr.bf16.mxu0 %v14561_v54 }
 0xd41   :  { %14373 = vmatpush3.bf16.msra.mxu1 %v14372_v58  ;;  %14400 = vmatpush3.bf16.msra.mxu0 %v14399_v55 }
 0xd42   :  { %14374 = vmatprep.subr.bf16.mxu1 %v14561_v54  ;;  %14401 = vmatprep.subr.bf16.mxu0 %v14561_v54 }
 0xd45   :  { %14376 = vmatpush3.bf16.msra.mxu1 %v14375_v46  ;;  %14403 = vmatpush3.bf16.msra.mxu0 %v14402_v43 }
 0xdf7   :  { %v8779_v13 = vpop.f32.mrb[2].mxu1  ;;  %v8942_v47 = vpop.f32.mrb[100].mxu0 }
 0xdf8   :  { %v8783_v22 = vadd.f32 %v8779_v13, %v18006_v5  ;;  %v12897_v62 = vpop.f32.mrb[3].mxu1  ;;  %v12939_v50 = vpop.f32.mrb[101].mxu0 }
 0xdfa   :  { %v8946_v16 = vadd.f32 %v8942_v47, %v8783_v22 }
 0xdfb   :  { %v9018_v20 = vpop.f32.mrb[4].mxu1  ;;  %v9181_v54 = vpop.f32.mrb[102].mxu0 }
 0xdfc   :  { %v12946_v21 = vpop.f32.mrb[5].mxu1  ;;  %12980 = vmatmul.mubr.f32.vlgmr.msra.gmra.mrb[6].mxu1 %v9018_v20  ;;  %v12988_v25 = vpop.f32.mrb[103].mxu0  ;;  %13022 = vmatmul.mubr.f32.vlgmr.msra.gmra.mrb[104].mxu0 %v9181_v54 }
 0xecf   :  { %v9105_v12 = vpop.f32.mrb[6].mxu1  ;;  %v9268_v26 = vpop.f32.mrb[104].mxu0 }
 0xed0   :  { %v9109_v63 = vadd.f32 %v9105_v12, %v8946_v16  ;;  %v12981_v11 = vpop.f32.mrb[7].mxu1  ;;  %v13023_v30 = vpop.f32.mrb[105].mxu0 }
 0xed2   :  { %v9272_v52 = vadd.f32 %v9268_v26, %v9109_v63 }
 0xed4   :  { %v9280_v5 = vadd.f32 %v10093_v56, %v9272_v52 }
 0xed6   :  { %9282 = vst.msk [vmem:[%s18156_s14] sm:$0x3] %vm9281_vm12, %v9280_v5 }

</bundles_post_ra>
